<compile_context>
chip_gen: v7x
topology: tpu7x:2x2x1
jax: 0.10.0
libtpu: 0.0.40
codegen_flags: <defaults>
</compile_context>

<pallas_src>
import functools

import jax
import jax.numpy as jnp
from jax.experimental import pallas as pl
from jax.experimental.pallas import tpu as pltpu

LRELU_SLOPE = 0.02
EPS = 1e-12
NOISE_STD = 0.1 * 0.01


# ----------------------------- Pallas kernels --------------------------------

def _conv_matmul_kernel(sig_ref, x_ref, w_ref, b_ref, o_ref, *, slope):
    """One conv layer as matmul: o = LeakyReLU(dot(x, w_bar) * (1/sigma) + b)."""
    acc = jnp.dot(x_ref[...], w_ref[...], preferred_element_type=jnp.float32)
    acc = acc * sig_ref[0] + b_ref[...]          # 1/sigma folded in; bias unscaled
    o_ref[...] = jnp.where(acc >= 0.0, acc, slope * acc).astype(o_ref.dtype)


def _tail_kernel(sig_ref, p3_ref, z_ref,
                 w3_ref, b3_ref,
                 w4_ref, b4_ref,
                 w5_ref, b5_ref,
                 w1x_ref, w1z_ref, b1_ref,
                 w2_ref, b2_ref,
                 w3z_ref, b3z_ref,
                 o_ref,
                 h3_scr, h4_scr, *, bsz, slope, eps):
    """Fused c3 -> c4 -> c5 -> xz1 -> xz2 -> xz3 (+eps), all resident in VMEM.

    p3_ref holds c3's im2col patches with rows ordered (y, x, b) over the 5x5
    output map, so every slice below is a contiguous row range.
    """
    zd = w3_ref.shape[1]          # 256
    nb = 3 * bsz                  # rows per c4 output-row block (ox, b)

    def lrelu(a):
        return jnp.where(a >= 0.0, a, slope * a)

    # ---- c3: (Mp, cin*9) @ (cin*9, zd) ----
    h3 = jnp.dot(p3_ref[...], w3_ref[...], preferred_element_type=jnp.float32)
    h3_scr[...] = lrelu(h3 * sig_ref[0] + b3_ref[...]).astype(jnp.bfloat16)

    # ---- c4: 3x3 conv over the 5x5 map as 9 shifted dots ----
    # output rows ordered (oy)(ox, b); input row for (oy+dy, ox+dx, b) is
    # ((oy+dy)*5 + (ox+dx))*bsz + b  -> contiguous 3*bsz rows per (oy, dy, dx).
    for oy in range(3):
        acc = jnp.zeros((nb, zd), jnp.float32)
        for dy in range(3):
            for dx in range(3):
                start = ((oy + dy) * 5 + dx) * bsz
                rows = h3_scr[start:start + nb, :]
                wk = w4_ref[(dy * 3 + dx) * zd:(dy * 3 + dx + 1) * zd, :]
                acc = acc + jnp.dot(rows, wk, preferred_element_type=jnp.float32)
        blk = lrelu(acc * sig_ref[1] + b4_ref[...])
        h4_scr[oy * nb:(oy + 1) * nb, :] = blk.astype(jnp.bfloat16)

    # ---- c5: dense over the flattened (ky, kx, cin) 3x3 activation, 9 dots ----
    acc5 = jnp.zeros((bsz, zd), jnp.float32)
    for p in range(9):
        rows = h4_scr[p * bsz:(p + 1) * bsz, :]
        wk = w5_ref[p * zd:(p + 1) * zd, :]
        acc5 = acc5 + jnp.dot(rows, wk, preferred_element_type=jnp.float32)
    h5 = lrelu(acc5 * sig_ref[2] + b5_ref[...])                    # (B, zd)

    # ---- xz1 on concat([dx, z], channel): split weight, skip the concat ----
    a1 = (jnp.dot(h5.astype(jnp.bfloat16), w1x_ref[...],
                  preferred_element_type=jnp.float32)
          + jnp.dot(z_ref[...], w1z_ref[...], preferred_element_type=jnp.float32))
    h1 = lrelu(a1 * sig_ref[3] + b1_ref[...])                      # (B, 2*zd)

    # ---- xz2 ----
    h2 = jnp.dot(h1.astype(jnp.bfloat16), w2_ref[...],
                 preferred_element_type=jnp.float32)
    h2 = lrelu(h2 * sig_ref[4] + b2_ref[...])                      # (B, zd)

    # ---- xz3 (no activation) + eps ----
    h3o = jnp.dot(h2.astype(jnp.bfloat16), w3z_ref[...],
                  preferred_element_type=jnp.float32)
    o_ref[...] = (h3o * sig_ref[5] + b3z_ref[...] + eps).astype(o_ref.dtype)


# ----------------------------- Pallas wrappers --------------------------------

def fused_conv_matmul(inv_sigma, patches, wmat, bias, *, slope=LRELU_SLOPE):
    """(M,K)@(K,N) * (1/sigma) + b, LeakyReLU; single full-width block, no grid."""
    M, K = patches.shape
    K2, N = wmat.shape
    assert K == K2
    vmem = pl.BlockSpec(memory_space=pltpu.MemorySpace.VMEM)
    kernel = functools.partial(_conv_matmul_kernel, slope=slope)
    return pl.pallas_call(
        kernel,
        out_shape=jax.ShapeDtypeStruct((M, N), jnp.bfloat16),
        in_specs=[pl.BlockSpec(memory_space=pltpu.MemorySpace.SMEM),  # 1/sigma
                  vmem, vmem, vmem],
        out_specs=vmem,
    )(inv_sigma, patches, wmat, bias)


def fused_tail(sig, p3, z, prep, *, bsz, slope=LRELU_SLOPE, eps=EPS):
    """Single Pallas call for c3 -> c4 -> c5 -> DiscriminatorXZ head."""
    zd = prep['c3']['wmat'].shape[1]
    operands = (sig, p3, z,
                prep['c3']['wmat'], prep['c3']['b'],
                prep['c4']['wmat'], prep['c4']['b'],
                prep['c5']['wmat'], prep['c5']['b'],
                prep['xz1']['wmat_x'], prep['xz1']['wmat_z'], prep['xz1']['b'],
                prep['xz2']['wmat'], prep['xz2']['b'],
                prep['xz3']['wmat'], prep['xz3']['b'])
    vmem = pl.BlockSpec(memory_space=pltpu.MemorySpace.VMEM)
    in_specs = [pl.BlockSpec(memory_space=pltpu.MemorySpace.SMEM)] \
        + [vmem] * (len(operands) - 1)
    kernel = functools.partial(_tail_kernel, bsz=bsz, slope=slope, eps=eps)
    return pl.pallas_call(
        kernel,
        out_shape=jax.ShapeDtypeStruct((bsz, 1), jnp.float32),
        in_specs=in_specs,
        out_specs=vmem,
        scratch_shapes=[
            pltpu.VMEM((p3.shape[0], zd), jnp.bfloat16),   # c3 activation (5x5 map)
            pltpu.VMEM((9 * bsz, zd), jnp.bfloat16),       # c4 activation (3x3 map)
        ],
    )(*operands)


# ------------------------------- Glue (JAX) -----------------------------------

def l2normalize(v, eps=1e-12):
    return v / (jnp.linalg.norm(v) + eps)


def spectral_inv_sigma(w_bar, u):
    """One power iteration (SpectralNorm._update_u_v) -> 1/sigma.
    # TODO(synk): u/v are not persisted across forward calls (single-forward
    # power iteration only), matching one invocation of the PyTorch module.
    """
    h = w_bar.shape[0]
    wm = w_bar.reshape(h, -1)
    v = l2normalize(wm.T @ u)
    u_new = l2normalize(wm @ v)
    sigma = jnp.dot(u_new, wm @ v)
    return 1.0 / sigma


def conv_sn_layer(x_nhwc, lp, inv_sigma, *, stride):
    """SpectralNorm(Conv2d 3x3) + LeakyReLU on an NHWC bf16 activation."""
    b, h, w, _ = x_nhwc.shape
    kh = kw = 3
    oh = (h - kh) // stride + 1
    ow = (w - kw) // stride + 1
    # One XLA op for im2col; feature dim ordered (cin, kh, kw), matching the
    # PyTorch weight.view(cout, -1) flattening used to build lp['wmat'].
    patches = jax.lax.conv_general_dilated_patches(
        x_nhwc, (kh, kw), (stride, stride), 'VALID',
        dimension_numbers=('NHWC', 'HWIO', 'NHWC'))
    m = b * oh * ow
    patches = patches.reshape(m, -1)
    m_pad = (-m) % 16                      # clean bf16 (16,128) sublane packing
    if m_pad:
        patches = jnp.pad(patches, ((0, m_pad), (0, 0)))
    out = fused_conv_matmul(inv_sigma, patches, lp['wmat'], lp['b'])
    return out[:m].reshape(b, oh, ow, -1)


def discriminator_forward(prep, x_input, z_input, key):
    """Discriminator.forward(x_input, z_input) — eval mode."""
    k1, k2 = jax.random.split(key)

    # Hoist all spectral-norm power iterations off the activation critical path
    # (they depend only on weights; XLA overlaps them with the conv pipeline).
    inv = {n: spectral_inv_sigma(prep[n]['w_bar'], prep[n]['u'])
           for n in ('c1', 'c2', 'c3', 'c4', 'c5', 'xz1', 'xz2', 'xz3')}
    sig_c1 = inv['c1'].reshape(1).astype(jnp.float32)
    sig_c2 = inv['c2'].reshape(1).astype(jnp.float32)
    sig_tail = jnp.stack([inv['c3'], inv['c4'], inv['c5'],
                          inv['xz1'], inv['xz2'], inv['xz3']]).astype(jnp.float32)

    x = x_input + jax.random.normal(k1, x_input.shape, jnp.float32) * NOISE_STD
    # TODO(synk): bf16 activations quantize most of the 1e-3-std noise; compare
    # against an f32 reference with relaxed tolerance (or switch to f32 inputs).
    x = jnp.transpose(x, (0, 2, 3, 1)).astype(jnp.bfloat16)     # NCHW -> NHWC once

    # DiscriminatorX c1/c2; LeakyReLU fused into each Pallas call.
    # TODO(synk): Dropout2d(0.2) is eval-mode identity; training-mode channel
    # dropout/scaling is not emitted.
    x = conv_sn_layer(x, prep['c1'], sig_c1, stride=2)   # (B,15,15,128) [64 real + 64 zero]
    x = conv_sn_layer(x, prep['c2'], sig_c2, stride=2)   # (B, 7, 7,128)

    bsz = x.shape[0]
    # c3 im2col; rows reordered (y, x, b) so every in-kernel slice is contiguous.
    p3 = jax.lax.conv_general_dilated_patches(
        x, (3, 3), (1, 1), 'VALID', dimension_numbers=('NHWC', 'HWIO', 'NHWC'))
    assert p3.shape[1:3] == (5, 5), p3.shape       # fused kernel assumes 5x5 map
    p3 = jnp.transpose(p3, (1, 2, 0, 3)).reshape(25 * bsz, -1)
    m_pad = (-p3.shape[0]) % 16
    if m_pad:
        p3 = jnp.pad(p3, ((0, m_pad), (0, 0)))

    z = z_input.reshape(bsz, -1)
    z = z + jax.random.normal(k2, z.shape, jnp.float32) * NOISE_STD
    z = z.astype(jnp.bfloat16)

    out = fused_tail(sig_tail, p3, z, prep, bsz=bsz)
    return out.reshape(bsz, 1, 1, 1)


# ------------------------------- Parameters -----------------------------------

def init_conv_params(key, cout, cin, kh, kw):
    """Deterministic synthetic Conv2d params + spectral-norm u vector."""
    kw_, kb, ku = jax.random.split(key, 3)
    fan_in = cin * kh * kw
    bound = 1.0 / jnp.sqrt(float(fan_in))
    w = jax.random.uniform(kw_, (cout, cin, kh, kw), jnp.float32, -bound, bound)
    b = jax.random.uniform(kb, (cout,), jnp.float32, -bound, bound)
    u = l2normalize(jax.random.normal(ku, (cout,), jnp.float32))
    return w, b, u


def prepare_params(raw, zd):
    """Pre-reorder weights once: bf16 matmul matrices + f32 w_bar/u for sigma."""
    prep = {}

    # c1: im2col weight, output channels zero-padded to a lane-dense 128.
    w, b, u = raw['c1']
    cout = w.shape[0]
    n1 = max(128, ((cout + 127) // 128) * 128)
    wmat = w.reshape(cout, -1).T.astype(jnp.bfloat16)             # (cin*9, cout)
    prep['c1'] = dict(
        w_bar=w, u=u,
        wmat=jnp.pad(wmat, ((0, 0), (0, n1 - cout))),
        b=jnp.pad(b, (0, n1 - cout)).reshape(1, n1).astype(jnp.float32))

    # c2: input-channel dim padded to match c1's padded output (zero rows).
    w, b, u = raw['c2']
    cout, cin = w.shape[:2]
    w_pad = jnp.pad(w, ((0, 0), (0, n1 - cin), (0, 0), (0, 0)))
    prep['c2'] = dict(
        w_bar=w, u=u,
        wmat=w_pad.reshape(cout, -1).T.astype(jnp.bfloat16),      # (n1*9, cout)
        b=b.reshape(1, cout).astype(jnp.float32))

    # c3: patch features ordered (cin, kh, kw) == weight.view(cout,-1).
    w, b, u = raw['c3']
    cout = w.shape[0]
    prep['c3'] = dict(
        w_bar=w, u=u,
        wmat=w.reshape(cout, -1).T.astype(jnp.bfloat16),
        b=b.reshape(1, cout).astype(jnp.float32))

    # c4 / c5: per-filter-position (cin, cout) blocks, rows ordered (kh, kw, cin).
    for name in ('c4', 'c5'):
        w, b, u = raw[name]
        cout = w.shape[0]
        prep[name] = dict(
            w_bar=w, u=u,
            wmat=jnp.transpose(w, (2, 3, 1, 0)).reshape(-1, cout).astype(jnp.bfloat16),
            b=b.reshape(1, cout).astype(jnp.float32))

    # xz1 acts on concat([dx, z], channel); split its weight to avoid the concat.
    w, b, u = raw['xz1']
    cout, cin = w.shape[:2]
    wmat = w.reshape(cout, cin).T.astype(jnp.bfloat16)
    prep['xz1'] = dict(w_bar=w, u=u, wmat_x=wmat[:zd], wmat_z=wmat[zd:],
                       b=b.reshape(1, cout).astype(jnp.float32))

    for name in ('xz2', 'xz3'):
        w, b, u = raw[name]
        cout, cin = w.shape[:2]
        prep[name] = dict(
            w_bar=w, u=u,
            wmat=w.reshape(cout, cin).T.astype(jnp.bfloat16),
            b=b.reshape(1, cout).astype(jnp.float32))
    return prep


# --------------------------------- Driver --------------------------------------

if __name__ == "__main__":
    ZD, CH = 256, 3          # Discriminator defaults (ch=3, zd=256)
    B, H = 2, 32             # 32x32 input -> DiscriminatorX output spatial 1x1

    key = jax.random.PRNGKey(0)
    kp, kx, kz, kn = jax.random.split(key, 4)
    pkeys = jax.random.split(kp, 8)

    raw = {
        'c1':  init_conv_params(pkeys[0], ZD // 4, CH,      3, 3),
        'c2':  init_conv_params(pkeys[1], ZD // 2, ZD // 4, 3, 3),
        'c3':  init_conv_params(pkeys[2], ZD,      ZD // 2, 3, 3),
        'c4':  init_conv_params(pkeys[3], ZD,      ZD,      3, 3),
        'c5':  init_conv_params(pkeys[4], ZD,      ZD,      3, 3),
        'xz1': init_conv_params(pkeys[5], ZD * 2,  ZD * 2,  1, 1),
        'xz2': init_conv_params(pkeys[6], ZD,      ZD * 2,  1, 1),
        'xz3': init_conv_params(pkeys[7], 1,       ZD,      1, 1),
    }
    prep = prepare_params(raw, ZD)

    x_input = jax.random.normal(kx, (B, CH, H, H), jnp.float32)
    z_input = jax.random.normal(kz, (B, ZD, 1, 1), jnp.float32)

    fwd = jax.jit(discriminator_forward)
    out = fwd(prep, x_input, z_input, kn)
    jax.block_until_ready(out)
    assert out.shape == (B, 1, 1, 1), out.shape
    assert out.dtype == jnp.float32
    assert bool(jnp.all(jnp.isfinite(out)))
    print("KERNEL_OK")
</pallas_src>

<mosaic_0001>
module attributes {stable_mosaic.version = 11 : i64} {
  func.func @_conv_matmul_kernel(%arg0: memref<1xf32, #tpu.memory_space<smem>>, %arg1: memref<464x27xbf16, #tpu.memory_space<vmem>>, %arg2: memref<27x128xbf16, #tpu.memory_space<vmem>>, %arg3: memref<1x128xf32, #tpu.memory_space<vmem>>, %arg4: memref<464x128xbf16, #tpu.memory_space<vmem>>) attributes {dimension_semantics = [], scalar_prefetch = 0 : i64, scratch_operands = 0 : i64, tpu.core_type = #tpu.core_type<tc>} {
    %c0 = arith.constant 0 : index
    %c0_0 = arith.constant 0 : index
    %0 = vector.load %arg1[%c0, %c0_0] : memref<464x27xbf16, #tpu.memory_space<vmem>>, vector<464x27xbf16>
    %c0_1 = arith.constant 0 : index
    %c0_2 = arith.constant 0 : index
    %1 = vector.load %arg2[%c0_1, %c0_2] : memref<27x128xbf16, #tpu.memory_space<vmem>>, vector<27x128xbf16>
    %cst = arith.constant dense<0.000000e+00> : vector<464x128xf32>
    %2 = tpu.matmul %0, %1, %cst {dimension_numbers = #tpu.dot_dimension_numbers<[1], [0], [0], [1], [0, 0, 1, 1], [], []>} : vector<464x27xbf16>, vector<27x128xbf16>, vector<464x128xf32> -> vector<464x128xf32>
    %c0_3 = arith.constant 0 : index
    %3 = memref.load %arg0[%c0_3] : memref<1xf32, #tpu.memory_space<smem>>
    %4 = vector.broadcast %3 : f32 to vector<464x128xf32>
    %5 = arith.mulf %2, %4 : vector<464x128xf32>
    %c0_4 = arith.constant 0 : index
    %c0_5 = arith.constant 0 : index
    %6 = vector.load %arg3[%c0_4, %c0_5] : memref<1x128xf32, #tpu.memory_space<vmem>>, vector<1x128xf32>
    %7 = vector.broadcast %6 : vector<1x128xf32> to vector<464x128xf32>
    %8 = arith.addf %5, %7 : vector<464x128xf32>
    %cst_6 = arith.constant 0.000000e+00 : f32
    %9 = vector.broadcast %cst_6 : f32 to vector<464x128xf32>
    %10 = arith.cmpf oge, %8, %9 : vector<464x128xf32>
    %cst_7 = arith.constant 2.000000e-02 : f32
    %11 = vector.broadcast %cst_7 : f32 to vector<464x128xf32>
    %12 = arith.mulf %11, %8 : vector<464x128xf32>
    %13 = arith.select %10, %8, %12 : vector<464x128xi1>, vector<464x128xf32>
    %14 = arith.truncf %13 : vector<464x128xf32> to vector<464x128xbf16>
    %c0_8 = arith.constant 0 : index
    %c0_9 = arith.constant 0 : index
    %15 = vector.load %arg4[%c0_8, %c0_9] : memref<464x128xbf16, #tpu.memory_space<vmem>>, vector<464x128xbf16>
    tpu.vector_store %arg4[%c0_8, %c0_9], %14 {strides = array<i32>} : memref<464x128xbf16, #tpu.memory_space<vmem>>, vector<464x128xbf16>,
    return
  }
}

module attributes {stable_mosaic.version = 11 : i64} {
  func.func @_conv_matmul_kernel(%arg0: memref<1xf32, #tpu.memory_space<smem>>, %arg1: memref<112x1152xbf16, #tpu.memory_space<vmem>>, %arg2: memref<1152x128xbf16, #tpu.memory_space<vmem>>, %arg3: memref<1x128xf32, #tpu.memory_space<vmem>>, %arg4: memref<112x128xbf16, #tpu.memory_space<vmem>>) attributes {dimension_semantics = [], scalar_prefetch = 0 : i64, scratch_operands = 0 : i64, tpu.core_type = #tpu.core_type<tc>} {
    %c0 = arith.constant 0 : index
    %c0_0 = arith.constant 0 : index
    %0 = vector.load %arg1[%c0, %c0_0] : memref<112x1152xbf16, #tpu.memory_space<vmem>>, vector<112x1152xbf16>
    %c0_1 = arith.constant 0 : index
    %c0_2 = arith.constant 0 : index
    %1 = vector.load %arg2[%c0_1, %c0_2] : memref<1152x128xbf16, #tpu.memory_space<vmem>>, vector<1152x128xbf16>
    %cst = arith.constant dense<0.000000e+00> : vector<112x128xf32>
    %2 = tpu.matmul %0, %1, %cst {dimension_numbers = #tpu.dot_dimension_numbers<[1], [0], [0], [1], [0, 0, 1, 1], [], []>} : vector<112x1152xbf16>, vector<1152x128xbf16>, vector<112x128xf32> -> vector<112x128xf32>
    %c0_3 = arith.constant 0 : index
    %3 = memref.load %arg0[%c0_3] : memref<1xf32, #tpu.memory_space<smem>>
    %4 = vector.broadcast %3 : f32 to vector<112x128xf32>
    %5 = arith.mulf %2, %4 : vector<112x128xf32>
    %c0_4 = arith.constant 0 : index
    %c0_5 = arith.constant 0 : index
    %6 = vector.load %arg3[%c0_4, %c0_5] : memref<1x128xf32, #tpu.memory_space<vmem>>, vector<1x128xf32>
    %7 = vector.broadcast %6 : vector<1x128xf32> to vector<112x128xf32>
    %8 = arith.addf %5, %7 : vector<112x128xf32>
    %cst_6 = arith.constant 0.000000e+00 : f32
    %9 = vector.broadcast %cst_6 : f32 to vector<112x128xf32>
    %10 = arith.cmpf oge, %8, %9 : vector<112x128xf32>
    %cst_7 = arith.constant 2.000000e-02 : f32
    %11 = vector.broadcast %cst_7 : f32 to vector<112x128xf32>
    %12 = arith.mulf %11, %8 : vector<112x128xf32>
    %13 = arith.select %10, %8, %12 : vector<112x128xi1>, vector<112x128xf32>
    %14 = arith.truncf %13 : vector<112x128xf32> to vector<112x128xbf16>
    %c0_8 = arith.constant 0 : index
    %c0_9 = arith.constant 0 : index
    %15 = vector.load %arg4[%c0_8, %c0_9] : memref<112x128xbf16, #tpu.memory_space<vmem>>, vector<112x128xbf16>
    tpu.vector_store %arg4[%c0_8, %c0_9], %14 {strides = array<i32>} : memref<112x128xbf16, #tpu.memory_space<vmem>>, vector<112x128xbf16>,
    return
  }
}

module attributes {stable_mosaic.version = 11 : i64} {
  func.func @_tail_kernel(%arg0: memref<6xf32, #tpu.memory_space<smem>>, %arg1: memref<64x1152xbf16, #tpu.memory_space<vmem>>, %arg2: memref<2x256xbf16, #tpu.memory_space<vmem>>, %arg3: memref<1152x256xbf16, #tpu.memory_space<vmem>>, %arg4: memref<1x256xf32, #tpu.memory_space<vmem>>, %arg5: memref<2304x256xbf16, #tpu.memory_space<vmem>>, %arg6: memref<1x256xf32, #tpu.memory_space<vmem>>, %arg7: memref<2304x256xbf16, #tpu.memory_space<vmem>>, %arg8: memref<1x256xf32, #tpu.memory_space<vmem>>, %arg9: memref<256x512xbf16, #tpu.memory_space<vmem>>, %arg10: memref<256x512xbf16, #tpu.memory_space<vmem>>, %arg11: memref<1x512xf32, #tpu.memory_space<vmem>>, %arg12: memref<512x256xbf16, #tpu.memory_space<vmem>>, %arg13: memref<1x256xf32, #tpu.memory_space<vmem>>, %arg14: memref<256x1xbf16, #tpu.memory_space<vmem>>, %arg15: memref<1x1xf32, #tpu.memory_space<vmem>>, %arg16: memref<2x1xf32, #tpu.memory_space<vmem>>, %arg17: memref<64x256xbf16, #tpu.memory_space<vmem>>, %arg18: memref<18x256xbf16, #tpu.memory_space<vmem>>) attributes {dimension_semantics = [], scalar_prefetch = 0 : i64, scratch_operands = 2 : i64, tpu.core_type = #tpu.core_type<tc>} {
    %c0 = arith.constant 0 : index
    %c0_0 = arith.constant 0 : index
    %0 = vector.load %arg1[%c0, %c0_0] : memref<64x1152xbf16, #tpu.memory_space<vmem>>, vector<64x1152xbf16>
    %c0_1 = arith.constant 0 : index
    %c0_2 = arith.constant 0 : index
    %1 = vector.load %arg3[%c0_1, %c0_2] : memref<1152x256xbf16, #tpu.memory_space<vmem>>, vector<1152x256xbf16>
    %cst = arith.constant dense<0.000000e+00> : vector<64x256xf32>
    %2 = tpu.matmul %0, %1, %cst {dimension_numbers = #tpu.dot_dimension_numbers<[1], [0], [0], [1], [0, 0, 1, 1], [], []>} : vector<64x1152xbf16>, vector<1152x256xbf16>, vector<64x256xf32> -> vector<64x256xf32>
    %c0_3 = arith.constant 0 : index
    %3 = memref.load %arg0[%c0_3] : memref<6xf32, #tpu.memory_space<smem>>
    %4 = vector.broadcast %3 : f32 to vector<64x256xf32>
    %5 = arith.mulf %2, %4 : vector<64x256xf32>
    %c0_4 = arith.constant 0 : index
    %c0_5 = arith.constant 0 : index
    %6 = vector.load %arg4[%c0_4, %c0_5] : memref<1x256xf32, #tpu.memory_space<vmem>>, vector<1x256xf32>
    %7 = vector.broadcast %6 : vector<1x256xf32> to vector<64x256xf32>
    %8 = arith.addf %5, %7 : vector<64x256xf32>
    %cst_6 = arith.constant 0.000000e+00 : f32
    %9 = vector.broadcast %cst_6 : f32 to vector<64x256xf32>
    %10 = arith.cmpf oge, %8, %9 : vector<64x256xf32>
    %cst_7 = arith.constant 2.000000e-02 : f32
    %11 = vector.broadcast %cst_7 : f32 to vector<64x256xf32>
    %12 = arith.mulf %11, %8 : vector<64x256xf32>
    %13 = arith.select %10, %8, %12 : vector<64x256xi1>, vector<64x256xf32>
    %14 = arith.truncf %13 : vector<64x256xf32> to vector<64x256xbf16>
    %c0_8 = arith.constant 0 : index
    %c0_9 = arith.constant 0 : index
    %15 = vector.load %arg17[%c0_8, %c0_9] : memref<64x256xbf16, #tpu.memory_space<vmem>>, vector<64x256xbf16>
    tpu.vector_store %arg17[%c0_8, %c0_9], %14 {strides = array<i32>} : memref<64x256xbf16, #tpu.memory_space<vmem>>, vector<64x256xbf16>,
    %cst_10 = arith.constant 0.000000e+00 : f32
    %16 = vector.broadcast %cst_10 : f32 to vector<6x256xf32>
    %c0_11 = arith.constant 0 : index
    %c0_12 = arith.constant 0 : index
    %17 = vector.load %arg17[%c0_11, %c0_12] : memref<64x256xbf16, #tpu.memory_space<vmem>>, vector<6x256xbf16>
    %c0_13 = arith.constant 0 : index
    %c0_14 = arith.constant 0 : index
    %18 = vector.load %arg5[%c0_13, %c0_14] : memref<2304x256xbf16, #tpu.memory_space<vmem>>, vector<256x256xbf16>
    %cst_15 = arith.constant dense<0.000000e+00> : vector<6x256xf32>
    %19 = tpu.matmul %17, %18, %cst_15 {dimension_numbers = #tpu.dot_dimension_numbers<[1], [0], [0], [1], [0, 0, 1, 1], [], []>} : vector<6x256xbf16>, vector<256x256xbf16>, vector<6x256xf32> -> vector<6x256xf32>
    %20 = arith.addf %16, %19 : vector<6x256xf32>
    %c2 = arith.constant 2 : index
    %c0_16 = arith.constant 0 : index
    %21 = vector.load %arg17[%c2, %c0_16] : memref<64x256xbf16, #tpu.memory_space<vmem>>, vector<6x256xbf16>
    %c256 = arith.constant 256 : index
    %c0_17 = arith.constant 0 : index
    %22 = vector.load %arg5[%c256, %c0_17] : memref<2304x256xbf16, #tpu.memory_space<vmem>>, vector<256x256xbf16>
    %cst_18 = arith.constant dense<0.000000e+00> : vector<6x256xf32>
    %23 = tpu.matmul %21, %22, %cst_18 {dimension_numbers = #tpu.dot_dimension_numbers<[1], [0], [0], [1], [0, 0, 1, 1], [], []>} : vector<6x256xbf16>, vector<256x256xbf16>, vector<6x256xf32> -> vector<6x256xf32>
    %24 = arith.addf %20, %23 : vector<6x256xf32>
    %c4 = arith.constant 4 : index
    %c0_19 = arith.constant 0 : index
    %25 = vector.load %arg17[%c4, %c0_19] : memref<64x256xbf16, #tpu.memory_space<vmem>>, vector<6x256xbf16>
    %c512 = arith.constant 512 : index
    %c0_20 = arith.constant 0 : index
    %26 = vector.load %arg5[%c512, %c0_20] : memref<2304x256xbf16, #tpu.memory_space<vmem>>, vector<256x256xbf16>
    %cst_21 = arith.constant dense<0.000000e+00> : vector<6x256xf32>
    %27 = tpu.matmul %25, %26, %cst_21 {dimension_numbers = #tpu.dot_dimension_numbers<[1], [0], [0], [1], [0, 0, 1, 1], [], []>} : vector<6x256xbf16>, vector<256x256xbf16>, vector<6x256xf32> -> vector<6x256xf32>
    %28 = arith.addf %24, %27 : vector<6x256xf32>
    %c10 = arith.constant 10 : index
    %c0_22 = arith.constant 0 : index
    %29 = vector.load %arg17[%c10, %c0_22] : memref<64x256xbf16, #tpu.memory_space<vmem>>, vector<6x256xbf16>
    %c768 = arith.constant 768 : index
    %c0_23 = arith.constant 0 : index
    %30 = vector.load %arg5[%c768, %c0_23] : memref<2304x256xbf16, #tpu.memory_space<vmem>>, vector<256x256xbf16>
    %cst_24 = arith.constant dense<0.000000e+00> : vector<6x256xf32>
    %31 = tpu.matmul %29, %30, %cst_24 {dimension_numbers = #tpu.dot_dimension_numbers<[1], [0], [0], [1], [0, 0, 1, 1], [], []>} : vector<6x256xbf16>, vector<256x256xbf16>, vector<6x256xf32> -> vector<6x256xf32>
    %32 = arith.addf %28, %31 : vector<6x256xf32>
    %c12 = arith.constant 12 : index
    %c0_25 = arith.constant 0 : index
    %33 = vector.load %arg17[%c12, %c0_25] : memref<64x256xbf16, #tpu.memory_space<vmem>>, vector<6x256xbf16>
    %c1024 = arith.constant 1024 : index
    %c0_26 = arith.constant 0 : index
    %34 = vector.load %arg5[%c1024, %c0_26] : memref<2304x256xbf16, #tpu.memory_space<vmem>>, vector<256x256xbf16>
    %cst_27 = arith.constant dense<0.000000e+00> : vector<6x256xf32>
    %35 = tpu.matmul %33, %34, %cst_27 {dimension_numbers = #tpu.dot_dimension_numbers<[1], [0], [0], [1], [0, 0, 1, 1], [], []>} : vector<6x256xbf16>, vector<256x256xbf16>, vector<6x256xf32> -> vector<6x256xf32>
    %36 = arith.addf %32, %35 : vector<6x256xf32>
    %c14 = arith.constant 14 : index
    %c0_28 = arith.constant 0 : index
    %37 = vector.load %arg17[%c14, %c0_28] : memref<64x256xbf16, #tpu.memory_space<vmem>>, vector<6x256xbf16>
    %c1280 = arith.constant 1280 : index
    %c0_29 = arith.constant 0 : index
    %38 = vector.load %arg5[%c1280, %c0_29] : memref<2304x256xbf16, #tpu.memory_space<vmem>>, vector<256x256xbf16>
    %cst_30 = arith.constant dense<0.000000e+00> : vector<6x256xf32>
    %39 = tpu.matmul %37, %38, %cst_30 {dimension_numbers = #tpu.dot_dimension_numbers<[1], [0], [0], [1], [0, 0, 1, 1], [], []>} : vector<6x256xbf16>, vector<256x256xbf16>, vector<6x256xf32> -> vector<6x256xf32>
    %40 = arith.addf %36, %39 : vector<6x256xf32>
    %c20 = arith.constant 20 : index
    %c0_31 = arith.constant 0 : index
    %41 = vector.load %arg17[%c20, %c0_31] : memref<64x256xbf16, #tpu.memory_space<vmem>>, vector<6x256xbf16>
    %c1536 = arith.constant 1536 : index
    %c0_32 = arith.constant 0 : index
    %42 = vector.load %arg5[%c1536, %c0_32] : memref<2304x256xbf16, #tpu.memory_space<vmem>>, vector<256x256xbf16>
    %cst_33 = arith.constant dense<0.000000e+00> : vector<6x256xf32>
    %43 = tpu.matmul %41, %42, %cst_33 {dimension_numbers = #tpu.dot_dimension_numbers<[1], [0], [0], [1], [0, 0, 1, 1], [], []>} : vector<6x256xbf16>, vector<256x256xbf16>, vector<6x256xf32> -> vector<6x256xf32>
    %44 = arith.addf %40, %43 : vector<6x256xf32>
    %c22 = arith.constant 22 : index
    %c0_34 = arith.constant 0 : index
    %45 = vector.load %arg17[%c22, %c0_34] : memref<64x256xbf16, #tpu.memory_space<vmem>>, vector<6x256xbf16>
    %c1792 = arith.constant 1792 : index
    %c0_35 = arith.constant 0 : index
    %46 = vector.load %arg5[%c1792, %c0_35] : memref<2304x256xbf16, #tpu.memory_space<vmem>>, vector<256x256xbf16>
    %cst_36 = arith.constant dense<0.000000e+00> : vector<6x256xf32>
    %47 = tpu.matmul %45, %46, %cst_36 {dimension_numbers = #tpu.dot_dimension_numbers<[1], [0], [0], [1], [0, 0, 1, 1], [], []>} : vector<6x256xbf16>, vector<256x256xbf16>, vector<6x256xf32> -> vector<6x256xf32>
    %48 = arith.addf %44, %47 : vector<6x256xf32>
    %c24 = arith.constant 24 : index
    %c0_37 = arith.constant 0 : index
    %49 = vector.load %arg17[%c24, %c0_37] : memref<64x256xbf16, #tpu.memory_space<vmem>>, vector<6x256xbf16>
    %c2048 = arith.constant 2048 : index
    %c0_38 = arith.constant 0 : index
    %50 = vector.load %arg5[%c2048, %c0_38] : memref<2304x256xbf16, #tpu.memory_space<vmem>>, vector<256x256xbf16>
    %cst_39 = arith.constant dense<0.000000e+00> : vector<6x256xf32>
    %51 = tpu.matmul %49, %50, %cst_39 {dimension_numbers = #tpu.dot_dimension_numbers<[1], [0], [0], [1], [0, 0, 1, 1], [], []>} : vector<6x256xbf16>, vector<256x256xbf16>, vector<6x256xf32> -> vector<6x256xf32>
    %52 = arith.addf %48, %51 : vector<6x256xf32>
    %c1 = arith.constant 1 : index
    %53 = memref.load %arg0[%c1] : memref<6xf32, #tpu.memory_space<smem>>
    %54 = vector.broadcast %53 : f32 to vector<6x256xf32>
    %55 = arith.mulf %52, %54 : vector<6x256xf32>
    %c0_40 = arith.constant 0 : index
    %c0_41 = arith.constant 0 : index
    %56 = vector.load %arg6[%c0_40, %c0_41] : memref<1x256xf32, #tpu.memory_space<vmem>>, vector<1x256xf32>
    %57 = vector.broadcast %56 : vector<1x256xf32> to vector<6x256xf32>
    %58 = arith.addf %55, %57 : vector<6x256xf32>
    %cst_42 = arith.constant 0.000000e+00 : f32
    %59 = vector.broadcast %cst_42 : f32 to vector<6x256xf32>
    %60 = arith.cmpf oge, %58, %59 : vector<6x256xf32>
    %cst_43 = arith.constant 2.000000e-02 : f32
    %61 = vector.broadcast %cst_43 : f32 to vector<6x256xf32>
    %62 = arith.mulf %61, %58 : vector<6x256xf32>
    %63 = arith.select %60, %58, %62 : vector<6x256xi1>, vector<6x256xf32>
    %64 = arith.truncf %63 : vector<6x256xf32> to vector<6x256xbf16>
    %c0_44 = arith.constant 0 : index
    %c0_45 = arith.constant 0 : index
    %65 = vector.load %arg18[%c0_44, %c0_45] : memref<18x256xbf16, #tpu.memory_space<vmem>>, vector<6x256xbf16>
    tpu.vector_store %arg18[%c0_44, %c0_45], %64 {strides = array<i32>} : memref<18x256xbf16, #tpu.memory_space<vmem>>, vector<6x256xbf16>,
    %cst_46 = arith.constant 0.000000e+00 : f32
    %66 = vector.broadcast %cst_46 : f32 to vector<6x256xf32>
    %c10_47 = arith.constant 10 : index
    %c0_48 = arith.constant 0 : index
    %67 = vector.load %arg17[%c10_47, %c0_48] : memref<64x256xbf16, #tpu.memory_space<vmem>>, vector<6x256xbf16>
    %c0_49 = arith.constant 0 : index
    %c0_50 = arith.constant 0 : index
    %68 = vector.load %arg5[%c0_49, %c0_50] : memref<2304x256xbf16, #tpu.memory_space<vmem>>, vector<256x256xbf16>
    %cst_51 = arith.constant dense<0.000000e+00> : vector<6x256xf32>
    %69 = tpu.matmul %67, %68, %cst_51 {dimension_numbers = #tpu.dot_dimension_numbers<[1], [0], [0], [1], [0, 0, 1, 1], [], []>} : vector<6x256xbf16>, vector<256x256xbf16>, vector<6x256xf32> -> vector<6x256xf32>
    %70 = arith.addf %66, %69 : vector<6x256xf32>
    %c12_52 = arith.constant 12 : index
    %c0_53 = arith.constant 0 : index
    %71 = vector.load %arg17[%c12_52, %c0_53] : memref<64x256xbf16, #tpu.memory_space<vmem>>, vector<6x256xbf16>
    %c256_54 = arith.constant 256 : index
    %c0_55 = arith.constant 0 : index
    %72 = vector.load %arg5[%c256_54, %c0_55] : memref<2304x256xbf16, #tpu.memory_space<vmem>>, vector<256x256xbf16>
    %cst_56 = arith.constant dense<0.000000e+00> : vector<6x256xf32>
    %73 = tpu.matmul %71, %72, %cst_56 {dimension_numbers = #tpu.dot_dimension_numbers<[1], [0], [0], [1], [0, 0, 1, 1], [], []>} : vector<6x256xbf16>, vector<256x256xbf16>, vector<6x256xf32> -> vector<6x256xf32>
    %74 = arith.addf %70, %73 : vector<6x256xf32>
    %c14_57 = arith.constant 14 : index
    %c0_58 = arith.constant 0 : index
    %75 = vector.load %arg17[%c14_57, %c0_58] : memref<64x256xbf16, #tpu.memory_space<vmem>>, vector<6x256xbf16>
    %c512_59 = arith.constant 512 : index
    %c0_60 = arith.constant 0 : index
    %76 = vector.load %arg5[%c512_59, %c0_60] : memref<2304x256xbf16, #tpu.memory_space<vmem>>, vector<256x256xbf16>
    %cst_61 = arith.constant dense<0.000000e+00> : vector<6x256xf32>
    %77 = tpu.matmul %75, %76, %cst_61 {dimension_numbers = #tpu.dot_dimension_numbers<[1], [0], [0], [1], [0, 0, 1, 1], [], []>} : vector<6x256xbf16>, vector<256x256xbf16>, vector<6x256xf32> -> vector<6x256xf32>
    %78 = arith.addf %74, %77 : vector<6x256xf32>
    %c20_62 = arith.constant 20 : index
    %c0_63 = arith.constant 0 : index
    %79 = vector.load %arg17[%c20_62, %c0_63] : memref<64x256xbf16, #tpu.memory_space<vmem>>, vector<6x256xbf16>
    %c768_64 = arith.constant 768 : index
    %c0_65 = arith.constant 0 : index
    %80 = vector.load %arg5[%c768_64, %c0_65] : memref<2304x256xbf16, #tpu.memory_space<vmem>>, vector<256x256xbf16>
    %cst_66 = arith.constant dense<0.000000e+00> : vector<6x256xf32>
    %81 = tpu.matmul %79, %80, %cst_66 {dimension_numbers = #tpu.dot_dimension_numbers<[1], [0], [0], [1], [0, 0, 1, 1], [], []>} : vector<6x256xbf16>, vector<256x256xbf16>, vector<6x256xf32> -> vector<6x256xf32>
    %82 = arith.addf %78, %81 : vector<6x256xf32>
    %c22_67 = arith.constant 22 : index
    %c0_68 = arith.constant 0 : index
    %83 = vector.load %arg17[%c22_67, %c0_68] : memref<64x256xbf16, #tpu.memory_space<vmem>>, vector<6x256xbf16>
    %c1024_69 = arith.constant 1024 : index
    %c0_70 = arith.constant 0 : index
    %84 = vector.load %arg5[%c1024_69, %c0_70] : memref<2304x256xbf16, #tpu.memory_space<vmem>>, vector<256x256xbf16>
    %cst_71 = arith.constant dense<0.000000e+00> : vector<6x256xf32>
    %85 = tpu.matmul %83, %84, %cst_71 {dimension_numbers = #tpu.dot_dimension_numbers<[1], [0], [0], [1], [0, 0, 1, 1], [], []>} : vector<6x256xbf16>, vector<256x256xbf16>, vector<6x256xf32> -> vector<6x256xf32>
    %86 = arith.addf %82, %85 : vector<6x256xf32>
    %c24_72 = arith.constant 24 : index
    %c0_73 = arith.constant 0 : index
    %87 = vector.load %arg17[%c24_72, %c0_73] : memref<64x256xbf16, #tpu.memory_space<vmem>>, vector<6x256xbf16>
    %c1280_74 = arith.constant 1280 : index
    %c0_75 = arith.constant 0 : index
    %88 = vector.load %arg5[%c1280_74, %c0_75] : memref<2304x256xbf16, #tpu.memory_space<vmem>>, vector<256x256xbf16>
    %cst_76 = arith.constant dense<0.000000e+00> : vector<6x256xf32>
    %89 = tpu.matmul %87, %88, %cst_76 {dimension_numbers = #tpu.dot_dimension_numbers<[1], [0], [0], [1], [0, 0, 1, 1], [], []>} : vector<6x256xbf16>, vector<256x256xbf16>, vector<6x256xf32> -> vector<6x256xf32>
    %90 = arith.addf %86, %89 : vector<6x256xf32>
    %c30 = arith.constant 30 : index
    %c0_77 = arith.constant 0 : index
    %91 = vector.load %arg17[%c30, %c0_77] : memref<64x256xbf16, #tpu.memory_space<vmem>>, vector<6x256xbf16>
    %c1536_78 = arith.constant 1536 : index
    %c0_79 = arith.constant 0 : index
    %92 = vector.load %arg5[%c1536_78, %c0_79] : memref<2304x256xbf16, #tpu.memory_space<vmem>>, vector<256x256xbf16>
    %cst_80 = arith.constant dense<0.000000e+00> : vector<6x256xf32>
    %93 = tpu.matmul %91, %92, %cst_80 {dimension_numbers = #tpu.dot_dimension_numbers<[1], [0], [0], [1], [0, 0, 1, 1], [], []>} : vector<6x256xbf16>, vector<256x256xbf16>, vector<6x256xf32> -> vector<6x256xf32>
    %94 = arith.addf %90, %93 : vector<6x256xf32>
    %c32 = arith.constant 32 : index
    %c0_81 = arith.constant 0 : index
    %95 = vector.load %arg17[%c32, %c0_81] : memref<64x256xbf16, #tpu.memory_space<vmem>>, vector<6x256xbf16>
    %c1792_82 = arith.constant 1792 : index
    %c0_83 = arith.constant 0 : index
    %96 = vector.load %arg5[%c1792_82, %c0_83] : memref<2304x256xbf16, #tpu.memory_space<vmem>>, vector<256x256xbf16>
    %cst_84 = arith.constant dense<0.000000e+00> : vector<6x256xf32>
    %97 = tpu.matmul %95, %96, %cst_84 {dimension_numbers = #tpu.dot_dimension_numbers<[1], [0], [0], [1], [0, 0, 1, 1], [], []>} : vector<6x256xbf16>, vector<256x256xbf16>, vector<6x256xf32> -> vector<6x256xf32>
    %98 = arith.addf %94, %97 : vector<6x256xf32>
    %c34 = arith.constant 34 : index
    %c0_85 = arith.constant 0 : index
    %99 = vector.load %arg17[%c34, %c0_85] : memref<64x256xbf16, #tpu.memory_space<vmem>>, vector<6x256xbf16>
    %c2048_86 = arith.constant 2048 : index
    %c0_87 = arith.constant 0 : index
    %100 = vector.load %arg5[%c2048_86, %c0_87] : memref<2304x256xbf16, #tpu.memory_space<vmem>>, vector<256x256xbf16>
    %cst_88 = arith.constant dense<0.000000e+00> : vector<6x256xf32>
    %101 = tpu.matmul %99, %100, %cst_88 {dimension_numbers = #tpu.dot_dimension_numbers<[1], [0], [0], [1], [0, 0, 1, 1], [], []>} : vector<6x256xbf16>, vector<256x256xbf16>, vector<6x256xf32> -> vector<6x256xf32>
    %102 = arith.addf %98, %101 : vector<6x256xf32>
    %c1_89 = arith.constant 1 : index
    %103 = memref.load %arg0[%c1_89] : memref<6xf32, #tpu.memory_space<smem>>
    %104 = vector.broadcast %103 : f32 to vector<6x256xf32>
    %105 = arith.mulf %102, %104 : vector<6x256xf32>
    %c0_90 = arith.constant 0 : index
    %c0_91 = arith.constant 0 : index
    %106 = vector.load %arg6[%c0_90, %c0_91] : memref<1x256xf32, #tpu.memory_space<vmem>>, vector<1x256xf32>
    %107 = vector.broadcast %106 : vector<1x256xf32> to vector<6x256xf32>
    %108 = arith.addf %105, %107 : vector<6x256xf32>
    %cst_92 = arith.constant 0.000000e+00 : f32
    %109 = vector.broadcast %cst_92 : f32 to vector<6x256xf32>
    %110 = arith.cmpf oge, %108, %109 : vector<6x256xf32>
    %cst_93 = arith.constant 2.000000e-02 : f32
    %111 = vector.broadcast %cst_93 : f32 to vector<6x256xf32>
    %112 = arith.mulf %111, %108 : vector<6x256xf32>
    %113 = arith.select %110, %108, %112 : vector<6x256xi1>, vector<6x256xf32>
    %114 = arith.truncf %113 : vector<6x256xf32> to vector<6x256xbf16>
    %c6 = arith.constant 6 : index
    %c0_94 = arith.constant 0 : index
    %115 = vector.load %arg18[%c6, %c0_94] : memref<18x256xbf16, #tpu.memory_space<vmem>>, vector<6x256xbf16>
    tpu.vector_store %arg18[%c6, %c0_94], %114 {strides = array<i32>} : memref<18x256xbf16, #tpu.memory_space<vmem>>, vector<6x256xbf16>,
    %cst_95 = arith.constant 0.000000e+00 : f32
    %116 = vector.broadcast %cst_95 : f32 to vector<6x256xf32>
    %c20_96 = arith.constant 20 : index
    %c0_97 = arith.constant 0 : index
    %117 = vector.load %arg17[%c20_96, %c0_97] : memref<64x256xbf16, #tpu.memory_space<vmem>>, vector<6x256xbf16>
    %c0_98 = arith.constant 0 : index
    %c0_99 = arith.constant 0 : index
    %118 = vector.load %arg5[%c0_98, %c0_99] : memref<2304x256xbf16, #tpu.memory_space<vmem>>, vector<256x256xbf16>
    %cst_100 = arith.constant dense<0.000000e+00> : vector<6x256xf32>
    %119 = tpu.matmul %117, %118, %cst_100 {dimension_numbers = #tpu.dot_dimension_numbers<[1], [0], [0], [1], [0, 0, 1, 1], [], []>} : vector<6x256xbf16>, vector<256x256xbf16>, vector<6x256xf32> -> vector<6x256xf32>
    %120 = arith.addf %116, %119 : vector<6x256xf32>
    %c22_101 = arith.constant 22 : index
    %c0_102 = arith.constant 0 : index
    %121 = vector.load %arg17[%c22_101, %c0_102] : memref<64x256xbf16, #tpu.memory_space<vmem>>, vector<6x256xbf16>
    %c256_103 = arith.constant 256 : index
    %c0_104 = arith.constant 0 : index
    %122 = vector.load %arg5[%c256_103, %c0_104] : memref<2304x256xbf16, #tpu.memory_space<vmem>>, vector<256x256xbf16>
    %cst_105 = arith.constant dense<0.000000e+00> : vector<6x256xf32>
    %123 = tpu.matmul %121, %122, %cst_105 {dimension_numbers = #tpu.dot_dimension_numbers<[1], [0], [0], [1], [0, 0, 1, 1], [], []>} : vector<6x256xbf16>, vector<256x256xbf16>, vector<6x256xf32> -> vector<6x256xf32>
    %124 = arith.addf %120, %123 : vector<6x256xf32>
    %c24_106 = arith.constant 24 : index
    %c0_107 = arith.constant 0 : index
    %125 = vector.load %arg17[%c24_106, %c0_107] : memref<64x256xbf16, #tpu.memory_space<vmem>>, vector<6x256xbf16>
    %c512_108 = arith.constant 512 : index
    %c0_109 = arith.constant 0 : index
    %126 = vector.load %arg5[%c512_108, %c0_109] : memref<2304x256xbf16, #tpu.memory_space<vmem>>, vector<256x256xbf16>
    %cst_110 = arith.constant dense<0.000000e+00> : vector<6x256xf32>
    %127 = tpu.matmul %125, %126, %cst_110 {dimension_numbers = #tpu.dot_dimension_numbers<[1], [0], [0], [1], [0, 0, 1, 1], [], []>} : vector<6x256xbf16>, vector<256x256xbf16>, vector<6x256xf32> -> vector<6x256xf32>
    %128 = arith.addf %124, %127 : vector<6x256xf32>
    %c30_111 = arith.constant 30 : index
    %c0_112 = arith.constant 0 : index
    %129 = vector.load %arg17[%c30_111, %c0_112] : memref<64x256xbf16, #tpu.memory_space<vmem>>, vector<6x256xbf16>
    %c768_113 = arith.constant 768 : index
    %c0_114 = arith.constant 0 : index
    %130 = vector.load %arg5[%c768_113, %c0_114] : memref<2304x256xbf16, #tpu.memory_space<vmem>>, vector<256x256xbf16>
    %cst_115 = arith.constant dense<0.000000e+00> : vector<6x256xf32>
    %131 = tpu.matmul %129, %130, %cst_115 {dimension_numbers = #tpu.dot_dimension_numbers<[1], [0], [0], [1], [0, 0, 1, 1], [], []>} : vector<6x256xbf16>, vector<256x256xbf16>, vector<6x256xf32> -> vector<6x256xf32>
    %132 = arith.addf %128, %131 : vector<6x256xf32>
    %c32_116 = arith.constant 32 : index
    %c0_117 = arith.constant 0 : index
    %133 = vector.load %arg17[%c32_116, %c0_117] : memref<64x256xbf16, #tpu.memory_space<vmem>>, vector<6x256xbf16>
    %c1024_118 = arith.constant 1024 : index
    %c0_119 = arith.constant 0 : index
    %134 = vector.load %arg5[%c1024_118, %c0_119] : memref<2304x256xbf16, #tpu.memory_space<vmem>>, vector<256x256xbf16>
    %cst_120 = arith.constant dense<0.000000e+00> : vector<6x256xf32>
    %135 = tpu.matmul %133, %134, %cst_120 {dimension_numbers = #tpu.dot_dimension_numbers<[1], [0], [0], [1], [0, 0, 1, 1], [], []>} : vector<6x256xbf16>, vector<256x256xbf16>, vector<6x256xf32> -> vector<6x256xf32>
    %136 = arith.addf %132, %135 : vector<6x256xf32>
    %c34_121 = arith.constant 34 : index
    %c0_122 = arith.constant 0 : index
    %137 = vector.load %arg17[%c34_121, %c0_122] : memref<64x256xbf16, #tpu.memory_space<vmem>>, vector<6x256xbf16>
    %c1280_123 = arith.constant 1280 : index
    %c0_124 = arith.constant 0 : index
    %138 = vector.load %arg5[%c1280_123, %c0_124] : memref<2304x256xbf16, #tpu.memory_space<vmem>>, vector<256x256xbf16>
    %cst_125 = arith.constant dense<0.000000e+00> : vector<6x256xf32>
    %139 = tpu.matmul %137, %138, %cst_125 {dimension_numbers = #tpu.dot_dimension_numbers<[1], [0], [0], [1], [0, 0, 1, 1], [], []>} : vector<6x256xbf16>, vector<256x256xbf16>, vector<6x256xf32> -> vector<6x256xf32>
    %140 = arith.addf %136, %139 : vector<6x256xf32>
    %c40 = arith.constant 40 : index
    %c0_126 = arith.constant 0 : index
    %141 = vector.load %arg17[%c40, %c0_126] : memref<64x256xbf16, #tpu.memory_space<vmem>>, vector<6x256xbf16>
    %c1536_127 = arith.constant 1536 : index
    %c0_128 = arith.constant 0 : index
    %142 = vector.load %arg5[%c1536_127, %c0_128] : memref<2304x256xbf16, #tpu.memory_space<vmem>>, vector<256x256xbf16>
    %cst_129 = arith.constant dense<0.000000e+00> : vector<6x256xf32>
    %143 = tpu.matmul %141, %142, %cst_129 {dimension_numbers = #tpu.dot_dimension_numbers<[1], [0], [0], [1], [0, 0, 1, 1], [], []>} : vector<6x256xbf16>, vector<256x256xbf16>, vector<6x256xf32> -> vector<6x256xf32>
    %144 = arith.addf %140, %143 : vector<6x256xf32>
    %c42 = arith.constant 42 : index
    %c0_130 = arith.constant 0 : index
    %145 = vector.load %arg17[%c42, %c0_130] : memref<64x256xbf16, #tpu.memory_space<vmem>>, vector<6x256xbf16>
    %c1792_131 = arith.constant 1792 : index
    %c0_132 = arith.constant 0 : index
    %146 = vector.load %arg5[%c1792_131, %c0_132] : memref<2304x256xbf16, #tpu.memory_space<vmem>>, vector<256x256xbf16>
    %cst_133 = arith.constant dense<0.000000e+00> : vector<6x256xf32>
    %147 = tpu.matmul %145, %146, %cst_133 {dimension_numbers = #tpu.dot_dimension_numbers<[1], [0], [0], [1], [0, 0, 1, 1], [], []>} : vector<6x256xbf16>, vector<256x256xbf16>, vector<6x256xf32> -> vector<6x256xf32>
    %148 = arith.addf %144, %147 : vector<6x256xf32>
    %c44 = arith.constant 44 : index
    %c0_134 = arith.constant 0 : index
    %149 = vector.load %arg17[%c44, %c0_134] : memref<64x256xbf16, #tpu.memory_space<vmem>>, vector<6x256xbf16>
    %c2048_135 = arith.constant 2048 : index
    %c0_136 = arith.constant 0 : index
    %150 = vector.load %arg5[%c2048_135, %c0_136] : memref<2304x256xbf16, #tpu.memory_space<vmem>>, vector<256x256xbf16>
    %cst_137 = arith.constant dense<0.000000e+00> : vector<6x256xf32>
    %151 = tpu.matmul %149, %150, %cst_137 {dimension_numbers = #tpu.dot_dimension_numbers<[1], [0], [0], [1], [0, 0, 1, 1], [], []>} : vector<6x256xbf16>, vector<256x256xbf16>, vector<6x256xf32> -> vector<6x256xf32>
    %152 = arith.addf %148, %151 : vector<6x256xf32>
    %c1_138 = arith.constant 1 : index
    %153 = memref.load %arg0[%c1_138] : memref<6xf32, #tpu.memory_space<smem>>
    %154 = vector.broadcast %153 : f32 to vector<6x256xf32>
    %155 = arith.mulf %152, %154 : vector<6x256xf32>
    %c0_139 = arith.constant 0 : index
    %c0_140 = arith.constant 0 : index
    %156 = vector.load %arg6[%c0_139, %c0_140] : memref<1x256xf32, #tpu.memory_space<vmem>>, vector<1x256xf32>
    %157 = vector.broadcast %156 : vector<1x256xf32> to vector<6x256xf32>
    %158 = arith.addf %155, %157 : vector<6x256xf32>
    %cst_141 = arith.constant 0.000000e+00 : f32
    %159 = vector.broadcast %cst_141 : f32 to vector<6x256xf32>
    %160 = arith.cmpf oge, %158, %159 : vector<6x256xf32>
    %cst_142 = arith.constant 2.000000e-02 : f32
    %161 = vector.broadcast %cst_142 : f32 to vector<6x256xf32>
    %162 = arith.mulf %161, %158 : vector<6x256xf32>
    %163 = arith.select %160, %158, %162 : vector<6x256xi1>, vector<6x256xf32>
    %164 = arith.truncf %163 : vector<6x256xf32> to vector<6x256xbf16>
    %c12_143 = arith.constant 12 : index
    %c0_144 = arith.constant 0 : index
    %165 = vector.load %arg18[%c12_143, %c0_144] : memref<18x256xbf16, #tpu.memory_space<vmem>>, vector<6x256xbf16>
    tpu.vector_store %arg18[%c12_143, %c0_144], %164 {strides = array<i32>} : memref<18x256xbf16, #tpu.memory_space<vmem>>, vector<6x256xbf16>,
    %cst_145 = arith.constant 0.000000e+00 : f32
    %166 = vector.broadcast %cst_145 : f32 to vector<2x256xf32>
    %c0_146 = arith.constant 0 : index
    %c0_147 = arith.constant 0 : index
    %167 = vector.load %arg18[%c0_146, %c0_147] : memref<18x256xbf16, #tpu.memory_space<vmem>>, vector<2x256xbf16>
    %c0_148 = arith.constant 0 : index
    %c0_149 = arith.constant 0 : index
    %168 = vector.load %arg7[%c0_148, %c0_149] : memref<2304x256xbf16, #tpu.memory_space<vmem>>, vector<256x256xbf16>
    %cst_150 = arith.constant dense<0.000000e+00> : vector<2x256xf32>
    %169 = tpu.matmul %167, %168, %cst_150 {dimension_numbers = #tpu.dot_dimension_numbers<[1], [0], [0], [1], [0, 0, 1, 1], [], []>} : vector<2x256xbf16>, vector<256x256xbf16>, vector<2x256xf32> -> vector<2x256xf32>
    %170 = arith.addf %166, %169 : vector<2x256xf32>
    %c2_151 = arith.constant 2 : index
    %c0_152 = arith.constant 0 : index
    %171 = vector.load %arg18[%c2_151, %c0_152] : memref<18x256xbf16, #tpu.memory_space<vmem>>, vector<2x256xbf16>
    %c256_153 = arith.constant 256 : index
    %c0_154 = arith.constant 0 : index
    %172 = vector.load %arg7[%c256_153, %c0_154] : memref<2304x256xbf16, #tpu.memory_space<vmem>>, vector<256x256xbf16>
    %cst_155 = arith.constant dense<0.000000e+00> : vector<2x256xf32>
    %173 = tpu.matmul %171, %172, %cst_155 {dimension_numbers = #tpu.dot_dimension_numbers<[1], [0], [0], [1], [0, 0, 1, 1], [], []>} : vector<2x256xbf16>, vector<256x256xbf16>, vector<2x256xf32> -> vector<2x256xf32>
    %174 = arith.addf %170, %173 : vector<2x256xf32>
    %c4_156 = arith.constant 4 : index
    %c0_157 = arith.constant 0 : index
    %175 = vector.load %arg18[%c4_156, %c0_157] : memref<18x256xbf16, #tpu.memory_space<vmem>>, vector<2x256xbf16>
    %c512_158 = arith.constant 512 : index
    %c0_159 = arith.constant 0 : index
    %176 = vector.load %arg7[%c512_158, %c0_159] : memref<2304x256xbf16, #tpu.memory_space<vmem>>, vector<256x256xbf16>
    %cst_160 = arith.constant dense<0.000000e+00> : vector<2x256xf32>
    %177 = tpu.matmul %175, %176, %cst_160 {dimension_numbers = #tpu.dot_dimension_numbers<[1], [0], [0], [1], [0, 0, 1, 1], [], []>} : vector<2x256xbf16>, vector<256x256xbf16>, vector<2x256xf32> -> vector<2x256xf32>
    %178 = arith.addf %174, %177 : vector<2x256xf32>
    %c6_161 = arith.constant 6 : index
    %c0_162 = arith.constant 0 : index
    %179 = vector.load %arg18[%c6_161, %c0_162] : memref<18x256xbf16, #tpu.memory_space<vmem>>, vector<2x256xbf16>
    %c768_163 = arith.constant 768 : index
    %c0_164 = arith.constant 0 : index
    %180 = vector.load %arg7[%c768_163, %c0_164] : memref<2304x256xbf16, #tpu.memory_space<vmem>>, vector<256x256xbf16>
    %cst_165 = arith.constant dense<0.000000e+00> : vector<2x256xf32>
    %181 = tpu.matmul %179, %180, %cst_165 {dimension_numbers = #tpu.dot_dimension_numbers<[1], [0], [0], [1], [0, 0, 1, 1], [], []>} : vector<2x256xbf16>, vector<256x256xbf16>, vector<2x256xf32> -> vector<2x256xf32>
    %182 = arith.addf %178, %181 : vector<2x256xf32>
    %c8 = arith.constant 8 : index
    %c0_166 = arith.constant 0 : index
    %183 = vector.load %arg18[%c8, %c0_166] : memref<18x256xbf16, #tpu.memory_space<vmem>>, vector<2x256xbf16>
    %c1024_167 = arith.constant 1024 : index
    %c0_168 = arith.constant 0 : index
    %184 = vector.load %arg7[%c1024_167, %c0_168] : memref<2304x256xbf16, #tpu.memory_space<vmem>>, vector<256x256xbf16>
    %cst_169 = arith.constant dense<0.000000e+00> : vector<2x256xf32>
    %185 = tpu.matmul %183, %184, %cst_169 {dimension_numbers = #tpu.dot_dimension_numbers<[1], [0], [0], [1], [0, 0, 1, 1], [], []>} : vector<2x256xbf16>, vector<256x256xbf16>, vector<2x256xf32> -> vector<2x256xf32>
    %186 = arith.addf %182, %185 : vector<2x256xf32>
    %c10_170 = arith.constant 10 : index
    %c0_171 = arith.constant 0 : index
    %187 = vector.load %arg18[%c10_170, %c0_171] : memref<18x256xbf16, #tpu.memory_space<vmem>>, vector<2x256xbf16>
    %c1280_172 = arith.constant 1280 : index
    %c0_173 = arith.constant 0 : index
    %188 = vector.load %arg7[%c1280_172, %c0_173] : memref<2304x256xbf16, #tpu.memory_space<vmem>>, vector<256x256xbf16>
    %cst_174 = arith.constant dense<0.000000e+00> : vector<2x256xf32>
    %189 = tpu.matmul %187, %188, %cst_174 {dimension_numbers = #tpu.dot_dimension_numbers<[1], [0], [0], [1], [0, 0, 1, 1], [], []>} : vector<2x256xbf16>, vector<256x256xbf16>, vector<2x256xf32> -> vector<2x256xf32>
    %190 = arith.addf %186, %189 : vector<2x256xf32>
    %c12_175 = arith.constant 12 : index
    %c0_176 = arith.constant 0 : index
    %191 = vector.load %arg18[%c12_175, %c0_176] : memref<18x256xbf16, #tpu.memory_space<vmem>>, vector<2x256xbf16>
    %c1536_177 = arith.constant 1536 : index
    %c0_178 = arith.constant 0 : index
    %192 = vector.load %arg7[%c1536_177, %c0_178] : memref<2304x256xbf16, #tpu.memory_space<vmem>>, vector<256x256xbf16>
    %cst_179 = arith.constant dense<0.000000e+00> : vector<2x256xf32>
    %193 = tpu.matmul %191, %192, %cst_179 {dimension_numbers = #tpu.dot_dimension_numbers<[1], [0], [0], [1], [0, 0, 1, 1], [], []>} : vector<2x256xbf16>, vector<256x256xbf16>, vector<2x256xf32> -> vector<2x256xf32>
    %194 = arith.addf %190, %193 : vector<2x256xf32>
    %c14_180 = arith.constant 14 : index
    %c0_181 = arith.constant 0 : index
    %195 = vector.load %arg18[%c14_180, %c0_181] : memref<18x256xbf16, #tpu.memory_space<vmem>>, vector<2x256xbf16>
    %c1792_182 = arith.constant 1792 : index
    %c0_183 = arith.constant 0 : index
    %196 = vector.load %arg7[%c1792_182, %c0_183] : memref<2304x256xbf16, #tpu.memory_space<vmem>>, vector<256x256xbf16>
    %cst_184 = arith.constant dense<0.000000e+00> : vector<2x256xf32>
    %197 = tpu.matmul %195, %196, %cst_184 {dimension_numbers = #tpu.dot_dimension_numbers<[1], [0], [0], [1], [0, 0, 1, 1], [], []>} : vector<2x256xbf16>, vector<256x256xbf16>, vector<2x256xf32> -> vector<2x256xf32>
    %198 = arith.addf %194, %197 : vector<2x256xf32>
    %c16 = arith.constant 16 : index
    %c0_185 = arith.constant 0 : index
    %199 = vector.load %arg18[%c16, %c0_185] : memref<18x256xbf16, #tpu.memory_space<vmem>>, vector<2x256xbf16>
    %c2048_186 = arith.constant 2048 : index
    %c0_187 = arith.constant 0 : index
    %200 = vector.load %arg7[%c2048_186, %c0_187] : memref<2304x256xbf16, #tpu.memory_space<vmem>>, vector<256x256xbf16>
    %cst_188 = arith.constant dense<0.000000e+00> : vector<2x256xf32>
    %201 = tpu.matmul %199, %200, %cst_188 {dimension_numbers = #tpu.dot_dimension_numbers<[1], [0], [0], [1], [0, 0, 1, 1], [], []>} : vector<2x256xbf16>, vector<256x256xbf16>, vector<2x256xf32> -> vector<2x256xf32>
    %202 = arith.addf %198, %201 : vector<2x256xf32>
    %c2_189 = arith.constant 2 : index
    %203 = memref.load %arg0[%c2_189] : memref<6xf32, #tpu.memory_space<smem>>
    %204 = vector.broadcast %203 : f32 to vector<2x256xf32>
    %205 = arith.mulf %202, %204 : vector<2x256xf32>
    %c0_190 = arith.constant 0 : index
    %c0_191 = arith.constant 0 : index
    %206 = vector.load %arg8[%c0_190, %c0_191] : memref<1x256xf32, #tpu.memory_space<vmem>>, vector<1x256xf32>
    %207 = vector.broadcast %206 : vector<1x256xf32> to vector<2x256xf32>
    %208 = arith.addf %205, %207 : vector<2x256xf32>
    %cst_192 = arith.constant 0.000000e+00 : f32
    %209 = vector.broadcast %cst_192 : f32 to vector<2x256xf32>
    %210 = arith.cmpf oge, %208, %209 : vector<2x256xf32>
    %cst_193 = arith.constant 2.000000e-02 : f32
    %211 = vector.broadcast %cst_193 : f32 to vector<2x256xf32>
    %212 = arith.mulf %211, %208 : vector<2x256xf32>
    %213 = arith.select %210, %208, %212 : vector<2x256xi1>, vector<2x256xf32>
    %214 = arith.truncf %213 : vector<2x256xf32> to vector<2x256xbf16>
    %c0_194 = arith.constant 0 : index
    %c0_195 = arith.constant 0 : index
    %215 = vector.load %arg9[%c0_194, %c0_195] : memref<256x512xbf16, #tpu.memory_space<vmem>>, vector<256x512xbf16>
    %cst_196 = arith.constant dense<0.000000e+00> : vector<2x512xf32>
    %216 = tpu.matmul %214, %215, %cst_196 {dimension_numbers = #tpu.dot_dimension_numbers<[1], [0], [0], [1], [0, 0, 1, 1], [], []>} : vector<2x256xbf16>, vector<256x512xbf16>, vector<2x512xf32> -> vector<2x512xf32>
    %c0_197 = arith.constant 0 : index
    %c0_198 = arith.constant 0 : index
    %217 = vector.load %arg2[%c0_197, %c0_198] : memref<2x256xbf16, #tpu.memory_space<vmem>>, vector<2x256xbf16>
    %c0_199 = arith.constant 0 : index
    %c0_200 = arith.constant 0 : index
    %218 = vector.load %arg10[%c0_199, %c0_200] : memref<256x512xbf16, #tpu.memory_space<vmem>>, vector<256x512xbf16>
    %cst_201 = arith.constant dense<0.000000e+00> : vector<2x512xf32>
    %219 = tpu.matmul %217, %218, %cst_201 {dimension_numbers = #tpu.dot_dimension_numbers<[1], [0], [0], [1], [0, 0, 1, 1], [], []>} : vector<2x256xbf16>, vector<256x512xbf16>, vector<2x512xf32> -> vector<2x512xf32>
    %220 = arith.addf %216, %219 : vector<2x512xf32>
    %c3 = arith.constant 3 : index
    %221 = memref.load %arg0[%c3] : memref<6xf32, #tpu.memory_space<smem>>
    %222 = vector.broadcast %221 : f32 to vector<2x512xf32>
    %223 = arith.mulf %220, %222 : vector<2x512xf32>
    %c0_202 = arith.constant 0 : index
    %c0_203 = arith.constant 0 : index
    %224 = vector.load %arg11[%c0_202, %c0_203] : memref<1x512xf32, #tpu.memory_space<vmem>>, vector<1x512xf32>
    %225 = vector.broadcast %224 : vector<1x512xf32> to vector<2x512xf32>
    %226 = arith.addf %223, %225 : vector<2x512xf32>
    %cst_204 = arith.constant 0.000000e+00 : f32
    %227 = vector.broadcast %cst_204 : f32 to vector<2x512xf32>
    %228 = arith.cmpf oge, %226, %227 : vector<2x512xf32>
    %cst_205 = arith.constant 2.000000e-02 : f32
    %229 = vector.broadcast %cst_205 : f32 to vector<2x512xf32>
    %230 = arith.mulf %229, %226 : vector<2x512xf32>
    %231 = arith.select %228, %226, %230 : vector<2x512xi1>, vector<2x512xf32>
    %232 = arith.truncf %231 : vector<2x512xf32> to vector<2x512xbf16>
    %c0_206 = arith.constant 0 : index
    %c0_207 = arith.constant 0 : index
    %233 = vector.load %arg12[%c0_206, %c0_207] : memref<512x256xbf16, #tpu.memory_space<vmem>>, vector<512x256xbf16>
    %cst_208 = arith.constant dense<0.000000e+00> : vector<2x256xf32>
    %234 = tpu.matmul %232, %233, %cst_208 {dimension_numbers = #tpu.dot_dimension_numbers<[1], [0], [0], [1], [0, 0, 1, 1], [], []>} : vector<2x512xbf16>, vector<512x256xbf16>, vector<2x256xf32> -> vector<2x256xf32>
    %c4_209 = arith.constant 4 : index
    %235 = memref.load %arg0[%c4_209] : memref<6xf32, #tpu.memory_space<smem>>
    %236 = vector.broadcast %235 : f32 to vector<2x256xf32>
    %237 = arith.mulf %234, %236 : vector<2x256xf32>
    %c0_210 = arith.constant 0 : index
    %c0_211 = arith.constant 0 : index
    %238 = vector.load %arg13[%c0_210, %c0_211] : memref<1x256xf32, #tpu.memory_space<vmem>>, vector<1x256xf32>
    %239 = vector.broadcast %238 : vector<1x256xf32> to vector<2x256xf32>
    %240 = arith.addf %237, %239 : vector<2x256xf32>
    %cst_212 = arith.constant 0.000000e+00 : f32
    %241 = vector.broadcast %cst_212 : f32 to vector<2x256xf32>
    %242 = arith.cmpf oge, %240, %241 : vector<2x256xf32>
    %cst_213 = arith.constant 2.000000e-02 : f32
    %243 = vector.broadcast %cst_213 : f32 to vector<2x256xf32>
    %244 = arith.mulf %243, %240 : vector<2x256xf32>
    %245 = arith.select %242, %240, %244 : vector<2x256xi1>, vector<2x256xf32>
    %246 = arith.truncf %245 : vector<2x256xf32> to vector<2x256xbf16>
    %c0_214 = arith.constant 0 : index
    %c0_215 = arith.constant 0 : index
    %247 = vector.load %arg14[%c0_214, %c0_215] : memref<256x1xbf16, #tpu.memory_space<vmem>>, vector<256x1xbf16>
    %cst_216 = arith.constant dense<0.000000e+00> : vector<2x1xf32>
    %248 = tpu.matmul %246, %247, %cst_216 {dimension_numbers = #tpu.dot_dimension_numbers<[1], [0], [0], [1], [0, 0, 1, 1], [], []>} : vector<2x256xbf16>, vector<256x1xbf16>, vector<2x1xf32> -> vector<2x1xf32>
    %c5 = arith.constant 5 : index
    %249 = memref.load %arg0[%c5] : memref<6xf32, #tpu.memory_space<smem>>
    %250 = vector.broadcast %249 : f32 to vector<2x1xf32>
    %251 = arith.mulf %248, %250 : vector<2x1xf32>
    %c0_217 = arith.constant 0 : index
    %c0_218 = arith.constant 0 : index
    %252 = vector.load %arg15[%c0_217, %c0_218] : memref<1x1xf32, #tpu.memory_space<vmem>>, vector<1x1xf32>
    %253 = vector.broadcast %252 : vector<1x1xf32> to vector<2x1xf32>
    %254 = arith.addf %251, %253 : vector<2x1xf32>
    %cst_219 = arith.constant 9.99999996E-13 : f32
    %255 = vector.broadcast %cst_219 : f32 to vector<2x1xf32>
    %256 = arith.addf %254, %255 : vector<2x1xf32>
    %c0_220 = arith.constant 0 : index
    %c0_221 = arith.constant 0 : index
    %257 = vector.load %arg16[%c0_220, %c0_221] : memref<2x1xf32, #tpu.memory_space<vmem>>, vector<2x1xf32>
    tpu.vector_store %arg16[%c0_220, %c0_221], %256 {strides = array<i32>} : memref<2x1xf32, #tpu.memory_space<vmem>>, vector<2x1xf32>,
    return
  }
}

</mosaic_0001>

<bundles_post_ra>
// kernel: discriminator_forward.5
= control target key start
LH: loop header
LB: loop body
LE: loop exit
PB: predicated region body
PF: predicated region fallthrough
CT: control target
= control target key end

     0   :  { %vm325_vm0 = vcmask 1044480   ;;  %vm326_vm1 = vcmask 1045504   ;;  %v1729_v0 = vmov 0.0   ;;  %v1730_v2 = vmov 65535   ;;  %s2154_s2 = inlined_call_operand.vmem [shape: bf16[27,128], index: 2, kind: input, shape index: {}]   ;;  %s2155_s1 = inlined_call_operand.vmem [shape: bf16[464,27], index: 1, kind: input, shape index: {}]   ;;  %s2156_s0 = inlined_call_operand.<no memory space> [shape: f32[1], index: 0, kind: input, shape index: {}]   ;;  %s2157_s3 = inlined_call_operand.vmem [shape: f32[1,128], index: 3, kind: input, shape index: {}]   ;;  %s2158_s4 = inlined_call_operand.vmem [shape: bf16[464,128], index: 4, kind: output, shape index: {}]  }
   0x1   :  { %1571 = vmatprep.subr.bf16.mxu0 %v1729_v0  ;;  %v1698_v1 = vld [vmem:[%s2154_s2] sm:$0xff]   ;;  %1691 = vmatprep.subr.bf16.mxu1 %v1729_v0  ;;  %v327_v3 = vsel %vm325_vm0, 4294967295, %v1730_v2  ;;  %v1699_v4 = vld [vmem:[%s2154_s2 + $0x8] sm:$0x3f]   ;;  %vm1731_vm2 = vmmov 0   ;;  %v1701_v8 = vld [vmem:[%s2155_s1 + $0x78] sm:$0xff]   ;;  %v1944_v36 = vstv %s2156_s0 }
   0x2   :  { %1572 = vmatpush3.bf16.msra.mxu0 %v1698_v1  ;;  %1693 = vmatpush3.bf16.msra.mxu1 %v1698_v1  ;;  %v328_v5 = vsel %vm326_vm1, %v327_v3, 0  ;;  %v1700_v7 = vld [vmem:[%s2155_s1] sm:$0xff]   ;;  %vm237_vm3 = vcmask 220160   ;;  %v1702_v9 = vld [vmem:[%s2155_s1 + $0x8] sm:$0xff]   ;;  %v1704_v11 = vld [vmem:[%s2155_s1 + $0x10] sm:$0xff]  }
   0x3   :  { %1573 = vmatprep.subr.bf16.mxu0 %v1729_v0  ;;  %v330_v6 = vand.u32 %v1699_v4, %v328_v5  ;;  %1575 = vmatprep.mubr.msk.bf16.mxu0 %vm1731_vm2, %v1729_v0  ;;  %v1703_v10 = vld [vmem:[%s2155_s1 + $0x80] sm:$0xff]   ;;  %v1705_v12 = vld [vmem:[%s2155_s1 + $0x88] sm:$0xff]   ;;  %v1706_v13 = vld [vmem:[%s2155_s1 + $0x18] sm:$0xff]  }
   0x4   :  { %1692 = vmatprep.subr.bf16.mxu1 %v1729_v0  ;;  %1635 = vmatprep.mubr.msk.bf16.mxu1 %vm1731_vm2, %v1729_v0  ;;  %v1707_v14 = vld [vmem:[%s2155_s1 + $0x90] sm:$0xff]   ;;  %v1708_v15 = vld [vmem:[%s2155_s1 + $0x20] sm:$0xff]   ;;  %v1709_v16 = vld [vmem:[%s2155_s1 + $0x98] sm:$0xff]  }
   0x5   :  { %v1710_v17 = vld [vmem:[%s2155_s1 + $0x28] sm:$0xff]   ;;  %v1711_v18 = vld [vmem:[%s2155_s1 + $0xa0] sm:$0xff]   ;;  %v1712_v19 = vld [vmem:[%s2155_s1 + $0x30] sm:$0xff]  }
   0x6   :  { %1574 = vmatpush3.bf16.msra.mxu0 %v330_v6  ;;  %1694 = vmatpush3.bf16.msra.mxu1 %v330_v6  ;;  %v1713_v20 = vld [vmem:[%s2155_s1 + $0xa8] sm:$0xff]   ;;  %v1714_v21 = vld [vmem:[%s2155_s1 + $0x38] sm:$0xff]   ;;  %v1715_v22 = vld [vmem:[%s2155_s1 + $0xb0] sm:$0xff]  }
   0x7   :  { %v1716_v23 = vld [vmem:[%s2155_s1 + $0x40] sm:$0xff]   ;;  %v1717_v24 = vld [vmem:[%s2155_s1 + $0xb8] sm:$0xff]   ;;  %v1718_v25 = vld [vmem:[%s2155_s1 + $0x48] sm:$0xff]  }
   0x8   :  { %v1719_v26 = vld [vmem:[%s2155_s1 + $0xc0] sm:$0xff]   ;;  %v1720_v27 = vld [vmem:[%s2155_s1 + $0x50] sm:$0xff]   ;;  %v1721_v28 = vld [vmem:[%s2155_s1 + $0xc8] sm:$0xff]  }
   0x9   :  { %1576 = vmatmul.mubr.msk.bf16.vlgmr.msra.gmra.mrb[0].mxu0 %vm237_vm3, %v1700_v7  ;;  %1636 = vmatmul.mubr.msk.bf16.vlgmr.msra.gmra.mrb[0].mxu1 %vm237_vm3, %v1701_v8  ;;  %v1722_v29 = vld [vmem:[%s2155_s1 + $0x58] sm:$0xff]   ;;  %v1723_v30 = vld [vmem:[%s2155_s1 + $0xd0] sm:$0xff]   ;;  %v1724_v31 = vld [vmem:[%s2155_s1 + $0x60] sm:$0xff]  }
   0xa   :  { %1579 = vmatprep.mubr.msk.bf16.mxu0 %vm1731_vm2, %v1729_v0  ;;  %1639 = vmatprep.mubr.msk.bf16.mxu1 %vm1731_vm2, %v1729_v0  ;;  %v1725_v32 = vld [vmem:[%s2155_s1 + $0xd8] sm:$0xff]   ;;  %v1726_v33 = vld [vmem:[%s2155_s1 + $0x68] sm:$0xff]   ;;  %v1727_v34 = vld [vmem:[%s2155_s1 + $0xe0] sm:$0xff]  }
   0xb   :  { %v1728_v35 = vld [vmem:[%s2155_s1 + $0x70] sm:$0xff]   ;;  %v1949_v38 = vld [vmem:[%s2157_s3] ss:$0 sm:$0xff] }
  0x11   :  { %1580 = vmatmul.mubr.msk.bf16.gmra.mrb[4].mxu0 %vm237_vm3, %v1702_v9  ;;  %1640 = vmatmul.mubr.msk.bf16.gmra.mrb[4].mxu1 %vm237_vm3, %v1703_v10 }
  0x12   :  { %1583 = vmatprep.mubr.msk.bf16.mxu0 %vm1731_vm2, %v1729_v0  ;;  %1643 = vmatprep.mubr.msk.bf16.mxu1 %vm1731_vm2, %v1729_v0 }
  0x19   :  { %1584 = vmatmul.mubr.msk.bf16.gmra.mrb[8].mxu0 %vm237_vm3, %v1704_v11  ;;  %1644 = vmatmul.mubr.msk.bf16.gmra.mrb[8].mxu1 %vm237_vm3, %v1705_v12 }
  0x1a   :  { %1587 = vmatprep.mubr.msk.bf16.mxu0 %vm1731_vm2, %v1729_v0  ;;  %1647 = vmatprep.mubr.msk.bf16.mxu1 %vm1731_vm2, %v1729_v0 }
  0x21   :  { %1588 = vmatmul.mubr.msk.bf16.gmra.mrb[12].mxu0 %vm237_vm3, %v1706_v13  ;;  %1648 = vmatmul.mubr.msk.bf16.gmra.mrb[12].mxu1 %vm237_vm3, %v1707_v14 }
  0x22   :  { %1591 = vmatprep.mubr.msk.bf16.mxu0 %vm1731_vm2, %v1729_v0  ;;  %1651 = vmatprep.mubr.msk.bf16.mxu1 %vm1731_vm2, %v1729_v0 }
  0x29   :  { %1592 = vmatmul.mubr.msk.bf16.gmra.mrb[16].mxu0 %vm237_vm3, %v1708_v15  ;;  %1652 = vmatmul.mubr.msk.bf16.gmra.mrb[16].mxu1 %vm237_vm3, %v1709_v16 }
  0x2a   :  { %1595 = vmatprep.mubr.msk.bf16.mxu0 %vm1731_vm2, %v1729_v0  ;;  %1655 = vmatprep.mubr.msk.bf16.mxu1 %vm1731_vm2, %v1729_v0 }
  0x31   :  { %1596 = vmatmul.mubr.msk.bf16.gmra.mrb[20].mxu0 %vm237_vm3, %v1710_v17  ;;  %1656 = vmatmul.mubr.msk.bf16.gmra.mrb[20].mxu1 %vm237_vm3, %v1711_v18 }
  0x32   :  { %1599 = vmatprep.mubr.msk.bf16.mxu0 %vm1731_vm2, %v1729_v0  ;;  %1659 = vmatprep.mubr.msk.bf16.mxu1 %vm1731_vm2, %v1729_v0 }
  0x39   :  { %1600 = vmatmul.mubr.msk.bf16.gmra.mrb[24].mxu0 %vm237_vm3, %v1712_v19  ;;  %1660 = vmatmul.mubr.msk.bf16.gmra.mrb[24].mxu1 %vm237_vm3, %v1713_v20 }
  0x3a   :  { %1603 = vmatprep.mubr.msk.bf16.mxu0 %vm1731_vm2, %v1729_v0  ;;  %1663 = vmatprep.mubr.msk.bf16.mxu1 %vm1731_vm2, %v1729_v0 }
  0x41   :  { %1604 = vmatmul.mubr.msk.bf16.gmra.mrb[28].mxu0 %vm237_vm3, %v1714_v21  ;;  %1664 = vmatmul.mubr.msk.bf16.gmra.mrb[28].mxu1 %vm237_vm3, %v1715_v22 }
  0x42   :  { %1607 = vmatprep.mubr.msk.bf16.mxu0 %vm1731_vm2, %v1729_v0  ;;  %1667 = vmatprep.mubr.msk.bf16.mxu1 %vm1731_vm2, %v1729_v0 }
  0x49   :  { %1608 = vmatmul.mubr.msk.bf16.gmra.mrb[32].mxu0 %vm237_vm3, %v1716_v23  ;;  %1668 = vmatmul.mubr.msk.bf16.gmra.mrb[32].mxu1 %vm237_vm3, %v1717_v24 }
  0x4a   :  { %1611 = vmatprep.mubr.msk.bf16.mxu0 %vm1731_vm2, %v1729_v0  ;;  %1671 = vmatprep.mubr.msk.bf16.mxu1 %vm1731_vm2, %v1729_v0 }
  0x51   :  { %1612 = vmatmul.mubr.msk.bf16.gmra.mrb[36].mxu0 %vm237_vm3, %v1718_v25  ;;  %1672 = vmatmul.mubr.msk.bf16.gmra.mrb[36].mxu1 %vm237_vm3, %v1719_v26 }
  0x52   :  { %1615 = vmatprep.mubr.msk.bf16.mxu0 %vm1731_vm2, %v1729_v0  ;;  %1675 = vmatprep.mubr.msk.bf16.mxu1 %vm1731_vm2, %v1729_v0 }
  0x59   :  { %1616 = vmatmul.mubr.msk.bf16.gmra.mrb[40].mxu0 %vm237_vm3, %v1720_v27  ;;  %1676 = vmatmul.mubr.msk.bf16.gmra.mrb[40].mxu1 %vm237_vm3, %v1721_v28 }
  0x5a   :  { %1619 = vmatprep.mubr.msk.bf16.mxu0 %vm1731_vm2, %v1729_v0  ;;  %1679 = vmatprep.mubr.msk.bf16.mxu1 %vm1731_vm2, %v1729_v0 }
  0x61   :  { %1620 = vmatmul.mubr.msk.bf16.gmra.mrb[44].mxu0 %vm237_vm3, %v1722_v29  ;;  %1680 = vmatmul.mubr.msk.bf16.gmra.mrb[44].mxu1 %vm237_vm3, %v1723_v30 }
  0x62   :  { %1623 = vmatprep.mubr.msk.bf16.mxu0 %vm1731_vm2, %v1729_v0  ;;  %1683 = vmatprep.mubr.msk.bf16.mxu1 %vm1731_vm2, %v1729_v0 }
  0x69   :  { %1624 = vmatmul.mubr.msk.bf16.gmra.mrb[48].mxu0 %vm237_vm3, %v1724_v31  ;;  %1684 = vmatmul.mubr.msk.bf16.gmra.mrb[48].mxu1 %vm237_vm3, %v1725_v32 }
  0x6a   :  { %1627 = vmatprep.mubr.msk.bf16.mxu0 %vm1731_vm2, %v1729_v0  ;;  %1687 = vmatprep.mubr.msk.bf16.mxu1 %vm1731_vm2, %v1729_v0 }
  0x71   :  { %1628 = vmatmul.mubr.msk.bf16.gmra.mrb[52].mxu0 %vm237_vm3, %v1726_v33  ;;  %1688 = vmatmul.mubr.msk.bf16.gmra.mrb[52].mxu1 %vm237_vm3, %v1727_v34 }
  0x72   :  { %1631 = vmatprep.mubr.msk.bf16.mxu0 %vm1731_vm2, %v1729_v0 }
  0x79   :  { %1632 = vmatmul.mubr.msk.bf16.gmra.mrb[56].mxu0 %vm237_vm3, %v1728_v35 }
  0xdc   :  { %v366_v37 = vpop.f32.mrb[0].mxu0  ;;  %v486_v39 = vpop.f32.mrb[0].mxu1 }
  0xdd   :  { %v599_v40 = vmul.f32 %v1944_v36, %v366_v37  ;;  %v1577_v41 = vpop.f32.mrb[1].mxu0  ;;  %v629_v42 = vmul.f32 %v1944_v36, %v486_v39  ;;  %v1637_v43 = vpop.f32.mrb[1].mxu1 }
  0xde   :  { %v369_v44 = vpop.f32.mrb[2].mxu0  ;;  %v489_v45 = vpop.f32.mrb[2].mxu1 }
  0xdf   :  { %v664_v46 = vadd.f32 %v1949_v38, %v599_v40  ;;  %v600_v47 = vmul.f32 %v1944_v36, %v369_v44  ;;  %v1578_v48 = vpop.f32.mrb[3].mxu0  ;;  %v694_v49 = vadd.f32 %v1949_v38, %v629_v42  ;;  %v630_v50 = vmul.f32 %v1944_v36, %v489_v45  ;;  %v1638_v51 = vpop.f32.mrb[3].mxu1 }
  0xe1   :  { %v780_v52 = vmul.f32 0.02, %v664_v46  ;;  %v665_v53 = vadd.f32 %v1949_v38, %v600_v47  ;;  %vm752_vm4 = vcmp.ge.f32.partialorder %v694_v49, 0.0  ;;  %vm722_vm5 = vcmp.ge.f32.partialorder %v664_v46, 0.0 }
  0xe2   :  { %v810_v54 = vmul.f32 0.02, %v694_v49  ;;  %v695_v55 = vadd.f32 %v1949_v38, %v630_v50 }
  0xe3   :  { %vm723_vm6 = vcmp.ge.f32.partialorder %v665_v53, 0.0  ;;  %v781_v56 = vmul.f32 0.02, %v665_v53  ;;  %v838_v61 = vsel %vm722_vm5, %v664_v46, %v780_v52 }
  0xe4   :  { %v868_v57 = vsel %vm752_vm4, %v694_v49, %v810_v54  ;;  %vm753_vm7 = vcmp.ge.f32.partialorder %v695_v55, 0.0  ;;  %v811_v58 = vmul.f32 0.02, %v695_v55  ;;  %v374_v59 = vpop.f32.mrb[4].mxu0  ;;  %v494_v60 = vpop.f32.mrb[4].mxu1 }
  0xe5   :  { %v839_v62 = vsel %vm723_vm6, %v665_v53, %v781_v56  ;;  %v601_v63 = vmul.f32 %v1944_v36, %v374_v59  ;;  %v1581_v0 = vpop.f32.mrb[5].mxu0  ;;  %v631_v1 = vmul.f32 %v1944_v36, %v494_v60  ;;  %v1641_v2 = vpop.f32.mrb[5].mxu1 }
  0xe6   :  { %v1370_v3 = vpack.c.bf16 %v839_v62, %v838_v61  ;;  %v869_v4 = vsel %vm753_vm7, %v695_v55, %v811_v58  ;;  %v377_v5 = vpop.f32.mrb[6].mxu0  ;;  %v497_v6 = vpop.f32.mrb[6].mxu1 }
  0xe7   :  { %v1445_v7 = vpack.c.bf16 %v869_v4, %v868_v57  ;;  %v666_v8 = vadd.f32 %v1949_v38, %v601_v63  ;;  %v602_v9 = vmul.f32 %v1944_v36, %v377_v5  ;;  %v1582_v10 = vpop.f32.mrb[7].mxu0  ;;  %v696_v11 = vadd.f32 %v1949_v38, %v631_v1  ;;  %v1642_v12 = vpop.f32.mrb[7].mxu1 }
  0xe8   :  { %1371 = vst [vmem:[%s2158_s4] sm:$0xff] %v1370_v3   ;;  %v632_v13 = vmul.f32 %v1944_v36, %v497_v6 }
  0xe9   :  { %1526 = vst [vmem:[%s2158_s4 + $0x78] sm:$0xff] %v1445_v7   ;;  %v782_v14 = vmul.f32 0.02, %v666_v8  ;;  %v667_v15 = vadd.f32 %v1949_v38, %v602_v9  ;;  %vm754_vm8 = vcmp.ge.f32.partialorder %v696_v11, 0.0  ;;  %vm724_vm9 = vcmp.ge.f32.partialorder %v666_v8, 0.0 }
  0xea   :  { %v812_v16 = vmul.f32 0.02, %v696_v11  ;;  %v697_v17 = vadd.f32 %v1949_v38, %v632_v13 }
  0xeb   :  { %vm725_vm10 = vcmp.ge.f32.partialorder %v667_v15, 0.0  ;;  %v783_v18 = vmul.f32 0.02, %v667_v15  ;;  %v840_v23 = vsel %vm724_vm9, %v666_v8, %v782_v14 }
  0xec   :  { %v870_v19 = vsel %vm754_vm8, %v696_v11, %v812_v16  ;;  %vm755_vm11 = vcmp.ge.f32.partialorder %v697_v17, 0.0  ;;  %v813_v20 = vmul.f32 0.02, %v697_v17  ;;  %v382_v21 = vpop.f32.mrb[8].mxu0  ;;  %v502_v22 = vpop.f32.mrb[8].mxu1 }
  0xed   :  { %v841_v24 = vsel %vm725_vm10, %v667_v15, %v783_v18  ;;  %v603_v25 = vmul.f32 %v1944_v36, %v382_v21  ;;  %v1585_v26 = vpop.f32.mrb[9].mxu0  ;;  %v633_v27 = vmul.f32 %v1944_v36, %v502_v22  ;;  %v1645_v28 = vpop.f32.mrb[9].mxu1 }
  0xee   :  { %v1375_v29 = vpack.c.bf16 %v841_v24, %v840_v23  ;;  %v871_v30 = vsel %vm755_vm11, %v697_v17, %v813_v20  ;;  %v385_v31 = vpop.f32.mrb[10].mxu0  ;;  %v505_v32 = vpop.f32.mrb[10].mxu1 }
  0xef   :  { %v1450_v33 = vpack.c.bf16 %v871_v30, %v870_v19  ;;  %v668_v34 = vadd.f32 %v1949_v38, %v603_v25  ;;  %v604_v35 = vmul.f32 %v1944_v36, %v385_v31  ;;  %v1586_v37 = vpop.f32.mrb[11].mxu0  ;;  %v698_v39 = vadd.f32 %v1949_v38, %v633_v27  ;;  %v1646_v40 = vpop.f32.mrb[11].mxu1 }
  0xf0   :  { %1512 = vst [vmem:[%s2158_s4 + $0x8] sm:$0xff] %v1375_v29   ;;  %v634_v41 = vmul.f32 %v1944_v36, %v505_v32 }
  0xf1   :  { %1527 = vst [vmem:[%s2158_s4 + $0x80] sm:$0xff] %v1450_v33   ;;  %v784_v42 = vmul.f32 0.02, %v668_v34  ;;  %v669_v43 = vadd.f32 %v1949_v38, %v604_v35  ;;  %vm756_vm12 = vcmp.ge.f32.partialorder %v698_v39, 0.0  ;;  %vm726_vm13 = vcmp.ge.f32.partialorder %v668_v34, 0.0 }
  0xf2   :  { %v814_v44 = vmul.f32 0.02, %v698_v39  ;;  %v699_v45 = vadd.f32 %v1949_v38, %v634_v41 }
  0xf3   :  { %vm727_vm14 = vcmp.ge.f32.partialorder %v669_v43, 0.0  ;;  %v785_v46 = vmul.f32 0.02, %v669_v43  ;;  %v842_v51 = vsel %vm726_vm13, %v668_v34, %v784_v42 }
  0xf4   :  { %v872_v47 = vsel %vm756_vm12, %v698_v39, %v814_v44  ;;  %vm757_vm15 = vcmp.ge.f32.partialorder %v699_v45, 0.0  ;;  %v815_v48 = vmul.f32 0.02, %v699_v45  ;;  %v390_v49 = vpop.f32.mrb[12].mxu0  ;;  %v510_v50 = vpop.f32.mrb[12].mxu1 }
  0xf5   :  { %v843_v52 = vsel %vm727_vm14, %v669_v43, %v785_v46  ;;  %v605_v53 = vmul.f32 %v1944_v36, %v390_v49  ;;  %v1589_v54 = vpop.f32.mrb[13].mxu0  ;;  %v635_v55 = vmul.f32 %v1944_v36, %v510_v50  ;;  %v1649_v56 = vpop.f32.mrb[13].mxu1 }
  0xf6   :  { %v1380_v57 = vpack.c.bf16 %v843_v52, %v842_v51  ;;  %v873_v58 = vsel %vm757_vm15, %v699_v45, %v815_v48  ;;  %v393_v59 = vpop.f32.mrb[14].mxu0  ;;  %v513_v60 = vpop.f32.mrb[14].mxu1 }
  0xf7   :  { %v1455_v61 = vpack.c.bf16 %v873_v58, %v872_v47  ;;  %v670_v62 = vadd.f32 %v1949_v38, %v605_v53  ;;  %v606_v63 = vmul.f32 %v1944_v36, %v393_v59  ;;  %v1590_v0 = vpop.f32.mrb[15].mxu0  ;;  %v700_v1 = vadd.f32 %v1949_v38, %v635_v55  ;;  %v1650_v2 = vpop.f32.mrb[15].mxu1 }
  0xf8   :  { %1513 = vst [vmem:[%s2158_s4 + $0x10] sm:$0xff] %v1380_v57   ;;  %v636_v3 = vmul.f32 %v1944_v36, %v513_v60 }
  0xf9   :  { %1528 = vst [vmem:[%s2158_s4 + $0x88] sm:$0xff] %v1455_v61   ;;  %v786_v4 = vmul.f32 0.02, %v670_v62  ;;  %v671_v5 = vadd.f32 %v1949_v38, %v606_v63  ;;  %vm758_vm0 = vcmp.ge.f32.partialorder %v700_v1, 0.0  ;;  %vm728_vm1 = vcmp.ge.f32.partialorder %v670_v62, 0.0 }
  0xfa   :  { %v816_v6 = vmul.f32 0.02, %v700_v1  ;;  %v701_v7 = vadd.f32 %v1949_v38, %v636_v3 }
  0xfb   :  { %vm729_vm2 = vcmp.ge.f32.partialorder %v671_v5, 0.0  ;;  %v787_v8 = vmul.f32 0.02, %v671_v5  ;;  %v844_v13 = vsel %vm728_vm1, %v670_v62, %v786_v4 }
  0xfc   :  { %v874_v9 = vsel %vm758_vm0, %v700_v1, %v816_v6  ;;  %vm759_vm3 = vcmp.ge.f32.partialorder %v701_v7, 0.0  ;;  %v817_v10 = vmul.f32 0.02, %v701_v7  ;;  %v398_v11 = vpop.f32.mrb[16].mxu0  ;;  %v518_v12 = vpop.f32.mrb[16].mxu1 }
  0xfd   :  { %v845_v14 = vsel %vm729_vm2, %v671_v5, %v787_v8  ;;  %v607_v15 = vmul.f32 %v1944_v36, %v398_v11  ;;  %v1593_v16 = vpop.f32.mrb[17].mxu0  ;;  %v637_v17 = vmul.f32 %v1944_v36, %v518_v12  ;;  %v1653_v18 = vpop.f32.mrb[17].mxu1 }
  0xfe   :  { %v1385_v19 = vpack.c.bf16 %v845_v14, %v844_v13  ;;  %v875_v20 = vsel %vm759_vm3, %v701_v7, %v817_v10  ;;  %v401_v21 = vpop.f32.mrb[18].mxu0  ;;  %v521_v22 = vpop.f32.mrb[18].mxu1 }
  0xff   :  { %v1460_v23 = vpack.c.bf16 %v875_v20, %v874_v9  ;;  %v672_v24 = vadd.f32 %v1949_v38, %v607_v15  ;;  %v608_v25 = vmul.f32 %v1944_v36, %v401_v21  ;;  %v1594_v26 = vpop.f32.mrb[19].mxu0  ;;  %v702_v27 = vadd.f32 %v1949_v38, %v637_v17  ;;  %v1654_v28 = vpop.f32.mrb[19].mxu1 }
 0x100   :  { %1514 = vst [vmem:[%s2158_s4 + $0x18] sm:$0xff] %v1385_v19   ;;  %v638_v29 = vmul.f32 %v1944_v36, %v521_v22 }
 0x101   :  { %1529 = vst [vmem:[%s2158_s4 + $0x90] sm:$0xff] %v1460_v23   ;;  %v788_v30 = vmul.f32 0.02, %v672_v24  ;;  %v673_v31 = vadd.f32 %v1949_v38, %v608_v25  ;;  %vm760_vm4 = vcmp.ge.f32.partialorder %v702_v27, 0.0  ;;  %vm730_vm5 = vcmp.ge.f32.partialorder %v672_v24, 0.0 }
 0x102   :  { %v818_v32 = vmul.f32 0.02, %v702_v27  ;;  %v703_v33 = vadd.f32 %v1949_v38, %v638_v29 }
 0x103   :  { %vm731_vm6 = vcmp.ge.f32.partialorder %v673_v31, 0.0  ;;  %v789_v34 = vmul.f32 0.02, %v673_v31  ;;  %v846_v41 = vsel %vm730_vm5, %v672_v24, %v788_v30 }
 0x104   :  { %v876_v35 = vsel %vm760_vm4, %v702_v27, %v818_v32  ;;  %vm761_vm7 = vcmp.ge.f32.partialorder %v703_v33, 0.0  ;;  %v819_v37 = vmul.f32 0.02, %v703_v33  ;;  %v406_v39 = vpop.f32.mrb[20].mxu0  ;;  %v526_v40 = vpop.f32.mrb[20].mxu1 }
 0x105   :  { %v847_v42 = vsel %vm731_vm6, %v673_v31, %v789_v34  ;;  %v609_v43 = vmul.f32 %v1944_v36, %v406_v39  ;;  %v1597_v44 = vpop.f32.mrb[21].mxu0  ;;  %v639_v45 = vmul.f32 %v1944_v36, %v526_v40  ;;  %v1657_v46 = vpop.f32.mrb[21].mxu1 }
 0x106   :  { %v1390_v47 = vpack.c.bf16 %v847_v42, %v846_v41  ;;  %v877_v48 = vsel %vm761_vm7, %v703_v33, %v819_v37  ;;  %v409_v49 = vpop.f32.mrb[22].mxu0  ;;  %v529_v50 = vpop.f32.mrb[22].mxu1 }
 0x107   :  { %v1465_v51 = vpack.c.bf16 %v877_v48, %v876_v35  ;;  %v674_v52 = vadd.f32 %v1949_v38, %v609_v43  ;;  %v610_v53 = vmul.f32 %v1944_v36, %v409_v49  ;;  %v1598_v54 = vpop.f32.mrb[23].mxu0  ;;  %v704_v55 = vadd.f32 %v1949_v38, %v639_v45  ;;  %v1658_v56 = vpop.f32.mrb[23].mxu1 }
 0x108   :  { %1515 = vst [vmem:[%s2158_s4 + $0x20] sm:$0xff] %v1390_v47   ;;  %v640_v57 = vmul.f32 %v1944_v36, %v529_v50 }
 0x109   :  { %1530 = vst [vmem:[%s2158_s4 + $0x98] sm:$0xff] %v1465_v51   ;;  %v790_v58 = vmul.f32 0.02, %v674_v52  ;;  %v675_v59 = vadd.f32 %v1949_v38, %v610_v53  ;;  %vm762_vm8 = vcmp.ge.f32.partialorder %v704_v55, 0.0  ;;  %vm732_vm9 = vcmp.ge.f32.partialorder %v674_v52, 0.0 }
 0x10a   :  { %v820_v60 = vmul.f32 0.02, %v704_v55  ;;  %v705_v61 = vadd.f32 %v1949_v38, %v640_v57 }
 0x10b   :  { %vm733_vm10 = vcmp.ge.f32.partialorder %v675_v59, 0.0  ;;  %v791_v62 = vmul.f32 0.02, %v675_v59  ;;  %v848_v3 = vsel %vm732_vm9, %v674_v52, %v790_v58 }
 0x10c   :  { %v878_v63 = vsel %vm762_vm8, %v704_v55, %v820_v60  ;;  %vm763_vm11 = vcmp.ge.f32.partialorder %v705_v61, 0.0  ;;  %v821_v0 = vmul.f32 0.02, %v705_v61  ;;  %v414_v1 = vpop.f32.mrb[24].mxu0  ;;  %v534_v2 = vpop.f32.mrb[24].mxu1 }
 0x10d   :  { %v849_v4 = vsel %vm733_vm10, %v675_v59, %v791_v62  ;;  %v611_v5 = vmul.f32 %v1944_v36, %v414_v1  ;;  %v1601_v6 = vpop.f32.mrb[25].mxu0  ;;  %v641_v7 = vmul.f32 %v1944_v36, %v534_v2  ;;  %v1661_v8 = vpop.f32.mrb[25].mxu1 }
 0x10e   :  { %v1395_v9 = vpack.c.bf16 %v849_v4, %v848_v3  ;;  %v879_v10 = vsel %vm763_vm11, %v705_v61, %v821_v0  ;;  %v417_v11 = vpop.f32.mrb[26].mxu0  ;;  %v537_v12 = vpop.f32.mrb[26].mxu1 }
 0x10f   :  { %v1470_v13 = vpack.c.bf16 %v879_v10, %v878_v63  ;;  %v676_v14 = vadd.f32 %v1949_v38, %v611_v5  ;;  %v612_v15 = vmul.f32 %v1944_v36, %v417_v11  ;;  %v1602_v16 = vpop.f32.mrb[27].mxu0  ;;  %v706_v17 = vadd.f32 %v1949_v38, %v641_v7  ;;  %v1662_v18 = vpop.f32.mrb[27].mxu1 }
 0x110   :  { %1516 = vst [vmem:[%s2158_s4 + $0x28] sm:$0xff] %v1395_v9   ;;  %v642_v19 = vmul.f32 %v1944_v36, %v537_v12 }
 0x111   :  { %1531 = vst [vmem:[%s2158_s4 + $0xa0] sm:$0xff] %v1470_v13   ;;  %v792_v20 = vmul.f32 0.02, %v676_v14  ;;  %v677_v21 = vadd.f32 %v1949_v38, %v612_v15  ;;  %vm764_vm12 = vcmp.ge.f32.partialorder %v706_v17, 0.0  ;;  %vm734_vm13 = vcmp.ge.f32.partialorder %v676_v14, 0.0 }
 0x112   :  { %v822_v22 = vmul.f32 0.02, %v706_v17  ;;  %v707_v23 = vadd.f32 %v1949_v38, %v642_v19 }
 0x113   :  { %vm735_vm14 = vcmp.ge.f32.partialorder %v677_v21, 0.0  ;;  %v793_v24 = vmul.f32 0.02, %v677_v21  ;;  %v850_v29 = vsel %vm734_vm13, %v676_v14, %v792_v20 }
 0x114   :  { %v880_v25 = vsel %vm764_vm12, %v706_v17, %v822_v22  ;;  %vm765_vm15 = vcmp.ge.f32.partialorder %v707_v23, 0.0  ;;  %v823_v26 = vmul.f32 0.02, %v707_v23  ;;  %v422_v27 = vpop.f32.mrb[28].mxu0  ;;  %v542_v28 = vpop.f32.mrb[28].mxu1 }
 0x115   :  { %v851_v30 = vsel %vm735_vm14, %v677_v21, %v793_v24  ;;  %v613_v31 = vmul.f32 %v1944_v36, %v422_v27  ;;  %v1605_v32 = vpop.f32.mrb[29].mxu0  ;;  %v643_v33 = vmul.f32 %v1944_v36, %v542_v28  ;;  %v1665_v34 = vpop.f32.mrb[29].mxu1 }
 0x116   :  { %v1400_v35 = vpack.c.bf16 %v851_v30, %v850_v29  ;;  %v881_v37 = vsel %vm765_vm15, %v707_v23, %v823_v26  ;;  %v425_v39 = vpop.f32.mrb[30].mxu0  ;;  %v545_v40 = vpop.f32.mrb[30].mxu1 }
 0x117   :  { %v1475_v41 = vpack.c.bf16 %v881_v37, %v880_v25  ;;  %v678_v42 = vadd.f32 %v1949_v38, %v613_v31  ;;  %v614_v43 = vmul.f32 %v1944_v36, %v425_v39  ;;  %v1606_v44 = vpop.f32.mrb[31].mxu0  ;;  %v708_v45 = vadd.f32 %v1949_v38, %v643_v33  ;;  %v1666_v46 = vpop.f32.mrb[31].mxu1 }
 0x118   :  { %1517 = vst [vmem:[%s2158_s4 + $0x30] sm:$0xff] %v1400_v35   ;;  %v644_v47 = vmul.f32 %v1944_v36, %v545_v40 }
 0x119   :  { %1532 = vst [vmem:[%s2158_s4 + $0xa8] sm:$0xff] %v1475_v41   ;;  %v794_v48 = vmul.f32 0.02, %v678_v42  ;;  %v679_v49 = vadd.f32 %v1949_v38, %v614_v43  ;;  %vm766_vm0 = vcmp.ge.f32.partialorder %v708_v45, 0.0  ;;  %vm736_vm1 = vcmp.ge.f32.partialorder %v678_v42, 0.0 }
 0x11a   :  { %v824_v50 = vmul.f32 0.02, %v708_v45  ;;  %v709_v51 = vadd.f32 %v1949_v38, %v644_v47 }
 0x11b   :  { %vm737_vm2 = vcmp.ge.f32.partialorder %v679_v49, 0.0  ;;  %v795_v52 = vmul.f32 0.02, %v679_v49  ;;  %v852_v57 = vsel %vm736_vm1, %v678_v42, %v794_v48 }
 0x11c   :  { %v882_v53 = vsel %vm766_vm0, %v708_v45, %v824_v50  ;;  %vm767_vm3 = vcmp.ge.f32.partialorder %v709_v51, 0.0  ;;  %v825_v54 = vmul.f32 0.02, %v709_v51  ;;  %v430_v55 = vpop.f32.mrb[32].mxu0  ;;  %v550_v56 = vpop.f32.mrb[32].mxu1 }
 0x11d   :  { %v853_v58 = vsel %vm737_vm2, %v679_v49, %v795_v52  ;;  %v615_v59 = vmul.f32 %v1944_v36, %v430_v55  ;;  %v1609_v60 = vpop.f32.mrb[33].mxu0  ;;  %v645_v61 = vmul.f32 %v1944_v36, %v550_v56  ;;  %v1669_v62 = vpop.f32.mrb[33].mxu1 }
 0x11e   :  { %v1405_v63 = vpack.c.bf16 %v853_v58, %v852_v57  ;;  %v883_v0 = vsel %vm767_vm3, %v709_v51, %v825_v54  ;;  %v433_v1 = vpop.f32.mrb[34].mxu0  ;;  %v553_v2 = vpop.f32.mrb[34].mxu1 }
 0x11f   :  { %v1480_v3 = vpack.c.bf16 %v883_v0, %v882_v53  ;;  %v680_v4 = vadd.f32 %v1949_v38, %v615_v59  ;;  %v616_v5 = vmul.f32 %v1944_v36, %v433_v1  ;;  %v1610_v6 = vpop.f32.mrb[35].mxu0  ;;  %v710_v7 = vadd.f32 %v1949_v38, %v645_v61  ;;  %v1670_v8 = vpop.f32.mrb[35].mxu1 }
 0x120   :  { %1518 = vst [vmem:[%s2158_s4 + $0x38] sm:$0xff] %v1405_v63   ;;  %v646_v9 = vmul.f32 %v1944_v36, %v553_v2 }
 0x121   :  { %1533 = vst [vmem:[%s2158_s4 + $0xb0] sm:$0xff] %v1480_v3   ;;  %v796_v10 = vmul.f32 0.02, %v680_v4  ;;  %v681_v11 = vadd.f32 %v1949_v38, %v616_v5  ;;  %vm768_vm4 = vcmp.ge.f32.partialorder %v710_v7, 0.0  ;;  %vm738_vm5 = vcmp.ge.f32.partialorder %v680_v4, 0.0 }
 0x122   :  { %v826_v12 = vmul.f32 0.02, %v710_v7  ;;  %v711_v13 = vadd.f32 %v1949_v38, %v646_v9 }
 0x123   :  { %vm739_vm6 = vcmp.ge.f32.partialorder %v681_v11, 0.0  ;;  %v797_v14 = vmul.f32 0.02, %v681_v11  ;;  %v854_v19 = vsel %vm738_vm5, %v680_v4, %v796_v10 }
 0x124   :  { %v884_v15 = vsel %vm768_vm4, %v710_v7, %v826_v12  ;;  %vm769_vm7 = vcmp.ge.f32.partialorder %v711_v13, 0.0  ;;  %v827_v16 = vmul.f32 0.02, %v711_v13  ;;  %v438_v17 = vpop.f32.mrb[36].mxu0  ;;  %v558_v18 = vpop.f32.mrb[36].mxu1 }
 0x125   :  { %v855_v20 = vsel %vm739_vm6, %v681_v11, %v797_v14  ;;  %v617_v21 = vmul.f32 %v1944_v36, %v438_v17  ;;  %v1613_v22 = vpop.f32.mrb[37].mxu0  ;;  %v647_v23 = vmul.f32 %v1944_v36, %v558_v18  ;;  %v1673_v24 = vpop.f32.mrb[37].mxu1 }
 0x126   :  { %v1410_v25 = vpack.c.bf16 %v855_v20, %v854_v19  ;;  %v885_v26 = vsel %vm769_vm7, %v711_v13, %v827_v16  ;;  %v441_v27 = vpop.f32.mrb[38].mxu0  ;;  %v561_v28 = vpop.f32.mrb[38].mxu1 }
 0x127   :  { %v1485_v29 = vpack.c.bf16 %v885_v26, %v884_v15  ;;  %v682_v30 = vadd.f32 %v1949_v38, %v617_v21  ;;  %v618_v31 = vmul.f32 %v1944_v36, %v441_v27  ;;  %v1614_v32 = vpop.f32.mrb[39].mxu0  ;;  %v712_v33 = vadd.f32 %v1949_v38, %v647_v23  ;;  %v1674_v34 = vpop.f32.mrb[39].mxu1 }
 0x128   :  { %1519 = vst [vmem:[%s2158_s4 + $0x40] sm:$0xff] %v1410_v25   ;;  %v648_v35 = vmul.f32 %v1944_v36, %v561_v28 }
 0x129   :  { %1534 = vst [vmem:[%s2158_s4 + $0xb8] sm:$0xff] %v1485_v29   ;;  %v798_v37 = vmul.f32 0.02, %v682_v30  ;;  %v683_v39 = vadd.f32 %v1949_v38, %v618_v31  ;;  %vm770_vm8 = vcmp.ge.f32.partialorder %v712_v33, 0.0  ;;  %vm740_vm9 = vcmp.ge.f32.partialorder %v682_v30, 0.0 }
 0x12a   :  { %v828_v40 = vmul.f32 0.02, %v712_v33  ;;  %v713_v41 = vadd.f32 %v1949_v38, %v648_v35 }
 0x12b   :  { %vm741_vm10 = vcmp.ge.f32.partialorder %v683_v39, 0.0  ;;  %v799_v42 = vmul.f32 0.02, %v683_v39  ;;  %v856_v47 = vsel %vm740_vm9, %v682_v30, %v798_v37 }
 0x12c   :  { %v886_v43 = vsel %vm770_vm8, %v712_v33, %v828_v40  ;;  %vm771_vm11 = vcmp.ge.f32.partialorder %v713_v41, 0.0  ;;  %v829_v44 = vmul.f32 0.02, %v713_v41  ;;  %v446_v45 = vpop.f32.mrb[40].mxu0  ;;  %v566_v46 = vpop.f32.mrb[40].mxu1 }
 0x12d   :  { %v857_v48 = vsel %vm741_vm10, %v683_v39, %v799_v42  ;;  %v619_v49 = vmul.f32 %v1944_v36, %v446_v45  ;;  %v1617_v50 = vpop.f32.mrb[41].mxu0  ;;  %v649_v51 = vmul.f32 %v1944_v36, %v566_v46  ;;  %v1677_v52 = vpop.f32.mrb[41].mxu1 }
 0x12e   :  { %v1415_v53 = vpack.c.bf16 %v857_v48, %v856_v47  ;;  %v887_v54 = vsel %vm771_vm11, %v713_v41, %v829_v44  ;;  %v449_v55 = vpop.f32.mrb[42].mxu0  ;;  %v569_v56 = vpop.f32.mrb[42].mxu1 }
 0x12f   :  { %v1490_v57 = vpack.c.bf16 %v887_v54, %v886_v43  ;;  %v684_v58 = vadd.f32 %v1949_v38, %v619_v49  ;;  %v620_v59 = vmul.f32 %v1944_v36, %v449_v55  ;;  %v1618_v60 = vpop.f32.mrb[43].mxu0  ;;  %v714_v61 = vadd.f32 %v1949_v38, %v649_v51  ;;  %v1678_v62 = vpop.f32.mrb[43].mxu1 }
 0x130   :  { %1520 = vst [vmem:[%s2158_s4 + $0x48] sm:$0xff] %v1415_v53   ;;  %v650_v63 = vmul.f32 %v1944_v36, %v569_v56 }
 0x131   :  { %1535 = vst [vmem:[%s2158_s4 + $0xc0] sm:$0xff] %v1490_v57   ;;  %v800_v0 = vmul.f32 0.02, %v684_v58  ;;  %v685_v1 = vadd.f32 %v1949_v38, %v620_v59  ;;  %vm772_vm12 = vcmp.ge.f32.partialorder %v714_v61, 0.0  ;;  %vm742_vm13 = vcmp.ge.f32.partialorder %v684_v58, 0.0 }
 0x132   :  { %v830_v2 = vmul.f32 0.02, %v714_v61  ;;  %v715_v3 = vadd.f32 %v1949_v38, %v650_v63 }
 0x133   :  { %vm743_vm14 = vcmp.ge.f32.partialorder %v685_v1, 0.0  ;;  %v801_v4 = vmul.f32 0.02, %v685_v1  ;;  %v858_v9 = vsel %vm742_vm13, %v684_v58, %v800_v0 }
 0x134   :  { %v888_v5 = vsel %vm772_vm12, %v714_v61, %v830_v2  ;;  %vm773_vm15 = vcmp.ge.f32.partialorder %v715_v3, 0.0  ;;  %v831_v6 = vmul.f32 0.02, %v715_v3  ;;  %v454_v7 = vpop.f32.mrb[44].mxu0  ;;  %v574_v8 = vpop.f32.mrb[44].mxu1 }
 0x135   :  { %v859_v10 = vsel %vm743_vm14, %v685_v1, %v801_v4  ;;  %v621_v11 = vmul.f32 %v1944_v36, %v454_v7  ;;  %v1621_v12 = vpop.f32.mrb[45].mxu0  ;;  %v651_v13 = vmul.f32 %v1944_v36, %v574_v8  ;;  %v1681_v14 = vpop.f32.mrb[45].mxu1 }
 0x136   :  { %v1420_v15 = vpack.c.bf16 %v859_v10, %v858_v9  ;;  %v889_v16 = vsel %vm773_vm15, %v715_v3, %v831_v6  ;;  %v457_v17 = vpop.f32.mrb[46].mxu0  ;;  %v577_v18 = vpop.f32.mrb[46].mxu1 }
 0x137   :  { %v1495_v19 = vpack.c.bf16 %v889_v16, %v888_v5  ;;  %v686_v20 = vadd.f32 %v1949_v38, %v621_v11  ;;  %v622_v21 = vmul.f32 %v1944_v36, %v457_v17  ;;  %v1622_v22 = vpop.f32.mrb[47].mxu0  ;;  %v716_v23 = vadd.f32 %v1949_v38, %v651_v13  ;;  %v1682_v24 = vpop.f32.mrb[47].mxu1 }
 0x138   :  { %1521 = vst [vmem:[%s2158_s4 + $0x50] sm:$0xff] %v1420_v15   ;;  %v652_v25 = vmul.f32 %v1944_v36, %v577_v18 }
 0x139   :  { %1536 = vst [vmem:[%s2158_s4 + $0xc8] sm:$0xff] %v1495_v19   ;;  %v802_v26 = vmul.f32 0.02, %v686_v20  ;;  %v687_v27 = vadd.f32 %v1949_v38, %v622_v21  ;;  %vm774_vm0 = vcmp.ge.f32.partialorder %v716_v23, 0.0  ;;  %vm744_vm1 = vcmp.ge.f32.partialorder %v686_v20, 0.0 }
 0x13a   :  { %v832_v28 = vmul.f32 0.02, %v716_v23  ;;  %v717_v29 = vadd.f32 %v1949_v38, %v652_v25 }
 0x13b   :  { %vm745_vm2 = vcmp.ge.f32.partialorder %v687_v27, 0.0  ;;  %v803_v30 = vmul.f32 0.02, %v687_v27  ;;  %v860_v35 = vsel %vm744_vm1, %v686_v20, %v802_v26 }
 0x13c   :  { %v890_v31 = vsel %vm774_vm0, %v716_v23, %v832_v28  ;;  %vm775_vm3 = vcmp.ge.f32.partialorder %v717_v29, 0.0  ;;  %v833_v32 = vmul.f32 0.02, %v717_v29  ;;  %v462_v33 = vpop.f32.mrb[48].mxu0  ;;  %v582_v34 = vpop.f32.mrb[48].mxu1 }
 0x13d   :  { %v861_v37 = vsel %vm745_vm2, %v687_v27, %v803_v30  ;;  %v623_v39 = vmul.f32 %v1944_v36, %v462_v33  ;;  %v1625_v40 = vpop.f32.mrb[49].mxu0  ;;  %v653_v41 = vmul.f32 %v1944_v36, %v582_v34  ;;  %v1685_v42 = vpop.f32.mrb[49].mxu1 }
 0x13e   :  { %v1425_v43 = vpack.c.bf16 %v861_v37, %v860_v35  ;;  %v891_v44 = vsel %vm775_vm3, %v717_v29, %v833_v32  ;;  %v465_v45 = vpop.f32.mrb[50].mxu0  ;;  %v585_v46 = vpop.f32.mrb[50].mxu1 }
 0x13f   :  { %v1500_v47 = vpack.c.bf16 %v891_v44, %v890_v31  ;;  %v688_v48 = vadd.f32 %v1949_v38, %v623_v39  ;;  %v624_v49 = vmul.f32 %v1944_v36, %v465_v45  ;;  %v1626_v50 = vpop.f32.mrb[51].mxu0  ;;  %v718_v51 = vadd.f32 %v1949_v38, %v653_v41  ;;  %v1686_v52 = vpop.f32.mrb[51].mxu1 }
 0x140   :  { %1522 = vst [vmem:[%s2158_s4 + $0x58] sm:$0xff] %v1425_v43   ;;  %v654_v53 = vmul.f32 %v1944_v36, %v585_v46 }
 0x141   :  { %1537 = vst [vmem:[%s2158_s4 + $0xd0] sm:$0xff] %v1500_v47   ;;  %v804_v54 = vmul.f32 0.02, %v688_v48  ;;  %v689_v55 = vadd.f32 %v1949_v38, %v624_v49  ;;  %vm776_vm4 = vcmp.ge.f32.partialorder %v718_v51, 0.0  ;;  %vm746_vm5 = vcmp.ge.f32.partialorder %v688_v48, 0.0 }
 0x142   :  { %v834_v56 = vmul.f32 0.02, %v718_v51  ;;  %v719_v57 = vadd.f32 %v1949_v38, %v654_v53 }
 0x143   :  { %vm747_vm6 = vcmp.ge.f32.partialorder %v689_v55, 0.0  ;;  %v805_v58 = vmul.f32 0.02, %v689_v55  ;;  %v862_v63 = vsel %vm746_vm5, %v688_v48, %v804_v54 }
 0x144   :  { %v892_v59 = vsel %vm776_vm4, %v718_v51, %v834_v56  ;;  %vm777_vm7 = vcmp.ge.f32.partialorder %v719_v57, 0.0  ;;  %v835_v60 = vmul.f32 0.02, %v719_v57  ;;  %v470_v61 = vpop.f32.mrb[52].mxu0  ;;  %v590_v62 = vpop.f32.mrb[52].mxu1 }
 0x145   :  { %v863_v0 = vsel %vm747_vm6, %v689_v55, %v805_v58  ;;  %v625_v1 = vmul.f32 %v1944_v36, %v470_v61  ;;  %v1629_v2 = vpop.f32.mrb[53].mxu0  ;;  %v655_v3 = vmul.f32 %v1944_v36, %v590_v62  ;;  %v1689_v4 = vpop.f32.mrb[53].mxu1 }
 0x146   :  { %v1430_v5 = vpack.c.bf16 %v863_v0, %v862_v63  ;;  %v893_v6 = vsel %vm777_vm7, %v719_v57, %v835_v60  ;;  %v473_v7 = vpop.f32.mrb[54].mxu0  ;;  %v593_v8 = vpop.f32.mrb[54].mxu1 }
 0x147   :  { %v1505_v9 = vpack.c.bf16 %v893_v6, %v892_v59  ;;  %v690_v10 = vadd.f32 %v1949_v38, %v625_v1  ;;  %v626_v11 = vmul.f32 %v1944_v36, %v473_v7  ;;  %v1630_v12 = vpop.f32.mrb[55].mxu0  ;;  %v720_v13 = vadd.f32 %v1949_v38, %v655_v3  ;;  %v1690_v14 = vpop.f32.mrb[55].mxu1 }
 0x148   :  { %1523 = vst [vmem:[%s2158_s4 + $0x60] sm:$0xff] %v1430_v5   ;;  %v656_v15 = vmul.f32 %v1944_v36, %v593_v8 }
 0x149   :  { %1538 = vst [vmem:[%s2158_s4 + $0xd8] sm:$0xff] %v1505_v9   ;;  %v806_v16 = vmul.f32 0.02, %v690_v10  ;;  %v691_v17 = vadd.f32 %v1949_v38, %v626_v11  ;;  %vm778_vm8 = vcmp.ge.f32.partialorder %v720_v13, 0.0  ;;  %vm748_vm9 = vcmp.ge.f32.partialorder %v690_v10, 0.0 }
 0x14a   :  { %v836_v18 = vmul.f32 0.02, %v720_v13  ;;  %v721_v19 = vadd.f32 %v1949_v38, %v656_v15 }
 0x14b   :  { %vm749_vm10 = vcmp.ge.f32.partialorder %v691_v17, 0.0  ;;  %v807_v20 = vmul.f32 0.02, %v691_v17  ;;  %v864_v24 = vsel %vm748_vm9, %v690_v10, %v806_v16 }
 0x14c   :  { %v894_v21 = vsel %vm778_vm8, %v720_v13, %v836_v18  ;;  %vm779_vm11 = vcmp.ge.f32.partialorder %v721_v19, 0.0  ;;  %v837_v22 = vmul.f32 0.02, %v721_v19  ;;  %v478_v23 = vpop.f32.mrb[56].mxu0 }
 0x14d   :  { %v865_v25 = vsel %vm749_vm10, %v691_v17, %v807_v20  ;;  %v627_v26 = vmul.f32 %v1944_v36, %v478_v23  ;;  %v1633_v27 = vpop.f32.mrb[57].mxu0 }
 0x14e   :  { %v1435_v28 = vpack.c.bf16 %v865_v25, %v864_v24  ;;  %v895_v29 = vsel %vm779_vm11, %v721_v19, %v837_v22  ;;  %v481_v30 = vpop.f32.mrb[58].mxu0 }
 0x14f   :  { %v1510_v31 = vpack.c.bf16 %v895_v29, %v894_v21  ;;  %v692_v32 = vadd.f32 %v1949_v38, %v627_v26  ;;  %v628_v33 = vmul.f32 %v1944_v36, %v481_v30  ;;  %v1634_v34 = vpop.f32.mrb[59].mxu0 }
 0x150   :  { %1524 = vst [vmem:[%s2158_s4 + $0x68] sm:$0xff] %v1435_v28  }
 0x151   :  { %1539 = vst [vmem:[%s2158_s4 + $0xe0] sm:$0xff] %v1510_v31   ;;  %v808_v35 = vmul.f32 0.02, %v692_v32  ;;  %v693_v37 = vadd.f32 %v1949_v38, %v628_v33  ;;  %vm750_vm12 = vcmp.ge.f32.partialorder %v692_v32, 0.0 }
 0x153   :  { %vm751_vm13 = vcmp.ge.f32.partialorder %v693_v37, 0.0  ;;  %v809_v39 = vmul.f32 0.02, %v693_v37  ;;  %v866_v40 = vsel %vm750_vm12, %v692_v32, %v808_v35 }
 0x155   :  { %v867_v41 = vsel %vm751_vm13, %v693_v37, %v809_v39 }
 0x156   :  { %v1440_v42 = vpack.c.bf16 %v867_v41, %v866_v40 }
 0x158   :  { %1525 = vst [vmem:[%s2158_s4 + $0x70] sm:$0xff] %v1440_v42  }

// kernel: discriminator_forward.6
= control target key start
LH: loop header
LB: loop body
LE: loop exit
PB: predicated region body
PF: predicated region fallthrough
CT: control target
= control target key end

     0   :  { %vm2263_vm0 = vmmov 0   ;;  %s2835_s2 = inlined_call_operand.vmem [shape: bf16[1152,128], index: 2, kind: input, shape index: {}]   ;;  %s2836_s1 = inlined_call_operand.vmem [shape: bf16[112,1152], index: 1, kind: input, shape index: {}]   ;;  %s2837_s0 = inlined_call_operand.<no memory space> [shape: f32[1], index: 0, kind: input, shape index: {}]   ;;  %s2838_s3 = inlined_call_operand.vmem [shape: f32[1,128], index: 3, kind: input, shape index: {}]   ;;  %s2839_s4 = inlined_call_operand.vmem [shape: bf16[112,128], index: 4, kind: output, shape index: {}]  }
   0x1   :  { %v2099_v0 = vld [vmem:[%s2835_s2 + $0x40] sm:$0xff]   ;;  %v2101_v2 = vld [vmem:[%s2835_s2 + $0x48] sm:$0xff]   ;;  %v2103_v4 = vld [vmem:[%s2835_s2 + $0x50] sm:$0xff]  }
   0x2   :  { %v2100_v1 = vld [vmem:[%s2835_s2] sm:$0xff]   ;;  %2081 = vmatprep.subr.bf16.mxu1 %v2099_v0  ;;  %1790 = vmatprep.subr.bf16.mxu0 %v2099_v0  ;;  %v2102_v3 = vld [vmem:[%s2835_s2 + $0x8] sm:$0xff]   ;;  %v2104_v5 = vld [vmem:[%s2835_s2 + $0x10] sm:$0xff]  }
   0x3   :  { %2089 = vmatpush3.bf16.msra.mxu1 %v2100_v1  ;;  %1791 = vmatpush3.bf16.msra.mxu0 %v2100_v1  ;;  %v2105_v6 = vld [vmem:[%s2835_s2 + $0x58] sm:$0xff]   ;;  %v2107_v8 = vld [vmem:[%s2835_s2 + $0x60] sm:$0xff]   ;;  %v2109_v10 = vld [vmem:[%s2835_s2 + $0x68] sm:$0xff]  }
   0x4   :  { %2082 = vmatprep.subr.bf16.mxu1 %v2101_v2  ;;  %1792 = vmatprep.subr.bf16.mxu0 %v2101_v2  ;;  %v2106_v7 = vld [vmem:[%s2835_s2 + $0x18] sm:$0xff]   ;;  %v2108_v9 = vld [vmem:[%s2835_s2 + $0x20] sm:$0xff]   ;;  %v2110_v12 = vld [vmem:[%s2835_s2 + $0x28] sm:$0xff]  }
   0x5   :  { %v2117_v11 = vld [vmem:[%s2836_s1 + $0x124] ss:$36 sps:$4 sm:$0xff]   ;;  %v2111_v14 = vld [vmem:[%s2835_s2 + $0x70] sm:$0xff]   ;;  %v2113_v16 = vld [vmem:[%s2835_s2 + $0x78] sm:$0xff]  }
   0x6   :  { %v2121_v13 = vld [vmem:[%s2836_s1 + $0x4] ss:$36 sps:$4 sm:$0xff]   ;;  %1051 = vmatprep.mubr.bf16.mxu1 %v2117_v11  ;;  %v2112_v15 = vld [vmem:[%s2835_s2 + $0x30] sm:$0xff]   ;;  %v2114_v17 = vld [vmem:[%s2835_s2 + $0x38] sm:$0xff]  }
   0x7   :  { %2090 = vmatpush3.bf16.msra.mxu1 %v2102_v3  ;;  %1793 = vmatpush3.bf16.msra.mxu0 %v2102_v3  ;;  %v2118_v18 = vld [vmem:[%s2835_s2 + $0xc0] sm:$0xff]   ;;  %v2125_v24 = vld [vmem:[%s2835_s2 + $0xc8] sm:$0xff]   ;;  %v2129_v30 = vld [vmem:[%s2835_s2 + $0xd0] sm:$0xff]  }
   0x8   :  { %2083 = vmatprep.subr.bf16.mxu1 %v2103_v4  ;;  %1794 = vmatprep.subr.bf16.mxu0 %v2103_v4  ;;  %v2115_v19 = vld [vmem:[%s2836_s1 + $0x120] ss:$36 sps:$4 sm:$0xff]   ;;  %v2127_v25 = vld [vmem:[%s2835_s2 + $0x148] sm:$0xff]   ;;  %v2134_v31 = vld [vmem:[%s2835_s2 + $0x150] sm:$0xff]  }
   0x9   :  { %1019 = vmatprep.mubr.bf16.mxu0 %v2121_v13  ;;  %v2119_v20 = vld [vmem:[%s2836_s1] ss:$36 sps:$4 sm:$0xff]   ;;  %v2130_v26 = vld [vmem:[%s2836_s1 + $0x4c] ss:$36 sps:$4 sm:$0xff]   ;;  %v2136_v36 = vld [vmem:[%s2835_s2 + $0xd8] sm:$0xff]  }
   0xa   :  { %v2123_v21 = vld [vmem:[%s2835_s2 + $0x140] sm:$0xff]   ;;  %v2126_v27 = vld [vmem:[%s2835_s2 + $0x88] sm:$0xff]   ;;  %v2132_v32 = vld [vmem:[%s2835_s2 + $0x90] sm:$0xff]  }
   0xb   :  { %2091 = vmatpush3.bf16.msra.mxu1 %v2104_v5  ;;  %1795 = vmatpush3.bf16.msra.mxu0 %v2104_v5  ;;  %v2122_v22 = vld [vmem:[%s2835_s2 + $0x80] sm:$0xff]   ;;  %v2137_v28 = vld [vmem:[%s2836_s1 + $0x16c] ss:$36 sps:$4 sm:$0xff]   ;;  %v2141_v37 = vld [vmem:[%s2835_s2 + $0x158] sm:$0xff]  }
   0xc   :  { %2084 = vmatprep.subr.bf16.mxu1 %v2105_v6  ;;  %1796 = vmatprep.subr.bf16.mxu0 %v2105_v6  ;;  %v2124_v23 = vld [vmem:[%s2835_s2 + $0x100] sm:$0xff]   ;;  %v2128_v29 = vld [vmem:[%s2835_s2 + $0x108] sm:$0xff]   ;;  %v2135_v35 = vld [vmem:[%s2835_s2 + $0x110] sm:$0xff]   ;;  %v2262_v6 = vmov 0.0  }
   0xd   :  { %v2133_v33 = vld [vmem:[%s2836_s1 + $0x48] ss:$36 sps:$4 sm:$0xff]   ;;  %v2139_v38 = vld [vmem:[%s2835_s2 + $0x98] sm:$0xff]   ;;  %v2143_v41 = vld [vmem:[%s2835_s2 + $0xe0] sm:$0xff]  }
   0xe   :  { %v2140_v34 = vld [vmem:[%s2836_s1 + $0x168] ss:$36 sps:$4 sm:$0xff]   ;;  %v2142_v39 = vld [vmem:[%s2835_s2 + $0x118] sm:$0xff]   ;;  %v2148_v42 = vld [vmem:[%s2835_s2 + $0x160] sm:$0xff]  }
   0xf   :  { %2092 = vmatpush3.bf16.msra.mxu1 %v2106_v7  ;;  %1797 = vmatpush3.bf16.msra.mxu0 %v2106_v7  ;;  %v2144_v40 = vld [vmem:[%s2836_s1 + $0x94] ss:$36 sps:$4 sm:$0xff]   ;;  %v2146_v44 = vld [vmem:[%s2835_s2 + $0xa0] sm:$0xff]   ;;  %v2150_v48 = vld [vmem:[%s2835_s2 + $0xe8] sm:$0xff]  }
  0x10   :  { %2085 = vmatprep.subr.bf16.mxu1 %v2107_v8  ;;  %1798 = vmatprep.subr.bf16.mxu0 %v2107_v8  ;;  %v2151_v43 = vld [vmem:[%s2836_s1 + $0x1b4] ss:$36 sps:$4 sm:$0xff]   ;;  %v2149_v46 = vld [vmem:[%s2835_s2 + $0x120] sm:$0xff]   ;;  %v2155_v49 = vld [vmem:[%s2835_s2 + $0x168] sm:$0xff]  }
  0x11   :  { %v2147_v45 = vld [vmem:[%s2836_s1 + $0x90] ss:$36 sps:$4 sm:$0xff]   ;;  %v2153_v50 = vld [vmem:[%s2835_s2 + $0xa8] sm:$0xff]   ;;  %v2158_v51 = vld [vmem:[%s2836_s1 + $0xdc] ss:$36 sps:$4 sm:$0xff]  }
  0x12   :  { %v2154_v47 = vld [vmem:[%s2836_s1 + $0x1b0] ss:$36 sps:$4 sm:$0xff]   ;;  %v2156_v52 = vld [vmem:[%s2835_s2 + $0x128] sm:$0xff]   ;;  %v2161_v56 = vld [vmem:[%s2836_s1 + $0xd8] ss:$36 sps:$4 sm:$0xff]  }
  0x13   :  { %2093 = vmatpush3.bf16.msra.mxu1 %v2108_v9  ;;  %1799 = vmatpush3.bf16.msra.mxu0 %v2108_v9  ;;  %v2157_v53 = vld [vmem:[%s2835_s2 + $0xf0] sm:$0xff]   ;;  %v2164_v58 = vld [vmem:[%s2835_s2 + $0xf8] sm:$0xff]   ;;  %v2171_v63 = vld [vmem:[%s2835_s2 + $0x1c0] sm:$0xff]  }
  0x14   :  { %2086 = vmatprep.subr.bf16.mxu1 %v2109_v10  ;;  %1800 = vmatprep.subr.bf16.mxu0 %v2109_v10  ;;  %v2162_v54 = vld [vmem:[%s2835_s2 + $0x170] sm:$0xff]   ;;  %v2166_v59 = vld [vmem:[%s2835_s2 + $0x178] sm:$0xff]   ;;  %v2167_v0 = vld [vmem:[%s2836_s1 + $0x8] ss:$36 sps:$4 sm:$0xff]  }
  0x15   :  { %v2160_v55 = vld [vmem:[%s2835_s2 + $0xb0] sm:$0xff]   ;;  %v2165_v60 = vld [vmem:[%s2835_s2 + $0xb8] sm:$0xff]   ;;  %v2175_v3 = vld [vmem:[%s2835_s2 + $0x180] sm:$0xff]  }
  0x16   :  { %v2163_v57 = vld [vmem:[%s2835_s2 + $0x130] sm:$0xff]   ;;  %v2170_v62 = vld [vmem:[%s2835_s2 + $0x138] sm:$0xff]   ;;  %v2176_v4 = vld [vmem:[%s2835_s2 + $0x200] sm:$0xff]  }
  0x17   :  { %2094 = vmatpush3.bf16.msra.mxu1 %v2110_v12  ;;  %1801 = vmatpush3.bf16.msra.mxu0 %v2110_v12  ;;  %v2169_v61 = vld [vmem:[%s2836_s1 + $0xc] ss:$36 sps:$4 sm:$0xff]   ;;  %v2174_v2 = vld [vmem:[%s2836_s1 + $0x14] ss:$36 sps:$4 sm:$0xff]   ;;  %v2182_v9 = vld [vmem:[%s2836_s1 + $0x5c] ss:$36 sps:$4 sm:$0xff]  }
  0x18   :  { %2087 = vmatprep.subr.bf16.mxu1 %v2111_v14  ;;  %1802 = vmatprep.subr.bf16.mxu0 %v2111_v14  ;;  %v2172_v1 = vld [vmem:[%s2836_s1 + $0x10] ss:$36 sps:$4 sm:$0xff]   ;;  %v2179_v7 = vld [vmem:[%s2835_s2 + $0x1c8] sm:$0xff]   ;;  %v2184_v13 = vld [vmem:[%s2836_s1 + $0x58] ss:$36 sps:$4 sm:$0xff]  }
  0x19   :  { %v2177_v5 = vld [vmem:[%s2836_s1 + $0x54] ss:$36 sps:$4 sm:$0xff]   ;;  %v2181_v8 = vld [vmem:[%s2835_s2 + $0x188] sm:$0xff]   ;;  %v2187_v14 = vld [vmem:[%s2836_s1 + $0x9c] ss:$36 sps:$4 sm:$0xff]  }
  0x1a   :  { %v2180_v10 = vld [vmem:[%s2836_s1 + $0x50] ss:$36 sps:$4 sm:$0xff]   ;;  %v2185_v11 = vld [vmem:[%s2835_s2 + $0x208] sm:$0xff]  }
  0x1b   :  { %2095 = vmatpush3.bf16.msra.mxu1 %v2112_v15  ;;  %1803 = vmatpush3.bf16.msra.mxu0 %v2112_v15  ;;  %v2186_v12 = vld [vmem:[%s2835_s2 + $0x1d0] sm:$0xff]  }
  0x1c   :  { %2088 = vmatprep.subr.bf16.mxu1 %v2113_v16  ;;  %1804 = vmatprep.subr.bf16.mxu0 %v2113_v16  ;;  %v2189_v15 = vld [vmem:[%s2835_s2 + $0x190] sm:$0xff]   ;;  %v2191_v16 = vld [vmem:[%s2836_s1 + $0xa4] ss:$36 sps:$4 sm:$0xff]  }
  0x1f   :  { %2096 = vmatpush3.bf16.msra.mxu1 %v2114_v17  ;;  %1805 = vmatpush3.bf16.msra.mxu0 %v2114_v17  ;;  %v2194_v17 = vld [vmem:[%s2835_s2 + $0x210] sm:$0xff]  }
  0x20   :  { %1848 = vmatprep.subr.bf16.mxu1 %v2118_v18  ;;  %1906 = vmatprep.subr.bf16.mxu0 %v2123_v21  ;;  %v2195_v18 = vld [vmem:[%s2835_s2 + $0x1d8] sm:$0xff]   ;;  %v2193_v21 = vld [vmem:[%s2836_s1 + $0xa0] ss:$36 sps:$4 sm:$0xff]  }
  0x22   :  { %1052 = vmatmul.mubr.bf16.vlgmr.msra.gmra.mrb[0].mxu1 %v2115_v19  ;;  %1020 = vmatmul.mubr.bf16.vlgmr.msra.gmra.mrb[0].mxu0 %v2119_v20  ;;  %v2196_v19 = vld [vmem:[%s2835_s2 + $0x198] sm:$0xff]  }
  0x23   :  { %1849 = vmatpush3.bf16.msra.mxu1 %v2122_v22  ;;  %1907 = vmatpush3.bf16.msra.mxu0 %v2124_v23  ;;  %v2190_v20 = vld [vmem:[%s2836_s1 + $0x98] ss:$36 sps:$4 sm:$0xff]   ;;  %v2197_v22 = vld [vmem:[%s2836_s1 + $0xe4] ss:$36 sps:$4 sm:$0xff]   ;;  %v2200_v23 = vld [vmem:[%s2836_s1 + $0xec] ss:$36 sps:$4 sm:$0xff]  }
  0x24   :  { %1850 = vmatprep.subr.bf16.mxu1 %v2125_v24  ;;  %1908 = vmatprep.subr.bf16.mxu0 %v2127_v25  ;;  %v2203_v24 = vld [vmem:[%s2835_s2 + $0x218] sm:$0xff]   ;;  %v2204_v25 = vld [vmem:[%s2835_s2 + $0x1e0] sm:$0xff]  }
  0x25   :  { %1027 = vmatprep.mubr.bf16.mxu0 %v2130_v26  ;;  %1059 = vmatprep.mubr.bf16.mxu1 %v2137_v28  ;;  %v2205_v26 = vld [vmem:[%s2835_s2 + $0x1a0] sm:$0xff]   ;;  %v2202_v28 = vld [vmem:[%s2836_s1 + $0xe8] ss:$36 sps:$4 sm:$0xff]  }
  0x27   :  { %1851 = vmatpush3.bf16.msra.mxu1 %v2126_v27  ;;  %1909 = vmatpush3.bf16.msra.mxu0 %v2128_v29  ;;  %v2199_v27 = vld [vmem:[%s2836_s1 + $0xe0] ss:$36 sps:$4 sm:$0xff]   ;;  %v2206_v29 = vld [vmem:[%s2836_s1 + $0x12c] ss:$36 sps:$4 sm:$0xff]  }
  0x28   :  { %1852 = vmatprep.subr.bf16.mxu1 %v2129_v30  ;;  %1910 = vmatprep.subr.bf16.mxu0 %v2134_v31  ;;  %v2209_v30 = vld [vmem:[%s2836_s1 + $0x134] ss:$36 sps:$4 sm:$0xff]   ;;  %v2212_v31 = vld [vmem:[%s2835_s2 + $0x220] sm:$0xff]  }
  0x2a   :  { %1028 = vmatmul.mubr.bf16.gmra.mrb[4].mxu0 %v2133_v33  ;;  %1060 = vmatmul.mubr.bf16.gmra.mrb[4].mxu1 %v2140_v34  ;;  %v2214_v33 = vld [vmem:[%s2835_s2 + $0x1a8] sm:$0xff]  }
  0x2b   :  { %1853 = vmatpush3.bf16.msra.mxu1 %v2132_v32  ;;  %1911 = vmatpush3.bf16.msra.mxu0 %v2135_v35  ;;  %v2213_v32 = vld [vmem:[%s2835_s2 + $0x1e8] sm:$0xff]  }
  0x2c   :  { %1854 = vmatprep.subr.bf16.mxu1 %v2136_v36  ;;  %1912 = vmatprep.subr.bf16.mxu0 %v2141_v37  ;;  %v2220_v34 = vld [vmem:[%s2835_s2 + $0x228] sm:$0xff]   ;;  %v2211_v36 = vld [vmem:[%s2836_s1 + $0x130] ss:$36 sps:$4 sm:$0xff]  }
  0x2d   :  { %1035 = vmatprep.mubr.bf16.mxu0 %v2144_v40  ;;  %1067 = vmatprep.mubr.bf16.mxu1 %v2151_v43  ;;  %v2208_v35 = vld [vmem:[%s2836_s1 + $0x128] ss:$36 sps:$4 sm:$0xff]   ;;  %v2222_v37 = vld [vmem:[%s2835_s2 + $0x1f0] sm:$0xff]   ;;  %v2218_v40 = vld [vmem:[%s2836_s1 + $0x17c] ss:$36 sps:$4 sm:$0xff]  }
  0x2e   :  { %v2232_v43 = vld [vmem:[%s2835_s2 + $0x1b8] sm:$0xff]  }
  0x2f   :  { %1855 = vmatpush3.bf16.msra.mxu1 %v2139_v38  ;;  %1913 = vmatpush3.bf16.msra.mxu0 %v2142_v39  ;;  %v2223_v38 = vld [vmem:[%s2835_s2 + $0x1b0] sm:$0xff]  }
  0x30   :  { %1856 = vmatprep.subr.bf16.mxu1 %v2143_v41  ;;  %1914 = vmatprep.subr.bf16.mxu0 %v2148_v42  ;;  %v2215_v39 = vld [vmem:[%s2836_s1 + $0x174] ss:$36 sps:$4 sm:$0xff]  }
  0x31   :  { %v2227_v41 = vld [vmem:[%s2835_s2 + $0x230] sm:$0xff]   ;;  %v2230_v42 = vld [vmem:[%s2835_s2 + $0x1f8] sm:$0xff]  }
  0x32   :  { %1036 = vmatmul.mubr.bf16.gmra.mrb[8].mxu0 %v2147_v45  ;;  %1068 = vmatmul.mubr.bf16.gmra.mrb[8].mxu1 %v2154_v47  ;;  %v2236_v45 = vld [vmem:[%s2835_s2 + $0x238] sm:$0xff]  }
  0x33   :  { %1857 = vmatpush3.bf16.msra.mxu1 %v2146_v44  ;;  %1915 = vmatpush3.bf16.msra.mxu0 %v2149_v46  ;;  %v2217_v44 = vld [vmem:[%s2836_s1 + $0x170] ss:$36 sps:$4 sm:$0xff]   ;;  %v2221_v46 = vld [vmem:[%s2836_s1 + $0x178] ss:$36 sps:$4 sm:$0xff]  }
  0x34   :  { %1858 = vmatprep.subr.bf16.mxu1 %v2150_v48  ;;  %1916 = vmatprep.subr.bf16.mxu0 %v2155_v49  ;;  %v2224_v47 = vld [vmem:[%s2836_s1 + $0x1bc] ss:$36 sps:$4 sm:$0xff]   ;;  %v2228_v48 = vld [vmem:[%s2836_s1 + $0x1c4] ss:$36 sps:$4 sm:$0xff]  }
  0x35   :  { %1043 = vmatprep.mubr.bf16.mxu0 %v2158_v51  ;;  %1108 = vmatprep.mubr.bf16.mxu1 %v2169_v61  ;;  %v2226_v49 = vld [vmem:[%s2836_s1 + $0x1b8] ss:$36 sps:$4 sm:$0xff]   ;;  %v2248_v61 = vld [vmem:[%s2836_s1 + $0xf0] ss:$36 sps:$4 sm:$0xff]  }
  0x36   :  { %v2235_v51 = vld [vmem:[%s2836_s1 + $0x1c] ss:$36 sps:$4 sm:$0xff]  }
  0x37   :  { %1859 = vmatpush3.bf16.msra.mxu1 %v2153_v50  ;;  %1917 = vmatpush3.bf16.msra.mxu0 %v2156_v52  ;;  %v2231_v50 = vld [vmem:[%s2836_s1 + $0x1c0] ss:$36 sps:$4 sm:$0xff]   ;;  %v2233_v52 = vld [vmem:[%s2836_s1 + $0x18] ss:$36 sps:$4 sm:$0xff]  }
  0x38   :  { %1860 = vmatprep.subr.bf16.mxu1 %v2157_v53  ;;  %1918 = vmatprep.subr.bf16.mxu0 %v2162_v54  ;;  %v2237_v53 = vld [vmem:[%s2836_s1 + $0x20] ss:$36 sps:$4 sm:$0xff]  }
  0x39   :  { %v2238_v54 = vld [vmem:[%s2836_s1 + $0x64] ss:$36 sps:$4 sm:$0xff]  }
  0x3a   :  { %1044 = vmatmul.mubr.bf16.gmra.mrb[12].mxu0 %v2161_v56  ;;  %v2241_v56 = vld [vmem:[%s2836_s1 + $0x68] ss:$36 sps:$4 sm:$0xff]  }
  0x3b   :  { %1861 = vmatpush3.bf16.msra.mxu1 %v2160_v55  ;;  %1919 = vmatpush3.bf16.msra.mxu0 %v2163_v57  ;;  %v2240_v55 = vld [vmem:[%s2836_s1 + $0x60] ss:$36 sps:$4 sm:$0xff]   ;;  %v2242_v57 = vld [vmem:[%s2836_s1 + $0xac] ss:$36 sps:$4 sm:$0xff]  }
  0x3c   :  { %1862 = vmatprep.subr.bf16.mxu1 %v2164_v58  ;;  %1920 = vmatprep.subr.bf16.mxu0 %v2166_v59  ;;  %v2244_v58 = vld [vmem:[%s2836_s1 + $0xa8] ss:$36 sps:$4 sm:$0xff]   ;;  %v2245_v59 = vld [vmem:[%s2836_s1 + $0xb0] ss:$36 sps:$4 sm:$0xff]  }
  0x3d   :  { %1197 = vmatprep.mubr.bf16.mxu0 %v2174_v2  ;;  %v2254_v2 = vld [vmem:[%s2836_s1 + $0x184] ss:$36 sps:$4 sm:$0xff]  }
  0x3f   :  { %1863 = vmatpush3.bf16.msra.mxu1 %v2165_v60  ;;  %1921 = vmatpush3.bf16.msra.mxu0 %v2170_v62  ;;  %v2246_v60 = vld [vmem:[%s2836_s1 + $0xf4] ss:$36 sps:$4 sm:$0xff]  }
  0x40   :  { %1964 = vmatprep.subr.bf16.mxu1 %v2171_v63  ;;  %2037 = vmatprep.subr.bf16.mxu0 %v2262_v6  ;;  %v2249_v62 = vld [vmem:[%s2836_s1 + $0xf8] ss:$36 sps:$4 sm:$0xff]  }
  0x41   :  { %v2250_v63 = vld [vmem:[%s2836_s1 + $0x13c] ss:$36 sps:$4 sm:$0xff]  }
  0x42   :  { %1109 = vmatmul.mubr.bf16.vlgmr.msra.gmra.mrb[12].mxu1 %v2167_v0  ;;  %1198 = vmatmul.mubr.bf16.vlgmr.msra.gmra.mrb[16].mxu0 %v2172_v1  ;;  %v2252_v0 = vld [vmem:[%s2836_s1 + $0x138] ss:$36 sps:$4 sm:$0xff]   ;;  %v2253_v1 = vld [vmem:[%s2836_s1 + $0x140] ss:$36 sps:$4 sm:$0xff]  }
  0x43   :  { %1965 = vmatpush3.bf16.msra.mxu1 %v2175_v3  ;;  %2038 = vmatpush3.bf16.msra.mxu0 %v2176_v4  ;;  %v2256_v3 = vld [vmem:[%s2836_s1 + $0x180] ss:$36 sps:$4 sm:$0xff]   ;;  %v2257_v4 = vld [vmem:[%s2836_s1 + $0x188] ss:$36 sps:$4 sm:$0xff]  }
  0x44   :  { %1116 = vmatprep.mubr.bf16.mxu1 %v2177_v5  ;;  %1966 = vmatprep.subr.bf16.mxu1 %v2179_v7  ;;  %v2258_v5 = vld [vmem:[%s2836_s1 + $0x1cc] ss:$36 sps:$4 sm:$0xff]  }
  0x45   :  { %1205 = vmatprep.mubr.bf16.mxu0 %v2182_v9  ;;  %2039 = vmatprep.subr.bf16.mxu0 %v2262_v6  ;;  %v2260_v7 = vld [vmem:[%s2836_s1 + $0x1c8] ss:$36 sps:$4 sm:$0xff]  }
  0x47   :  { %1967 = vmatpush3.bf16.msra.mxu1 %v2181_v8  ;;  %2040 = vmatpush3.bf16.msra.mxu0 %v2185_v11  ;;  %v2261_v8 = vld [vmem:[%s2836_s1 + $0x1d0] ss:$36 sps:$4 sm:$0xff]  }
  0x48   :  { %1968 = vmatprep.subr.bf16.mxu1 %v2186_v12  ;;  %2041 = vmatprep.subr.bf16.mxu0 %v2262_v6 }
  0x4a   :  { %1117 = vmatmul.mubr.bf16.gmra.mrb[16].mxu1 %v2180_v10  ;;  %1206 = vmatmul.mubr.bf16.gmra.mrb[20].mxu0 %v2184_v13 }
  0x4b   :  { %1124 = vmatprep.mubr.bf16.mxu1 %v2187_v14  ;;  %1969 = vmatpush3.bf16.msra.mxu1 %v2189_v15 }
  0x4c   :  { %1213 = vmatprep.mubr.bf16.mxu0 %v2191_v16  ;;  %2042 = vmatpush3.bf16.msra.mxu0 %v2194_v17 }
  0x4d   :  { %1970 = vmatprep.subr.bf16.mxu1 %v2195_v18  ;;  %2043 = vmatprep.subr.bf16.mxu0 %v2262_v6 }
  0x4f   :  { %1971 = vmatpush3.bf16.msra.mxu1 %v2196_v19 }
  0x50   :  { %2044 = vmatpush3.bf16.msra.mxu0 %v2203_v24  ;;  %1972 = vmatprep.subr.bf16.mxu1 %v2204_v25 }
  0x51   :  { %2045 = vmatprep.subr.bf16.mxu0 %v2262_v6 }
  0x52   :  { %1125 = vmatmul.mubr.bf16.gmra.mrb[20].mxu1 %v2190_v20  ;;  %1214 = vmatmul.mubr.bf16.gmra.mrb[24].mxu0 %v2193_v21 }
  0x53   :  { %1132 = vmatprep.mubr.bf16.mxu1 %v2197_v22  ;;  %1221 = vmatprep.mubr.bf16.mxu0 %v2200_v23 }
  0x54   :  { %1973 = vmatpush3.bf16.msra.mxu1 %v2205_v26  ;;  %2046 = vmatpush3.bf16.msra.mxu0 %v2212_v31 }
  0x55   :  { %1974 = vmatprep.subr.bf16.mxu1 %v2213_v32  ;;  %2047 = vmatprep.subr.bf16.mxu0 %v2262_v6 }
  0x58   :  { %1975 = vmatpush3.bf16.msra.mxu1 %v2214_v33  ;;  %2048 = vmatpush3.bf16.msra.mxu0 %v2220_v34 }
  0x59   :  { %2049 = vmatprep.subr.bf16.mxu0 %v2262_v6  ;;  %1976 = vmatprep.subr.bf16.mxu1 %v2222_v37 }
  0x5a   :  { %1133 = vmatmul.mubr.bf16.gmra.mrb[24].mxu1 %v2199_v27  ;;  %1222 = vmatmul.mubr.bf16.gmra.mrb[28].mxu0 %v2202_v28 }
  0x5b   :  { %1140 = vmatprep.mubr.bf16.mxu1 %v2206_v29  ;;  %1229 = vmatprep.mubr.bf16.mxu0 %v2209_v30 }
  0x5c   :  { %1977 = vmatpush3.bf16.msra.mxu1 %v2223_v38  ;;  %2050 = vmatpush3.bf16.msra.mxu0 %v2227_v41 }
  0x5d   :  { %1978 = vmatprep.subr.bf16.mxu1 %v2230_v42  ;;  %2051 = vmatprep.subr.bf16.mxu0 %v2262_v6 }
  0x60   :  { %1979 = vmatpush3.bf16.msra.mxu1 %v2232_v43  ;;  %2052 = vmatpush3.bf16.msra.mxu0 %v2236_v45 }
  0x62   :  { %1141 = vmatmul.mubr.bf16.gmra.mrb[28].mxu1 %v2208_v35  ;;  %1230 = vmatmul.mubr.bf16.gmra.mrb[32].mxu0 %v2211_v36 }
  0x63   :  { %1148 = vmatprep.mubr.bf16.mxu1 %v2215_v39  ;;  %1237 = vmatprep.mubr.bf16.mxu0 %v2218_v40 }
  0x6a   :  { %1149 = vmatmul.mubr.bf16.gmra.mrb[32].mxu1 %v2217_v44  ;;  %1238 = vmatmul.mubr.bf16.gmra.mrb[36].mxu0 %v2221_v46 }
  0x6b   :  { %1156 = vmatprep.mubr.bf16.mxu1 %v2224_v47  ;;  %1245 = vmatprep.mubr.bf16.mxu0 %v2228_v48 }
  0x72   :  { %1157 = vmatmul.mubr.bf16.gmra.mrb[36].mxu1 %v2226_v49  ;;  %1246 = vmatmul.mubr.bf16.gmra.mrb[40].mxu0 %v2231_v50 }
  0x73   :  { %1286 = vmatprep.mubr.bf16.mxu1 %v2235_v51  ;;  %2053 = vmatprep.mubr.msk.bf16.mxu0 %vm2263_vm0, %v2262_v6 }
  0x7a   :  { %1287 = vmatmul.mubr.bf16.vlgmr.msra.gmra.mrb[40].mxu1 %v2233_v52  ;;  %2054 = vmatmul.mubr.bf16.vlgmr.msra.gmra.mrb[44].mxu0 %v2237_v53 }
  0x7b   :  { %1294 = vmatprep.mubr.bf16.mxu1 %v2238_v54  ;;  %2057 = vmatprep.mubr.msk.bf16.mxu0 %vm2263_vm0, %v2262_v6 }
  0x82   :  { %1295 = vmatmul.mubr.bf16.gmra.mrb[44].mxu1 %v2240_v55  ;;  %2058 = vmatmul.mubr.bf16.gmra.mrb[48].mxu0 %v2241_v56 }
  0x83   :  { %1302 = vmatprep.mubr.bf16.mxu1 %v2242_v57  ;;  %2061 = vmatprep.mubr.msk.bf16.mxu0 %vm2263_vm0, %v2262_v6 }
  0x8a   :  { %1303 = vmatmul.mubr.bf16.gmra.mrb[48].mxu1 %v2244_v58  ;;  %2062 = vmatmul.mubr.bf16.gmra.mrb[52].mxu0 %v2245_v59 }
  0x8b   :  { %1310 = vmatprep.mubr.bf16.mxu1 %v2246_v60  ;;  %2065 = vmatprep.mubr.msk.bf16.mxu0 %vm2263_vm0, %v2262_v6 }
  0x92   :  { %1311 = vmatmul.mubr.bf16.gmra.mrb[52].mxu1 %v2248_v61  ;;  %2066 = vmatmul.mubr.bf16.gmra.mrb[56].mxu0 %v2249_v62 }
  0x93   :  { %1318 = vmatprep.mubr.bf16.mxu1 %v2250_v63  ;;  %2069 = vmatprep.mubr.msk.bf16.mxu0 %vm2263_vm0, %v2262_v6 }
  0x9a   :  { %1319 = vmatmul.mubr.bf16.gmra.mrb[56].mxu1 %v2252_v0  ;;  %2070 = vmatmul.mubr.bf16.gmra.mrb[60].mxu0 %v2253_v1 }
  0x9b   :  { %1326 = vmatprep.mubr.bf16.mxu1 %v2254_v2  ;;  %2073 = vmatprep.mubr.msk.bf16.mxu0 %vm2263_vm0, %v2262_v6 }
  0xa2   :  { %1327 = vmatmul.mubr.bf16.gmra.mrb[60].mxu1 %v2256_v3  ;;  %2074 = vmatmul.mubr.bf16.gmra.mrb[64].mxu0 %v2257_v4 }
  0xa3   :  { %1334 = vmatprep.mubr.bf16.mxu1 %v2258_v5  ;;  %2077 = vmatprep.mubr.msk.bf16.mxu0 %vm2263_vm0, %v2262_v6 }
  0xaa   :  { %1335 = vmatmul.mubr.bf16.gmra.mrb[64].mxu1 %v2260_v7  ;;  %2078 = vmatmul.mubr.bf16.gmra.mrb[68].mxu0 %v2261_v8 }
  0xf5   :  { %v1830_v9 = vpop.f32.mrb[0].mxu1  ;;  %v1806_v10 = vpop.f32.mrb[0].mxu0 }
  0xf6   :  { %v1831_v11 = vpop.f32.mrb[1].mxu1  ;;  %v1807_v12 = vpop.f32.mrb[1].mxu0 }
  0xf7   :  { %v2716_v13 = vadd.f32 %v1831_v11, %v1830_v9  ;;  %v1833_v14 = vpop.f32.mrb[2].mxu1  ;;  %v1808_v15 = vadd.f32 %v1807_v12, %v1806_v10  ;;  %v1809_v16 = vpop.f32.mrb[2].mxu0 }
  0xf8   :  { %v1834_v6 = vpop.f32.mrb[3].mxu1  ;;  %v1810_v17 = vpop.f32.mrb[3].mxu0 }
  0xf9   :  { %v2718_v18 = vadd.f32 %v1834_v6, %v1833_v14  ;;  %v1811_v19 = vadd.f32 %v1810_v17, %v1809_v16 }
  0xfd   :  { %v1812_v20 = vpop.f32.mrb[4].mxu0  ;;  %v1836_v21 = vpop.f32.mrb[4].mxu1 }
  0xfe   :  { %v1813_v22 = vpop.f32.mrb[5].mxu0  ;;  %v1837_v23 = vpop.f32.mrb[5].mxu1 }
  0xff   :  { %v1814_v24 = vadd.f32 %v1813_v22, %v1812_v20  ;;  %v1815_v25 = vpop.f32.mrb[6].mxu0  ;;  %v2720_v26 = vadd.f32 %v1837_v23, %v1836_v21  ;;  %v1839_v27 = vpop.f32.mrb[6].mxu1 }
 0x100   :  { %v1816_v28 = vpop.f32.mrb[7].mxu0  ;;  %v1840_v29 = vpop.f32.mrb[7].mxu1 }
 0x101   :  { %v1817_v30 = vadd.f32 %v1816_v28, %v1815_v25  ;;  %v2722_v31 = vadd.f32 %v1840_v29, %v1839_v27 }
 0x105   :  { %v1818_v32 = vpop.f32.mrb[8].mxu0  ;;  %v1842_v33 = vpop.f32.mrb[8].mxu1 }
 0x106   :  { %v1819_v34 = vpop.f32.mrb[9].mxu0  ;;  %v1843_v35 = vpop.f32.mrb[9].mxu1 }
 0x107   :  { %v1820_v36 = vadd.f32 %v1819_v34, %v1818_v32  ;;  %v1821_v37 = vpop.f32.mrb[10].mxu0  ;;  %v2724_v38 = vadd.f32 %v1843_v35, %v1842_v33  ;;  %v1845_v39 = vpop.f32.mrb[10].mxu1 }
 0x108   :  { %v1822_v40 = vpop.f32.mrb[11].mxu0  ;;  %v1846_v41 = vpop.f32.mrb[11].mxu1 }
 0x109   :  { %v1823_v42 = vadd.f32 %v1822_v40, %v1821_v37  ;;  %v2726_v43 = vadd.f32 %v1846_v41, %v1845_v39 }
 0x10d   :  { %v1824_v44 = vpop.f32.mrb[12].mxu0 }
 0x10e   :  { %v1825_v45 = vpop.f32.mrb[13].mxu0 }
 0x10f   :  { %v1826_v46 = vadd.f32 %v1825_v45, %v1824_v44  ;;  %v1827_v47 = vpop.f32.mrb[14].mxu0 }
 0x110   :  { %v1828_v48 = vpop.f32.mrb[15].mxu0 }
 0x111   :  { %v1829_v49 = vadd.f32 %v1828_v48, %v1827_v47 }
 0x115   :  { %v1864_v50 = vpop.f32.mrb[12].mxu1  ;;  %v1922_v51 = vpop.f32.mrb[16].mxu0 }
 0x116   :  { %v1865_v52 = vpop.f32.mrb[13].mxu1  ;;  %v1923_v53 = vpop.f32.mrb[17].mxu0 }
 0x117   :  { %v1866_v54 = vadd.f32 %v1865_v52, %v1864_v50  ;;  %v1867_v55 = vpop.f32.mrb[14].mxu1  ;;  %v1924_v56 = vadd.f32 %v1923_v53, %v1922_v51  ;;  %v1925_v57 = vpop.f32.mrb[18].mxu0 }
 0x118   :  { %v1868_v58 = vpop.f32.mrb[15].mxu1  ;;  %v1926_v59 = vpop.f32.mrb[19].mxu0 }
 0x119   :  { %v1111_v60 = vadd.f32 %v1866_v54, %v1808_v15  ;;  %v1869_v61 = vadd.f32 %v1868_v58, %v1867_v55  ;;  %v1927_v62 = vadd.f32 %v1926_v59, %v1925_v57 }
 0x11b   :  { %v1114_v63 = vadd.f32 %v1869_v61, %v1811_v19  ;;  %v2728_v0 = vadd.f32 %v1924_v56, %v1111_v60 }
 0x11d   :  { %v2730_v1 = vadd.f32 %v1927_v62, %v1114_v63  ;;  %v1870_v2 = vpop.f32.mrb[16].mxu1  ;;  %v1928_v3 = vpop.f32.mrb[20].mxu0 }
 0x11e   :  { %v1871_v4 = vpop.f32.mrb[17].mxu1  ;;  %v1929_v5 = vpop.f32.mrb[21].mxu0 }
 0x11f   :  { %v1872_v7 = vadd.f32 %v1871_v4, %v1870_v2  ;;  %v1873_v8 = vpop.f32.mrb[18].mxu1  ;;  %v1930_v9 = vadd.f32 %v1929_v5, %v1928_v3  ;;  %v1931_v10 = vpop.f32.mrb[22].mxu0 }
 0x120   :  { %v1874_v11 = vpop.f32.mrb[19].mxu1  ;;  %v1932_v12 = vpop.f32.mrb[23].mxu0 }
 0x121   :  { %v1119_v14 = vadd.f32 %v1872_v7, %v1814_v24  ;;  %v1875_v16 = vadd.f32 %v1874_v11, %v1873_v8  ;;  %v1933_v15 = vadd.f32 %v1932_v12, %v1931_v10 }
 0x123   :  { %v1122_v6 = vadd.f32 %v1875_v16, %v1817_v30  ;;  %v2732_v17 = vadd.f32 %v1930_v9, %v1119_v14 }
 0x125   :  { %v2734_v19 = vadd.f32 %v1933_v15, %v1122_v6  ;;  %v1876_v20 = vpop.f32.mrb[20].mxu1  ;;  %v1934_v21 = vpop.f32.mrb[24].mxu0 }
 0x126   :  { %v1877_v22 = vpop.f32.mrb[21].mxu1  ;;  %v1935_v23 = vpop.f32.mrb[25].mxu0 }
 0x127   :  { %v1878_v25 = vadd.f32 %v1877_v22, %v1876_v20  ;;  %v1879_v27 = vpop.f32.mrb[22].mxu1  ;;  %v1936_v28 = vadd.f32 %v1935_v23, %v1934_v21  ;;  %v1937_v29 = vpop.f32.mrb[26].mxu0 }
 0x128   :  { %v1880_v32 = vpop.f32.mrb[23].mxu1  ;;  %v1938_v33 = vpop.f32.mrb[27].mxu0 }
 0x129   :  { %v1127_v34 = vadd.f32 %v1878_v25, %v1820_v36  ;;  %v1881_v35 = vadd.f32 %v1880_v32, %v1879_v27  ;;  %v1939_v24 = vadd.f32 %v1938_v33, %v1937_v29 }
 0x12b   :  { %v1130_v37 = vadd.f32 %v1881_v35, %v1823_v42  ;;  %v2736_v39 = vadd.f32 %v1936_v28, %v1127_v34 }
 0x12d   :  { %v2738_v30 = vadd.f32 %v1939_v24, %v1130_v37  ;;  %v1882_v40 = vpop.f32.mrb[24].mxu1  ;;  %v1940_v41 = vpop.f32.mrb[28].mxu0 }
 0x12e   :  { %v1883_v44 = vpop.f32.mrb[25].mxu1  ;;  %v1941_v45 = vpop.f32.mrb[29].mxu0 }
 0x12f   :  { %v1884_v47 = vadd.f32 %v1883_v44, %v1882_v40  ;;  %v1885_v48 = vpop.f32.mrb[26].mxu1  ;;  %v1942_v50 = vadd.f32 %v1941_v45, %v1940_v41  ;;  %v1943_v51 = vpop.f32.mrb[30].mxu0 }
 0x130   :  { %v1886_v52 = vpop.f32.mrb[27].mxu1  ;;  %v1944_v53 = vpop.f32.mrb[31].mxu0 }
 0x131   :  { %v1135_v54 = vadd.f32 %v1884_v47, %v1826_v46  ;;  %v1887_v55 = vadd.f32 %v1886_v52, %v1885_v48  ;;  %v1945_v36 = vadd.f32 %v1944_v53, %v1943_v51 }
 0x133   :  { %v1138_v56 = vadd.f32 %v1887_v55, %v1829_v49  ;;  %v2740_v57 = vadd.f32 %v1942_v50, %v1135_v54 }
 0x135   :  { %v2742_v42 = vadd.f32 %v1945_v36, %v1138_v56  ;;  %v1888_v58 = vpop.f32.mrb[28].mxu1  ;;  %v1946_v59 = vpop.f32.mrb[32].mxu0 }
 0x136   :  { %v1889_v60 = vpop.f32.mrb[29].mxu1  ;;  %v1947_v61 = vpop.f32.mrb[33].mxu0 }
 0x137   :  { %v1890_v62 = vadd.f32 %v1889_v60, %v1888_v58  ;;  %v1891_v63 = vpop.f32.mrb[30].mxu1  ;;  %v1948_v2 = vadd.f32 %v1947_v61, %v1946_v59  ;;  %v1949_v3 = vpop.f32.mrb[34].mxu0 }
 0x138   :  { %v1892_v4 = vpop.f32.mrb[31].mxu1  ;;  %v1950_v5 = vpop.f32.mrb[35].mxu0 }
 0x139   :  { %v1143_v7 = vadd.f32 %v1890_v62, %v2716_v13  ;;  %v1893_v46 = vadd.f32 %v1892_v4, %v1891_v63  ;;  %v1951_v8 = vadd.f32 %v1950_v5, %v1949_v3 }
 0x13b   :  { %v1146_v49 = vadd.f32 %v1893_v46, %v2718_v18  ;;  %v2746_v9 = vadd.f32 %v1948_v2, %v1143_v7  ;;  %v2772_v2 = vld [vmem:[%s2838_s3] ss:$0 sm:$0xff] }
 0x13d   :  { %v2748_v10 = vadd.f32 %v1951_v8, %v1146_v49  ;;  %v1894_v11 = vpop.f32.mrb[32].mxu1  ;;  %v1952_v12 = vpop.f32.mrb[36].mxu0 }
 0x13e   :  { %v1895_v14 = vpop.f32.mrb[33].mxu1  ;;  %v1953_v16 = vpop.f32.mrb[37].mxu0 }
 0x13f   :  { %v1896_v15 = vadd.f32 %v1895_v14, %v1894_v11  ;;  %v1897_v6 = vpop.f32.mrb[34].mxu1  ;;  %v1954_v20 = vadd.f32 %v1953_v16, %v1952_v12  ;;  %v1955_v21 = vpop.f32.mrb[38].mxu0 }
 0x140   :  { %v1898_v22 = vpop.f32.mrb[35].mxu1  ;;  %v1956_v23 = vpop.f32.mrb[39].mxu0 }
 0x141   :  { %v1151_v13 = vadd.f32 %v1896_v15, %v2720_v26  ;;  %v1899_v25 = vadd.f32 %v1898_v22, %v1897_v6  ;;  %v1957_v27 = vadd.f32 %v1956_v23, %v1955_v21 }
 0x143   :  { %v1154_v18 = vadd.f32 %v1899_v25, %v2722_v31  ;;  %v2752_v28 = vadd.f32 %v1954_v20, %v1151_v13 }
 0x145   :  { %v2754_v29 = vadd.f32 %v1957_v27, %v1154_v18  ;;  %v1900_v32 = vpop.f32.mrb[36].mxu1  ;;  %v1958_v33 = vpop.f32.mrb[40].mxu0 }
 0x146   :  { %v1901_v34 = vpop.f32.mrb[37].mxu1  ;;  %v1959_v35 = vpop.f32.mrb[41].mxu0 }
 0x147   :  { %v1902_v24 = vadd.f32 %v1901_v34, %v1900_v32  ;;  %v1903_v37 = vpop.f32.mrb[38].mxu1  ;;  %v1960_v40 = vadd.f32 %v1959_v35, %v1958_v33  ;;  %v1961_v41 = vpop.f32.mrb[42].mxu0 }
 0x148   :  { %v1904_v44 = vpop.f32.mrb[39].mxu1  ;;  %v1962_v45 = vpop.f32.mrb[43].mxu0 }
 0x149   :  { %v1159_v26 = vadd.f32 %v1902_v24, %v2724_v38  ;;  %v1905_v47 = vadd.f32 %v1904_v44, %v1903_v37  ;;  %v1963_v48 = vadd.f32 %v1962_v45, %v1961_v41 }
 0x14b   :  { %v1162_v31 = vadd.f32 %v1905_v47, %v2726_v43  ;;  %v2758_v50 = vadd.f32 %v1960_v40, %v1159_v26  ;;  %v2766_v43 = vstv %s2837_s0 }
 0x14d   :  { %v2760_v51 = vadd.f32 %v1963_v48, %v1162_v31  ;;  %v1980_v52 = vpop.f32.mrb[40].mxu1  ;;  %v1377_v53 = vpop.f32.mrb[44].mxu0 }
 0x14e   :  { %v1981_v54 = vpop.f32.mrb[41].mxu1  ;;  %v2055_v55 = vpop.f32.mrb[45].mxu0 }
 0x14f   :  { %v1982_v36 = vadd.f32 %v1981_v54, %v1980_v52  ;;  %v1983_v56 = vpop.f32.mrb[42].mxu1  ;;  %v1380_v58 = vpop.f32.mrb[46].mxu0 }
 0x150   :  { %v1984_v59 = vpop.f32.mrb[43].mxu1  ;;  %v2056_v60 = vpop.f32.mrb[47].mxu0 }
 0x151   :  { %v1985_v61 = vadd.f32 %v1984_v59, %v1983_v56  ;;  %v1289_v38 = vadd.f32 %v1982_v36, %v2728_v0 }
 0x153   :  { %v1378_v62 = vadd.f32 %v1377_v53, %v1289_v38  ;;  %v1292_v63 = vadd.f32 %v1985_v61, %v2730_v1 }
 0x155   :  { %v1434_v3 = vmul.f32 %v2766_v43, %v1378_v62  ;;  %v1381_v4 = vadd.f32 %v1380_v58, %v1292_v63  ;;  %v1986_v5 = vpop.f32.mrb[44].mxu1  ;;  %v1385_v7 = vpop.f32.mrb[48].mxu0 }
 0x156   :  { %v1987_v46 = vpop.f32.mrb[45].mxu1  ;;  %v2059_v0 = vpop.f32.mrb[49].mxu0 }
 0x157   :  { %v1455_v8 = vadd.f32 %v2772_v2, %v1434_v3  ;;  %v1435_v49 = vmul.f32 %v2766_v43, %v1381_v4  ;;  %v1988_v11 = vadd.f32 %v1987_v46, %v1986_v5  ;;  %v1989_v12 = vpop.f32.mrb[46].mxu1  ;;  %v1388_v14 = vpop.f32.mrb[50].mxu0 }
 0x158   :  { %v1990_v1 = vpop.f32.mrb[47].mxu1  ;;  %v2060_v16 = vpop.f32.mrb[51].mxu0 }
 0x159   :  { %v1483_v15 = vmul.f32 0.02, %v1455_v8  ;;  %v1456_v6 = vadd.f32 %v2772_v2, %v1435_v49  ;;  %v1991_v20 = vadd.f32 %v1990_v1, %v1989_v12  ;;  %vm1469_vm1 = vcmp.ge.f32.partialorder %v1455_v8, 0.0 }
 0x15a   :  { %v1297_v21 = vadd.f32 %v1988_v11, %v2732_v17 }
 0x15b   :  { %vm1470_vm2 = vcmp.ge.f32.partialorder %v1456_v6, 0.0  ;;  %v1484_v22 = vmul.f32 0.02, %v1456_v6  ;;  %v1300_v23 = vadd.f32 %v1991_v20, %v2734_v19  ;;  %v1497_v25 = vsel %vm1469_vm1, %v1455_v8, %v1483_v15 }
 0x15c   :  { %v1386_v13 = vadd.f32 %v1385_v7, %v1297_v21 }
 0x15d   :  { %v1498_v27 = vsel %vm1470_vm2, %v1456_v6, %v1484_v22  ;;  %v1389_v18 = vadd.f32 %v1388_v14, %v1300_v23  ;;  %v1992_v32 = vpop.f32.mrb[48].mxu1  ;;  %v1393_v33 = vpop.f32.mrb[52].mxu0 }
 0x15e   :  { %v1752_v34 = vpack.c.bf16 %v1498_v27, %v1497_v25  ;;  %v1436_v35 = vmul.f32 %v2766_v43, %v1386_v13  ;;  %v1993_v24 = vpop.f32.mrb[49].mxu1  ;;  %v2063_v37 = vpop.f32.mrb[53].mxu0 }
 0x15f   :  { %v1437_v40 = vmul.f32 %v2766_v43, %v1389_v18  ;;  %v1994_v41 = vadd.f32 %v1993_v24, %v1992_v32  ;;  %v1995_v44 = vpop.f32.mrb[50].mxu1  ;;  %v1396_v17 = vpop.f32.mrb[54].mxu0 }
 0x160   :  { %1753 = vst [vmem:[%s2839_s4] sm:$0xff] %v1752_v34   ;;  %v1457_v19 = vadd.f32 %v2772_v2, %v1436_v35  ;;  %v1996_v45 = vpop.f32.mrb[51].mxu1  ;;  %v2064_v26 = vpop.f32.mrb[55].mxu0 }
 0x161   :  { %v1458_v47 = vadd.f32 %v2772_v2, %v1437_v40  ;;  %v1997_v48 = vadd.f32 %v1996_v45, %v1995_v44  ;;  %v1305_v31 = vadd.f32 %v1994_v41, %v2736_v39 }
 0x162   :  { %vm1471_vm3 = vcmp.ge.f32.partialorder %v1457_v19, 0.0  ;;  %v1485_v52 = vmul.f32 0.02, %v1457_v19 }
 0x163   :  { %vm1472_vm4 = vcmp.ge.f32.partialorder %v1458_v47, 0.0  ;;  %v1486_v53 = vmul.f32 0.02, %v1458_v47  ;;  %v1394_v54 = vadd.f32 %v1393_v33, %v1305_v31  ;;  %v1308_v55 = vadd.f32 %v1997_v48, %v2738_v30 }
 0x164   :  { %v1499_v36 = vsel %vm1471_vm3, %v1457_v19, %v1485_v52 }
 0x165   :  { %v1500_v56 = vsel %vm1472_vm4, %v1458_v47, %v1486_v53  ;;  %v1438_v58 = vmul.f32 %v2766_v43, %v1394_v54  ;;  %v1397_v59 = vadd.f32 %v1396_v17, %v1308_v55  ;;  %v1998_v60 = vpop.f32.mrb[52].mxu1  ;;  %v1401_v61 = vpop.f32.mrb[56].mxu0 }
 0x166   :  { %v1757_v38 = vpack.c.bf16 %v1500_v56, %v1499_v36  ;;  %v1999_v62 = vpop.f32.mrb[53].mxu1  ;;  %v2067_v63 = vpop.f32.mrb[57].mxu0 }
 0x167   :  { %v1459_v3 = vadd.f32 %v2772_v2, %v1438_v58  ;;  %v1439_v39 = vmul.f32 %v2766_v43, %v1397_v59  ;;  %v2000_v4 = vadd.f32 %v1999_v62, %v1998_v60  ;;  %v2001_v5 = vpop.f32.mrb[54].mxu1  ;;  %v1404_v7 = vpop.f32.mrb[58].mxu0 }
 0x168   :  { %1784 = vst [vmem:[%s2839_s4 + $0x8] sm:$0xff] %v1757_v38   ;;  %v2002_v30 = vpop.f32.mrb[55].mxu1  ;;  %v2068_v46 = vpop.f32.mrb[59].mxu0 }
 0x169   :  { %v1487_v0 = vmul.f32 0.02, %v1459_v3  ;;  %v1460_v8 = vadd.f32 %v2772_v2, %v1439_v39  ;;  %v2003_v49 = vadd.f32 %v2002_v30, %v2001_v5  ;;  %vm1473_vm5 = vcmp.ge.f32.partialorder %v1459_v3, 0.0 }
 0x16a   :  { %v1313_v11 = vadd.f32 %v2000_v4, %v2740_v57 }
 0x16b   :  { %vm1474_vm6 = vcmp.ge.f32.partialorder %v1460_v8, 0.0  ;;  %v1488_v12 = vmul.f32 0.02, %v1460_v8  ;;  %v1316_v14 = vadd.f32 %v2003_v49, %v2742_v42  ;;  %v1501_v16 = vsel %vm1473_vm5, %v1459_v3, %v1487_v0 }
 0x16c   :  { %v1402_v1 = vadd.f32 %v1401_v61, %v1313_v11 }
 0x16d   :  { %v1502_v15 = vsel %vm1474_vm6, %v1460_v8, %v1488_v12  ;;  %v1405_v6 = vadd.f32 %v1404_v7, %v1316_v14  ;;  %v2004_v20 = vpop.f32.mrb[56].mxu1  ;;  %v1409_v21 = vpop.f32.mrb[60].mxu0 }
 0x16e   :  { %v1762_v22 = vpack.c.bf16 %v1502_v15, %v1501_v16  ;;  %v1440_v23 = vmul.f32 %v2766_v43, %v1402_v1  ;;  %v2005_v13 = vpop.f32.mrb[57].mxu1  ;;  %v2071_v25 = vpop.f32.mrb[61].mxu0 }
 0x16f   :  { %v1441_v27 = vmul.f32 %v2766_v43, %v1405_v6  ;;  %v2006_v18 = vadd.f32 %v2005_v13, %v2004_v20  ;;  %v2007_v32 = vpop.f32.mrb[58].mxu1  ;;  %v1412_v57 = vpop.f32.mrb[62].mxu0 }
 0x170   :  { %1785 = vst [vmem:[%s2839_s4 + $0x10] sm:$0xff] %v1762_v22   ;;  %v1461_v42 = vadd.f32 %v2772_v2, %v1440_v23  ;;  %v2008_v33 = vpop.f32.mrb[59].mxu1  ;;  %v2072_v34 = vpop.f32.mrb[63].mxu0 }
 0x171   :  { %v1462_v35 = vadd.f32 %v2772_v2, %v1441_v27  ;;  %v2009_v24 = vadd.f32 %v2008_v33, %v2007_v32  ;;  %v1321_v37 = vadd.f32 %v2006_v18, %v2746_v9 }
 0x172   :  { %vm1475_vm7 = vcmp.ge.f32.partialorder %v1461_v42, 0.0  ;;  %v1489_v40 = vmul.f32 0.02, %v1461_v42 }
 0x173   :  { %vm1476_vm8 = vcmp.ge.f32.partialorder %v1462_v35, 0.0  ;;  %v1490_v41 = vmul.f32 0.02, %v1462_v35  ;;  %v1410_v44 = vadd.f32 %v1409_v21, %v1321_v37  ;;  %v1324_v17 = vadd.f32 %v2009_v24, %v2748_v10 }
 0x174   :  { %v1503_v19 = vsel %vm1475_vm7, %v1461_v42, %v1489_v40 }
 0x175   :  { %v1504_v45 = vsel %vm1476_vm8, %v1462_v35, %v1490_v41  ;;  %v1442_v26 = vmul.f32 %v2766_v43, %v1410_v44  ;;  %v1413_v47 = vadd.f32 %v1412_v57, %v1324_v17  ;;  %v2010_v48 = vpop.f32.mrb[60].mxu1  ;;  %v1417_v31 = vpop.f32.mrb[64].mxu0 }
 0x176   :  { %v1767_v52 = vpack.c.bf16 %v1504_v45, %v1503_v19  ;;  %v2011_v53 = vpop.f32.mrb[61].mxu1  ;;  %v2075_v54 = vpop.f32.mrb[65].mxu0 }
 0x177   :  { %v1463_v55 = vadd.f32 %v2772_v2, %v1442_v26  ;;  %v1443_v9 = vmul.f32 %v2766_v43, %v1413_v47  ;;  %v2012_v36 = vadd.f32 %v2011_v53, %v2010_v48  ;;  %v2013_v56 = vpop.f32.mrb[62].mxu1  ;;  %v1420_v58 = vpop.f32.mrb[66].mxu0 }
 0x178   :  { %1786 = vst [vmem:[%s2839_s4 + $0x18] sm:$0xff] %v1767_v52   ;;  %v2014_v10 = vpop.f32.mrb[63].mxu1  ;;  %v2076_v59 = vpop.f32.mrb[67].mxu0 }
 0x179   :  { %v1491_v60 = vmul.f32 0.02, %v1463_v55  ;;  %v1464_v61 = vadd.f32 %v2772_v2, %v1443_v9  ;;  %v2015_v38 = vadd.f32 %v2014_v10, %v2013_v56  ;;  %vm1477_vm9 = vcmp.ge.f32.partialorder %v1463_v55, 0.0 }
 0x17a   :  { %v1329_v62 = vadd.f32 %v2012_v36, %v2752_v28 }
 0x17b   :  { %vm1478_vm10 = vcmp.ge.f32.partialorder %v1464_v61, 0.0  ;;  %v1492_v63 = vmul.f32 0.02, %v1464_v61  ;;  %v1332_v3 = vadd.f32 %v2015_v38, %v2754_v29  ;;  %v1505_v4 = vsel %vm1477_vm9, %v1463_v55, %v1491_v60 }
 0x17c   :  { %v1418_v39 = vadd.f32 %v1417_v31, %v1329_v62 }
 0x17d   :  { %v1506_v5 = vsel %vm1478_vm10, %v1464_v61, %v1492_v63  ;;  %v1421_v7 = vadd.f32 %v1420_v58, %v1332_v3  ;;  %v2016_v30 = vpop.f32.mrb[64].mxu1  ;;  %v1425_v46 = vpop.f32.mrb[68].mxu0 }
 0x17e   :  { %v1772_v0 = vpack.c.bf16 %v1506_v5, %v1505_v4  ;;  %v1444_v8 = vmul.f32 %v2766_v43, %v1418_v39  ;;  %v2017_v49 = vpop.f32.mrb[65].mxu1  ;;  %v2079_v11 = vpop.f32.mrb[69].mxu0 }
 0x17f   :  { %v1445_v12 = vmul.f32 %v2766_v43, %v1421_v7  ;;  %v2018_v14 = vadd.f32 %v2017_v49, %v2016_v30  ;;  %v2019_v1 = vpop.f32.mrb[66].mxu1  ;;  %v1428_v28 = vpop.f32.mrb[70].mxu0 }
 0x180   :  { %1787 = vst [vmem:[%s2839_s4 + $0x20] sm:$0xff] %v1772_v0   ;;  %v1465_v29 = vadd.f32 %v2772_v2, %v1444_v8  ;;  %v2020_v16 = vpop.f32.mrb[67].mxu1  ;;  %v2080_v15 = vpop.f32.mrb[71].mxu0 }
 0x181   :  { %v1466_v6 = vadd.f32 %v2772_v2, %v1445_v12  ;;  %v2021_v20 = vadd.f32 %v2020_v16, %v2019_v1  ;;  %v1337_v21 = vadd.f32 %v2018_v14, %v2758_v50 }
 0x182   :  { %vm1479_vm11 = vcmp.ge.f32.partialorder %v1465_v29, 0.0  ;;  %v1493_v22 = vmul.f32 0.02, %v1465_v29 }
 0x183   :  { %vm1480_vm12 = vcmp.ge.f32.partialorder %v1466_v6, 0.0  ;;  %v1494_v23 = vmul.f32 0.02, %v1466_v6  ;;  %v1426_v13 = vadd.f32 %v1425_v46, %v1337_v21  ;;  %v1340_v25 = vadd.f32 %v2021_v20, %v2760_v51 }
 0x184   :  { %v1507_v27 = vsel %vm1479_vm11, %v1465_v29, %v1493_v22 }
 0x185   :  { %v1508_v18 = vsel %vm1480_vm12, %v1466_v6, %v1494_v23  ;;  %v1446_v32 = vmul.f32 %v2766_v43, %v1426_v13  ;;  %v1429_v57 = vadd.f32 %v1428_v28, %v1340_v25 }
 0x186   :  { %v1777_v42 = vpack.c.bf16 %v1508_v18, %v1507_v27 }
 0x187   :  { %v1467_v33 = vadd.f32 %v2772_v2, %v1446_v32  ;;  %v1447_v34 = vmul.f32 %v2766_v43, %v1429_v57 }
 0x188   :  { %1788 = vst [vmem:[%s2839_s4 + $0x28] sm:$0xff] %v1777_v42  }
 0x189   :  { %v1495_v50 = vmul.f32 0.02, %v1467_v33  ;;  %v1468_v35 = vadd.f32 %v2772_v2, %v1447_v34  ;;  %vm1481_vm13 = vcmp.ge.f32.partialorder %v1467_v33, 0.0 }
 0x18b   :  { %vm1482_vm14 = vcmp.ge.f32.partialorder %v1468_v35, 0.0  ;;  %v1496_v51 = vmul.f32 0.02, %v1468_v35  ;;  %v1509_v24 = vsel %vm1481_vm13, %v1467_v33, %v1495_v50 }
 0x18d   :  { %v1510_v37 = vsel %vm1482_vm14, %v1468_v35, %v1496_v51 }
 0x18e   :  { %v1782_v40 = vpack.c.bf16 %v1510_v37, %v1509_v24 }
 0x190   :  { %1789 = vst [vmem:[%s2839_s4 + $0x30] sm:$0xff] %v1782_v40  }

// kernel: discriminator_forward.7
= control target key start
LH: loop header
LB: loop body
LE: loop exit
PB: predicated region body
PF: predicated region fallthrough
CT: control target
= control target key end

     0   :  { %s20058_s0 = inlined_call_operand.vmem [shape: f32[6], index: 0, kind: input, shape index: {}]   ;;  %s20059_s1 = inlined_call_operand.vmem [shape: bf16[64,1152], index: 1, kind: input, shape index: {}]   ;;  %s20060_s2 = inlined_call_operand.vmem [shape: bf16[2,256], index: 2, kind: input, shape index: {}]   ;;  %s20061_s3 = inlined_call_operand.vmem [shape: bf16[1152,256], index: 3, kind: input, shape index: {}]   ;;  %s20062_s4 = inlined_call_operand.vmem [shape: f32[1,256], index: 4, kind: input, shape index: {}]   ;;  %s20063_s5 = inlined_call_operand.vmem [shape: bf16[2304,256], index: 5, kind: input, shape index: {}]   ;;  %s20064_s6 = inlined_call_operand.vmem [shape: f32[1,256], index: 6, kind: input, shape index: {}]   ;;  %s20065_s7 = inlined_call_operand.vmem [shape: bf16[2304,256], index: 7, kind: input, shape index: {}]   ;;  %s20066_s8 = inlined_call_operand.vmem [shape: f32[1,256], index: 8, kind: input, shape index: {}]   ;;  %s20067_s9 = inlined_call_operand.vmem [shape: bf16[256,512], index: 9, kind: input, shape index: {}]   ;;  %s20068_s10 = inlined_call_operand.vmem [shape: bf16[256,512], index: 10, kind: input, shape index: {}]   ;;  %s20069_s11 = inlined_call_operand.vmem [shape: f32[1,512], index: 11, kind: input, shape index: {}]   ;;  %s20070_s12 = inlined_call_operand.vmem [shape: bf16[512,256], index: 12, kind: input, shape index: {}]   ;;  %s20071_s13 = inlined_call_operand.vmem [shape: f32[1,256], index: 13, kind: input, shape index: {}]   ;;  %s20072_s14 = inlined_call_operand.vmem [shape: bf16[256,1], index: 14, kind: input, shape index: {}]   ;;  %s20073_s15 = inlined_call_operand.<no memory space> [shape: f32[1,1], index: 15, kind: input, shape index: {}]   ;;  %s20074_s16 = inlined_call_operand.vmem [shape: f32[2,1], index: 16, kind: output, shape index: {}]  }
   0x1   :  { %20075 = sst [smem:[#allocation8_spill]] %s20058_s0  ;;  %v21_v0 = vstv %s20073_s15 }
   0x2   :  { %22 = vst [vmem:[#allocation4] sm:$0x1] %v21_v0 }
   0x3   :  { %23 = vsyncpa [#allocation6], 0  ;;  %s20076_s25 = sld [smem:[#allocation8_spill]] }
   0x9   :  { %s30_s26 = sshll.u32 %s20076_s25, 4  ;;  %s31_s26 = int_to_ptr.vmem [resolvable:$true] %s30_s26 }
   0xa   :  { %s15922_s27 = scalar_lea.vmem %s31_s26, 16  ;;  %p15927_p1 = scmp.lt.s32.totalorder %s31_s26, %s31_s26 }
   0xb   :  { %p15923_p0 = scmp.ne.s32.totalorder %s31_s26, %s15922_s27  ;;  %p15928_p2 = scmp.lt.s32.totalorder %s15922_s27, %s15922_s27 }
   0xd   :  { %p15929_p3 = por %p15928_p2, %p15927_p1 }
   0xf   :  { %p15930_p4 = pnand %p15929_p3, %p15923_p0 }
  0x11   :  { %15933 = shalt.err (!%p15930_p4)
}
  0x12   :  { %s15936_s28 = smov [#allocation5]  }
  0x13   :  { %33 = dma.vmem_to_smem %s31_s26, 16, %s15936_s28, [#allocation6]  }
  0x14   :  { %15934 = dma.done.wait [#allocation6], 16  }
  0x15   :  { %15935 = vsyncadd [#allocation6], 4294967280 }
  0x16   :  { %67 = sfence }
  0x17   :  { %v14036_v1 = vld [vmem:[%s20061_s3 + $0x4] ss:$8 sps:$4 sm:$0xff]   ;;  %v14038_v2 = vld [vmem:[%s20061_s3] ss:$8 sps:$4 sm:$0xff]   ;;  %v14039_v3 = vld [vmem:[%s20061_s3 + $0x14] ss:$8 sps:$4 sm:$0xff]  }
  0x18   :  { %1157 = vmatprep.subr.bf16.mxu0 %v14036_v1  ;;  %v14041_v4 = vld [vmem:[%s20061_s3 + $0x10] ss:$8 sps:$4 sm:$0xff]   ;;  %v14042_v5 = vld [vmem:[%s20061_s3 + $0x24] ss:$8 sps:$4 sm:$0xff]   ;;  %v14044_v6 = vld [vmem:[%s20061_s3 + $0x20] ss:$8 sps:$4 sm:$0xff]  }
  0x19   :  { %1158 = vmatpush1.bf16.msra.mxu0 %v14038_v2  ;;  %v14045_v7 = vld [vmem:[%s20061_s3 + $0x34] ss:$8 sps:$4 sm:$0xff]   ;;  %v14047_v8 = vld [vmem:[%s20061_s3 + $0x30] ss:$8 sps:$4 sm:$0xff]   ;;  %v14048_v9 = vld [vmem:[%s20061_s3 + $0x44] ss:$8 sps:$4 sm:$0xff]  }
  0x1a   :  { %1159 = vmatprep.subr.bf16.mxu0 %v14039_v3  ;;  %v14050_v10 = vld [vmem:[%s20061_s3 + $0x40] ss:$8 sps:$4 sm:$0xff]   ;;  %v14051_v11 = vld [vmem:[%s20061_s3 + $0x54] ss:$8 sps:$4 sm:$0xff]   ;;  %v14053_v12 = vld [vmem:[%s20061_s3 + $0x50] ss:$8 sps:$4 sm:$0xff]  }
  0x1b   :  { %v14054_v13 = vld [vmem:[%s20061_s3 + $0x64] ss:$8 sps:$4 sm:$0xff]   ;;  %v14056_v15 = vld [vmem:[%s20061_s3 + $0x60] ss:$8 sps:$4 sm:$0xff]   ;;  %v14057_v16 = vld [vmem:[%s20061_s3 + $0x74] ss:$8 sps:$4 sm:$0xff]  }
  0x1c   :  { %v14086_v14 = vld [vmem:[%s20059_s1 + $0x4] ss:$36 sps:$4 sm:$0xff]   ;;  %v14059_v17 = vld [vmem:[%s20061_s3 + $0x70] ss:$8 sps:$4 sm:$0xff]   ;;  %v14063_v20 = vld [vmem:[%s20061_s3 + $0x94] ss:$8 sps:$4 sm:$0xff]  }
  0x1d   :  { %1160 = vmatpush1.bf16.msra.mxu0 %v14041_v4  ;;  %1189 = vmatprep.mubr.bf16.mxu0 %v14086_v14  ;;  %v14060_v18 = vld [vmem:[%s20061_s3 + $0x84] ss:$8 sps:$4 sm:$0xff]   ;;  %v14062_v19 = vld [vmem:[%s20061_s3 + $0x80] ss:$8 sps:$4 sm:$0xff]   ;;  %v14065_v21 = vld [vmem:[%s20061_s3 + $0x90] ss:$8 sps:$4 sm:$0xff]  }
  0x1e   :  { %1161 = vmatprep.subr.bf16.mxu0 %v14042_v5  ;;  %v14066_v22 = vld [vmem:[%s20061_s3 + $0xa4] ss:$8 sps:$4 sm:$0xff]   ;;  %v14068_v23 = vld [vmem:[%s20061_s3 + $0xa0] ss:$8 sps:$4 sm:$0xff]   ;;  %v14069_v24 = vld [vmem:[%s20061_s3 + $0xb4] ss:$8 sps:$4 sm:$0xff]  }
  0x1f   :  { %v14071_v25 = vld [vmem:[%s20061_s3 + $0xb0] ss:$8 sps:$4 sm:$0xff]   ;;  %v14072_v26 = vld [vmem:[%s20061_s3 + $0xc4] ss:$8 sps:$4 sm:$0xff]   ;;  %v14074_v27 = vld [vmem:[%s20061_s3 + $0xc0] ss:$8 sps:$4 sm:$0xff]  }
  0x20   :  { %v14075_v28 = vld [vmem:[%s20061_s3 + $0xd4] ss:$8 sps:$4 sm:$0xff]   ;;  %v14077_v29 = vld [vmem:[%s20061_s3 + $0xd0] ss:$8 sps:$4 sm:$0xff]   ;;  %v14078_v30 = vld [vmem:[%s20061_s3 + $0xe4] ss:$8 sps:$4 sm:$0xff]  }
  0x21   :  { %1162 = vmatpush1.bf16.msra.mxu0 %v14044_v6  ;;  %v14080_v31 = vld [vmem:[%s20061_s3 + $0xe0] ss:$8 sps:$4 sm:$0xff]   ;;  %v14081_v32 = vld [vmem:[%s20061_s3 + $0xf4] ss:$8 sps:$4 sm:$0xff]   ;;  %v14083_v33 = vld [vmem:[%s20061_s3 + $0xf0] ss:$8 sps:$4 sm:$0xff]  }
  0x22   :  { %1163 = vmatprep.subr.bf16.mxu0 %v14045_v7  ;;  %v14089_v34 = vld [vmem:[%s20061_s3 + $0x104] ss:$8 sps:$4 sm:$0xff]   ;;  %v14087_v36 = vld [vmem:[%s20061_s3 + $0x100] ss:$8 sps:$4 sm:$0xff]   ;;  %v14092_v38 = vld [vmem:[%s20061_s3 + $0x114] ss:$8 sps:$4 sm:$0xff]  }
  0x23   :  { %v14084_v35 = vld [vmem:[%s20059_s1] ss:$36 sps:$4 sm:$0xff]   ;;  %v14117_v37 = vld [vmem:[%s20059_s1 + $0x4c] ss:$36 sps:$4 sm:$0xff]   ;;  %v14126_v43 = vld [vmem:[%s20059_s1 + $0x94] ss:$36 sps:$4 sm:$0xff]  }
  0x24   :  { %v14090_v39 = vld [vmem:[%s20061_s3 + $0x110] ss:$8 sps:$4 sm:$0xff]   ;;  %v14095_v40 = vld [vmem:[%s20061_s3 + $0x124] ss:$8 sps:$4 sm:$0xff]   ;;  %v14093_v41 = vld [vmem:[%s20061_s3 + $0x120] ss:$8 sps:$4 sm:$0xff]  }
  0x25   :  { %1164 = vmatpush1.bf16.msra.mxu0 %v14047_v8  ;;  %v14122_v42 = vld [vmem:[%s20059_s1 + $0x48] ss:$36 sps:$4 sm:$0xff]   ;;  %v14098_v44 = vld [vmem:[%s20061_s3 + $0x134] ss:$8 sps:$4 sm:$0xff]   ;;  %v14096_v45 = vld [vmem:[%s20061_s3 + $0x130] ss:$8 sps:$4 sm:$0xff]  }
  0x26   :  { %1165 = vmatprep.subr.bf16.mxu0 %v14048_v9  ;;  %v14101_v46 = vld [vmem:[%s20061_s3 + $0x144] ss:$8 sps:$4 sm:$0xff]   ;;  %v14131_v47 = vld [vmem:[%s20059_s1 + $0x90] ss:$36 sps:$4 sm:$0xff]   ;;  %v14099_v48 = vld [vmem:[%s20061_s3 + $0x140] ss:$8 sps:$4 sm:$0xff]  }
  0x27   :  { %v14135_v49 = vld [vmem:[%s20059_s1 + $0xdc] ss:$36 sps:$4 sm:$0xff]   ;;  %v14102_v51 = vld [vmem:[%s20061_s3 + $0x150] ss:$8 sps:$4 sm:$0xff]   ;;  %v14107_v52 = vld [vmem:[%s20061_s3 + $0x164] ss:$8 sps:$4 sm:$0xff]  }
  0x28   :  { %v14104_v50 = vld [vmem:[%s20061_s3 + $0x154] ss:$8 sps:$4 sm:$0xff]   ;;  %v14105_v54 = vld [vmem:[%s20061_s3 + $0x160] ss:$8 sps:$4 sm:$0xff]   ;;  %v14146_v56 = vld [vmem:[%s20059_s1 + $0xc] ss:$36 sps:$4 sm:$0xff]  }
  0x29   :  { %1166 = vmatpush1.bf16.msra.mxu0 %v14050_v10  ;;  %v14140_v53 = vld [vmem:[%s20059_s1 + $0xd8] ss:$36 sps:$4 sm:$0xff]   ;;  %v14113_v58 = vld [vmem:[%s20061_s3 + $0x184] ss:$8 sps:$4 sm:$0xff]   ;;  %v14111_v59 = vld [vmem:[%s20061_s3 + $0x180] ss:$8 sps:$4 sm:$0xff]  }
  0x2a   :  { %1167 = vmatprep.subr.bf16.mxu0 %v14051_v11  ;;  %v14110_v55 = vld [vmem:[%s20061_s3 + $0x174] ss:$8 sps:$4 sm:$0xff]   ;;  %v14108_v57 = vld [vmem:[%s20061_s3 + $0x170] ss:$8 sps:$4 sm:$0xff]   ;;  %v14121_v62 = vld [vmem:[%s20061_s3 + $0x1a4] ss:$8 sps:$4 sm:$0xff]  }
  0x2b   :  { %v14116_v60 = vld [vmem:[%s20061_s3 + $0x194] ss:$8 sps:$4 sm:$0xff]   ;;  %v14114_v61 = vld [vmem:[%s20061_s3 + $0x190] ss:$8 sps:$4 sm:$0xff]   ;;  %v14119_v63 = vld [vmem:[%s20061_s3 + $0x1a0] ss:$8 sps:$4 sm:$0xff]  }
  0x2c   :  { %v14125_v0 = vld [vmem:[%s20061_s3 + $0x1b4] ss:$8 sps:$4 sm:$0xff]   ;;  %v14123_v1 = vld [vmem:[%s20061_s3 + $0x1b0] ss:$8 sps:$4 sm:$0xff]   ;;  %v14130_v2 = vld [vmem:[%s20061_s3 + $0x1c4] ss:$8 sps:$4 sm:$0xff]  }
  0x2d   :  { %1168 = vmatpush1.bf16.msra.mxu0 %v14053_v12  ;;  %v14128_v3 = vld [vmem:[%s20061_s3 + $0x1c0] ss:$8 sps:$4 sm:$0xff]   ;;  %v14134_v4 = vld [vmem:[%s20061_s3 + $0x1d4] ss:$8 sps:$4 sm:$0xff]   ;;  %v14132_v5 = vld [vmem:[%s20061_s3 + $0x1d0] ss:$8 sps:$4 sm:$0xff]  }
  0x2e   :  { %1169 = vmatprep.subr.bf16.mxu0 %v14054_v13  ;;  %v14139_v6 = vld [vmem:[%s20061_s3 + $0x1e4] ss:$8 sps:$4 sm:$0xff]   ;;  %v14137_v7 = vld [vmem:[%s20061_s3 + $0x1e0] ss:$8 sps:$4 sm:$0xff]   ;;  %v14143_v8 = vld [vmem:[%s20061_s3 + $0x1f4] ss:$8 sps:$4 sm:$0xff]  }
  0x2f   :  { %v14141_v9 = vld [vmem:[%s20061_s3 + $0x1f0] ss:$8 sps:$4 sm:$0xff]   ;;  %v14149_v10 = vld [vmem:[%s20061_s3 + $0x204] ss:$8 sps:$4 sm:$0xff]   ;;  %v14147_v12 = vld [vmem:[%s20061_s3 + $0x200] ss:$8 sps:$4 sm:$0xff]  }
  0x30   :  { %v14144_v11 = vld [vmem:[%s20059_s1 + $0x8] ss:$36 sps:$4 sm:$0xff]   ;;  %v14177_v13 = vld [vmem:[%s20059_s1 + $0x54] ss:$36 sps:$4 sm:$0xff]   ;;  %s1522_s19 = sld [smem:[#allocation5]]  ;;  %vm2634_vm12 = vcmask 1041408  }
  0x31   :  { %1170 = vmatpush1.bf16.msra.mxu0 %v14056_v15  ;;  %v14152_v14 = vld [vmem:[%s20061_s3 + $0x214] ss:$8 sps:$4 sm:$0xff]   ;;  %v14150_v15 = vld [vmem:[%s20061_s3 + $0x210] ss:$8 sps:$4 sm:$0xff]   ;;  %s12702_s26 = sld [smem:[#allocation5 + $0x1]]  ;;  %s13720_s27 = sld [smem:[#allocation5 + $0x3]] }
  0x32   :  { %1171 = vmatprep.subr.bf16.mxu0 %v14057_v16  ;;  %v14155_v16 = vld [vmem:[%s20061_s3 + $0x224] ss:$8 sps:$4 sm:$0xff]   ;;  %s13785_s24 = sld [smem:[#allocation5 + $0x4]] }
  0x35   :  { %1172 = vmatpush1.bf16.msra.mxu0 %v14059_v17  ;;  %v14182_v17 = vld [vmem:[%s20059_s1 + $0x50] ss:$36 sps:$4 sm:$0xff]  }
  0x36   :  { %1173 = vmatprep.subr.bf16.mxu0 %v14060_v18  ;;  %v14153_v18 = vld [vmem:[%s20061_s3 + $0x220] ss:$8 sps:$4 sm:$0xff]  }
  0x39   :  { %1174 = vmatpush1.bf16.msra.mxu0 %v14062_v19  ;;  %v14186_v19 = vld [vmem:[%s20059_s1 + $0x9c] ss:$36 sps:$4 sm:$0xff]  }
  0x3a   :  { %1175 = vmatprep.subr.bf16.mxu0 %v14063_v20  ;;  %v14158_v20 = vld [vmem:[%s20061_s3 + $0x234] ss:$8 sps:$4 sm:$0xff]  }
  0x3d   :  { %1176 = vmatpush1.bf16.msra.mxu0 %v14065_v21  ;;  %v14156_v21 = vld [vmem:[%s20061_s3 + $0x230] ss:$8 sps:$4 sm:$0xff]  }
  0x3e   :  { %1177 = vmatprep.subr.bf16.mxu0 %v14066_v22  ;;  %v14161_v22 = vld [vmem:[%s20061_s3 + $0x244] ss:$8 sps:$4 sm:$0xff]  }
  0x41   :  { %1178 = vmatpush1.bf16.msra.mxu0 %v14068_v23  ;;  %v14191_v23 = vld [vmem:[%s20059_s1 + $0x98] ss:$36 sps:$4 sm:$0xff]  }
  0x42   :  { %1179 = vmatprep.subr.bf16.mxu0 %v14069_v24  ;;  %v14159_v24 = vld [vmem:[%s20061_s3 + $0x240] ss:$8 sps:$4 sm:$0xff]  }
  0x45   :  { %1180 = vmatpush1.bf16.msra.mxu0 %v14071_v25  ;;  %v14195_v25 = vld [vmem:[%s20059_s1 + $0xe4] ss:$36 sps:$4 sm:$0xff]  }
  0x46   :  { %1181 = vmatprep.subr.bf16.mxu0 %v14072_v26  ;;  %v14164_v26 = vld [vmem:[%s20061_s3 + $0x254] ss:$8 sps:$4 sm:$0xff]  }
  0x49   :  { %1182 = vmatpush1.bf16.msra.mxu0 %v14074_v27  ;;  %v14162_v27 = vld [vmem:[%s20061_s3 + $0x250] ss:$8 sps:$4 sm:$0xff]  }
  0x4a   :  { %1183 = vmatprep.subr.bf16.mxu0 %v14075_v28  ;;  %v14167_v28 = vld [vmem:[%s20061_s3 + $0x264] ss:$8 sps:$4 sm:$0xff]  }
  0x4d   :  { %1184 = vmatpush1.bf16.msra.mxu0 %v14077_v29  ;;  %v14200_v29 = vld [vmem:[%s20059_s1 + $0xe0] ss:$36 sps:$4 sm:$0xff]  }
  0x4e   :  { %1185 = vmatprep.subr.bf16.mxu0 %v14078_v30  ;;  %v14165_v30 = vld [vmem:[%s20061_s3 + $0x260] ss:$8 sps:$4 sm:$0xff]  }
  0x51   :  { %1186 = vmatpush1.bf16.msra.mxu0 %v14080_v31  ;;  %v14206_v31 = vld [vmem:[%s20059_s1 + $0x14] ss:$36 sps:$4 sm:$0xff]  }
  0x52   :  { %1187 = vmatprep.subr.bf16.mxu0 %v14081_v32  ;;  %v14170_v32 = vld [vmem:[%s20061_s3 + $0x274] ss:$8 sps:$4 sm:$0xff]  }
  0x55   :  { %1188 = vmatpush1.bf16.msra.mxu0 %v14083_v33  ;;  %v14168_v33 = vld [vmem:[%s20061_s3 + $0x270] ss:$8 sps:$4 sm:$0xff]  }
  0x56   :  { %1230 = vmatprep.subr.bf16.mxu0 %v14089_v34  ;;  %v14173_v34 = vld [vmem:[%s20061_s3 + $0x284] ss:$8 sps:$4 sm:$0xff]  }
  0x58   :  { %1190 = vmatmul.mubr.bf16.vlgmr.msra.gmra.mrb[0].mxu0 %v14084_v35  ;;  %v14171_v35 = vld [vmem:[%s20061_s3 + $0x280] ss:$8 sps:$4 sm:$0xff]  }
  0x59   :  { %1231 = vmatpush1.bf16.msra.mxu0 %v14087_v36  ;;  %1199 = vmatprep.mubr.bf16.mxu0 %v14117_v37  ;;  %v14176_v36 = vld [vmem:[%s20061_s3 + $0x294] ss:$8 sps:$4 sm:$0xff]   ;;  %v14174_v37 = vld [vmem:[%s20061_s3 + $0x290] ss:$8 sps:$4 sm:$0xff]  }
  0x5a   :  { %1232 = vmatprep.subr.bf16.mxu0 %v14092_v38  ;;  %v14181_v38 = vld [vmem:[%s20061_s3 + $0x2a4] ss:$8 sps:$4 sm:$0xff]  }
  0x5d   :  { %1233 = vmatpush1.bf16.msra.mxu0 %v14090_v39  ;;  %v14179_v39 = vld [vmem:[%s20061_s3 + $0x2a0] ss:$8 sps:$4 sm:$0xff]  }
  0x5e   :  { %1234 = vmatprep.subr.bf16.mxu0 %v14095_v40  ;;  %v14185_v40 = vld [vmem:[%s20061_s3 + $0x2b4] ss:$8 sps:$4 sm:$0xff]  }
  0x60   :  { %1200 = vmatmul.mubr.bf16.gmra.mrb[4].mxu0 %v14122_v42  ;;  %v14190_v42 = vld [vmem:[%s20061_s3 + $0x2c4] ss:$8 sps:$4 sm:$0xff]  }
  0x61   :  { %1235 = vmatpush1.bf16.msra.mxu0 %v14093_v41  ;;  %1209 = vmatprep.mubr.bf16.mxu0 %v14126_v43  ;;  %v14183_v41 = vld [vmem:[%s20061_s3 + $0x2b0] ss:$8 sps:$4 sm:$0xff]   ;;  %v14188_v43 = vld [vmem:[%s20061_s3 + $0x2c0] ss:$8 sps:$4 sm:$0xff]  }
  0x62   :  { %1236 = vmatprep.subr.bf16.mxu0 %v14098_v44  ;;  %v14194_v44 = vld [vmem:[%s20061_s3 + $0x2d4] ss:$8 sps:$4 sm:$0xff]  }
  0x65   :  { %1237 = vmatpush1.bf16.msra.mxu0 %v14096_v45  ;;  %v14192_v45 = vld [vmem:[%s20061_s3 + $0x2d0] ss:$8 sps:$4 sm:$0xff]  }
  0x66   :  { %1238 = vmatprep.subr.bf16.mxu0 %v14101_v46  ;;  %v14199_v46 = vld [vmem:[%s20061_s3 + $0x2e4] ss:$8 sps:$4 sm:$0xff]  }
  0x68   :  { %1210 = vmatmul.mubr.bf16.gmra.mrb[8].mxu0 %v14131_v47  ;;  %v14197_v47 = vld [vmem:[%s20061_s3 + $0x2e0] ss:$8 sps:$4 sm:$0xff]  }
  0x69   :  { %1239 = vmatpush1.bf16.msra.mxu0 %v14099_v48  ;;  %1219 = vmatprep.mubr.bf16.mxu0 %v14135_v49  ;;  %v14203_v48 = vld [vmem:[%s20061_s3 + $0x2f4] ss:$8 sps:$4 sm:$0xff]   ;;  %v16369_v49 = vld [vmem:[%s20063_s5 + $0x104] ss:$8 sps:$4 sm:$0xff]  }
  0x6a   :  { %1240 = vmatprep.subr.bf16.mxu0 %v14104_v50  ;;  %v16374_v50 = vld [vmem:[%s20063_s5 + $0x100] ss:$8 sps:$4 sm:$0xff]   ;;  %1866 = vmatprep.subr.bf16.mxu1 %v16369_v49 }
  0x6b   :  { %1867 = vmatpush1.bf16.msra.mxu1 %v16374_v50 }
  0x6d   :  { %1241 = vmatpush1.bf16.msra.mxu0 %v14102_v51  ;;  %v16379_v51 = vld [vmem:[%s20063_s5 + $0x114] ss:$8 sps:$4 sm:$0xff]  }
  0x6e   :  { %1242 = vmatprep.subr.bf16.mxu0 %v14107_v52  ;;  %v14201_v52 = vld [vmem:[%s20061_s3 + $0x2f0] ss:$8 sps:$4 sm:$0xff]   ;;  %1868 = vmatprep.subr.bf16.mxu1 %v16379_v51 }
  0x70   :  { %1220 = vmatmul.mubr.bf16.gmra.mrb[12].mxu0 %v14140_v53  ;;  %v14209_v53 = vld [vmem:[%s20061_s3 + $0x304] ss:$8 sps:$4 sm:$0xff]  }
  0x71   :  { %1243 = vmatpush1.bf16.msra.mxu0 %v14105_v54  ;;  %1262 = vmatprep.mubr.bf16.mxu0 %v14146_v56  ;;  %v16392_v54 = vld [vmem:[%s20063_s5 + $0x110] ss:$8 sps:$4 sm:$0xff]   ;;  %v16401_v56 = vld [vmem:[%s20063_s5 + $0x124] ss:$8 sps:$4 sm:$0xff]  }
  0x72   :  { %1244 = vmatprep.subr.bf16.mxu0 %v14110_v55  ;;  %v14204_v55 = vld [vmem:[%s20059_s1 + $0x10] ss:$36 sps:$4 sm:$0xff]   ;;  %1869 = vmatpush1.bf16.msra.mxu1 %v16392_v54 }
  0x73   :  { %1870 = vmatprep.subr.bf16.mxu1 %v16401_v56 }
  0x75   :  { %1245 = vmatpush1.bf16.msra.mxu0 %v14108_v57  ;;  %v14207_v57 = vld [vmem:[%s20061_s3 + $0x300] ss:$8 sps:$4 sm:$0xff]  }
  0x76   :  { %1246 = vmatprep.subr.bf16.mxu0 %v14113_v58  ;;  %v14237_v58 = vld [vmem:[%s20059_s1 + $0x5c] ss:$36 sps:$4 sm:$0xff]  }
  0x79   :  { %1247 = vmatpush1.bf16.msra.mxu0 %v14111_v59  ;;  %v14212_v59 = vld [vmem:[%s20061_s3 + $0x314] ss:$8 sps:$4 sm:$0xff]  }
  0x7a   :  { %1248 = vmatprep.subr.bf16.mxu0 %v14116_v60  ;;  %v16415_v60 = vld [vmem:[%s20063_s5 + $0x120] ss:$8 sps:$4 sm:$0xff]  }
  0x7b   :  { %1871 = vmatpush1.bf16.msra.mxu1 %v16415_v60 }
  0x7d   :  { %1249 = vmatpush1.bf16.msra.mxu0 %v14114_v61  ;;  %v16420_v61 = vld [vmem:[%s20063_s5 + $0x134] ss:$8 sps:$4 sm:$0xff]  }
  0x7e   :  { %1250 = vmatprep.subr.bf16.mxu0 %v14121_v62  ;;  %v14210_v62 = vld [vmem:[%s20061_s3 + $0x310] ss:$8 sps:$4 sm:$0xff]   ;;  %1872 = vmatprep.subr.bf16.mxu1 %v16420_v61 }
  0x81   :  { %1251 = vmatpush1.bf16.msra.mxu0 %v14119_v63  ;;  %v14215_v63 = vld [vmem:[%s20061_s3 + $0x324] ss:$8 sps:$4 sm:$0xff]  }
  0x82   :  { %1252 = vmatprep.subr.bf16.mxu0 %v14125_v0  ;;  %v16433_v0 = vld [vmem:[%s20063_s5 + $0x130] ss:$8 sps:$4 sm:$0xff]  }
  0x83   :  { %1873 = vmatpush1.bf16.msra.mxu1 %v16433_v0 }
  0x85   :  { %1253 = vmatpush1.bf16.msra.mxu0 %v14123_v1  ;;  %v14239_v1 = vld [vmem:[%s20059_s1 + $0x58] ss:$36 sps:$4 sm:$0xff]  }
  0x86   :  { %1254 = vmatprep.subr.bf16.mxu0 %v14130_v2  ;;  %v16441_v2 = vld [vmem:[%s20063_s5 + $0x144] ss:$8 sps:$4 sm:$0xff]  }
  0x87   :  { %1874 = vmatprep.subr.bf16.mxu1 %v16441_v2 }
  0x89   :  { %1255 = vmatpush1.bf16.msra.mxu0 %v14128_v3  ;;  %v14213_v3 = vld [vmem:[%s20061_s3 + $0x320] ss:$8 sps:$4 sm:$0xff]  }
  0x8a   :  { %1256 = vmatprep.subr.bf16.mxu0 %v14134_v4  ;;  %v14246_v4 = vld [vmem:[%s20059_s1 + $0xa4] ss:$36 sps:$4 sm:$0xff]  }
  0x8d   :  { %1257 = vmatpush1.bf16.msra.mxu0 %v14132_v5  ;;  %v14218_v5 = vld [vmem:[%s20061_s3 + $0x334] ss:$8 sps:$4 sm:$0xff]  }
  0x8e   :  { %1258 = vmatprep.subr.bf16.mxu0 %v14139_v6  ;;  %v16457_v6 = vld [vmem:[%s20063_s5 + $0x140] ss:$8 sps:$4 sm:$0xff]  }
  0x8f   :  { %1875 = vmatpush1.bf16.msra.mxu1 %v16457_v6 }
  0x91   :  { %1259 = vmatpush1.bf16.msra.mxu0 %v14137_v7  ;;  %v16462_v7 = vld [vmem:[%s20063_s5 + $0x154] ss:$8 sps:$4 sm:$0xff]  }
  0x92   :  { %1260 = vmatprep.subr.bf16.mxu0 %v14143_v8  ;;  %v14216_v8 = vld [vmem:[%s20061_s3 + $0x330] ss:$8 sps:$4 sm:$0xff]   ;;  %1876 = vmatprep.subr.bf16.mxu1 %v16462_v7 }
  0x95   :  { %1261 = vmatpush1.bf16.msra.mxu0 %v14141_v9  ;;  %v14221_v9 = vld [vmem:[%s20061_s3 + $0x344] ss:$8 sps:$4 sm:$0xff]  }
  0x96   :  { %1303 = vmatprep.subr.bf16.mxu0 %v14149_v10  ;;  %v16475_v10 = vld [vmem:[%s20063_s5 + $0x150] ss:$8 sps:$4 sm:$0xff]  }
  0x97   :  { %1877 = vmatpush1.bf16.msra.mxu1 %v16475_v10 }
  0x98   :  { %1263 = vmatmul.mubr.bf16.vlgmr.msra.gmra.mrb[0].mxu0 %v14144_v11  ;;  %v14248_v11 = vld [vmem:[%s20059_s1 + $0xa0] ss:$36 sps:$4 sm:$0xff]  }
  0x99   :  { %1304 = vmatpush1.bf16.msra.mxu0 %v14147_v12  ;;  %1272 = vmatprep.mubr.bf16.mxu0 %v14177_v13  ;;  %v16483_v12 = vld [vmem:[%s20063_s5 + $0x164] ss:$8 sps:$4 sm:$0xff]   ;;  %v14219_v13 = vld [vmem:[%s20061_s3 + $0x340] ss:$8 sps:$4 sm:$0xff]  }
  0x9a   :  { %1305 = vmatprep.subr.bf16.mxu0 %v14152_v14  ;;  %v14255_v14 = vld [vmem:[%s20059_s1 + $0xec] ss:$36 sps:$4 sm:$0xff]   ;;  %1878 = vmatprep.subr.bf16.mxu1 %v16483_v12 }
  0x9d   :  { %1306 = vmatpush1.bf16.msra.mxu0 %v14150_v15  ;;  %v14224_v15 = vld [vmem:[%s20061_s3 + $0x354] ss:$8 sps:$4 sm:$0xff]  }
  0x9e   :  { %1307 = vmatprep.subr.bf16.mxu0 %v14155_v16  ;;  %v16499_v16 = vld [vmem:[%s20063_s5 + $0x160] ss:$8 sps:$4 sm:$0xff]  }
  0x9f   :  { %1879 = vmatpush1.bf16.msra.mxu1 %v16499_v16 }
  0xa0   :  { %1273 = vmatmul.mubr.bf16.gmra.mrb[4].mxu0 %v14182_v17  ;;  %v16504_v17 = vld [vmem:[%s20063_s5 + $0x174] ss:$8 sps:$4 sm:$0xff]  }
  0xa1   :  { %1308 = vmatpush1.bf16.msra.mxu0 %v14153_v18  ;;  %1282 = vmatprep.mubr.bf16.mxu0 %v14186_v19  ;;  %v14222_v18 = vld [vmem:[%s20061_s3 + $0x350] ss:$8 sps:$4 sm:$0xff]   ;;  %v14227_v19 = vld [vmem:[%s20061_s3 + $0x364] ss:$8 sps:$4 sm:$0xff]  }
  0xa2   :  { %1309 = vmatprep.subr.bf16.mxu0 %v14158_v20  ;;  %v16517_v20 = vld [vmem:[%s20063_s5 + $0x170] ss:$8 sps:$4 sm:$0xff]   ;;  %1880 = vmatprep.subr.bf16.mxu1 %v16504_v17 }
  0xa3   :  { %1881 = vmatpush1.bf16.msra.mxu1 %v16517_v20 }
  0xa5   :  { %1310 = vmatpush1.bf16.msra.mxu0 %v14156_v21  ;;  %v14257_v21 = vld [vmem:[%s20059_s1 + $0xe8] ss:$36 sps:$4 sm:$0xff]  }
  0xa6   :  { %1311 = vmatprep.subr.bf16.mxu0 %v14161_v22  ;;  %v16525_v22 = vld [vmem:[%s20063_s5 + $0x184] ss:$8 sps:$4 sm:$0xff]  }
  0xa7   :  { %1882 = vmatprep.subr.bf16.mxu1 %v16525_v22 }
  0xa8   :  { %1283 = vmatmul.mubr.bf16.gmra.mrb[8].mxu0 %v14191_v23  ;;  %v14225_v23 = vld [vmem:[%s20061_s3 + $0x360] ss:$8 sps:$4 sm:$0xff]  }
  0xa9   :  { %1312 = vmatpush1.bf16.msra.mxu0 %v14159_v24  ;;  %1292 = vmatprep.mubr.bf16.mxu0 %v14195_v25  ;;  %v14266_v24 = vld [vmem:[%s20059_s1 + $0x1c] ss:$36 sps:$4 sm:$0xff]  }
  0xaa   :  { %1313 = vmatprep.subr.bf16.mxu0 %v14164_v26  ;;  %v14230_v25 = vld [vmem:[%s20061_s3 + $0x374] ss:$8 sps:$4 sm:$0xff]   ;;  %v16541_v26 = vld [vmem:[%s20063_s5 + $0x180] ss:$8 sps:$4 sm:$0xff]  }
  0xab   :  { %1883 = vmatpush1.bf16.msra.mxu1 %v16541_v26 }
  0xad   :  { %1314 = vmatpush1.bf16.msra.mxu0 %v14162_v27  ;;  %v16546_v27 = vld [vmem:[%s20063_s5 + $0x194] ss:$8 sps:$4 sm:$0xff]  }
  0xae   :  { %1315 = vmatprep.subr.bf16.mxu0 %v14167_v28  ;;  %v14228_v28 = vld [vmem:[%s20061_s3 + $0x370] ss:$8 sps:$4 sm:$0xff]   ;;  %1884 = vmatprep.subr.bf16.mxu1 %v16546_v27 }
  0xb0   :  { %1293 = vmatmul.mubr.bf16.gmra.mrb[12].mxu0 %v14200_v29  ;;  %v14233_v29 = vld [vmem:[%s20061_s3 + $0x384] ss:$8 sps:$4 sm:$0xff]  }
  0xb1   :  { %1316 = vmatpush1.bf16.msra.mxu0 %v14165_v30  ;;  %1335 = vmatprep.mubr.bf16.mxu0 %v14206_v31  ;;  %v16559_v30 = vld [vmem:[%s20063_s5 + $0x190] ss:$8 sps:$4 sm:$0xff]   ;;  %v16564_v31 = vld [vmem:[%s20063_s5 + $0x1a4] ss:$8 sps:$4 sm:$0xff]  }
  0xb2   :  { %1317 = vmatprep.subr.bf16.mxu0 %v14170_v32  ;;  %v14231_v32 = vld [vmem:[%s20061_s3 + $0x380] ss:$8 sps:$4 sm:$0xff]   ;;  %1885 = vmatpush1.bf16.msra.mxu1 %v16559_v30 }
  0xb3   :  { %1886 = vmatprep.subr.bf16.mxu1 %v16564_v31 }
  0xb5   :  { %1318 = vmatpush1.bf16.msra.mxu0 %v14168_v33  ;;  %v14236_v33 = vld [vmem:[%s20061_s3 + $0x394] ss:$8 sps:$4 sm:$0xff]  }
  0xb6   :  { %1319 = vmatprep.subr.bf16.mxu0 %v14173_v34  ;;  %v14234_v34 = vld [vmem:[%s20061_s3 + $0x390] ss:$8 sps:$4 sm:$0xff]  }
  0xb9   :  { %1320 = vmatpush1.bf16.msra.mxu0 %v14171_v35  ;;  %v14242_v35 = vld [vmem:[%s20061_s3 + $0x3a4] ss:$8 sps:$4 sm:$0xff]  }
  0xba   :  { %1321 = vmatprep.subr.bf16.mxu0 %v14176_v36  ;;  %v14240_v36 = vld [vmem:[%s20061_s3 + $0x3a0] ss:$8 sps:$4 sm:$0xff]  }
  0xbd   :  { %1322 = vmatpush1.bf16.msra.mxu0 %v14174_v37  ;;  %v14245_v37 = vld [vmem:[%s20061_s3 + $0x3b4] ss:$8 sps:$4 sm:$0xff]  }
  0xbe   :  { %1323 = vmatprep.subr.bf16.mxu0 %v14181_v38  ;;  %v14243_v38 = vld [vmem:[%s20061_s3 + $0x3b0] ss:$8 sps:$4 sm:$0xff]  }
  0xc1   :  { %1324 = vmatpush1.bf16.msra.mxu0 %v14179_v39  ;;  %v14251_v39 = vld [vmem:[%s20061_s3 + $0x3c4] ss:$8 sps:$4 sm:$0xff]  }
  0xc2   :  { %1325 = vmatprep.subr.bf16.mxu0 %v14185_v40  ;;  %v14249_v40 = vld [vmem:[%s20061_s3 + $0x3c0] ss:$8 sps:$4 sm:$0xff]  }
  0xc5   :  { %1326 = vmatpush1.bf16.msra.mxu0 %v14183_v41  ;;  %v14254_v41 = vld [vmem:[%s20061_s3 + $0x3d4] ss:$8 sps:$4 sm:$0xff]  }
  0xc6   :  { %1327 = vmatprep.subr.bf16.mxu0 %v14190_v42  ;;  %v14252_v42 = vld [vmem:[%s20061_s3 + $0x3d0] ss:$8 sps:$4 sm:$0xff]  }
  0xc9   :  { %1328 = vmatpush1.bf16.msra.mxu0 %v14188_v43  ;;  %v14260_v43 = vld [vmem:[%s20061_s3 + $0x3e4] ss:$8 sps:$4 sm:$0xff]  }
  0xca   :  { %1329 = vmatprep.subr.bf16.mxu0 %v14194_v44  ;;  %v14258_v44 = vld [vmem:[%s20061_s3 + $0x3e0] ss:$8 sps:$4 sm:$0xff]  }
  0xcd   :  { %1330 = vmatpush1.bf16.msra.mxu0 %v14192_v45  ;;  %v14263_v45 = vld [vmem:[%s20061_s3 + $0x3f4] ss:$8 sps:$4 sm:$0xff]  }
  0xce   :  { %1331 = vmatprep.subr.bf16.mxu0 %v14199_v46  ;;  %v14261_v46 = vld [vmem:[%s20061_s3 + $0x3f0] ss:$8 sps:$4 sm:$0xff]  }
  0xd1   :  { %1332 = vmatpush1.bf16.msra.mxu0 %v14197_v47  ;;  %v14269_v47 = vld [vmem:[%s20061_s3 + $0x404] ss:$8 sps:$4 sm:$0xff]  }
  0xd2   :  { %1333 = vmatprep.subr.bf16.mxu0 %v14203_v48  ;;  %v14264_v48 = vld [vmem:[%s20059_s1 + $0x18] ss:$36 sps:$4 sm:$0xff]  }
  0xd5   :  { %1334 = vmatpush1.bf16.msra.mxu0 %v14201_v52  ;;  %v14267_v52 = vld [vmem:[%s20061_s3 + $0x400] ss:$8 sps:$4 sm:$0xff]  }
  0xd6   :  { %1376 = vmatprep.subr.bf16.mxu0 %v14209_v53  ;;  %v14273_v53 = vld [vmem:[%s20059_s1 + $0x64] ss:$36 sps:$4 sm:$0xff]  }
  0xd8   :  { %1336 = vmatmul.mubr.bf16.vlgmr.msra.gmra.mrb[0].mxu0 %v14204_v55  ;;  %v14272_v55 = vld [vmem:[%s20061_s3 + $0x414] ss:$8 sps:$4 sm:$0xff]  }
  0xd9   :  { %1377 = vmatpush1.bf16.msra.mxu0 %v14207_v57  ;;  %1345 = vmatprep.mubr.bf16.mxu0 %v14237_v58  ;;  %v14270_v57 = vld [vmem:[%s20061_s3 + $0x410] ss:$8 sps:$4 sm:$0xff]   ;;  %v14278_v58 = vld [vmem:[%s20061_s3 + $0x424] ss:$8 sps:$4 sm:$0xff]  }
  0xda   :  { %1378 = vmatprep.subr.bf16.mxu0 %v14212_v59  ;;  %v14275_v59 = vld [vmem:[%s20059_s1 + $0x60] ss:$36 sps:$4 sm:$0xff]  }
  0xdd   :  { %1379 = vmatpush1.bf16.msra.mxu0 %v14210_v62  ;;  %v14276_v62 = vld [vmem:[%s20061_s3 + $0x420] ss:$8 sps:$4 sm:$0xff]  }
  0xde   :  { %1380 = vmatprep.subr.bf16.mxu0 %v14215_v63  ;;  %v14282_v63 = vld [vmem:[%s20059_s1 + $0xac] ss:$36 sps:$4 sm:$0xff]  }
  0xe0   :  { %1346 = vmatmul.mubr.bf16.gmra.mrb[4].mxu0 %v14239_v1  ;;  %v14281_v1 = vld [vmem:[%s20061_s3 + $0x434] ss:$8 sps:$4 sm:$0xff]  }
  0xe1   :  { %1381 = vmatpush1.bf16.msra.mxu0 %v14213_v3  ;;  %1355 = vmatprep.mubr.bf16.mxu0 %v14246_v4  ;;  %v14279_v3 = vld [vmem:[%s20061_s3 + $0x430] ss:$8 sps:$4 sm:$0xff]   ;;  %v14287_v4 = vld [vmem:[%s20061_s3 + $0x444] ss:$8 sps:$4 sm:$0xff]  }
  0xe2   :  { %1382 = vmatprep.subr.bf16.mxu0 %v14218_v5  ;;  %v14284_v5 = vld [vmem:[%s20059_s1 + $0xa8] ss:$36 sps:$4 sm:$0xff]  }
  0xe5   :  { %1383 = vmatpush1.bf16.msra.mxu0 %v14216_v8  ;;  %v14285_v8 = vld [vmem:[%s20061_s3 + $0x440] ss:$8 sps:$4 sm:$0xff]  }
  0xe6   :  { %1384 = vmatprep.subr.bf16.mxu0 %v14221_v9  ;;  %v14291_v9 = vld [vmem:[%s20059_s1 + $0xf4] ss:$36 sps:$4 sm:$0xff]  }
  0xe8   :  { %1356 = vmatmul.mubr.bf16.gmra.mrb[8].mxu0 %v14248_v11  ;;  %v14290_v11 = vld [vmem:[%s20061_s3 + $0x454] ss:$8 sps:$4 sm:$0xff]  }
  0xe9   :  { %1385 = vmatpush1.bf16.msra.mxu0 %v14219_v13  ;;  %1365 = vmatprep.mubr.bf16.mxu0 %v14255_v14  ;;  %v14288_v13 = vld [vmem:[%s20061_s3 + $0x450] ss:$8 sps:$4 sm:$0xff]   ;;  %v14296_v14 = vld [vmem:[%s20061_s3 + $0x464] ss:$8 sps:$4 sm:$0xff]  }
  0xea   :  { %1386 = vmatprep.subr.bf16.mxu0 %v14224_v15  ;;  %v14293_v15 = vld [vmem:[%s20059_s1 + $0xf0] ss:$36 sps:$4 sm:$0xff]  }
  0xed   :  { %1387 = vmatpush1.bf16.msra.mxu0 %v14222_v18  ;;  %v14294_v18 = vld [vmem:[%s20061_s3 + $0x460] ss:$8 sps:$4 sm:$0xff]  }
  0xee   :  { %1388 = vmatprep.subr.bf16.mxu0 %v14227_v19  ;;  %v14299_v19 = vld [vmem:[%s20061_s3 + $0x474] ss:$8 sps:$4 sm:$0xff]  }
  0xf0   :  { %1366 = vmatmul.mubr.bf16.gmra.mrb[12].mxu0 %v14257_v21  ;;  %v14297_v21 = vld [vmem:[%s20061_s3 + $0x470] ss:$8 sps:$4 sm:$0xff]  }
  0xf1   :  { %1389 = vmatpush1.bf16.msra.mxu0 %v14225_v23  ;;  %1408 = vmatprep.mubr.bf16.mxu0 %v14266_v24  ;;  %v15937_v23 = vmov 0   ;;  %v14300_v24 = vld [vmem:[%s20059_s1 + $0x20] ss:$36 sps:$4 sm:$0xff]  }
  0xf2   :  { %1390 = vmatprep.subr.bf16.mxu0 %v14230_v25  ;;  %v14301_v25 = vld [vmem:[%s20059_s1 + $0x68] ss:$36 sps:$4 sm:$0xff]  }
  0xf5   :  { %1391 = vmatpush1.bf16.msra.mxu0 %v14228_v28  ;;  %v16764_v28 = vstv %s1522_s19 }
  0xf6   :  { %1392 = vmatprep.subr.bf16.mxu0 %v14233_v29 }
  0xf9   :  { %1393 = vmatpush1.bf16.msra.mxu0 %v14231_v32 }
  0xfa   :  { %1394 = vmatprep.subr.bf16.mxu0 %v14236_v33 }
  0xfd   :  { %1395 = vmatpush1.bf16.msra.mxu0 %v14234_v34 }
  0xfe   :  { %1396 = vmatprep.subr.bf16.mxu0 %v14242_v35 }
 0x101   :  { %1397 = vmatpush1.bf16.msra.mxu0 %v14240_v36 }
 0x102   :  { %1398 = vmatprep.subr.bf16.mxu0 %v14245_v37 }
 0x105   :  { %1399 = vmatpush1.bf16.msra.mxu0 %v14243_v38 }
 0x106   :  { %1400 = vmatprep.subr.bf16.mxu0 %v14251_v39 }
 0x109   :  { %1401 = vmatpush1.bf16.msra.mxu0 %v14249_v40 }
 0x10a   :  { %1402 = vmatprep.subr.bf16.mxu0 %v14254_v41 }
 0x10d   :  { %1403 = vmatpush1.bf16.msra.mxu0 %v14252_v42 }
 0x10e   :  { %1404 = vmatprep.subr.bf16.mxu0 %v14260_v43 }
 0x111   :  { %1405 = vmatpush1.bf16.msra.mxu0 %v14258_v44 }
 0x112   :  { %1406 = vmatprep.subr.bf16.mxu0 %v14263_v45 }
 0x115   :  { %1407 = vmatpush1.bf16.msra.mxu0 %v14261_v46 }
 0x116   :  { %1449 = vmatprep.subr.bf16.mxu0 %v14269_v47 }
 0x118   :  { %1409 = vmatmul.mubr.bf16.vlgmr.msra.gmra.mrb[0].mxu0 %v14264_v48 }
 0x119   :  { %1450 = vmatpush1.bf16.msra.mxu0 %v14267_v52  ;;  %1418 = vmatprep.mubr.bf16.mxu0 %v14273_v53 }
 0x11a   :  { %1451 = vmatprep.subr.bf16.mxu0 %v14272_v55 }
 0x11d   :  { %1452 = vmatpush1.bf16.msra.mxu0 %v14270_v57 }
 0x11e   :  { %1453 = vmatprep.subr.bf16.mxu0 %v14278_v58 }
 0x120   :  { %1419 = vmatmul.mubr.bf16.gmra.mrb[4].mxu0 %v14275_v59 }
 0x121   :  { %1454 = vmatpush1.bf16.msra.mxu0 %v14276_v62  ;;  %1428 = vmatprep.mubr.bf16.mxu0 %v14282_v63 }
 0x122   :  { %1455 = vmatprep.subr.bf16.mxu0 %v14281_v1 }
 0x125   :  { %1456 = vmatpush1.bf16.msra.mxu0 %v14279_v3 }
 0x126   :  { %1457 = vmatprep.subr.bf16.mxu0 %v14287_v4 }
 0x128   :  { %1429 = vmatmul.mubr.bf16.gmra.mrb[8].mxu0 %v14284_v5 }
 0x129   :  { %1458 = vmatpush1.bf16.msra.mxu0 %v14285_v8  ;;  %1438 = vmatprep.mubr.bf16.mxu0 %v14291_v9 }
 0x12a   :  { %1459 = vmatprep.subr.bf16.mxu0 %v14290_v11 }
 0x12d   :  { %1460 = vmatpush1.bf16.msra.mxu0 %v14288_v13 }
 0x12e   :  { %1461 = vmatprep.subr.bf16.mxu0 %v14296_v14 }
 0x130   :  { %1439 = vmatmul.mubr.bf16.gmra.mrb[12].mxu0 %v14293_v15 }
 0x131   :  { %1462 = vmatpush1.bf16.msra.mxu0 %v14294_v18  ;;  %1481 = vmatprep.mubr.bf16.mxu0 %v15937_v23 }
 0x132   :  { %1463 = vmatprep.subr.bf16.mxu0 %v14299_v19 }
 0x135   :  { %1464 = vmatpush1.bf16.msra.mxu0 %v14297_v21 }
 0x136   :  { %4102 = vmatprep.subr.bf16.mxu0 %v16369_v49  ;;  %v14302_v49 = vld [vmem:[%s20059_s1 + $0xb0] ss:$36 sps:$4 sm:$0xff]  }
 0x138   :  { %1482 = vmatmul.mubr.bf16.vlgmr.msra.gmra.mrb[0].mxu0 %v14300_v24 }
 0x139   :  { %1491 = vmatprep.mubr.bf16.mxu0 %v15937_v23  ;;  %4103 = vmatpush1.bf16.msra.mxu0 %v16374_v50  ;;  %v14303_v50 = vld [vmem:[%s20059_s1 + $0xf8] ss:$36 sps:$4 sm:$0xff]   ;;  %s13590_s1 = sld [smem:[#allocation5 + $0x2]] }
 0x13a   :  { %4104 = vmatprep.subr.bf16.mxu0 %v16379_v51  ;;  %v14336_v51 = vld [vmem:[%s20063_s5 + $0x1a0] ss:$8 sps:$4 sm:$0xff]  }
 0x13b   :  { %1887 = vmatpush1.bf16.msra.mxu1 %v14336_v51 }
 0x13d   :  { %4105 = vmatpush1.bf16.msra.mxu0 %v16392_v54  ;;  %v14337_v54 = vld [vmem:[%s20063_s5 + $0x1b4] ss:$8 sps:$4 sm:$0xff]  }
 0x13e   :  { %4106 = vmatprep.subr.bf16.mxu0 %v16401_v56  ;;  %v14339_v56 = vld [vmem:[%s20063_s5 + $0x1b0] ss:$8 sps:$4 sm:$0xff]   ;;  %1888 = vmatprep.subr.bf16.mxu1 %v14337_v54 }
 0x13f   :  { %1889 = vmatpush1.bf16.msra.mxu1 %v14339_v56 }
 0x140   :  { %1492 = vmatmul.mubr.bf16.gmra.mrb[4].mxu0 %v14301_v25 }
 0x141   :  { %1501 = vmatprep.mubr.bf16.mxu0 %v15937_v23  ;;  %4107 = vmatpush1.bf16.msra.mxu0 %v16415_v60  ;;  %v14340_v60 = vld [vmem:[%s20063_s5 + $0x1c4] ss:$8 sps:$4 sm:$0xff]  }
 0x142   :  { %4108 = vmatprep.subr.bf16.mxu0 %v16420_v61  ;;  %v14342_v61 = vld [vmem:[%s20063_s5 + $0x1c0] ss:$8 sps:$4 sm:$0xff]   ;;  %1890 = vmatprep.subr.bf16.mxu1 %v14340_v60 }
 0x143   :  { %1891 = vmatpush1.bf16.msra.mxu1 %v14342_v61 }
 0x145   :  { %4109 = vmatpush1.bf16.msra.mxu0 %v16433_v0  ;;  %v14343_v0 = vld [vmem:[%s20063_s5 + $0x1d4] ss:$8 sps:$4 sm:$0xff]  }
 0x146   :  { %4110 = vmatprep.subr.bf16.mxu0 %v16441_v2  ;;  %v14345_v2 = vld [vmem:[%s20063_s5 + $0x1d0] ss:$8 sps:$4 sm:$0xff]   ;;  %1892 = vmatprep.subr.bf16.mxu1 %v14343_v0 }
 0x147   :  { %1893 = vmatpush1.bf16.msra.mxu1 %v14345_v2 }
 0x148   :  { %1502 = vmatmul.mubr.bf16.gmra.mrb[8].mxu0 %v14302_v49 }
 0x149   :  { %1511 = vmatprep.mubr.bf16.mxu0 %v15937_v23  ;;  %4111 = vmatpush1.bf16.msra.mxu0 %v16457_v6  ;;  %v14346_v6 = vld [vmem:[%s20063_s5 + $0x1e4] ss:$8 sps:$4 sm:$0xff]  }
 0x14a   :  { %4112 = vmatprep.subr.bf16.mxu0 %v16462_v7  ;;  %v14348_v7 = vld [vmem:[%s20063_s5 + $0x1e0] ss:$8 sps:$4 sm:$0xff]   ;;  %1894 = vmatprep.subr.bf16.mxu1 %v14346_v6 }
 0x14b   :  { %1895 = vmatpush1.bf16.msra.mxu1 %v14348_v7 }
 0x14d   :  { %4113 = vmatpush1.bf16.msra.mxu0 %v16475_v10  ;;  %v14349_v10 = vld [vmem:[%s20063_s5 + $0x1f4] ss:$8 sps:$4 sm:$0xff]  }
 0x14e   :  { %4114 = vmatprep.subr.bf16.mxu0 %v16483_v12  ;;  %v14351_v12 = vld [vmem:[%s20063_s5 + $0x1f0] ss:$8 sps:$4 sm:$0xff]   ;;  %1896 = vmatprep.subr.bf16.mxu1 %v14349_v10 }
 0x14f   :  { %1897 = vmatpush1.bf16.msra.mxu1 %v14351_v12 }
 0x150   :  { %1512 = vmatmul.mubr.bf16.gmra.mrb[12].mxu0 %v14303_v50 }
 0x151   :  { %4115 = vmatpush1.bf16.msra.mxu0 %v16499_v16  ;;  %v14354_v16 = vld [vmem:[%s20063_s5 + $0x4] ss:$8 sps:$4 sm:$0xff]  }
 0x152   :  { %4116 = vmatprep.subr.bf16.mxu0 %v16504_v17  ;;  %2067 = vmatprep.subr.bf16.mxu1 %v14354_v16  ;;  %v1542_v17 = vlaneseq }
 0x155   :  { %4117 = vmatpush1.bf16.msra.mxu0 %v16517_v20  ;;  %v16753_v20 = vshrl.u32 %v1542_v17, 7 }
 0x156   :  { %4118 = vmatprep.subr.bf16.mxu0 %v16525_v22  ;;  %v1540_v22 = vld [vmem:[%s20062_s4] sm:$0x3] }
 0x159   :  { %4119 = vmatpush1.bf16.msra.mxu0 %v16541_v26  ;;  %v16759_v26 = vsub.s32 0, %v16753_v20 }
 0x15a   :  { %4120 = vmatprep.subr.bf16.mxu0 %v16546_v27  ;;  %v16762_v27 = vsub.s32 1, %v16753_v20 }
 0x15b   :  { %v16767_v29 = vrot.slane %v1540_v22, %v16759_v26 }
 0x15d   :  { %4121 = vmatpush1.bf16.msra.mxu0 %v16559_v30 }
 0x15e   :  { %4122 = vmatprep.subr.bf16.mxu0 %v16564_v31  ;;  %v16770_v31 = vrot.slane %v1540_v22, %v16762_v27 }
 0x161   :  { %4123 = vmatpush1.bf16.msra.mxu0 %v14336_v51 }
 0x162   :  { %4124 = vmatprep.subr.bf16.mxu0 %v14337_v54 }
 0x165   :  { %4125 = vmatpush1.bf16.msra.mxu0 %v14339_v56 }
 0x166   :  { %4126 = vmatprep.subr.bf16.mxu0 %v14340_v60 }
 0x169   :  { %4127 = vmatpush1.bf16.msra.mxu0 %v14342_v61 }
 0x16a   :  { %4128 = vmatprep.subr.bf16.mxu0 %v14343_v0 }
 0x16d   :  { %4129 = vmatpush1.bf16.msra.mxu0 %v14345_v2 }
 0x16e   :  { %4130 = vmatprep.subr.bf16.mxu0 %v14346_v6 }
 0x171   :  { %4131 = vmatpush1.bf16.msra.mxu0 %v14348_v7 }
 0x172   :  { %4132 = vmatprep.subr.bf16.mxu0 %v14349_v10 }
 0x175   :  { %4133 = vmatpush1.bf16.msra.mxu0 %v14351_v12 }
 0x176   :  { %4309 = vmatprep.subr.bf16.mxu0 %v14354_v16 }
 0x20b   :  { %v1483_v30 = vpop.f32.mrb[0].mxu0 }
 0x20c   :  { %v1524_v32 = vmul.f32 %v16764_v28, %v1483_v30  ;;  %v1485_v33 = vpop.f32.mrb[1].mxu0 }
 0x20d   :  { %v1525_v34 = vmul.f32 %v16764_v28, %v1485_v33  ;;  %v1487_v35 = vpop.f32.mrb[2].mxu0 }
 0x20e   :  { %v1552_v36 = vadd.f32 %v16767_v29, %v1524_v32  ;;  %v1526_v37 = vmul.f32 %v16764_v28, %v1487_v35  ;;  %v1489_v38 = vpop.f32.mrb[3].mxu0  ;;  %v16798_v32 = vld [vmem:[%s20063_s5] ss:$8 sps:$4 sm:$0xff]  }
 0x20f   :  { %v1553_v39 = vadd.f32 %v16770_v31, %v1525_v34  ;;  %v1527_v40 = vmul.f32 %v16764_v28, %v1489_v38 }
 0x210   :  { %v1584_v41 = vmul.f32 0.02, %v1552_v36  ;;  %v1554_v42 = vadd.f32 %v16767_v29, %v1526_v37  ;;  %vm1568_vm0 = vcmp.ge.f32.partialorder %v1552_v36, 0.0 }
 0x211   :  { %v1585_v43 = vmul.f32 0.02, %v1553_v39  ;;  %v1555_v44 = vadd.f32 %v16770_v31, %v1527_v40  ;;  %vm1569_vm1 = vcmp.ge.f32.partialorder %v1553_v39, 0.0 }
 0x212   :  { %vm1570_vm2 = vcmp.ge.f32.partialorder %v1554_v42, 0.0  ;;  %v1586_v45 = vmul.f32 0.02, %v1554_v42  ;;  %v1600_v48 = vsel %vm1568_vm0, %v1552_v36, %v1584_v41  ;;  %v16804_v36 = vld [vmem:[%s20063_s5 + $0x14] ss:$8 sps:$4 sm:$0xff]  }
 0x213   :  { %vm1571_vm3 = vcmp.ge.f32.partialorder %v1555_v44, 0.0  ;;  %v1587_v46 = vmul.f32 0.02, %v1555_v44  ;;  %v1493_v47 = vpop.f32.mrb[4].mxu0  ;;  %v1601_v57 = vsel %vm1569_vm1, %v1553_v39, %v1585_v43  ;;  %vm2886_vm1 = vcmask 1040384  }
 0x214   :  { %v1602_v52 = vsel %vm1570_vm2, %v1554_v42, %v1586_v45  ;;  %v1528_v53 = vmul.f32 %v16764_v28, %v1493_v47  ;;  %v1495_v55 = vpop.f32.mrb[5].mxu0  ;;  %v14355_v45 = vld [vmem:[%s20063_s5 + $0x10] ss:$8 sps:$4 sm:$0xff]  }
 0x215   :  { %v1616_v58 = vpack.c.bf16 %v1602_v52, %v1600_v48  ;;  %v1603_v59 = vsel %vm1571_vm3, %v1555_v44, %v1587_v46  ;;  %v1529_v62 = vmul.f32 %v16764_v28, %v1495_v55  ;;  %v1497_v63 = vpop.f32.mrb[6].mxu0  ;;  %v14360_v55 = vld [vmem:[%s20063_s5 + $0x24] ss:$8 sps:$4 sm:$0xff]  }
 0x216   :  { %v1617_v1 = vpack.c.bf16 %v1603_v59, %v1601_v57  ;;  %v1556_v3 = vadd.f32 %v16767_v29, %v1528_v53  ;;  %v1530_v4 = vmul.f32 %v16764_v28, %v1497_v63  ;;  %v1499_v5 = vpop.f32.mrb[7].mxu0 }
 0x217   :  { %1624 = vst [vmem:[#allocation2] sm:$0xff] %v1616_v58  ;;  %v1557_v8 = vadd.f32 %v16770_v31, %v1529_v62  ;;  %v1531_v9 = vmul.f32 %v16764_v28, %v1499_v5 }
 0x218   :  { %1625 = vst [vmem:[#allocation2 + $0x8] sm:$0xff] %v1617_v1  ;;  %v1588_v11 = vmul.f32 0.02, %v1556_v3  ;;  %v1558_v13 = vadd.f32 %v16767_v29, %v1530_v4  ;;  %vm1572_vm4 = vcmp.ge.f32.partialorder %v1556_v3, 0.0 }
 0x219   :  { %v1589_v14 = vmul.f32 0.02, %v1557_v8  ;;  %v1559_v15 = vadd.f32 %v16770_v31, %v1531_v9  ;;  %vm1573_vm5 = vcmp.ge.f32.partialorder %v1557_v8, 0.0 }
 0x21a   :  { %vm1574_vm6 = vcmp.ge.f32.partialorder %v1558_v13, 0.0  ;;  %v1590_v18 = vmul.f32 0.02, %v1558_v13  ;;  %v1604_v23 = vsel %vm1572_vm4, %v1556_v3, %v1588_v11 }
 0x21b   :  { %vm1575_vm7 = vcmp.ge.f32.partialorder %v1559_v15, 0.0  ;;  %v1591_v19 = vmul.f32 0.02, %v1559_v15  ;;  %v1503_v21 = vpop.f32.mrb[8].mxu0  ;;  %v1605_v50 = vsel %vm1573_vm5, %v1557_v8, %v1589_v14  ;;  %v14358_v8 = vld [vmem:[%s20063_s5 + $0x20] ss:$8 sps:$4 sm:$0xff]  }
 0x21c   :  { %v1606_v24 = vsel %vm1574_vm6, %v1558_v13, %v1590_v18  ;;  %v1532_v25 = vmul.f32 %v16764_v28, %v1503_v21  ;;  %v1505_v49 = vpop.f32.mrb[9].mxu0 }
 0x21d   :  { %v1618_v51 = vpack.c.bf16 %v1606_v24, %v1604_v23  ;;  %v1607_v54 = vsel %vm1575_vm7, %v1559_v15, %v1591_v19  ;;  %v1533_v56 = vmul.f32 %v16764_v28, %v1505_v49  ;;  %v1507_v60 = vpop.f32.mrb[10].mxu0  ;;  %v14363_v49 = vld [vmem:[%s20063_s5 + $0x34] ss:$8 sps:$4 sm:$0xff]  }
 0x21e   :  { %v1619_v61 = vpack.c.bf16 %v1607_v54, %v1605_v50  ;;  %v1560_v0 = vadd.f32 %v16767_v29, %v1532_v25  ;;  %v1534_v2 = vmul.f32 %v16764_v28, %v1507_v60  ;;  %v1509_v6 = vpop.f32.mrb[11].mxu0  ;;  %v1666_v7 = vld [vmem:[#allocation2] sm:$0xe]  ;;  %v3894_v1 = vld [vmem:[#allocation2] sm:$0xc0] }
 0x21f   :  { %1626 = vst [vmem:[#allocation2 + $0x10] sm:$0xff] %v1618_v51  ;;  %v1561_v10 = vadd.f32 %v16770_v31, %v1533_v56  ;;  %v1535_v12 = vmul.f32 %v16764_v28, %v1509_v6  ;;  %v1667_v16 = vld [vmem:[#allocation2 + $0x8] sm:$0xe]  ;;  %v1702_v35 = vrot.slane %v1666_v7, 1  ;;  %v3895_v57 = vld [vmem:[#allocation2 + $0x8] sm:$0xc0] }
 0x220   :  { %1627 = vst [vmem:[#allocation2 + $0x18] sm:$0xff] %v1619_v61  ;;  %v1592_v17 = vmul.f32 0.02, %v1560_v0  ;;  %v1562_v22 = vadd.f32 %v16767_v29, %v1534_v2  ;;  %v1703_v30 = vrot.slane %v1667_v16, 1  ;;  %vm1576_vm8 = vcmp.ge.f32.partialorder %v1560_v0, 0.0 }
 0x221   :  { %v1593_v33 = vmul.f32 0.02, %v1561_v10  ;;  %v1563_v34 = vadd.f32 %v16770_v31, %v1535_v12  ;;  %vm1577_vm9 = vcmp.ge.f32.partialorder %v1561_v10, 0.0  ;;  %v1633_v40 = vld [vmem:[#allocation2 + $0x8] sm:$0x7]  ;;  %v3937_v15 = vrot.slane %v3895_v57, 6 }
 0x222   :  { %vm1578_vm10 = vcmp.ge.f32.partialorder %v1562_v22, 0.0  ;;  %v1594_v37 = vmul.f32 0.02, %v1562_v22  ;;  %1898 = vmatprep.mubr.bf16.mxu1 %v1703_v30  ;;  %v1608_v41 = vsel %vm1576_vm8, %v1560_v0, %v1592_v17  ;;  %v3861_v19 = vld [vmem:[#allocation2 + $0x8] sm:$0xe0] }
 0x223   :  { %vm1579_vm11 = vcmp.ge.f32.partialorder %v1563_v34, 0.0  ;;  %v1595_v38 = vmul.f32 0.02, %v1563_v34  ;;  %v1513_v39 = vpop.f32.mrb[12].mxu0  ;;  %1899 = vmatmul.mubr.bf16.vlgmr.msra.gmra.mrb[0].mxu1 %v1702_v35  ;;  %v1609_v46 = vsel %vm1577_vm9, %v1561_v10, %v1593_v33  ;;  %v4146_v51 = vrot.slane %v3861_v19, 5 }
 0x224   :  { %v1610_v42 = vsel %vm1578_vm10, %v1562_v22, %v1594_v37  ;;  %v1536_v43 = vmul.f32 %v16764_v28, %v1513_v39  ;;  %2068 = vmatpush1.bf16.msra.mxu1 %v16798_v32  ;;  %v1515_v44 = vpop.f32.mrb[13].mxu0  ;;  %2099 = vmatprep.mubr.bf16.mxu1 %v1633_v40  ;;  %v14366_v2 = vld [vmem:[%s20063_s5 + $0x44] ss:$8 sps:$4 sm:$0xff]   ;;  %v14364_v7 = vld [vmem:[%s20063_s5 + $0x40] ss:$8 sps:$4 sm:$0xff]  }
 0x225   :  { %v1620_v47 = vpack.c.bf16 %v1610_v42, %v1608_v41  ;;  %v1611_v48 = vsel %vm1579_vm11, %v1563_v34, %v1595_v38  ;;  %v1537_v52 = vmul.f32 %v16764_v28, %v1515_v44  ;;  %v1517_v53 = vpop.f32.mrb[14].mxu0  ;;  %2069 = vmatprep.subr.bf16.mxu1 %v16804_v36  ;;  %v14369_v10 = vld [vmem:[%s20063_s5 + $0x54] ss:$8 sps:$4 sm:$0xff]   ;;  %v14367_v12 = vld [vmem:[%s20063_s5 + $0x50] ss:$8 sps:$4 sm:$0xff]  }
 0x226   :  { %v1621_v58 = vpack.c.bf16 %v1611_v48, %v1609_v46  ;;  %v1564_v59 = vadd.f32 %v16767_v29, %v1536_v43  ;;  %v1538_v62 = vmul.f32 %v16764_v28, %v1517_v53  ;;  %v1519_v63 = vpop.f32.mrb[15].mxu0  ;;  %v3896_v3 = vld [vmem:[#allocation2 + $0x10] sm:$0x1]  ;;  %v14372_v16 = vld [vmem:[%s20063_s5 + $0x64] ss:$8 sps:$4 sm:$0xff]  }
 0x227   :  { %1628 = vst [vmem:[#allocation2 + $0x20] sm:$0xff] %v1620_v47  ;;  %v1565_v4 = vadd.f32 %v16770_v31, %v1537_v52  ;;  %v1539_v5 = vmul.f32 %v16764_v28, %v1519_v63  ;;  %v3897_v9 = vld [vmem:[#allocation2 + $0x18] sm:$0x1]  ;;  %v3935_v11 = vrot.slane %v3896_v3, 6  ;;  %v3934_v28 = vrot.slane %v3894_v1, 6 }
 0x228   :  { %1629 = vst [vmem:[#allocation2 + $0x28] sm:$0xff] %v1621_v58  ;;  %v1596_v13 = vmul.f32 0.02, %v1564_v59  ;;  %v1566_v14 = vadd.f32 %v16767_v29, %v1538_v62  ;;  %2070 = vmatpush1.bf16.msra.mxu1 %v14355_v45  ;;  %v3938_v18 = vrot.slane %v3897_v9, 6  ;;  %vm1580_vm13 = vcmp.ge.f32.partialorder %v1564_v59, 0.0 }
 0x229   :  { %v1597_v21 = vmul.f32 0.02, %v1565_v4  ;;  %v1567_v23 = vadd.f32 %v16770_v31, %v1539_v5  ;;  %2071 = vmatprep.subr.bf16.mxu1 %v14360_v55  ;;  %vm1581_vm14 = vcmp.ge.f32.partialorder %v1565_v4, 0.0  ;;  %v3936_v50 = vsel %vm2634_vm12, %v3934_v28, %v3935_v11  ;;  %v14361_v31 = vld [vmem:[%s20063_s5 + $0x30] ss:$8 sps:$4 sm:$0xff]  }
 0x22a   :  { %vm1582_vm15 = vcmp.ge.f32.partialorder %v1566_v14, 0.0  ;;  %v1598_v24 = vmul.f32 0.02, %v1566_v14  ;;  %v3939_v25 = vsel %vm2634_vm12, %v3937_v15, %v3938_v18  ;;  %v1612_v54 = vsel %vm1580_vm13, %v1564_v59, %v1596_v13  ;;  %v14370_v17 = vld [vmem:[%s20063_s5 + $0x60] ss:$8 sps:$4 sm:$0xff]  }
 0x22b   :  { %vm1583_vm0 = vcmp.ge.f32.partialorder %v1567_v23, 0.0  ;;  %v1599_v29 = vmul.f32 0.02, %v1567_v23  ;;  %4134 = vmatprep.mubr.bf16.mxu0 %v3939_v25  ;;  %v1613_v60 = vsel %vm1581_vm14, %v1565_v4, %v1597_v21  ;;  %v14375_v22 = vld [vmem:[%s20063_s5 + $0x74] ss:$8 sps:$4 sm:$0xff]  }
 0x22c   :  { %v1614_v56 = vsel %vm1582_vm15, %v1566_v14, %v1598_v24  ;;  %2072 = vmatpush1.bf16.msra.mxu1 %v14358_v8  ;;  %4135 = vmatmul.mubr.bf16.vlgmr.msra.gmra.mrb[16].mxu0 %v3936_v50  ;;  %v14373_v30 = vld [vmem:[%s20063_s5 + $0x70] ss:$8 sps:$4 sm:$0xff]   ;;  %v14376_v33 = vld [vmem:[%s20063_s5 + $0x80] ss:$8 sps:$4 sm:$0xff]   ;;  %v14381_v34 = vld [vmem:[%s20063_s5 + $0x94] ss:$8 sps:$4 sm:$0xff]  }
 0x22d   :  { %v1622_v61 = vpack.c.bf16 %v1614_v56, %v1612_v54  ;;  %v1615_v0 = vsel %vm1583_vm0, %v1567_v23, %v1599_v29  ;;  %4310 = vmatpush1.bf16.msra.mxu0 %v16798_v32  ;;  %4341 = vmatprep.mubr.bf16.mxu0 %v4146_v51  ;;  %v14378_v32 = vld [vmem:[%s20063_s5 + $0x84] ss:$8 sps:$4 sm:$0xff]   ;;  %v14379_v35 = vld [vmem:[%s20063_s5 + $0x90] ss:$8 sps:$4 sm:$0xff]   ;;  %v14382_v37 = vld [vmem:[%s20063_s5 + $0xa0] ss:$8 sps:$4 sm:$0xff]  }
 0x22e   :  { %v1623_v6 = vpack.c.bf16 %v1615_v0, %v1613_v60  ;;  %2073 = vmatprep.subr.bf16.mxu1 %v14363_v49  ;;  %4311 = vmatprep.subr.bf16.mxu0 %v16804_v36  ;;  %v14384_v36 = vld [vmem:[%s20063_s5 + $0xa4] ss:$8 sps:$4 sm:$0xff]   ;;  %v14387_v38 = vld [vmem:[%s20063_s5 + $0xb4] ss:$8 sps:$4 sm:$0xff]   ;;  %v14385_v39 = vld [vmem:[%s20063_s5 + $0xb0] ss:$8 sps:$4 sm:$0xff]  }
 0x22f   :  { %1630 = vst [vmem:[#allocation2 + $0x30] sm:$0xff] %v1622_v61  ;;  %v14390_v40 = vld [vmem:[%s20063_s5 + $0xc4] ss:$8 sps:$4 sm:$0xff]   ;;  %v14388_v41 = vld [vmem:[%s20063_s5 + $0xc0] ss:$8 sps:$4 sm:$0xff]   ;;  %vm12227_vm0 = vcmask 1024  }
 0x230   :  { %1631 = vst [vmem:[#allocation2 + $0x38] sm:$0xff] %v1623_v6  ;;  %2074 = vmatpush1.bf16.msra.mxu1 %v14361_v31  ;;  %v14393_v42 = vld [vmem:[%s20063_s5 + $0xd4] ss:$8 sps:$4 sm:$0xff]   ;;  %v14391_v43 = vld [vmem:[%s20063_s5 + $0xd0] ss:$8 sps:$4 sm:$0xff]  }
 0x231   :  { %4312 = vmatpush1.bf16.msra.mxu0 %v14355_v45  ;;  %2075 = vmatprep.subr.bf16.mxu1 %v14366_v2  ;;  %v14396_v44 = vld [vmem:[%s20063_s5 + $0xe4] ss:$8 sps:$4 sm:$0xff]   ;;  %v14394_v45 = vld [vmem:[%s20063_s5 + $0xe0] ss:$8 sps:$4 sm:$0xff]   ;;  %v14399_v46 = vld [vmem:[%s20063_s5 + $0xf4] ss:$8 sps:$4 sm:$0xff]  }
 0x232   :  { %4313 = vmatprep.subr.bf16.mxu0 %v14360_v55  ;;  %v14397_v47 = vld [vmem:[%s20063_s5 + $0xf0] ss:$8 sps:$4 sm:$0xff]   ;;  %v14402_v48 = vld [vmem:[%s20063_s5 + $0x204] ss:$8 sps:$4 sm:$0xff]   ;;  %v14400_v53 = vld [vmem:[%s20063_s5 + $0x200] ss:$8 sps:$4 sm:$0xff]  }
 0x233   :  { %v2109_v52 = vld [vmem:[#allocation2 + $0x8] sm:$0x1c]  ;;  %v14405_v55 = vld [vmem:[%s20063_s5 + $0x214] ss:$8 sps:$4 sm:$0xff]   ;;  %v1632_v57 = vld [vmem:[#allocation2] sm:$0x7] }
 0x234   :  { %2076 = vmatpush1.bf16.msra.mxu1 %v14364_v7  ;;  %v2145_v58 = vrot.slane %v2109_v52, 2  ;;  %v14403_v59 = vld [vmem:[%s20063_s5 + $0x210] ss:$8 sps:$4 sm:$0xff]   ;;  %v14408_v62 = vld [vmem:[%s20063_s5 + $0x224] ss:$8 sps:$4 sm:$0xff]  }
 0x235   :  { %4314 = vmatpush1.bf16.msra.mxu0 %v14358_v8  ;;  %2077 = vmatprep.subr.bf16.mxu1 %v14369_v10  ;;  %v4353_v63 = vld [vmem:[#allocation2 + $0x18] sm:$0x3]  ;;  %v3860_v1 = vld [vmem:[#allocation2] sm:$0xe0]  ;;  %v4351_v3 = vld [vmem:[#allocation2 + $0x8] sm:$0x80] }
 0x236   :  { %4315 = vmatprep.subr.bf16.mxu0 %v14363_v49  ;;  %v14406_v4 = vld [vmem:[%s20063_s5 + $0x220] ss:$8 sps:$4 sm:$0xff]   ;;  %v4394_v5 = vrot.slane %v4353_v63, 7  ;;  %v4145_v8 = vrot.slane %v3860_v1, 5  ;;  %v4393_v9 = vrot.slane %v4351_v3, 7 }
 0x237   :  { %v14411_v11 = vld [vmem:[%s20063_s5 + $0x234] ss:$8 sps:$4 sm:$0xff]   ;;  %v14409_v14 = vld [vmem:[%s20063_s5 + $0x230] ss:$8 sps:$4 sm:$0xff]   ;;  %v14414_v15 = vld [vmem:[%s20063_s5 + $0x244] ss:$8 sps:$4 sm:$0xff]  }
 0x238   :  { %2078 = vmatpush1.bf16.msra.mxu1 %v14367_v12  ;;  %v4395_v13 = vsel %vm2886_vm1, %v4393_v9, %v4394_v5  ;;  %v14412_v18 = vld [vmem:[%s20063_s5 + $0x240] ss:$8 sps:$4 sm:$0xff]   ;;  %v14417_v19 = vld [vmem:[%s20063_s5 + $0x254] ss:$8 sps:$4 sm:$0xff]   ;;  %v14415_v21 = vld [vmem:[%s20063_s5 + $0x250] ss:$8 sps:$4 sm:$0xff]  }
 0x239   :  { %4316 = vmatpush1.bf16.msra.mxu0 %v14361_v31  ;;  %2079 = vmatprep.subr.bf16.mxu1 %v14372_v16  ;;  %v14420_v23 = vld [vmem:[%s20063_s5 + $0x264] ss:$8 sps:$4 sm:$0xff]   ;;  %v14418_v28 = vld [vmem:[%s20063_s5 + $0x260] ss:$8 sps:$4 sm:$0xff]   ;;  %v14423_v24 = vld [vmem:[%s20063_s5 + $0x274] ss:$8 sps:$4 sm:$0xff]  }
 0x23a   :  { %4317 = vmatprep.subr.bf16.mxu0 %v14366_v2  ;;  %v14421_v25 = vld [vmem:[%s20063_s5 + $0x270] ss:$8 sps:$4 sm:$0xff]   ;;  %v14426_v49 = vld [vmem:[%s20063_s5 + $0x284] ss:$8 sps:$4 sm:$0xff]   ;;  %v14424_v29 = vld [vmem:[%s20063_s5 + $0x280] ss:$8 sps:$4 sm:$0xff]  }
 0x23b   :  { %v14429_v50 = vld [vmem:[%s20063_s5 + $0x294] ss:$8 sps:$4 sm:$0xff]   ;;  %v14427_v51 = vld [vmem:[%s20063_s5 + $0x290] ss:$8 sps:$4 sm:$0xff]   ;;  %v14432_v54 = vld [vmem:[%s20063_s5 + $0x2a4] ss:$8 sps:$4 sm:$0xff]  }
 0x23c   :  { %2080 = vmatpush1.bf16.msra.mxu1 %v14370_v17  ;;  %v14430_v56 = vld [vmem:[%s20063_s5 + $0x2a0] ss:$8 sps:$4 sm:$0xff]   ;;  %v14435_v31 = vld [vmem:[%s20063_s5 + $0x2b4] ss:$8 sps:$4 sm:$0xff]   ;;  %v14433_v60 = vld [vmem:[%s20063_s5 + $0x2b0] ss:$8 sps:$4 sm:$0xff]  }
 0x23d   :  { %4318 = vmatpush1.bf16.msra.mxu0 %v14364_v7  ;;  %2081 = vmatprep.subr.bf16.mxu1 %v14375_v22  ;;  %v14438_v61 = vld [vmem:[%s20063_s5 + $0x2c4] ss:$8 sps:$4 sm:$0xff]   ;;  %v14436_v0 = vld [vmem:[%s20063_s5 + $0x2c0] ss:$8 sps:$4 sm:$0xff]   ;;  %v14441_v2 = vld [vmem:[%s20063_s5 + $0x2d4] ss:$8 sps:$4 sm:$0xff]  }
 0x23e   :  { %4319 = vmatprep.subr.bf16.mxu0 %v14369_v10  ;;  %v14439_v6 = vld [vmem:[%s20063_s5 + $0x2d0] ss:$8 sps:$4 sm:$0xff]   ;;  %v14444_v7 = vld [vmem:[%s20063_s5 + $0x2e4] ss:$8 sps:$4 sm:$0xff]   ;;  %v14442_v10 = vld [vmem:[%s20063_s5 + $0x2e0] ss:$8 sps:$4 sm:$0xff]  }
 0x23f   :  { %v14460_v52 = vld [vmem:[%s20063_s5 + $0x340] ss:$8 sps:$4 sm:$0xff]   ;;  %v14474_v63 = vld [vmem:[%s20063_s5 + $0x384] ss:$8 sps:$4 sm:$0xff]   ;;  %v14477_v3 = vld [vmem:[%s20063_s5 + $0x394] ss:$8 sps:$4 sm:$0xff]  }
 0x240   :  { %2082 = vmatpush1.bf16.msra.mxu1 %v14373_v30  ;;  %v14472_v1 = vld [vmem:[%s20063_s5 + $0x380] ss:$8 sps:$4 sm:$0xff]   ;;  %v14480_v5 = vld [vmem:[%s20063_s5 + $0x3a4] ss:$8 sps:$4 sm:$0xff]   ;;  %v14483_v9 = vld [vmem:[%s20063_s5 + $0x3b4] ss:$8 sps:$4 sm:$0xff]  }
 0x241   :  { %4320 = vmatpush1.bf16.msra.mxu0 %v14367_v12  ;;  %2083 = vmatprep.subr.bf16.mxu1 %v14378_v32  ;;  %v14447_v12 = vld [vmem:[%s20063_s5 + $0x2f4] ss:$8 sps:$4 sm:$0xff]  }
 0x242   :  { %4321 = vmatprep.subr.bf16.mxu0 %v14372_v16  ;;  %v14445_v16 = vld [vmem:[%s20063_s5 + $0x2f0] ss:$8 sps:$4 sm:$0xff]  }
 0x244   :  { %2084 = vmatpush1.bf16.msra.mxu1 %v14376_v33 }
 0x245   :  { %4322 = vmatpush1.bf16.msra.mxu0 %v14370_v17  ;;  %2085 = vmatprep.subr.bf16.mxu1 %v14381_v34  ;;  %v14450_v17 = vld [vmem:[%s20063_s5 + $0x304] ss:$8 sps:$4 sm:$0xff]  }
 0x246   :  { %4323 = vmatprep.subr.bf16.mxu0 %v14375_v22  ;;  %v2108_v22 = vld [vmem:[#allocation2] sm:$0x1c] }
 0x248   :  { %2086 = vmatpush1.bf16.msra.mxu1 %v14379_v35 }
 0x249   :  { %4324 = vmatpush1.bf16.msra.mxu0 %v14373_v30  ;;  %2087 = vmatprep.subr.bf16.mxu1 %v14384_v36  ;;  %v2352_v30 = vld [vmem:[#allocation2 + $0x8] sm:$0xe0] }
 0x24a   :  { %4325 = vmatprep.subr.bf16.mxu0 %v14378_v32  ;;  %v14448_v32 = vld [vmem:[%s20063_s5 + $0x300] ss:$8 sps:$4 sm:$0xff]  }
 0x24c   :  { %2088 = vmatpush1.bf16.msra.mxu1 %v14382_v37 }
 0x24d   :  { %4326 = vmatpush1.bf16.msra.mxu0 %v14376_v33  ;;  %2089 = vmatprep.subr.bf16.mxu1 %v14387_v38  ;;  %v2144_v33 = vrot.slane %v2108_v22, 2  ;;  %v14510_v22 = vld [vmem:[%s20063_s5 + $0x444] ss:$8 sps:$4 sm:$0xff]  }
 0x24e   :  { %4327 = vmatprep.subr.bf16.mxu0 %v14381_v34  ;;  %v14453_v34 = vld [vmem:[%s20063_s5 + $0x314] ss:$8 sps:$4 sm:$0xff]  }
 0x250   :  { %2090 = vmatpush1.bf16.msra.mxu1 %v14385_v39 }
 0x251   :  { %4328 = vmatpush1.bf16.msra.mxu0 %v14379_v35  ;;  %2091 = vmatprep.subr.bf16.mxu1 %v14390_v40  ;;  %v2388_v35 = vrot.slane %v2352_v30, 5  ;;  %v14508_v30 = vld [vmem:[%s20063_s5 + $0x440] ss:$8 sps:$4 sm:$0xff]  }
 0x252   :  { %4329 = vmatprep.subr.bf16.mxu0 %v14384_v36  ;;  %v14451_v36 = vld [vmem:[%s20063_s5 + $0x310] ss:$8 sps:$4 sm:$0xff]  }
 0x254   :  { %2092 = vmatpush1.bf16.msra.mxu1 %v14388_v41 }
 0x255   :  { %4330 = vmatpush1.bf16.msra.mxu0 %v14382_v37  ;;  %2093 = vmatprep.subr.bf16.mxu1 %v14393_v42  ;;  %v4352_v37 = vld [vmem:[#allocation2 + $0x10] sm:$0x3] }
 0x256   :  { %4331 = vmatprep.subr.bf16.mxu0 %v14387_v38  ;;  %v14456_v38 = vld [vmem:[%s20063_s5 + $0x324] ss:$8 sps:$4 sm:$0xff]  }
 0x258   :  { %2094 = vmatpush1.bf16.msra.mxu1 %v14391_v43 }
 0x259   :  { %4332 = vmatpush1.bf16.msra.mxu0 %v14385_v39  ;;  %2095 = vmatprep.subr.bf16.mxu1 %v14396_v44  ;;  %v4350_v39 = vld [vmem:[#allocation2] sm:$0x80] }
 0x25a   :  { %4333 = vmatprep.subr.bf16.mxu0 %v14390_v40  ;;  %v4391_v40 = vrot.slane %v4352_v37, 7  ;;  %v14517_v37 = vld [vmem:[%s20063_s5 + $0x470] ss:$8 sps:$4 sm:$0xff]  }
 0x25c   :  { %2096 = vmatpush1.bf16.msra.mxu1 %v14394_v45 }
 0x25d   :  { %4334 = vmatpush1.bf16.msra.mxu0 %v14388_v41  ;;  %2097 = vmatprep.subr.bf16.mxu1 %v14399_v46  ;;  %v14454_v41 = vld [vmem:[%s20063_s5 + $0x320] ss:$8 sps:$4 sm:$0xff]  }
 0x25e   :  { %4335 = vmatprep.subr.bf16.mxu0 %v14393_v42  ;;  %v4602_v42 = vld [vmem:[#allocation2 + $0x18] sm:$0x1c] }
 0x260   :  { %2098 = vmatpush1.bf16.msra.mxu1 %v14397_v47 }
 0x261   :  { %4336 = vmatpush1.bf16.msra.mxu0 %v14391_v43  ;;  %2308 = vmatprep.subr.bf16.mxu1 %v14402_v48  ;;  %v4390_v43 = vrot.slane %v4350_v39, 7  ;;  %v14520_v39 = vld [vmem:[%s20063_s5 + $0x480] ss:$8 sps:$4 sm:$0xff]  }
 0x262   :  { %4337 = vmatprep.subr.bf16.mxu0 %v14396_v44  ;;  %v14459_v44 = vld [vmem:[%s20063_s5 + $0x334] ss:$8 sps:$4 sm:$0xff]  }
 0x263   :  { %2100 = vmatmul.mubr.bf16.vlgmr.msra.gmra.mrb[0].mxu1 %v1632_v57  ;;  %v14468_v57 = vld [vmem:[%s20063_s5 + $0x364] ss:$8 sps:$4 sm:$0xff]  }
 0x264   :  { %2309 = vmatpush1.bf16.msra.mxu1 %v14400_v53  ;;  %2340 = vmatprep.mubr.bf16.mxu1 %v2145_v58  ;;  %v14466_v58 = vld [vmem:[%s20063_s5 + $0x360] ss:$8 sps:$4 sm:$0xff]  }
 0x265   :  { %4338 = vmatpush1.bf16.msra.mxu0 %v14394_v45  ;;  %2310 = vmatprep.subr.bf16.mxu1 %v14405_v55  ;;  %v4392_v45 = vsel %vm2886_vm1, %v4390_v43, %v4391_v40  ;;  %v14525_v40 = vld [vmem:[%s20063_s5 + $0x494] ss:$8 sps:$4 sm:$0xff]   ;;  %v14526_v43 = vld [vmem:[%s20063_s5 + $0x4a0] ss:$8 sps:$4 sm:$0xff]  }
 0x266   :  { %4339 = vmatprep.subr.bf16.mxu0 %v14399_v46  ;;  %v4638_v46 = vrot.slane %v4602_v42, 2  ;;  %v14528_v42 = vld [vmem:[%s20063_s5 + $0x4a4] ss:$8 sps:$4 sm:$0xff]  }
 0x268   :  { %2311 = vmatpush1.bf16.msra.mxu1 %v14403_v59 }
 0x269   :  { %4340 = vmatpush1.bf16.msra.mxu0 %v14397_v47  ;;  %2312 = vmatprep.subr.bf16.mxu1 %v14408_v62  ;;  %v14457_v47 = vld [vmem:[%s20063_s5 + $0x330] ss:$8 sps:$4 sm:$0xff]  }
 0x26a   :  { %4558 = vmatprep.subr.bf16.mxu0 %v14402_v48  ;;  %v14462_v48 = vld [vmem:[%s20063_s5 + $0x344] ss:$8 sps:$4 sm:$0xff]  }
 0x26c   :  { %2313 = vmatpush1.bf16.msra.mxu1 %v14406_v4  ;;  %4342 = vmatmul.mubr.bf16.vlgmr.msra.gmra.mrb[16].mxu0 %v4145_v8  ;;  %v14478_v8 = vld [vmem:[%s20063_s5 + $0x3a0] ss:$8 sps:$4 sm:$0xff]  }
 0x26d   :  { %4559 = vmatpush1.bf16.msra.mxu0 %v14400_v53  ;;  %4590 = vmatprep.mubr.bf16.mxu0 %v4395_v13  ;;  %v14465_v53 = vld [vmem:[%s20063_s5 + $0x354] ss:$8 sps:$4 sm:$0xff]   ;;  %v14486_v13 = vld [vmem:[%s20063_s5 + $0x3c4] ss:$8 sps:$4 sm:$0xff]  }
 0x26e   :  { %2314 = vmatprep.subr.bf16.mxu1 %v14411_v11  ;;  %4560 = vmatprep.subr.bf16.mxu0 %v14405_v55  ;;  %v14463_v55 = vld [vmem:[%s20063_s5 + $0x350] ss:$8 sps:$4 sm:$0xff]  }
 0x270   :  { %2315 = vmatpush1.bf16.msra.mxu1 %v14409_v14 }
 0x271   :  { %4561 = vmatpush1.bf16.msra.mxu0 %v14403_v59  ;;  %2316 = vmatprep.subr.bf16.mxu1 %v14414_v15  ;;  %v14471_v59 = vld [vmem:[%s20063_s5 + $0x374] ss:$8 sps:$4 sm:$0xff]  }
 0x272   :  { %4562 = vmatprep.subr.bf16.mxu0 %v14408_v62  ;;  %v14469_v62 = vld [vmem:[%s20063_s5 + $0x370] ss:$8 sps:$4 sm:$0xff]  }
 0x274   :  { %2317 = vmatpush1.bf16.msra.mxu1 %v14412_v18 }
 0x275   :  { %4563 = vmatpush1.bf16.msra.mxu0 %v14406_v4  ;;  %2318 = vmatprep.subr.bf16.mxu1 %v14417_v19  ;;  %v14475_v4 = vld [vmem:[%s20063_s5 + $0x390] ss:$8 sps:$4 sm:$0xff]  }
 0x276   :  { %4564 = vmatprep.subr.bf16.mxu0 %v14411_v11  ;;  %v14481_v11 = vld [vmem:[%s20063_s5 + $0x3b0] ss:$8 sps:$4 sm:$0xff]  }
 0x278   :  { %2319 = vmatpush1.bf16.msra.mxu1 %v14415_v21 }
 0x279   :  { %4565 = vmatpush1.bf16.msra.mxu0 %v14409_v14  ;;  %2320 = vmatprep.subr.bf16.mxu1 %v14420_v23  ;;  %v14484_v14 = vld [vmem:[%s20063_s5 + $0x3c0] ss:$8 sps:$4 sm:$0xff]  }
 0x27a   :  { %4566 = vmatprep.subr.bf16.mxu0 %v14414_v15  ;;  %v14489_v15 = vld [vmem:[%s20063_s5 + $0x3d4] ss:$8 sps:$4 sm:$0xff]  }
 0x27c   :  { %2321 = vmatpush1.bf16.msra.mxu1 %v14418_v28 }
 0x27d   :  { %4567 = vmatpush1.bf16.msra.mxu0 %v14412_v18  ;;  %2322 = vmatprep.subr.bf16.mxu1 %v14423_v24  ;;  %v14487_v18 = vld [vmem:[%s20063_s5 + $0x3d0] ss:$8 sps:$4 sm:$0xff]  }
 0x27e   :  { %4568 = vmatprep.subr.bf16.mxu0 %v14417_v19  ;;  %v14492_v19 = vld [vmem:[%s20063_s5 + $0x3e4] ss:$8 sps:$4 sm:$0xff]  }
 0x280   :  { %2323 = vmatpush1.bf16.msra.mxu1 %v14421_v25 }
 0x281   :  { %4569 = vmatpush1.bf16.msra.mxu0 %v14415_v21  ;;  %2324 = vmatprep.subr.bf16.mxu1 %v14426_v49  ;;  %v14490_v21 = vld [vmem:[%s20063_s5 + $0x3e0] ss:$8 sps:$4 sm:$0xff]  }
 0x282   :  { %4570 = vmatprep.subr.bf16.mxu0 %v14420_v23  ;;  %v14495_v23 = vld [vmem:[%s20063_s5 + $0x3f4] ss:$8 sps:$4 sm:$0xff]  }
 0x284   :  { %2325 = vmatpush1.bf16.msra.mxu1 %v14424_v29 }
 0x285   :  { %4571 = vmatpush1.bf16.msra.mxu0 %v14418_v28  ;;  %2326 = vmatprep.subr.bf16.mxu1 %v14429_v50  ;;  %v14493_v28 = vld [vmem:[%s20063_s5 + $0x3f0] ss:$8 sps:$4 sm:$0xff]  }
 0x286   :  { %4572 = vmatprep.subr.bf16.mxu0 %v14423_v24  ;;  %v2597_v24 = vld [vmem:[#allocation2 + $0x18] sm:$0x1] }
 0x288   :  { %2327 = vmatpush1.bf16.msra.mxu1 %v14427_v51 }
 0x289   :  { %4573 = vmatpush1.bf16.msra.mxu0 %v14421_v25  ;;  %2328 = vmatprep.subr.bf16.mxu1 %v14432_v54  ;;  %v14498_v25 = vld [vmem:[%s20063_s5 + $0x404] ss:$8 sps:$4 sm:$0xff]  }
 0x28a   :  { %4574 = vmatprep.subr.bf16.mxu0 %v14426_v49  ;;  %v2351_v49 = vld [vmem:[#allocation2] sm:$0xe0] }
 0x28c   :  { %2329 = vmatpush1.bf16.msra.mxu1 %v14430_v56 }
 0x28d   :  { %4575 = vmatpush1.bf16.msra.mxu0 %v14424_v29  ;;  %2330 = vmatprep.subr.bf16.mxu1 %v14435_v31  ;;  %v2595_v29 = vld [vmem:[#allocation2 + $0x8] sm:$0xc0] }
 0x28e   :  { %4576 = vmatprep.subr.bf16.mxu0 %v14429_v50  ;;  %v2639_v50 = vrot.slane %v2597_v24, 6 }
 0x290   :  { %2331 = vmatpush1.bf16.msra.mxu1 %v14433_v60 }
 0x291   :  { %4577 = vmatpush1.bf16.msra.mxu0 %v14427_v51  ;;  %2332 = vmatprep.subr.bf16.mxu1 %v14438_v61  ;;  %v14496_v51 = vld [vmem:[%s20063_s5 + $0x400] ss:$8 sps:$4 sm:$0xff]  }
 0x292   :  { %4578 = vmatprep.subr.bf16.mxu0 %v14432_v54  ;;  %v2387_v54 = vrot.slane %v2351_v49, 5 }
 0x294   :  { %2333 = vmatpush1.bf16.msra.mxu1 %v14436_v0 }
 0x295   :  { %4579 = vmatpush1.bf16.msra.mxu0 %v14430_v56  ;;  %2334 = vmatprep.subr.bf16.mxu1 %v14441_v2  ;;  %v2638_v56 = vrot.slane %v2595_v29, 6  ;;  %v14553_v29 = vld [vmem:[%s20063_s5 + $0x530] ss:$8 sps:$4 sm:$0xff]  }
 0x296   :  { %4580 = vmatprep.subr.bf16.mxu0 %v14435_v31  ;;  %v14501_v31 = vld [vmem:[%s20063_s5 + $0x414] ss:$8 sps:$4 sm:$0xff]  }
 0x298   :  { %2335 = vmatpush1.bf16.msra.mxu1 %v14439_v6 }
 0x299   :  { %4581 = vmatpush1.bf16.msra.mxu0 %v14433_v60  ;;  %2336 = vmatprep.subr.bf16.mxu1 %v14444_v7  ;;  %v2640_v60 = vsel %vm2634_vm12, %v2638_v56, %v2639_v50  ;;  %v14558_v50 = vld [vmem:[%s20063_s5 + $0x544] ss:$8 sps:$4 sm:$0xff]   ;;  %v14559_v56 = vld [vmem:[%s20063_s5 + $0x550] ss:$8 sps:$4 sm:$0xff]  }
 0x29a   :  { %4582 = vmatprep.subr.bf16.mxu0 %v14438_v61  ;;  %v14499_v61 = vld [vmem:[%s20063_s5 + $0x410] ss:$8 sps:$4 sm:$0xff]  }
 0x29c   :  { %2337 = vmatpush1.bf16.msra.mxu1 %v14442_v10 }
 0x29d   :  { %4583 = vmatpush1.bf16.msra.mxu0 %v14436_v0  ;;  %2338 = vmatprep.subr.bf16.mxu1 %v14447_v12  ;;  %v14504_v0 = vld [vmem:[%s20063_s5 + $0x424] ss:$8 sps:$4 sm:$0xff]  }
 0x29e   :  { %4584 = vmatprep.subr.bf16.mxu0 %v14441_v2  ;;  %v4601_v2 = vld [vmem:[#allocation2 + $0x10] sm:$0x1c] }
 0x2a0   :  { %2339 = vmatpush1.bf16.msra.mxu1 %v14445_v16 }
 0x2a1   :  { %4585 = vmatpush1.bf16.msra.mxu0 %v14439_v6  ;;  %2551 = vmatprep.subr.bf16.mxu1 %v14450_v17  ;;  %v14502_v6 = vld [vmem:[%s20063_s5 + $0x420] ss:$8 sps:$4 sm:$0xff]  }
 0x2a2   :  { %4586 = vmatprep.subr.bf16.mxu0 %v14444_v7  ;;  %v4845_v7 = vld [vmem:[#allocation2 + $0x18] sm:$0x38] }
 0x2a3   :  { %2341 = vmatmul.mubr.bf16.vlgmr.msra.gmra.mrb[0].mxu1 %v2144_v33  ;;  %v14511_v33 = vld [vmem:[%s20063_s5 + $0x450] ss:$8 sps:$4 sm:$0xff]  }
 0x2a4   :  { %2552 = vmatpush1.bf16.msra.mxu1 %v14448_v32  ;;  %2583 = vmatprep.mubr.bf16.mxu1 %v2388_v35  ;;  %v14514_v35 = vld [vmem:[%s20063_s5 + $0x460] ss:$8 sps:$4 sm:$0xff]  }
 0x2a5   :  { %4587 = vmatpush1.bf16.msra.mxu0 %v14442_v10  ;;  %2553 = vmatprep.subr.bf16.mxu1 %v14453_v34  ;;  %v4637_v10 = vrot.slane %v4601_v2, 2  ;;  %v14570_v2 = vld [vmem:[%s20063_s5 + $0x584] ss:$8 sps:$4 sm:$0xff]  }
 0x2a6   :  { %4588 = vmatprep.subr.bf16.mxu0 %v14447_v12  ;;  %v14507_v12 = vld [vmem:[%s20063_s5 + $0x434] ss:$8 sps:$4 sm:$0xff]  }
 0x2a8   :  { %2554 = vmatpush1.bf16.msra.mxu1 %v14451_v36 }
 0x2a9   :  { %4589 = vmatpush1.bf16.msra.mxu0 %v14445_v16  ;;  %2555 = vmatprep.subr.bf16.mxu1 %v14456_v38  ;;  %v4881_v16 = vrot.slane %v4845_v7, 3  ;;  %v14573_v7 = vld [vmem:[%s20063_s5 + $0x594] ss:$8 sps:$4 sm:$0xff]  }
 0x2aa   :  { %4801 = vmatprep.subr.bf16.mxu0 %v14450_v17  ;;  %v14505_v17 = vld [vmem:[%s20063_s5 + $0x430] ss:$8 sps:$4 sm:$0xff]  }
 0x2ac   :  { %2556 = vmatpush1.bf16.msra.mxu1 %v14454_v41  ;;  %4591 = vmatmul.mubr.bf16.vlgmr.msra.gmra.mrb[16].mxu0 %v4392_v45  ;;  %v14529_v45 = vld [vmem:[%s20063_s5 + $0x4b0] ss:$8 sps:$4 sm:$0xff]  }
 0x2ad   :  { %4802 = vmatpush1.bf16.msra.mxu0 %v14448_v32  ;;  %4833 = vmatprep.mubr.bf16.mxu0 %v4638_v46  ;;  %v14513_v32 = vld [vmem:[%s20063_s5 + $0x454] ss:$8 sps:$4 sm:$0xff]   ;;  %v14534_v46 = vld [vmem:[%s20063_s5 + $0x4c4] ss:$8 sps:$4 sm:$0xff]  }
 0x2ae   :  { %2557 = vmatprep.subr.bf16.mxu1 %v14459_v44  ;;  %4803 = vmatprep.subr.bf16.mxu0 %v14453_v34  ;;  %v14516_v34 = vld [vmem:[%s20063_s5 + $0x464] ss:$8 sps:$4 sm:$0xff]  }
 0x2b0   :  { %2558 = vmatpush1.bf16.msra.mxu1 %v14457_v47 }
 0x2b1   :  { %4804 = vmatpush1.bf16.msra.mxu0 %v14451_v36  ;;  %2559 = vmatprep.subr.bf16.mxu1 %v14462_v48  ;;  %v14519_v36 = vld [vmem:[%s20063_s5 + $0x474] ss:$8 sps:$4 sm:$0xff]  }
 0x2b2   :  { %4805 = vmatprep.subr.bf16.mxu0 %v14456_v38  ;;  %v14522_v38 = vld [vmem:[%s20063_s5 + $0x484] ss:$8 sps:$4 sm:$0xff]  }
 0x2b4   :  { %2560 = vmatpush1.bf16.msra.mxu1 %v14460_v52 }
 0x2b5   :  { %4806 = vmatpush1.bf16.msra.mxu0 %v14454_v41  ;;  %2561 = vmatprep.subr.bf16.mxu1 %v14465_v53  ;;  %v14523_v41 = vld [vmem:[%s20063_s5 + $0x490] ss:$8 sps:$4 sm:$0xff]  }
 0x2b6   :  { %4807 = vmatprep.subr.bf16.mxu0 %v14459_v44  ;;  %v14531_v44 = vld [vmem:[%s20063_s5 + $0x4b4] ss:$8 sps:$4 sm:$0xff]  }
 0x2b8   :  { %2562 = vmatpush1.bf16.msra.mxu1 %v14463_v55 }
 0x2b9   :  { %4808 = vmatpush1.bf16.msra.mxu0 %v14457_v47  ;;  %2563 = vmatprep.subr.bf16.mxu1 %v14468_v57  ;;  %v14532_v47 = vld [vmem:[%s20063_s5 + $0x4c0] ss:$8 sps:$4 sm:$0xff]  }
 0x2ba   :  { %4809 = vmatprep.subr.bf16.mxu0 %v14462_v48  ;;  %v14537_v48 = vld [vmem:[%s20063_s5 + $0x4d4] ss:$8 sps:$4 sm:$0xff]  }
 0x2bc   :  { %2564 = vmatpush1.bf16.msra.mxu1 %v14466_v58 }
 0x2bd   :  { %4810 = vmatpush1.bf16.msra.mxu0 %v14460_v52  ;;  %2565 = vmatprep.subr.bf16.mxu1 %v14471_v59  ;;  %v14535_v52 = vld [vmem:[%s20063_s5 + $0x4d0] ss:$8 sps:$4 sm:$0xff]  }
 0x2be   :  { %4811 = vmatprep.subr.bf16.mxu0 %v14465_v53  ;;  %v14540_v53 = vld [vmem:[%s20063_s5 + $0x4e4] ss:$8 sps:$4 sm:$0xff]  }
 0x2c0   :  { %2566 = vmatpush1.bf16.msra.mxu1 %v14469_v62 }
 0x2c1   :  { %4812 = vmatpush1.bf16.msra.mxu0 %v14463_v55  ;;  %2567 = vmatprep.subr.bf16.mxu1 %v14474_v63  ;;  %v14538_v55 = vld [vmem:[%s20063_s5 + $0x4e0] ss:$8 sps:$4 sm:$0xff]  }
 0x2c2   :  { %4813 = vmatprep.subr.bf16.mxu0 %v14468_v57  ;;  %v14543_v57 = vld [vmem:[%s20063_s5 + $0x4f4] ss:$8 sps:$4 sm:$0xff]  }
 0x2c4   :  { %2568 = vmatpush1.bf16.msra.mxu1 %v14472_v1 }
 0x2c5   :  { %4814 = vmatpush1.bf16.msra.mxu0 %v14466_v58  ;;  %2569 = vmatprep.subr.bf16.mxu1 %v14477_v3  ;;  %v2596_v58 = vld [vmem:[#allocation2 + $0x10] sm:$0x1] }
 0x2c6   :  { %4815 = vmatprep.subr.bf16.mxu0 %v14471_v59  ;;  %v14541_v59 = vld [vmem:[%s20063_s5 + $0x4f0] ss:$8 sps:$4 sm:$0xff]  }
 0x2c8   :  { %2570 = vmatpush1.bf16.msra.mxu1 %v14475_v4 }
 0x2c9   :  { %4816 = vmatpush1.bf16.msra.mxu0 %v14469_v62  ;;  %2571 = vmatprep.subr.bf16.mxu1 %v14480_v5  ;;  %v2849_v62 = vld [vmem:[#allocation2 + $0x18] sm:$0x3] }
 0x2ca   :  { %4817 = vmatprep.subr.bf16.mxu0 %v14474_v63  ;;  %v2594_v63 = vld [vmem:[#allocation2] sm:$0xc0] }
 0x2cc   :  { %2572 = vmatpush1.bf16.msra.mxu1 %v14478_v8 }
 0x2cd   :  { %4818 = vmatpush1.bf16.msra.mxu0 %v14472_v1  ;;  %2573 = vmatprep.subr.bf16.mxu1 %v14483_v9  ;;  %v14546_v1 = vld [vmem:[%s20063_s5 + $0x504] ss:$8 sps:$4 sm:$0xff]  }
 0x2ce   :  { %4819 = vmatprep.subr.bf16.mxu0 %v14477_v3  ;;  %v2636_v3 = vrot.slane %v2596_v58, 6  ;;  %v5331_v58 = vld [vmem:[#allocation2 + $0x18] sm:$0x80] }
 0x2d0   :  { %2574 = vmatpush1.bf16.msra.mxu1 %v14481_v11 }
 0x2d1   :  { %4820 = vmatpush1.bf16.msra.mxu0 %v14475_v4  ;;  %2575 = vmatprep.subr.bf16.mxu1 %v14486_v13  ;;  %v2847_v4 = vld [vmem:[#allocation2 + $0x8] sm:$0x80] }
 0x2d2   :  { %4821 = vmatprep.subr.bf16.mxu0 %v14480_v5  ;;  %v2891_v5 = vrot.slane %v2849_v62, 7 }
 0x2d4   :  { %2576 = vmatpush1.bf16.msra.mxu1 %v14484_v14 }
 0x2d5   :  { %4822 = vmatpush1.bf16.msra.mxu0 %v14478_v8  ;;  %2577 = vmatprep.subr.bf16.mxu1 %v14489_v15  ;;  %v2635_v8 = vrot.slane %v2594_v63, 6 }
 0x2d6   :  { %4823 = vmatprep.subr.bf16.mxu0 %v14483_v9  ;;  %v14544_v9 = vld [vmem:[%s20063_s5 + $0x500] ss:$8 sps:$4 sm:$0xff]  }
 0x2d8   :  { %2578 = vmatpush1.bf16.msra.mxu1 %v14487_v18 }
 0x2d9   :  { %4824 = vmatpush1.bf16.msra.mxu0 %v14481_v11  ;;  %2579 = vmatprep.subr.bf16.mxu1 %v14492_v19  ;;  %v2890_v11 = vrot.slane %v2847_v4, 7 }
 0x2da   :  { %4825 = vmatprep.subr.bf16.mxu0 %v14486_v13  ;;  %v14549_v13 = vld [vmem:[%s20063_s5 + $0x514] ss:$8 sps:$4 sm:$0xff]  }
 0x2dc   :  { %2580 = vmatpush1.bf16.msra.mxu1 %v14490_v21 }
 0x2dd   :  { %4826 = vmatpush1.bf16.msra.mxu0 %v14484_v14  ;;  %2581 = vmatprep.subr.bf16.mxu1 %v14495_v23  ;;  %v2637_v14 = vsel %vm2634_vm12, %v2635_v8, %v2636_v3  ;;  %v14603_v3 = vld [vmem:[%s20063_s5 + $0x634] ss:$8 sps:$4 sm:$0xff]   ;;  %v14606_v8 = vld [vmem:[%s20063_s5 + $0x644] ss:$8 sps:$4 sm:$0xff]  }
 0x2de   :  { %4827 = vmatprep.subr.bf16.mxu0 %v14489_v15  ;;  %v2892_v15 = vsel %vm2886_vm1, %v2890_v11, %v2891_v5  ;;  %v14601_v5 = vld [vmem:[%s20063_s5 + $0x630] ss:$8 sps:$4 sm:$0xff]   ;;  %v14609_v11 = vld [vmem:[%s20063_s5 + $0x654] ss:$8 sps:$4 sm:$0xff]  }
 0x2e0   :  { %2582 = vmatpush1.bf16.msra.mxu1 %v14493_v28 }
 0x2e1   :  { %4828 = vmatpush1.bf16.msra.mxu0 %v14487_v18  ;;  %2803 = vmatprep.subr.bf16.mxu1 %v14498_v25  ;;  %v14547_v18 = vld [vmem:[%s20063_s5 + $0x510] ss:$8 sps:$4 sm:$0xff]  }
 0x2e2   :  { %4829 = vmatprep.subr.bf16.mxu0 %v14492_v19  ;;  %v14552_v19 = vld [vmem:[%s20063_s5 + $0x524] ss:$8 sps:$4 sm:$0xff]  }
 0x2e3   :  { %2584 = vmatmul.mubr.bf16.vlgmr.msra.gmra.mrb[0].mxu1 %v2387_v54  ;;  %v14561_v54 = vld [vmem:[%s20063_s5 + $0x554] ss:$8 sps:$4 sm:$0xff]  }
 0x2e4   :  { %2804 = vmatpush1.bf16.msra.mxu1 %v14496_v51  ;;  %2835 = vmatprep.mubr.bf16.mxu1 %v2640_v60  ;;  %v14562_v60 = vld [vmem:[%s20063_s5 + $0x560] ss:$8 sps:$4 sm:$0xff]  }
 0x2e5   :  { %4830 = vmatpush1.bf16.msra.mxu0 %v14490_v21  ;;  %2805 = vmatprep.subr.bf16.mxu1 %v14501_v31  ;;  %v4844_v21 = vld [vmem:[#allocation2 + $0x10] sm:$0x38] }
 0x2e6   :  { %4831 = vmatprep.subr.bf16.mxu0 %v14495_v23  ;;  %v14550_v23 = vld [vmem:[%s20063_s5 + $0x520] ss:$8 sps:$4 sm:$0xff]   ;;  %v4880_v24 = vrot.slane %v4844_v21, 3  ;;  %v14618_v21 = vld [vmem:[%s20063_s5 + $0x684] ss:$8 sps:$4 sm:$0xff]  }
 0x2e8   :  { %2806 = vmatpush1.bf16.msra.mxu1 %v14499_v61 }
 0x2e9   :  { %4832 = vmatpush1.bf16.msra.mxu0 %v14493_v28  ;;  %2807 = vmatprep.subr.bf16.mxu1 %v14504_v0  ;;  %v5088_v28 = vld [vmem:[#allocation2 + $0x18] sm:$0x70] }
 0x2ea   :  { %5044 = vmatprep.subr.bf16.mxu0 %v14498_v25  ;;  %v14555_v25 = vld [vmem:[%s20063_s5 + $0x534] ss:$8 sps:$4 sm:$0xff]   ;;  %v5124_v49 = vrot.slane %v5088_v28, 4 }
 0x2eb   :  { %v14621_v28 = vld [vmem:[%s20063_s5 + $0x694] ss:$8 sps:$4 sm:$0xff]  }
 0x2ec   :  { %2808 = vmatpush1.bf16.msra.mxu1 %v14502_v6  ;;  %4834 = vmatmul.mubr.bf16.vlgmr.msra.gmra.mrb[16].mxu0 %v4637_v10  ;;  %v14571_v10 = vld [vmem:[%s20063_s5 + $0x590] ss:$8 sps:$4 sm:$0xff]  }
 0x2ed   :  { %5045 = vmatpush1.bf16.msra.mxu0 %v14496_v51  ;;  %5076 = vmatprep.mubr.bf16.mxu0 %v4881_v16  ;;  %v14556_v51 = vld [vmem:[%s20063_s5 + $0x540] ss:$8 sps:$4 sm:$0xff]  }
 0x2ee   :  { %2809 = vmatprep.subr.bf16.mxu1 %v14507_v12  ;;  %5046 = vmatprep.subr.bf16.mxu0 %v14501_v31  ;;  %v14564_v31 = vld [vmem:[%s20063_s5 + $0x564] ss:$8 sps:$4 sm:$0xff]   ;;  %v14574_v16 = vld [vmem:[%s20063_s5 + $0x5a0] ss:$8 sps:$4 sm:$0xff]  }
 0x2f0   :  { %2810 = vmatpush1.bf16.msra.mxu1 %v14505_v17 }
 0x2f1   :  { %5047 = vmatpush1.bf16.msra.mxu0 %v14499_v61  ;;  %2811 = vmatprep.subr.bf16.mxu1 %v14510_v22  ;;  %v14567_v61 = vld [vmem:[%s20063_s5 + $0x574] ss:$8 sps:$4 sm:$0xff]  }
 0x2f2   :  { %5048 = vmatprep.subr.bf16.mxu0 %v14504_v0  ;;  %v14565_v0 = vld [vmem:[%s20063_s5 + $0x570] ss:$8 sps:$4 sm:$0xff]  }
 0x2f4   :  { %2812 = vmatpush1.bf16.msra.mxu1 %v14508_v30 }
 0x2f5   :  { %5049 = vmatpush1.bf16.msra.mxu0 %v14502_v6  ;;  %2813 = vmatprep.subr.bf16.mxu1 %v14513_v32  ;;  %v14568_v6 = vld [vmem:[%s20063_s5 + $0x580] ss:$8 sps:$4 sm:$0xff]  }
 0x2f6   :  { %5050 = vmatprep.subr.bf16.mxu0 %v14507_v12  ;;  %v14576_v12 = vld [vmem:[%s20063_s5 + $0x5a4] ss:$8 sps:$4 sm:$0xff]  }
 0x2f8   :  { %2814 = vmatpush1.bf16.msra.mxu1 %v14511_v33 }
 0x2f9   :  { %5051 = vmatpush1.bf16.msra.mxu0 %v14505_v17  ;;  %2815 = vmatprep.subr.bf16.mxu1 %v14516_v34  ;;  %v14579_v17 = vld [vmem:[%s20063_s5 + $0x5b4] ss:$8 sps:$4 sm:$0xff]  }
 0x2fa   :  { %5052 = vmatprep.subr.bf16.mxu0 %v14510_v22  ;;  %v14577_v22 = vld [vmem:[%s20063_s5 + $0x5b0] ss:$8 sps:$4 sm:$0xff]  }
 0x2fc   :  { %2816 = vmatpush1.bf16.msra.mxu1 %v14514_v35 }
 0x2fd   :  { %5053 = vmatpush1.bf16.msra.mxu0 %v14508_v30  ;;  %2817 = vmatprep.subr.bf16.mxu1 %v14519_v36  ;;  %v14582_v30 = vld [vmem:[%s20063_s5 + $0x5c4] ss:$8 sps:$4 sm:$0xff]  }
 0x2fe   :  { %5054 = vmatprep.subr.bf16.mxu0 %v14513_v32  ;;  %v14580_v32 = vld [vmem:[%s20063_s5 + $0x5c0] ss:$8 sps:$4 sm:$0xff]  }
 0x300   :  { %2818 = vmatpush1.bf16.msra.mxu1 %v14517_v37 }
 0x301   :  { %5055 = vmatpush1.bf16.msra.mxu0 %v14511_v33  ;;  %2819 = vmatprep.subr.bf16.mxu1 %v14522_v38  ;;  %v14585_v33 = vld [vmem:[%s20063_s5 + $0x5d4] ss:$8 sps:$4 sm:$0xff]  }
 0x302   :  { %5056 = vmatprep.subr.bf16.mxu0 %v14516_v34  ;;  %v14583_v34 = vld [vmem:[%s20063_s5 + $0x5d0] ss:$8 sps:$4 sm:$0xff]  }
 0x304   :  { %2820 = vmatpush1.bf16.msra.mxu1 %v14520_v39 }
 0x305   :  { %5057 = vmatpush1.bf16.msra.mxu0 %v14514_v35  ;;  %2821 = vmatprep.subr.bf16.mxu1 %v14525_v40  ;;  %v14588_v35 = vld [vmem:[%s20063_s5 + $0x5e4] ss:$8 sps:$4 sm:$0xff]  }
 0x306   :  { %5058 = vmatprep.subr.bf16.mxu0 %v14519_v36  ;;  %v14586_v36 = vld [vmem:[%s20063_s5 + $0x5e0] ss:$8 sps:$4 sm:$0xff]  }
 0x308   :  { %2822 = vmatpush1.bf16.msra.mxu1 %v14523_v41 }
 0x309   :  { %5059 = vmatpush1.bf16.msra.mxu0 %v14517_v37  ;;  %2823 = vmatprep.subr.bf16.mxu1 %v14528_v42  ;;  %v14591_v37 = vld [vmem:[%s20063_s5 + $0x5f4] ss:$8 sps:$4 sm:$0xff]  }
 0x30a   :  { %5060 = vmatprep.subr.bf16.mxu0 %v14522_v38  ;;  %v2848_v38 = vld [vmem:[#allocation2 + $0x10] sm:$0x3] }
 0x30c   :  { %2824 = vmatpush1.bf16.msra.mxu1 %v14526_v43 }
 0x30d   :  { %5061 = vmatpush1.bf16.msra.mxu0 %v14520_v39  ;;  %2825 = vmatprep.subr.bf16.mxu1 %v14531_v44  ;;  %v14589_v39 = vld [vmem:[%s20063_s5 + $0x5f0] ss:$8 sps:$4 sm:$0xff]  }
 0x30e   :  { %5062 = vmatprep.subr.bf16.mxu0 %v14525_v40  ;;  %v2846_v40 = vld [vmem:[#allocation2] sm:$0x80] }
 0x310   :  { %2826 = vmatpush1.bf16.msra.mxu1 %v14529_v45 }
 0x311   :  { %5063 = vmatpush1.bf16.msra.mxu0 %v14523_v41  ;;  %2827 = vmatprep.subr.bf16.mxu1 %v14534_v46  ;;  %v14594_v41 = vld [vmem:[%s20063_s5 + $0x604] ss:$8 sps:$4 sm:$0xff]  }
 0x312   :  { %5064 = vmatprep.subr.bf16.mxu0 %v14528_v42  ;;  %v2888_v42 = vrot.slane %v2848_v38, 7  ;;  %v14651_v38 = vld [vmem:[%s20063_s5 + $0x734] ss:$8 sps:$4 sm:$0xff]  }
 0x314   :  { %2828 = vmatpush1.bf16.msra.mxu1 %v14532_v47 }
 0x315   :  { %5065 = vmatpush1.bf16.msra.mxu0 %v14526_v43  ;;  %2829 = vmatprep.subr.bf16.mxu1 %v14537_v48  ;;  %v3099_v43 = vld [vmem:[#allocation2 + $0x18] sm:$0x1c] }
 0x316   :  { %5066 = vmatprep.subr.bf16.mxu0 %v14531_v44  ;;  %v2887_v44 = vrot.slane %v2846_v40, 7  ;;  %v5582_v40 = vld [vmem:[#allocation2 + $0x28] sm:$0x7] }
 0x318   :  { %2830 = vmatpush1.bf16.msra.mxu1 %v14535_v52 }
 0x319   :  { %5067 = vmatpush1.bf16.msra.mxu0 %v14529_v45  ;;  %2831 = vmatprep.subr.bf16.mxu1 %v14540_v53  ;;  %v14592_v45 = vld [vmem:[%s20063_s5 + $0x600] ss:$8 sps:$4 sm:$0xff]  }
 0x31a   :  { %5068 = vmatprep.subr.bf16.mxu0 %v14534_v46  ;;  %v14597_v46 = vld [vmem:[%s20063_s5 + $0x614] ss:$8 sps:$4 sm:$0xff]  }
 0x31c   :  { %2832 = vmatpush1.bf16.msra.mxu1 %v14538_v55 }
 0x31d   :  { %5069 = vmatpush1.bf16.msra.mxu0 %v14532_v47  ;;  %2833 = vmatprep.subr.bf16.mxu1 %v14543_v57  ;;  %v2889_v47 = vsel %vm2886_vm1, %v2887_v44, %v2888_v42  ;;  %v14654_v42 = vld [vmem:[%s20063_s5 + $0x744] ss:$8 sps:$4 sm:$0xff]   ;;  %v14657_v44 = vld [vmem:[%s20063_s5 + $0x754] ss:$8 sps:$4 sm:$0xff]  }
 0x31e   :  { %5070 = vmatprep.subr.bf16.mxu0 %v14537_v48  ;;  %v3135_v48 = vrot.slane %v3099_v43, 2  ;;  %v14652_v43 = vld [vmem:[%s20063_s5 + $0x740] ss:$8 sps:$4 sm:$0xff]  }
 0x320   :  { %2834 = vmatpush1.bf16.msra.mxu1 %v14541_v59 }
 0x321   :  { %5071 = vmatpush1.bf16.msra.mxu0 %v14535_v52  ;;  %3055 = vmatprep.subr.bf16.mxu1 %v14546_v1  ;;  %v14595_v52 = vld [vmem:[%s20063_s5 + $0x610] ss:$8 sps:$4 sm:$0xff]  }
 0x322   :  { %5072 = vmatprep.subr.bf16.mxu0 %v14540_v53  ;;  %v14600_v53 = vld [vmem:[%s20063_s5 + $0x624] ss:$8 sps:$4 sm:$0xff]  }
 0x323   :  { %2836 = vmatmul.mubr.bf16.vlgmr.msra.gmra.mrb[0].mxu1 %v2637_v14  ;;  %v14612_v14 = vld [vmem:[%s20063_s5 + $0x664] ss:$8 sps:$4 sm:$0xff]  }
 0x324   :  { %3056 = vmatpush1.bf16.msra.mxu1 %v14544_v9  ;;  %3087 = vmatprep.mubr.bf16.mxu1 %v2892_v15  ;;  %v14610_v15 = vld [vmem:[%s20063_s5 + $0x660] ss:$8 sps:$4 sm:$0xff]  }
 0x325   :  { %5073 = vmatpush1.bf16.msra.mxu0 %v14538_v55  ;;  %3057 = vmatprep.subr.bf16.mxu1 %v14549_v13  ;;  %v5333_v55 = vld [vmem:[#allocation2 + $0x28] sm:$0x3] }
 0x326   :  { %5074 = vmatprep.subr.bf16.mxu0 %v14543_v57  ;;  %v5087_v57 = vld [vmem:[#allocation2 + $0x10] sm:$0x70]  ;;  %v5374_v62 = vrot.slane %v5333_v55, 7  ;;  %v14664_v55 = vld [vmem:[%s20063_s5 + $0x780] ss:$8 sps:$4 sm:$0xff]  }
 0x327   :  { %v5123_v63 = vrot.slane %v5087_v57, 4  ;;  %v14669_v57 = vld [vmem:[%s20063_s5 + $0x794] ss:$8 sps:$4 sm:$0xff]  }
 0x328   :  { %3058 = vmatpush1.bf16.msra.mxu1 %v14547_v18 }
 0x329   :  { %5075 = vmatpush1.bf16.msra.mxu0 %v14541_v59  ;;  %3059 = vmatprep.subr.bf16.mxu1 %v14552_v19  ;;  %v14598_v59 = vld [vmem:[%s20063_s5 + $0x620] ss:$8 sps:$4 sm:$0xff]  }
 0x32a   :  { %5287 = vmatprep.subr.bf16.mxu0 %v14546_v1  ;;  %v5373_v1 = vrot.slane %v5331_v58, 7  ;;  %v14667_v58 = vld [vmem:[%s20063_s5 + $0x790] ss:$8 sps:$4 sm:$0xff]  }
 0x32c   :  { %3060 = vmatpush1.bf16.msra.mxu1 %v14550_v23  ;;  %5077 = vmatmul.mubr.bf16.vlgmr.msra.gmra.mrb[16].mxu0 %v4880_v24  ;;  %v5375_v4 = vsel %vm2886_vm1, %v5373_v1, %v5374_v62  ;;  %v14619_v24 = vld [vmem:[%s20063_s5 + $0x690] ss:$8 sps:$4 sm:$0xff]   ;;  %v14670_v62 = vld [vmem:[%s20063_s5 + $0x7a0] ss:$8 sps:$4 sm:$0xff]  }
 0x32d   :  { %5288 = vmatpush1.bf16.msra.mxu0 %v14544_v9  ;;  %5319 = vmatprep.mubr.bf16.mxu0 %v5124_v49  ;;  %v14604_v9 = vld [vmem:[%s20063_s5 + $0x640] ss:$8 sps:$4 sm:$0xff]   ;;  %v14673_v1 = vld [vmem:[%s20063_s5 + $0x7b0] ss:$8 sps:$4 sm:$0xff]  }
 0x32e   :  { %3061 = vmatprep.subr.bf16.mxu1 %v14555_v25  ;;  %5289 = vmatprep.subr.bf16.mxu0 %v14549_v13  ;;  %v14607_v13 = vld [vmem:[%s20063_s5 + $0x650] ss:$8 sps:$4 sm:$0xff]   ;;  %v14622_v49 = vld [vmem:[%s20063_s5 + $0x6a0] ss:$8 sps:$4 sm:$0xff]  }
 0x330   :  { %3062 = vmatpush1.bf16.msra.mxu1 %v14553_v29 }
 0x331   :  { %5290 = vmatpush1.bf16.msra.mxu0 %v14547_v18  ;;  %3063 = vmatprep.subr.bf16.mxu1 %v14558_v50  ;;  %v14615_v18 = vld [vmem:[%s20063_s5 + $0x674] ss:$8 sps:$4 sm:$0xff]  }
 0x332   :  { %5291 = vmatprep.subr.bf16.mxu0 %v14552_v19  ;;  %v14613_v19 = vld [vmem:[%s20063_s5 + $0x670] ss:$8 sps:$4 sm:$0xff]  }
 0x334   :  { %3064 = vmatpush1.bf16.msra.mxu1 %v14556_v51 }
 0x335   :  { %5292 = vmatpush1.bf16.msra.mxu0 %v14550_v23  ;;  %3065 = vmatprep.subr.bf16.mxu1 %v14561_v54  ;;  %v14616_v23 = vld [vmem:[%s20063_s5 + $0x680] ss:$8 sps:$4 sm:$0xff]  }
 0x336   :  { %5293 = vmatprep.subr.bf16.mxu0 %v14555_v25  ;;  %v14624_v25 = vld [vmem:[%s20063_s5 + $0x6a4] ss:$8 sps:$4 sm:$0xff]  }
 0x338   :  { %3066 = vmatpush1.bf16.msra.mxu1 %v14559_v56 }
 0x339   :  { %5294 = vmatpush1.bf16.msra.mxu0 %v14553_v29  ;;  %3067 = vmatprep.subr.bf16.mxu1 %v14564_v31  ;;  %v14627_v29 = vld [vmem:[%s20063_s5 + $0x6b4] ss:$8 sps:$4 sm:$0xff]  }
 0x33a   :  { %5295 = vmatprep.subr.bf16.mxu0 %v14558_v50  ;;  %v14625_v50 = vld [vmem:[%s20063_s5 + $0x6b0] ss:$8 sps:$4 sm:$0xff]  }
 0x33c   :  { %3068 = vmatpush1.bf16.msra.mxu1 %v14562_v60 }
 0x33d   :  { %5296 = vmatpush1.bf16.msra.mxu0 %v14556_v51  ;;  %3069 = vmatprep.subr.bf16.mxu1 %v14567_v61  ;;  %v14630_v51 = vld [vmem:[%s20063_s5 + $0x6c4] ss:$8 sps:$4 sm:$0xff]  }
 0x33e   :  { %5297 = vmatprep.subr.bf16.mxu0 %v14561_v54  ;;  %v14628_v54 = vld [vmem:[%s20063_s5 + $0x6c0] ss:$8 sps:$4 sm:$0xff]  }
 0x340   :  { %3070 = vmatpush1.bf16.msra.mxu1 %v14565_v0 }
 0x341   :  { %5298 = vmatpush1.bf16.msra.mxu0 %v14559_v56  ;;  %3071 = vmatprep.subr.bf16.mxu1 %v14570_v2  ;;  %v14633_v56 = vld [vmem:[%s20063_s5 + $0x6d4] ss:$8 sps:$4 sm:$0xff]  }
 0x342   :  { %5299 = vmatprep.subr.bf16.mxu0 %v14564_v31  ;;  %v14631_v31 = vld [vmem:[%s20063_s5 + $0x6d0] ss:$8 sps:$4 sm:$0xff]  }
 0x344   :  { %3072 = vmatpush1.bf16.msra.mxu1 %v14568_v6 }
 0x345   :  { %5300 = vmatpush1.bf16.msra.mxu0 %v14562_v60  ;;  %3073 = vmatprep.subr.bf16.mxu1 %v14573_v7  ;;  %v14636_v60 = vld [vmem:[%s20063_s5 + $0x6e4] ss:$8 sps:$4 sm:$0xff]  }
 0x346   :  { %5301 = vmatprep.subr.bf16.mxu0 %v14567_v61  ;;  %v14634_v61 = vld [vmem:[%s20063_s5 + $0x6e0] ss:$8 sps:$4 sm:$0xff]  }
 0x348   :  { %3074 = vmatpush1.bf16.msra.mxu1 %v14571_v10 }
 0x349   :  { %5302 = vmatpush1.bf16.msra.mxu0 %v14565_v0  ;;  %3075 = vmatprep.subr.bf16.mxu1 %v14576_v12  ;;  %v14639_v0 = vld [vmem:[%s20063_s5 + $0x6f4] ss:$8 sps:$4 sm:$0xff]  }
 0x34a   :  { %5303 = vmatprep.subr.bf16.mxu0 %v14570_v2  ;;  %v14637_v2 = vld [vmem:[%s20063_s5 + $0x6f0] ss:$8 sps:$4 sm:$0xff]  }
 0x34c   :  { %3076 = vmatpush1.bf16.msra.mxu1 %v14574_v16 }
 0x34d   :  { %5304 = vmatpush1.bf16.msra.mxu0 %v14568_v6  ;;  %3077 = vmatprep.subr.bf16.mxu1 %v14579_v17  ;;  %v14642_v6 = vld [vmem:[%s20063_s5 + $0x704] ss:$8 sps:$4 sm:$0xff]  }
 0x34e   :  { %5305 = vmatprep.subr.bf16.mxu0 %v14573_v7  ;;  %v3098_v7 = vld [vmem:[#allocation2 + $0x10] sm:$0x1c] }
 0x350   :  { %3078 = vmatpush1.bf16.msra.mxu1 %v14577_v22 }
 0x351   :  { %5306 = vmatpush1.bf16.msra.mxu0 %v14571_v10  ;;  %3079 = vmatprep.subr.bf16.mxu1 %v14582_v30  ;;  %v3342_v10 = vld [vmem:[#allocation2 + $0x18] sm:$0x38] }
 0x352   :  { %5307 = vmatprep.subr.bf16.mxu0 %v14576_v12  ;;  %v14640_v12 = vld [vmem:[%s20063_s5 + $0x700] ss:$8 sps:$4 sm:$0xff]  }
 0x354   :  { %3080 = vmatpush1.bf16.msra.mxu1 %v14580_v32 }
 0x355   :  { %5308 = vmatpush1.bf16.msra.mxu0 %v14574_v16  ;;  %3081 = vmatprep.subr.bf16.mxu1 %v14585_v33  ;;  %v3134_v16 = vrot.slane %v3098_v7, 2  ;;  %v14706_v7 = vld [vmem:[%s20063_s5 + $0x860] ss:$8 sps:$4 sm:$0xff]  }
 0x356   :  { %5309 = vmatprep.subr.bf16.mxu0 %v14579_v17  ;;  %v14645_v17 = vld [vmem:[%s20063_s5 + $0x714] ss:$8 sps:$4 sm:$0xff]  }
 0x358   :  { %3082 = vmatpush1.bf16.msra.mxu1 %v14583_v34 }
 0x359   :  { %5310 = vmatpush1.bf16.msra.mxu0 %v14577_v22  ;;  %3083 = vmatprep.subr.bf16.mxu1 %v14588_v35  ;;  %v3378_v22 = vrot.slane %v3342_v10, 3  ;;  %v14711_v10 = vld [vmem:[%s20063_s5 + $0x874] ss:$8 sps:$4 sm:$0xff]  }
 0x35a   :  { %5311 = vmatprep.subr.bf16.mxu0 %v14582_v30  ;;  %v14643_v30 = vld [vmem:[%s20063_s5 + $0x710] ss:$8 sps:$4 sm:$0xff]  }
 0x35c   :  { %3084 = vmatpush1.bf16.msra.mxu1 %v14586_v36 }
 0x35d   :  { %5312 = vmatpush1.bf16.msra.mxu0 %v14580_v32  ;;  %3085 = vmatprep.subr.bf16.mxu1 %v14591_v37  ;;  %v5332_v32 = vld [vmem:[#allocation2 + $0x20] sm:$0x3] }
 0x35e   :  { %5313 = vmatprep.subr.bf16.mxu0 %v14585_v33  ;;  %v14648_v33 = vld [vmem:[%s20063_s5 + $0x724] ss:$8 sps:$4 sm:$0xff]  }
 0x360   :  { %3086 = vmatpush1.bf16.msra.mxu1 %v14589_v39 }
 0x361   :  { %5314 = vmatpush1.bf16.msra.mxu0 %v14583_v34  ;;  %3298 = vmatprep.subr.bf16.mxu1 %v14594_v41  ;;  %v5330_v34 = vld [vmem:[#allocation2 + $0x10] sm:$0x80] }
 0x362   :  { %5315 = vmatprep.subr.bf16.mxu0 %v14588_v35  ;;  %v5371_v35 = vrot.slane %v5332_v32, 7  ;;  %v14720_v32 = vld [vmem:[%s20063_s5 + $0x8a4] ss:$8 sps:$4 sm:$0xff]  }
 0x363   :  { %3088 = vmatmul.mubr.bf16.vlgmr.msra.gmra.mrb[0].mxu1 %v2889_v47  ;;  %v14658_v47 = vld [vmem:[%s20063_s5 + $0x760] ss:$8 sps:$4 sm:$0xff]  }
 0x364   :  { %3299 = vmatpush1.bf16.msra.mxu1 %v14592_v45  ;;  %3330 = vmatprep.mubr.bf16.mxu1 %v3135_v48  ;;  %v14663_v48 = vld [vmem:[%s20063_s5 + $0x774] ss:$8 sps:$4 sm:$0xff]  }
 0x365   :  { %5316 = vmatpush1.bf16.msra.mxu0 %v14586_v36  ;;  %3300 = vmatprep.subr.bf16.mxu1 %v14597_v46  ;;  %v14646_v36 = vld [vmem:[%s20063_s5 + $0x720] ss:$8 sps:$4 sm:$0xff]  }
 0x366   :  { %5317 = vmatprep.subr.bf16.mxu0 %v14591_v37  ;;  %v5370_v37 = vrot.slane %v5330_v34, 7  ;;  %v14723_v34 = vld [vmem:[%s20063_s5 + $0x8b4] ss:$8 sps:$4 sm:$0xff]  }
 0x368   :  { %3301 = vmatpush1.bf16.msra.mxu1 %v14595_v52 }
 0x369   :  { %5318 = vmatpush1.bf16.msra.mxu0 %v14589_v39  ;;  %3302 = vmatprep.subr.bf16.mxu1 %v14600_v53  ;;  %v5372_v39 = vsel %vm2886_vm1, %v5370_v37, %v5371_v35  ;;  %v14721_v35 = vld [vmem:[%s20063_s5 + $0x8b0] ss:$8 sps:$4 sm:$0xff]   ;;  %v14724_v37 = vld [vmem:[%s20063_s5 + $0x8c0] ss:$8 sps:$4 sm:$0xff]  }
 0x36a   :  { %5538 = vmatprep.subr.bf16.mxu0 %v14594_v41  ;;  %v14649_v41 = vld [vmem:[%s20063_s5 + $0x730] ss:$8 sps:$4 sm:$0xff]  }
 0x36c   :  { %3303 = vmatpush1.bf16.msra.mxu1 %v14598_v59  ;;  %5320 = vmatmul.mubr.bf16.vlgmr.msra.gmra.mrb[16].mxu0 %v5123_v63  ;;  %v14675_v63 = vld [vmem:[%s20063_s5 + $0x7b4] ss:$8 sps:$4 sm:$0xff]  }
 0x36d   :  { %5539 = vmatpush1.bf16.msra.mxu0 %v14592_v45  ;;  %5570 = vmatprep.mubr.bf16.mxu0 %v5375_v4  ;;  %v14655_v45 = vld [vmem:[%s20063_s5 + $0x750] ss:$8 sps:$4 sm:$0xff]   ;;  %v14676_v4 = vld [vmem:[%s20063_s5 + $0x7c0] ss:$8 sps:$4 sm:$0xff]  }
 0x36e   :  { %3304 = vmatprep.subr.bf16.mxu1 %v14603_v3  ;;  %5540 = vmatprep.subr.bf16.mxu0 %v14597_v46  ;;  %v14660_v46 = vld [vmem:[%s20063_s5 + $0x764] ss:$8 sps:$4 sm:$0xff]  }
 0x370   :  { %3305 = vmatpush1.bf16.msra.mxu1 %v14601_v5 }
 0x371   :  { %5541 = vmatpush1.bf16.msra.mxu0 %v14595_v52  ;;  %3306 = vmatprep.subr.bf16.mxu1 %v14606_v8  ;;  %v14661_v52 = vld [vmem:[%s20063_s5 + $0x770] ss:$8 sps:$4 sm:$0xff]  }
 0x372   :  { %5542 = vmatprep.subr.bf16.mxu0 %v14600_v53  ;;  %v14666_v53 = vld [vmem:[%s20063_s5 + $0x784] ss:$8 sps:$4 sm:$0xff]  }
 0x374   :  { %3307 = vmatpush1.bf16.msra.mxu1 %v14604_v9 }
 0x375   :  { %5543 = vmatpush1.bf16.msra.mxu0 %v14598_v59  ;;  %3308 = vmatprep.subr.bf16.mxu1 %v14609_v11  ;;  %v14672_v59 = vld [vmem:[%s20063_s5 + $0x7a4] ss:$8 sps:$4 sm:$0xff]  }
 0x376   :  { %5544 = vmatprep.subr.bf16.mxu0 %v14603_v3  ;;  %v14678_v3 = vld [vmem:[%s20063_s5 + $0x7c4] ss:$8 sps:$4 sm:$0xff]  }
 0x378   :  { %3309 = vmatpush1.bf16.msra.mxu1 %v14607_v13 }
 0x379   :  { %5545 = vmatpush1.bf16.msra.mxu0 %v14601_v5  ;;  %3310 = vmatprep.subr.bf16.mxu1 %v14612_v14  ;;  %v14681_v5 = vld [vmem:[%s20063_s5 + $0x7d4] ss:$8 sps:$4 sm:$0xff]  }
 0x37a   :  { %5546 = vmatprep.subr.bf16.mxu0 %v14606_v8  ;;  %v14679_v8 = vld [vmem:[%s20063_s5 + $0x7d0] ss:$8 sps:$4 sm:$0xff]  }
 0x37c   :  { %3311 = vmatpush1.bf16.msra.mxu1 %v14610_v15 }
 0x37d   :  { %5547 = vmatpush1.bf16.msra.mxu0 %v14604_v9  ;;  %3312 = vmatprep.subr.bf16.mxu1 %v14615_v18  ;;  %v14684_v9 = vld [vmem:[%s20063_s5 + $0x7e4] ss:$8 sps:$4 sm:$0xff]  }
 0x37e   :  { %5548 = vmatprep.subr.bf16.mxu0 %v14609_v11  ;;  %v14682_v11 = vld [vmem:[%s20063_s5 + $0x7e0] ss:$8 sps:$4 sm:$0xff]  }
 0x380   :  { %3313 = vmatpush1.bf16.msra.mxu1 %v14613_v19 }
 0x381   :  { %5549 = vmatpush1.bf16.msra.mxu0 %v14607_v13  ;;  %3314 = vmatprep.subr.bf16.mxu1 %v14618_v21  ;;  %v14687_v13 = vld [vmem:[%s20063_s5 + $0x7f4] ss:$8 sps:$4 sm:$0xff]  }
 0x382   :  { %5550 = vmatprep.subr.bf16.mxu0 %v14612_v14  ;;  %v14685_v14 = vld [vmem:[%s20063_s5 + $0x7f0] ss:$8 sps:$4 sm:$0xff]  }
 0x384   :  { %3315 = vmatpush1.bf16.msra.mxu1 %v14616_v23 }
 0x385   :  { %5551 = vmatpush1.bf16.msra.mxu0 %v14610_v15  ;;  %3316 = vmatprep.subr.bf16.mxu1 %v14621_v28  ;;  %v14690_v15 = vld [vmem:[%s20063_s5 + $0x804] ss:$8 sps:$4 sm:$0xff]  }
 0x386   :  { %5552 = vmatprep.subr.bf16.mxu0 %v14615_v18  ;;  %v3341_v18 = vld [vmem:[#allocation2 + $0x10] sm:$0x38] }
 0x388   :  { %3317 = vmatpush1.bf16.msra.mxu1 %v14619_v24 }
 0x389   :  { %5553 = vmatpush1.bf16.msra.mxu0 %v14613_v19  ;;  %3318 = vmatprep.subr.bf16.mxu1 %v14624_v25  ;;  %v3585_v19 = vld [vmem:[#allocation2 + $0x18] sm:$0x70] }
 0x38a   :  { %5554 = vmatprep.subr.bf16.mxu0 %v14618_v21  ;;  %v14688_v21 = vld [vmem:[%s20063_s5 + $0x800] ss:$8 sps:$4 sm:$0xff]  }
 0x38c   :  { %3319 = vmatpush1.bf16.msra.mxu1 %v14622_v49 }
 0x38d   :  { %5555 = vmatpush1.bf16.msra.mxu0 %v14616_v23  ;;  %3320 = vmatprep.subr.bf16.mxu1 %v14627_v29  ;;  %v3377_v23 = vrot.slane %v3341_v18, 3  ;;  %v14760_v18 = vld [vmem:[%s20063_s5 + $0x180] ss:$8 sps:$4 sm:$0xff]  }
 0x38e   :  { %5556 = vmatprep.subr.bf16.mxu0 %v14621_v28  ;;  %v14693_v28 = vld [vmem:[%s20063_s5 + $0x814] ss:$8 sps:$4 sm:$0xff]  }
 0x390   :  { %3321 = vmatpush1.bf16.msra.mxu1 %v14625_v50 }
 0x391   :  { %5557 = vmatpush1.bf16.msra.mxu0 %v14619_v24  ;;  %3322 = vmatprep.subr.bf16.mxu1 %v14630_v51  ;;  %v3621_v24 = vrot.slane %v3585_v19, 4  ;;  %v14765_v19 = vld [vmem:[%s20063_s5 + $0x194] ss:$8 sps:$4 sm:$0xff]  }
 0x392   :  { %5558 = vmatprep.subr.bf16.mxu0 %v14624_v25  ;;  %v14691_v25 = vld [vmem:[%s20063_s5 + $0x810] ss:$8 sps:$4 sm:$0xff]  }
 0x394   :  { %3323 = vmatpush1.bf16.msra.mxu1 %v14628_v54 }
 0x395   :  { %5559 = vmatpush1.bf16.msra.mxu0 %v14622_v49  ;;  %3324 = vmatprep.subr.bf16.mxu1 %v14633_v56  ;;  %v14696_v49 = vld [vmem:[%s20063_s5 + $0x824] ss:$8 sps:$4 sm:$0xff]  }
 0x396   :  { %5560 = vmatprep.subr.bf16.mxu0 %v14627_v29  ;;  %v14694_v29 = vld [vmem:[%s20063_s5 + $0x820] ss:$8 sps:$4 sm:$0xff]  }
 0x398   :  { %3325 = vmatpush1.bf16.msra.mxu1 %v14631_v31 }
 0x399   :  { %5561 = vmatpush1.bf16.msra.mxu0 %v14625_v50  ;;  %3326 = vmatprep.subr.bf16.mxu1 %v14636_v60  ;;  %v5819_v50 = vld [vmem:[#allocation2 + $0x28] sm:$0xe] }
 0x39a   :  { %5562 = vmatprep.subr.bf16.mxu0 %v14630_v51  ;;  %v14699_v51 = vld [vmem:[%s20063_s5 + $0x834] ss:$8 sps:$4 sm:$0xff]  }
 0x39c   :  { %3327 = vmatpush1.bf16.msra.mxu1 %v14634_v61 }
 0x39d   :  { %5563 = vmatpush1.bf16.msra.mxu0 %v14628_v54  ;;  %3328 = vmatprep.subr.bf16.mxu1 %v14639_v0  ;;  %v5581_v54 = vld [vmem:[#allocation2 + $0x20] sm:$0x7] }
 0x39e   :  { %5564 = vmatprep.subr.bf16.mxu0 %v14633_v56  ;;  %v5855_v56 = vrot.slane %v5819_v50, 1  ;;  %v14774_v50 = vld [vmem:[%s20063_s5 + $0x1c4] ss:$8 sps:$4 sm:$0xff]  }
 0x3a0   :  { %3329 = vmatpush1.bf16.msra.mxu1 %v14637_v2 }
 0x3a1   :  { %5565 = vmatpush1.bf16.msra.mxu0 %v14631_v31  ;;  %3541 = vmatprep.subr.bf16.mxu1 %v14642_v6  ;;  %v14697_v31 = vld [vmem:[%s20063_s5 + $0x830] ss:$8 sps:$4 sm:$0xff]  }
 0x3a2   :  { %5566 = vmatprep.subr.bf16.mxu0 %v14636_v60  ;;  %v14702_v60 = vld [vmem:[%s20063_s5 + $0x844] ss:$8 sps:$4 sm:$0xff]  }
 0x3a3   :  { %3331 = vmatmul.mubr.bf16.vlgmr.msra.gmra.mrb[0].mxu1 %v3134_v16  ;;  %v14714_v16 = vld [vmem:[%s20063_s5 + $0x884] ss:$8 sps:$4 sm:$0xff]  }
 0x3a4   :  { %3542 = vmatpush1.bf16.msra.mxu1 %v14640_v12  ;;  %3573 = vmatprep.mubr.bf16.mxu1 %v3378_v22  ;;  %v14717_v22 = vld [vmem:[%s20063_s5 + $0x894] ss:$8 sps:$4 sm:$0xff]  }
 0x3a5   :  { %5567 = vmatpush1.bf16.msra.mxu0 %v14634_v61  ;;  %3543 = vmatprep.subr.bf16.mxu1 %v14645_v17  ;;  %v14700_v61 = vld [vmem:[%s20063_s5 + $0x840] ss:$8 sps:$4 sm:$0xff]  }
 0x3a6   :  { %5568 = vmatprep.subr.bf16.mxu0 %v14639_v0  ;;  %v14705_v0 = vld [vmem:[%s20063_s5 + $0x854] ss:$8 sps:$4 sm:$0xff]  }
 0x3a8   :  { %3544 = vmatpush1.bf16.msra.mxu1 %v14643_v30 }
 0x3a9   :  { %5569 = vmatpush1.bf16.msra.mxu0 %v14637_v2  ;;  %3545 = vmatprep.subr.bf16.mxu1 %v14648_v33  ;;  %v14703_v2 = vld [vmem:[%s20063_s5 + $0x850] ss:$8 sps:$4 sm:$0xff]  }
 0x3aa   :  { %5775 = vmatprep.subr.bf16.mxu0 %v14642_v6  ;;  %v14708_v6 = vld [vmem:[%s20063_s5 + $0x864] ss:$8 sps:$4 sm:$0xff]  }
 0x3ac   :  { %3546 = vmatpush1.bf16.msra.mxu1 %v14646_v36  ;;  %5571 = vmatmul.mubr.bf16.vlgmr.msra.gmra.mrb[16].mxu0 %v5372_v39  ;;  %v14727_v39 = vld [vmem:[%s20063_s5 + $0x8d0] ss:$8 sps:$4 sm:$0xff]  }
 0x3ad   :  { %5776 = vmatpush1.bf16.msra.mxu0 %v14640_v12  ;;  %5807 = vmatprep.mubr.bf16.mxu0 %v5582_v40  ;;  %v14709_v12 = vld [vmem:[%s20063_s5 + $0x870] ss:$8 sps:$4 sm:$0xff]   ;;  %v14732_v40 = vld [vmem:[%s20063_s5 + $0x8e4] ss:$8 sps:$4 sm:$0xff]  }
 0x3ae   :  { %3547 = vmatprep.subr.bf16.mxu1 %v14651_v38  ;;  %5777 = vmatprep.subr.bf16.mxu0 %v14645_v17  ;;  %v14712_v17 = vld [vmem:[%s20063_s5 + $0x880] ss:$8 sps:$4 sm:$0xff]  }
 0x3b0   :  { %3548 = vmatpush1.bf16.msra.mxu1 %v14649_v41 }
 0x3b1   :  { %5778 = vmatpush1.bf16.msra.mxu0 %v14643_v30  ;;  %3549 = vmatprep.subr.bf16.mxu1 %v14654_v42  ;;  %v14715_v30 = vld [vmem:[%s20063_s5 + $0x890] ss:$8 sps:$4 sm:$0xff]  }
 0x3b2   :  { %5779 = vmatprep.subr.bf16.mxu0 %v14648_v33  ;;  %v14718_v33 = vld [vmem:[%s20063_s5 + $0x8a0] ss:$8 sps:$4 sm:$0xff]  }
 0x3b4   :  { %3550 = vmatpush1.bf16.msra.mxu1 %v14652_v43 }
 0x3b5   :  { %5780 = vmatpush1.bf16.msra.mxu0 %v14646_v36  ;;  %3551 = vmatprep.subr.bf16.mxu1 %v14657_v44  ;;  %v14726_v36 = vld [vmem:[%s20063_s5 + $0x8c4] ss:$8 sps:$4 sm:$0xff]  }
 0x3b6   :  { %5781 = vmatprep.subr.bf16.mxu0 %v14651_v38  ;;  %v14729_v38 = vld [vmem:[%s20063_s5 + $0x8d4] ss:$8 sps:$4 sm:$0xff]  }
 0x3b8   :  { %3552 = vmatpush1.bf16.msra.mxu1 %v14655_v45 }
 0x3b9   :  { %5782 = vmatpush1.bf16.msra.mxu0 %v14649_v41  ;;  %3553 = vmatprep.subr.bf16.mxu1 %v14660_v46  ;;  %v14730_v41 = vld [vmem:[%s20063_s5 + $0x8e0] ss:$8 sps:$4 sm:$0xff]  }
 0x3ba   :  { %5783 = vmatprep.subr.bf16.mxu0 %v14654_v42  ;;  %v14735_v42 = vld [vmem:[%s20063_s5 + $0x8f4] ss:$8 sps:$4 sm:$0xff]  }
 0x3bc   :  { %3554 = vmatpush1.bf16.msra.mxu1 %v14658_v47 }
 0x3bd   :  { %5784 = vmatpush1.bf16.msra.mxu0 %v14652_v43  ;;  %3555 = vmatprep.subr.bf16.mxu1 %v14663_v48  ;;  %v14733_v43 = vld [vmem:[%s20063_s5 + $0x8f0] ss:$8 sps:$4 sm:$0xff]  }
 0x3be   :  { %5785 = vmatprep.subr.bf16.mxu0 %v14657_v44  ;;  %v14738_v44 = vld [vmem:[%s20063_s5 + $0x104] ss:$8 sps:$4 sm:$0xff]  }
 0x3c0   :  { %3556 = vmatpush1.bf16.msra.mxu1 %v14661_v52 }
 0x3c1   :  { %5786 = vmatpush1.bf16.msra.mxu0 %v14655_v45  ;;  %3557 = vmatprep.subr.bf16.mxu1 %v14666_v53  ;;  %v3584_v45 = vld [vmem:[#allocation2 + $0x10] sm:$0x70] }
 0x3c2   :  { %5787 = vmatprep.subr.bf16.mxu0 %v14660_v46  ;;  %v6133_v46 = vld [vmem:[#allocation2 + $0x18] sm:$0x38] }
 0x3c4   :  { %3558 = vmatpush1.bf16.msra.mxu1 %v14664_v55 }
 0x3c5   :  { %5788 = vmatpush1.bf16.msra.mxu0 %v14658_v47  ;;  %3559 = vmatprep.subr.bf16.mxu1 %v14669_v57  ;;  %v14736_v47 = vld [vmem:[%s20063_s5 + $0x100] ss:$8 sps:$4 sm:$0xff]  }
 0x3c6   :  { %5789 = vmatprep.subr.bf16.mxu0 %v14663_v48  ;;  %v3620_v48 = vrot.slane %v3584_v45, 4  ;;  %v14907_v45 = vld [vmem:[%s20065_s7 + $0x170] ss:$8 sps:$4 sm:$0xff]  }
 0x3c8   :  { %3560 = vmatpush1.bf16.msra.mxu1 %v14667_v58 }
 0x3c9   :  { %5790 = vmatpush1.bf16.msra.mxu0 %v14661_v52  ;;  %3561 = vmatprep.subr.bf16.mxu1 %v14672_v59  ;;  %v14741_v52 = vld [vmem:[%s20063_s5 + $0x114] ss:$8 sps:$4 sm:$0xff]  }
 0x3ca   :  { %5791 = vmatprep.subr.bf16.mxu0 %v14666_v53  ;;  %v6169_v53 = vrot.slane %v6133_v46, 3  ;;  %v14909_v46 = vld [vmem:[%s20065_s7 + $0x174] ss:$8 sps:$4 sm:$0xff]  }
 0x3cc   :  { %3562 = vmatpush1.bf16.msra.mxu1 %v14670_v62 }
 0x3cd   :  { %5792 = vmatpush1.bf16.msra.mxu0 %v14664_v55  ;;  %3563 = vmatprep.subr.bf16.mxu1 %v14675_v63  ;;  %v14739_v55 = vld [vmem:[%s20063_s5 + $0x110] ss:$8 sps:$4 sm:$0xff]  }
 0x3ce   :  { %5793 = vmatprep.subr.bf16.mxu0 %v14669_v57  ;;  %v14744_v57 = vld [vmem:[%s20063_s5 + $0x124] ss:$8 sps:$4 sm:$0xff]  }
 0x3d0   :  { %3564 = vmatpush1.bf16.msra.mxu1 %v14673_v1 }
 0x3d1   :  { %5794 = vmatpush1.bf16.msra.mxu0 %v14667_v58  ;;  %3565 = vmatprep.subr.bf16.mxu1 %v14678_v3  ;;  %v5818_v58 = vld [vmem:[#allocation2 + $0x20] sm:$0xe] }
 0x3d2   :  { %5795 = vmatprep.subr.bf16.mxu0 %v14672_v59  ;;  %v14742_v59 = vld [vmem:[%s20063_s5 + $0x120] ss:$8 sps:$4 sm:$0xff]  }
 0x3d4   :  { %3566 = vmatpush1.bf16.msra.mxu1 %v14676_v4 }
 0x3d5   :  { %5796 = vmatpush1.bf16.msra.mxu0 %v14670_v62  ;;  %3567 = vmatprep.subr.bf16.mxu1 %v14681_v5  ;;  %v14747_v62 = vld [vmem:[%s20063_s5 + $0x134] ss:$8 sps:$4 sm:$0xff]  }
 0x3d6   :  { %5797 = vmatprep.subr.bf16.mxu0 %v14675_v63  ;;  %v5854_v63 = vrot.slane %v5818_v58, 1  ;;  %v14919_v58 = vld [vmem:[%s20065_s7 + $0x190] ss:$8 sps:$4 sm:$0xff]  }
 0x3d8   :  { %3568 = vmatpush1.bf16.msra.mxu1 %v14679_v8 }
 0x3d9   :  { %5798 = vmatpush1.bf16.msra.mxu0 %v14673_v1  ;;  %3569 = vmatprep.subr.bf16.mxu1 %v14684_v9  ;;  %v14745_v1 = vld [vmem:[%s20063_s5 + $0x130] ss:$8 sps:$4 sm:$0xff]  }
 0x3da   :  { %5799 = vmatprep.subr.bf16.mxu0 %v14678_v3  ;;  %v14750_v3 = vld [vmem:[%s20063_s5 + $0x144] ss:$8 sps:$4 sm:$0xff]  }
 0x3dc   :  { %3570 = vmatpush1.bf16.msra.mxu1 %v14682_v11 }
 0x3dd   :  { %5800 = vmatpush1.bf16.msra.mxu0 %v14676_v4  ;;  %3571 = vmatprep.subr.bf16.mxu1 %v14687_v13  ;;  %v14748_v4 = vld [vmem:[%s20063_s5 + $0x140] ss:$8 sps:$4 sm:$0xff]  }
 0x3de   :  { %5801 = vmatprep.subr.bf16.mxu0 %v14681_v5  ;;  %v14753_v5 = vld [vmem:[%s20063_s5 + $0x154] ss:$8 sps:$4 sm:$0xff]  }
 0x3e0   :  { %3572 = vmatpush1.bf16.msra.mxu1 %v14685_v14 }
 0x3e1   :  { %5802 = vmatpush1.bf16.msra.mxu0 %v14679_v8  ;;  %3784 = vmatprep.subr.bf16.mxu1 %v14690_v15  ;;  %v14751_v8 = vld [vmem:[%s20063_s5 + $0x150] ss:$8 sps:$4 sm:$0xff]  }
 0x3e2   :  { %5803 = vmatprep.subr.bf16.mxu0 %v14684_v9  ;;  %v14756_v9 = vld [vmem:[%s20063_s5 + $0x164] ss:$8 sps:$4 sm:$0xff]  }
 0x3e3   :  { %3574 = vmatmul.mubr.bf16.vlgmr.msra.gmra.mrb[0].mxu1 %v3377_v23  ;;  %v14768_v23 = vld [vmem:[%s20063_s5 + $0x1a4] ss:$8 sps:$4 sm:$0xff]  }
 0x3e4   :  { %3785 = vmatpush1.bf16.msra.mxu1 %v14688_v21  ;;  %3816 = vmatprep.mubr.bf16.mxu1 %v3621_v24  ;;  %v14771_v24 = vld [vmem:[%s20063_s5 + $0x1b4] ss:$8 sps:$4 sm:$0xff]  }
 0x3e5   :  { %5804 = vmatpush1.bf16.msra.mxu0 %v14682_v11  ;;  %3786 = vmatprep.subr.bf16.mxu1 %v14693_v28  ;;  %v14754_v11 = vld [vmem:[%s20063_s5 + $0x160] ss:$8 sps:$4 sm:$0xff]  }
 0x3e6   :  { %5805 = vmatprep.subr.bf16.mxu0 %v14687_v13  ;;  %v14759_v13 = vld [vmem:[%s20063_s5 + $0x174] ss:$8 sps:$4 sm:$0xff]  }
 0x3e8   :  { %3787 = vmatpush1.bf16.msra.mxu1 %v14691_v25 }
 0x3e9   :  { %5806 = vmatpush1.bf16.msra.mxu0 %v14685_v14  ;;  %3788 = vmatprep.subr.bf16.mxu1 %v14696_v49  ;;  %v14757_v14 = vld [vmem:[%s20063_s5 + $0x170] ss:$8 sps:$4 sm:$0xff]  }
 0x3ea   :  { %6018 = vmatprep.subr.bf16.mxu0 %v14690_v15  ;;  %v14762_v15 = vld [vmem:[%s20063_s5 + $0x184] ss:$8 sps:$4 sm:$0xff]  }
 0x3ec   :  { %3789 = vmatpush1.bf16.msra.mxu1 %v14694_v29  ;;  %5808 = vmatmul.mubr.bf16.vlgmr.msra.gmra.mrb[16].mxu0 %v5581_v54  ;;  %v14871_v54 = vld [vmem:[%s20065_s7 + $0x110] ss:$8 sps:$4 sm:$0xff]  }
 0x3ed   :  { %6019 = vmatpush1.bf16.msra.mxu0 %v14688_v21  ;;  %6050 = vmatprep.mubr.bf16.mxu0 %v5855_v56  ;;  %v14763_v21 = vld [vmem:[%s20063_s5 + $0x190] ss:$8 sps:$4 sm:$0xff]   ;;  %v14873_v56 = vld [vmem:[%s20065_s7 + $0x114] ss:$8 sps:$4 sm:$0xff]  }
 0x3ee   :  { %3790 = vmatprep.subr.bf16.mxu1 %v14699_v51  ;;  %6020 = vmatprep.subr.bf16.mxu0 %v14693_v28  ;;  %v14766_v28 = vld [vmem:[%s20063_s5 + $0x1a0] ss:$8 sps:$4 sm:$0xff]  }
 0x3f0   :  { %3791 = vmatpush1.bf16.msra.mxu1 %v14697_v31 }
 0x3f1   :  { %6021 = vmatpush1.bf16.msra.mxu0 %v14691_v25  ;;  %3792 = vmatprep.subr.bf16.mxu1 %v14702_v60  ;;  %v14769_v25 = vld [vmem:[%s20063_s5 + $0x1b0] ss:$8 sps:$4 sm:$0xff]  }
 0x3f2   :  { %6022 = vmatprep.subr.bf16.mxu0 %v14696_v49  ;;  %v14865_v49 = vld [vmem:[%s20065_s7 + $0x100] ss:$8 sps:$4 sm:$0xff]  }
 0x3f4   :  { %3793 = vmatpush1.bf16.msra.mxu1 %v14700_v61 }
 0x3f5   :  { %6023 = vmatpush1.bf16.msra.mxu0 %v14694_v29  ;;  %3794 = vmatprep.subr.bf16.mxu1 %v14705_v0  ;;  %v14867_v29 = vld [vmem:[%s20065_s7 + $0x104] ss:$8 sps:$4 sm:$0xff]  }
 0x3f6   :  { %6024 = vmatprep.subr.bf16.mxu0 %v14699_v51  ;;  %v14772_v51 = vld [vmem:[%s20063_s5 + $0x1c0] ss:$8 sps:$4 sm:$0xff]  }
 0x3f8   :  { %3795 = vmatpush1.bf16.msra.mxu1 %v14703_v2 }
 0x3f9   :  { %6025 = vmatpush1.bf16.msra.mxu0 %v14697_v31  ;;  %3796 = vmatprep.subr.bf16.mxu1 %v14708_v6  ;;  %v14777_v31 = vld [vmem:[%s20063_s5 + $0x1d4] ss:$8 sps:$4 sm:$0xff]  }
 0x3fa   :  { %6026 = vmatprep.subr.bf16.mxu0 %v14702_v60  ;;  %v14775_v60 = vld [vmem:[%s20063_s5 + $0x1d0] ss:$8 sps:$4 sm:$0xff]  }
 0x3fc   :  { %3797 = vmatpush1.bf16.msra.mxu1 %v14706_v7 }
 0x3fd   :  { %6027 = vmatpush1.bf16.msra.mxu0 %v14700_v61  ;;  %3798 = vmatprep.subr.bf16.mxu1 %v14711_v10  ;;  %v14877_v61 = vld [vmem:[%s20065_s7 + $0x120] ss:$8 sps:$4 sm:$0xff]  }
 0x3fe   :  { %6028 = vmatprep.subr.bf16.mxu0 %v14705_v0  ;;  %v14879_v0 = vld [vmem:[%s20065_s7 + $0x124] ss:$8 sps:$4 sm:$0xff]  }
 0x400   :  { %3799 = vmatpush1.bf16.msra.mxu1 %v14709_v12 }
 0x401   :  { %6029 = vmatpush1.bf16.msra.mxu0 %v14703_v2  ;;  %3800 = vmatprep.subr.bf16.mxu1 %v14714_v16  ;;  %v14780_v2 = vld [vmem:[%s20063_s5 + $0x1e4] ss:$8 sps:$4 sm:$0xff]  }
 0x402   :  { %6030 = vmatprep.subr.bf16.mxu0 %v14708_v6  ;;  %v14778_v6 = vld [vmem:[%s20063_s5 + $0x1e0] ss:$8 sps:$4 sm:$0xff]  }
 0x404   :  { %3801 = vmatpush1.bf16.msra.mxu1 %v14712_v17 }
 0x405   :  { %6031 = vmatpush1.bf16.msra.mxu0 %v14706_v7  ;;  %3802 = vmatprep.subr.bf16.mxu1 %v14717_v22  ;;  %v14883_v7 = vld [vmem:[%s20065_s7 + $0x130] ss:$8 sps:$4 sm:$0xff]  }
 0x406   :  { %6032 = vmatprep.subr.bf16.mxu0 %v14711_v10  ;;  %v14885_v10 = vld [vmem:[%s20065_s7 + $0x134] ss:$8 sps:$4 sm:$0xff]  }
 0x408   :  { %3803 = vmatpush1.bf16.msra.mxu1 %v14715_v30 }
 0x409   :  { %6033 = vmatpush1.bf16.msra.mxu0 %v14709_v12  ;;  %3804 = vmatprep.subr.bf16.mxu1 %v14720_v32  ;;  %v14783_v12 = vld [vmem:[%s20063_s5 + $0x1f4] ss:$8 sps:$4 sm:$0xff]  }
 0x40a   :  { %6034 = vmatprep.subr.bf16.mxu0 %v14714_v16  ;;  %v14781_v16 = vld [vmem:[%s20063_s5 + $0x1f0] ss:$8 sps:$4 sm:$0xff]  }
 0x40c   :  { %3805 = vmatpush1.bf16.msra.mxu1 %v14718_v33 }
 0x40d   :  { %6035 = vmatpush1.bf16.msra.mxu0 %v14712_v17  ;;  %3806 = vmatprep.subr.bf16.mxu1 %v14723_v34  ;;  %v14889_v17 = vld [vmem:[%s20065_s7 + $0x140] ss:$8 sps:$4 sm:$0xff]  }
 0x40e   :  { %6036 = vmatprep.subr.bf16.mxu0 %v14717_v22  ;;  %v14891_v22 = vld [vmem:[%s20065_s7 + $0x144] ss:$8 sps:$4 sm:$0xff]  }
 0x410   :  { %3807 = vmatpush1.bf16.msra.mxu1 %v14721_v35 }
 0x411   :  { %6037 = vmatpush1.bf16.msra.mxu0 %v14715_v30  ;;  %3808 = vmatprep.subr.bf16.mxu1 %v14726_v36  ;;  %v14786_v30 = vld [vmem:[%s20063_s5 + $0x4] ss:$8 sps:$4 sm:$0xff]  }
 0x412   :  { %6038 = vmatprep.subr.bf16.mxu0 %v14720_v32  ;;  %v6132_v32 = vld [vmem:[#allocation2 + $0x10] sm:$0x38] }
 0x414   :  { %3809 = vmatpush1.bf16.msra.mxu1 %v14724_v37 }
 0x415   :  { %6039 = vmatpush1.bf16.msra.mxu0 %v14718_v33  ;;  %3810 = vmatprep.subr.bf16.mxu1 %v14729_v38  ;;  %v6099_v33 = vld [vmem:[#allocation2 + $0x18] sm:$0x1c] }
 0x416   :  { %6040 = vmatprep.subr.bf16.mxu0 %v14723_v34  ;;  %v14784_v34 = vld [vmem:[%s20063_s5] ss:$8 sps:$4 sm:$0xff]  }
 0x418   :  { %3811 = vmatpush1.bf16.msra.mxu1 %v14727_v39 }
 0x419   :  { %6041 = vmatpush1.bf16.msra.mxu0 %v14721_v35  ;;  %3812 = vmatprep.subr.bf16.mxu1 %v14732_v40  ;;  %v14895_v35 = vld [vmem:[%s20065_s7 + $0x150] ss:$8 sps:$4 sm:$0xff]  }
 0x41a   :  { %6042 = vmatprep.subr.bf16.mxu0 %v14726_v36  ;;  %v14897_v36 = vld [vmem:[%s20065_s7 + $0x154] ss:$8 sps:$4 sm:$0xff]  }
 0x41c   :  { %3813 = vmatpush1.bf16.msra.mxu1 %v14730_v41 }
 0x41d   :  { %6043 = vmatpush1.bf16.msra.mxu0 %v14724_v37  ;;  %3814 = vmatprep.subr.bf16.mxu1 %v14735_v42  ;;  %v6168_v37 = vrot.slane %v6132_v32, 3  ;;  %v14832_v32 = vld [vmem:[%s20063_s5 + $0x200] ss:$8 sps:$4 sm:$0xff]  }
 0x41e   :  { %6044 = vmatprep.subr.bf16.mxu0 %v14729_v38  ;;  %v14789_v38 = vld [vmem:[%s20063_s5 + $0x14] ss:$8 sps:$4 sm:$0xff]  }
 0x420   :  { %3815 = vmatpush1.bf16.msra.mxu1 %v14733_v43 }
 0x421   :  { %6045 = vmatpush1.bf16.msra.mxu0 %v14727_v39  ;;  %6332 = vmatprep.subr.bf16.mxu1 %v14738_v44  ;;  %v6376_v39 = vrot.slane %v6099_v33, 2  ;;  %v14790_v44 = vld [vmem:[%s20063_s5 + $0x20] ss:$8 sps:$4 sm:$0xff]  }
 0x422   :  { %6046 = vmatprep.subr.bf16.mxu0 %v14732_v40  ;;  %v14787_v40 = vld [vmem:[%s20063_s5 + $0x10] ss:$8 sps:$4 sm:$0xff]  }
 0x423   :  { %3817 = vmatmul.mubr.bf16.vlgmr.msra.gmra.mrb[0].mxu1 %v3620_v48  ;;  %v14793_v48 = vld [vmem:[%s20063_s5 + $0x30] ss:$8 sps:$4 sm:$0xff]  }
 0x424   :  { %6333 = vmatpush1.bf16.msra.mxu1 %v14736_v47  ;;  %6364 = vmatprep.mubr.bf16.mxu1 %v6169_v53  ;;  %v14795_v47 = vld [vmem:[%s20063_s5 + $0x34] ss:$8 sps:$4 sm:$0xff]   ;;  %v14915_v53 = vld [vmem:[%s20065_s7 + $0x184] ss:$8 sps:$4 sm:$0xff]  }
 0x425   :  { %6047 = vmatpush1.bf16.msra.mxu0 %v14730_v41  ;;  %6334 = vmatprep.subr.bf16.mxu1 %v14741_v52  ;;  %v14901_v41 = vld [vmem:[%s20065_s7 + $0x160] ss:$8 sps:$4 sm:$0xff]  }
 0x426   :  { %6048 = vmatprep.subr.bf16.mxu0 %v14735_v42  ;;  %v14903_v42 = vld [vmem:[%s20065_s7 + $0x164] ss:$8 sps:$4 sm:$0xff]   ;;  %v14913_v52 = vld [vmem:[%s20065_s7 + $0x180] ss:$8 sps:$4 sm:$0xff]  }
 0x428   :  { %6335 = vmatpush1.bf16.msra.mxu1 %v14739_v55  ;;  %v14798_v55 = vld [vmem:[%s20063_s5 + $0x44] ss:$8 sps:$4 sm:$0xff]  }
 0x429   :  { %6049 = vmatpush1.bf16.msra.mxu0 %v14733_v43  ;;  %6336 = vmatprep.subr.bf16.mxu1 %v14744_v57  ;;  %v14792_v43 = vld [vmem:[%s20063_s5 + $0x24] ss:$8 sps:$4 sm:$0xff]   ;;  %v14796_v57 = vld [vmem:[%s20063_s5 + $0x40] ss:$8 sps:$4 sm:$0xff]  }
 0x42a   :  { %8563 = vmatprep.subr.bf16.mxu0 %v14867_v29  ;;  %v14822_v29 = vld [vmem:[%s20063_s5 + $0xc4] ss:$8 sps:$4 sm:$0xff]  }
 0x42c   :  { %6051 = vmatmul.mubr.bf16.vlgmr.msra.gmra.mrb[16].mxu0 %v5854_v63  ;;  %6337 = vmatpush1.bf16.msra.mxu1 %v14742_v59  ;;  %v14921_v59 = vld [vmem:[%s20065_s7 + $0x194] ss:$8 sps:$4 sm:$0xff]   ;;  %v14799_v63 = vld [vmem:[%s20063_s5 + $0x50] ss:$8 sps:$4 sm:$0xff]  }
 0x42d   :  { %6338 = vmatprep.subr.bf16.mxu1 %v14747_v62  ;;  %8564 = vmatpush1.bf16.msra.mxu0 %v14865_v49  ;;  %v14801_v62 = vld [vmem:[%s20063_s5 + $0x54] ss:$8 sps:$4 sm:$0xff]   ;;  %v14817_v49 = vld [vmem:[%s20063_s5 + $0xb0] ss:$8 sps:$4 sm:$0xff]  }
 0x42e   :  { %8565 = vmatprep.subr.bf16.mxu0 %v14873_v56  ;;  %v14820_v56 = vld [vmem:[%s20063_s5 + $0xc0] ss:$8 sps:$4 sm:$0xff]  }
 0x430   :  { %6339 = vmatpush1.bf16.msra.mxu1 %v14745_v1  ;;  %v14925_v1 = vld [vmem:[%s20065_s7 + $0x1a0] ss:$8 sps:$4 sm:$0xff]  }
 0x431   :  { %6340 = vmatprep.subr.bf16.mxu1 %v14750_v3  ;;  %8566 = vmatpush1.bf16.msra.mxu0 %v14871_v54  ;;  %v14927_v3 = vld [vmem:[%s20065_s7 + $0x1a4] ss:$8 sps:$4 sm:$0xff]  }
 0x432   :  { %8567 = vmatprep.subr.bf16.mxu0 %v14879_v0  ;;  %v14951_v54 = vld [vmem:[%s20065_s7 + $0x1e4] ss:$8 sps:$4 sm:$0xff]   ;;  %v14823_v0 = vld [vmem:[%s20063_s5 + $0xd0] ss:$8 sps:$4 sm:$0xff]  }
 0x434   :  { %6341 = vmatpush1.bf16.msra.mxu1 %v14748_v4  ;;  %v14804_v4 = vld [vmem:[%s20063_s5 + $0x64] ss:$8 sps:$4 sm:$0xff]  }
 0x435   :  { %6342 = vmatprep.subr.bf16.mxu1 %v14753_v5  ;;  %8568 = vmatpush1.bf16.msra.mxu0 %v14877_v61  ;;  %v14802_v5 = vld [vmem:[%s20063_s5 + $0x60] ss:$8 sps:$4 sm:$0xff]   ;;  %v14957_v61 = vld [vmem:[%s20065_s7 + $0x1f4] ss:$8 sps:$4 sm:$0xff]  }
 0x436   :  { %8569 = vmatprep.subr.bf16.mxu0 %v14885_v10  ;;  %v14826_v10 = vld [vmem:[%s20063_s5 + $0xe0] ss:$8 sps:$4 sm:$0xff]  }
 0x438   :  { %6343 = vmatpush1.bf16.msra.mxu1 %v14751_v8  ;;  %v14807_v8 = vld [vmem:[%s20063_s5 + $0x74] ss:$8 sps:$4 sm:$0xff]  }
 0x439   :  { %6344 = vmatprep.subr.bf16.mxu1 %v14756_v9  ;;  %8570 = vmatpush1.bf16.msra.mxu0 %v14883_v7  ;;  %v14805_v9 = vld [vmem:[%s20063_s5 + $0x70] ss:$8 sps:$4 sm:$0xff]   ;;  %v14965_v7 = vld [vmem:[%s20065_s7 + $0x4] ss:$8 sps:$4 sm:$0xff]  }
 0x43a   :  { %8571 = vmatprep.subr.bf16.mxu0 %v14891_v22  ;;  %v6098_v22 = vld [vmem:[#allocation2 + $0x10] sm:$0x1c] }
 0x43b   :  { %v6375_v33 = vrot.slane %v6098_v22, 2 }
 0x43c   :  { %6345 = vmatpush1.bf16.msra.mxu1 %v14754_v11  ;;  %v14810_v11 = vld [vmem:[%s20063_s5 + $0x84] ss:$8 sps:$4 sm:$0xff]  }
 0x43d   :  { %6346 = vmatprep.subr.bf16.mxu1 %v14759_v13  ;;  %8572 = vmatpush1.bf16.msra.mxu0 %v14889_v17  ;;  %v14808_v13 = vld [vmem:[%s20063_s5 + $0x80] ss:$8 sps:$4 sm:$0xff]   ;;  %v14834_v17 = vld [vmem:[%s20063_s5 + $0x204] ss:$8 sps:$4 sm:$0xff]  }
 0x43e   :  { %8573 = vmatprep.subr.bf16.mxu0 %v14897_v36  ;;  %v14835_v36 = vld [vmem:[%s20063_s5 + $0x210] ss:$8 sps:$4 sm:$0xff]  }
 0x440   :  { %6347 = vmatpush1.bf16.msra.mxu1 %v14757_v14  ;;  %v14813_v14 = vld [vmem:[%s20063_s5 + $0x94] ss:$8 sps:$4 sm:$0xff]  }
 0x441   :  { %6348 = vmatprep.subr.bf16.mxu1 %v14762_v15  ;;  %8574 = vmatpush1.bf16.msra.mxu0 %v14895_v35  ;;  %v14931_v15 = vld [vmem:[%s20065_s7 + $0x1b0] ss:$8 sps:$4 sm:$0xff]  }
 0x442   :  { %8575 = vmatprep.subr.bf16.mxu0 %v14903_v42  ;;  %v14844_v42 = vld [vmem:[%s20063_s5 + $0x240] ss:$8 sps:$4 sm:$0xff]  }
 0x444   :  { %6349 = vmatpush1.bf16.msra.mxu1 %v14760_v18  ;;  %v14933_v18 = vld [vmem:[%s20065_s7 + $0x1b4] ss:$8 sps:$4 sm:$0xff]  }
 0x445   :  { %6350 = vmatprep.subr.bf16.mxu1 %v14765_v19  ;;  %8576 = vmatpush1.bf16.msra.mxu0 %v14901_v41  ;;  %v14939_v19 = vld [vmem:[%s20065_s7 + $0x1c4] ss:$8 sps:$4 sm:$0xff]  }
 0x446   :  { %8577 = vmatprep.subr.bf16.mxu0 %v14909_v46  ;;  %v14846_v41 = vld [vmem:[%s20063_s5 + $0x244] ss:$8 sps:$4 sm:$0xff]   ;;  %v14850_v46 = vld [vmem:[%s20063_s5 + $0x260] ss:$8 sps:$4 sm:$0xff]  }
 0x448   :  { %6351 = vmatpush1.bf16.msra.mxu1 %v14763_v21  ;;  %v14811_v21 = vld [vmem:[%s20063_s5 + $0x90] ss:$8 sps:$4 sm:$0xff]  }
 0x449   :  { %6352 = vmatprep.subr.bf16.mxu1 %v14768_v23  ;;  %8578 = vmatpush1.bf16.msra.mxu0 %v14907_v45  ;;  %v14816_v23 = vld [vmem:[%s20063_s5 + $0xa4] ss:$8 sps:$4 sm:$0xff]  }
 0x44a   :  { %8579 = vmatprep.subr.bf16.mxu0 %v14915_v53  ;;  %v14852_v45 = vld [vmem:[%s20063_s5 + $0x264] ss:$8 sps:$4 sm:$0xff]   ;;  %v14856_v53 = vld [vmem:[%s20063_s5 + $0x280] ss:$8 sps:$4 sm:$0xff]  }
 0x44c   :  { %6353 = vmatpush1.bf16.msra.mxu1 %v14766_v28  ;;  %v14937_v28 = vld [vmem:[%s20065_s7 + $0x1c0] ss:$8 sps:$4 sm:$0xff]  }
 0x44d   :  { %6354 = vmatprep.subr.bf16.mxu1 %v14771_v24  ;;  %8580 = vmatpush1.bf16.msra.mxu0 %v14913_v52  ;;  %v14814_v24 = vld [vmem:[%s20063_s5 + $0xa0] ss:$8 sps:$4 sm:$0xff]   ;;  %v14858_v52 = vld [vmem:[%s20063_s5 + $0x284] ss:$8 sps:$4 sm:$0xff]  }
 0x44e   :  { %8581 = vmatprep.subr.bf16.mxu0 %v14921_v59  ;;  %v14862_v59 = vld [vmem:[%s20063_s5 + $0x2a0] ss:$8 sps:$4 sm:$0xff]  }
 0x450   :  { %6355 = vmatpush1.bf16.msra.mxu1 %v14769_v25  ;;  %v14819_v25 = vld [vmem:[%s20063_s5 + $0xb4] ss:$8 sps:$4 sm:$0xff]  }
 0x451   :  { %6356 = vmatprep.subr.bf16.mxu1 %v14774_v50  ;;  %8582 = vmatpush1.bf16.msra.mxu0 %v14919_v58  ;;  %v14943_v50 = vld [vmem:[%s20065_s7 + $0x1d0] ss:$8 sps:$4 sm:$0xff]   ;;  %v14864_v58 = vld [vmem:[%s20063_s5 + $0x2a4] ss:$8 sps:$4 sm:$0xff]  }
 0x452   :  { %8583 = vmatprep.subr.bf16.mxu0 %v14927_v3  ;;  %v14874_v3 = vld [vmem:[%s20063_s5 + $0x2c0] ss:$8 sps:$4 sm:$0xff]  }
 0x454   :  { %6357 = vmatpush1.bf16.msra.mxu1 %v14772_v51  ;;  %v14945_v51 = vld [vmem:[%s20065_s7 + $0x1d4] ss:$8 sps:$4 sm:$0xff]  }
 0x455   :  { %6358 = vmatprep.subr.bf16.mxu1 %v14777_v31  ;;  %8584 = vmatpush1.bf16.msra.mxu0 %v14925_v1  ;;  %v14825_v31 = vld [vmem:[%s20063_s5 + $0xd4] ss:$8 sps:$4 sm:$0xff]   ;;  %v14876_v1 = vld [vmem:[%s20063_s5 + $0x2c4] ss:$8 sps:$4 sm:$0xff]  }
 0x456   :  { %8585 = vmatprep.subr.bf16.mxu0 %v14933_v18  ;;  %v6580_v18 = vld [vmem:[#allocation2 + $0x10] sm:$0x70] }
 0x458   :  { %6359 = vmatpush1.bf16.msra.mxu1 %v14775_v60  ;;  %v14949_v60 = vld [vmem:[%s20065_s7 + $0x1e0] ss:$8 sps:$4 sm:$0xff]  }
 0x459   :  { %6360 = vmatprep.subr.bf16.mxu1 %v14780_v2  ;;  %8586 = vmatpush1.bf16.msra.mxu0 %v14931_v15  ;;  %v14828_v2 = vld [vmem:[%s20063_s5 + $0xe4] ss:$8 sps:$4 sm:$0xff]  }
 0x45a   :  { %8587 = vmatprep.subr.bf16.mxu0 %v14939_v19  ;;  %v14900_v15 = vld [vmem:[%s20063_s5 + $0x304] ss:$8 sps:$4 sm:$0xff]   ;;  %v6824_v19 = vld [vmem:[#allocation2 + $0x18] sm:$0x80] }
 0x45c   :  { %6361 = vmatpush1.bf16.msra.mxu1 %v14778_v6  ;;  %v14955_v6 = vld [vmem:[%s20065_s7 + $0x1f0] ss:$8 sps:$4 sm:$0xff]  }
 0x45d   :  { %6362 = vmatprep.subr.bf16.mxu1 %v14783_v12  ;;  %8588 = vmatpush1.bf16.msra.mxu0 %v14937_v28  ;;  %v14831_v12 = vld [vmem:[%s20063_s5 + $0xf4] ss:$8 sps:$4 sm:$0xff]   ;;  %v6616_v28 = vrot.slane %v6580_v18, 4 }
 0x45e   :  { %8589 = vmatprep.subr.bf16.mxu0 %v14945_v51  ;;  %v14910_v51 = vld [vmem:[%s20063_s5 + $0x320] ss:$8 sps:$4 sm:$0xff]  }
 0x460   :  { %6363 = vmatpush1.bf16.msra.mxu1 %v14781_v16  ;;  %v14829_v16 = vld [vmem:[%s20063_s5 + $0xf0] ss:$8 sps:$4 sm:$0xff]  }
 0x461   :  { %6539 = vmatprep.subr.bf16.mxu1 %v14786_v30  ;;  %8590 = vmatpush1.bf16.msra.mxu0 %v14943_v50  ;;  %v6581_v30 = vld [vmem:[#allocation2 + $0x18] sm:$0x70]  ;;  %v14912_v50 = vld [vmem:[%s20063_s5 + $0x324] ss:$8 sps:$4 sm:$0xff]  }
 0x462   :  { %8591 = vmatprep.subr.bf16.mxu0 %v14951_v54  ;;  %v6617_v35 = vrot.slane %v6581_v30, 4  ;;  %v14918_v54 = vld [vmem:[%s20063_s5 + $0x334] ss:$8 sps:$4 sm:$0xff]  }
 0x463   :  { %6365 = vmatmul.mubr.bf16.vlgmr.msra.gmra.mrb[4].mxu1 %v6168_v37  ;;  %v14840_v37 = vld [vmem:[%s20063_s5 + $0x224] ss:$8 sps:$4 sm:$0xff]  }
 0x464   :  { %6540 = vmatpush1.bf16.msra.mxu1 %v14784_v34  ;;  %6571 = vmatprep.mubr.bf16.mxu1 %v6376_v39  ;;  %v14837_v34 = vld [vmem:[%s20063_s5 + $0x214] ss:$8 sps:$4 sm:$0xff]  }
 0x465   :  { %6541 = vmatprep.subr.bf16.mxu1 %v14789_v38  ;;  %8592 = vmatpush1.bf16.msra.mxu0 %v14949_v60  ;;  %v14838_v38 = vld [vmem:[%s20063_s5 + $0x220] ss:$8 sps:$4 sm:$0xff]   ;;  %v14843_v39 = vld [vmem:[%s20063_s5 + $0x234] ss:$8 sps:$4 sm:$0xff]  }
 0x466   :  { %8593 = vmatprep.subr.bf16.mxu0 %v14957_v61  ;;  %v14922_v60 = vld [vmem:[%s20063_s5 + $0x340] ss:$8 sps:$4 sm:$0xff]   ;;  %v14930_v61 = vld [vmem:[%s20063_s5 + $0x354] ss:$8 sps:$4 sm:$0xff]  }
 0x468   :  { %6542 = vmatpush1.bf16.msra.mxu1 %v14787_v40  ;;  %v14841_v40 = vld [vmem:[%s20063_s5 + $0x230] ss:$8 sps:$4 sm:$0xff]  }
 0x469   :  { %6543 = vmatprep.subr.bf16.mxu1 %v14792_v43  ;;  %8594 = vmatpush1.bf16.msra.mxu0 %v14955_v6  ;;  %v14849_v43 = vld [vmem:[%s20063_s5 + $0x254] ss:$8 sps:$4 sm:$0xff]   ;;  %v14928_v6 = vld [vmem:[%s20063_s5 + $0x350] ss:$8 sps:$4 sm:$0xff]  }
 0x46a   :  { %8771 = vmatprep.subr.bf16.mxu0 %v14965_v7 }
 0x46c   :  { %6544 = vmatpush1.bf16.msra.mxu1 %v14790_v44  ;;  %v14847_v44 = vld [vmem:[%s20063_s5 + $0x250] ss:$8 sps:$4 sm:$0xff]  }
 0x46d   :  { %6545 = vmatprep.subr.bf16.mxu1 %v14795_v47  ;;  %v14855_v47 = vld [vmem:[%s20063_s5 + $0x274] ss:$8 sps:$4 sm:$0xff]  }
 0x470   :  { %6546 = vmatpush1.bf16.msra.mxu1 %v14793_v48  ;;  %v14853_v48 = vld [vmem:[%s20063_s5 + $0x270] ss:$8 sps:$4 sm:$0xff]  }
 0x471   :  { %6547 = vmatprep.subr.bf16.mxu1 %v14798_v55  ;;  %v14861_v55 = vld [vmem:[%s20063_s5 + $0x294] ss:$8 sps:$4 sm:$0xff]  }
 0x474   :  { %6548 = vmatpush1.bf16.msra.mxu1 %v14796_v57  ;;  %v14859_v57 = vld [vmem:[%s20063_s5 + $0x290] ss:$8 sps:$4 sm:$0xff]  }
 0x475   :  { %6549 = vmatprep.subr.bf16.mxu1 %v14801_v62  ;;  %v14870_v62 = vld [vmem:[%s20063_s5 + $0x2b4] ss:$8 sps:$4 sm:$0xff]  }
 0x478   :  { %6550 = vmatpush1.bf16.msra.mxu1 %v14799_v63  ;;  %v14868_v63 = vld [vmem:[%s20063_s5 + $0x2b0] ss:$8 sps:$4 sm:$0xff]  }
 0x479   :  { %6551 = vmatprep.subr.bf16.mxu1 %v14804_v4  ;;  %v14882_v4 = vld [vmem:[%s20063_s5 + $0x2d4] ss:$8 sps:$4 sm:$0xff]  }
 0x47c   :  { %6552 = vmatpush1.bf16.msra.mxu1 %v14802_v5  ;;  %v14880_v5 = vld [vmem:[%s20063_s5 + $0x2d0] ss:$8 sps:$4 sm:$0xff]  }
 0x47d   :  { %6553 = vmatprep.subr.bf16.mxu1 %v14807_v8  ;;  %v14888_v8 = vld [vmem:[%s20063_s5 + $0x2e4] ss:$8 sps:$4 sm:$0xff]  }
 0x480   :  { %6554 = vmatpush1.bf16.msra.mxu1 %v14805_v9  ;;  %v14886_v9 = vld [vmem:[%s20063_s5 + $0x2e0] ss:$8 sps:$4 sm:$0xff]  }
 0x481   :  { %6555 = vmatprep.subr.bf16.mxu1 %v14810_v11  ;;  %v14894_v11 = vld [vmem:[%s20063_s5 + $0x2f4] ss:$8 sps:$4 sm:$0xff]  }
 0x484   :  { %6556 = vmatpush1.bf16.msra.mxu1 %v14808_v13  ;;  %v14892_v13 = vld [vmem:[%s20063_s5 + $0x2f0] ss:$8 sps:$4 sm:$0xff]  }
 0x485   :  { %6557 = vmatprep.subr.bf16.mxu1 %v14813_v14  ;;  %v6826_v14 = vld [vmem:[#allocation2 + $0x28] sm:$0x3] }
 0x488   :  { %6558 = vmatpush1.bf16.msra.mxu1 %v14811_v21  ;;  %v6867_v21 = vrot.slane %v6826_v14, 7  ;;  %v14958_v14 = vld [vmem:[%s20063_s5 + $0x3a0] ss:$8 sps:$4 sm:$0xff]  }
 0x489   :  { %6559 = vmatprep.subr.bf16.mxu1 %v14816_v23  ;;  %v14898_v23 = vld [vmem:[%s20063_s5 + $0x300] ss:$8 sps:$4 sm:$0xff]  }
 0x48c   :  { %6560 = vmatpush1.bf16.msra.mxu1 %v14814_v24  ;;  %v6866_v24 = vrot.slane %v6824_v19, 7 }
 0x48d   :  { %6561 = vmatprep.subr.bf16.mxu1 %v14819_v25  ;;  %v14906_v25 = vld [vmem:[%s20063_s5 + $0x314] ss:$8 sps:$4 sm:$0xff]  }
 0x490   :  { %6562 = vmatpush1.bf16.msra.mxu1 %v14817_v49  ;;  %v6868_v49 = vsel %vm2886_vm1, %v6866_v24, %v6867_v21  ;;  %v14968_v21 = vld [vmem:[%s20063_s5 + $0x3b4] ss:$8 sps:$4 sm:$0xff]  }
 0x491   :  { %6563 = vmatprep.subr.bf16.mxu1 %v14822_v29  ;;  %v14904_v29 = vld [vmem:[%s20063_s5 + $0x310] ss:$8 sps:$4 sm:$0xff]  }
 0x494   :  { %6564 = vmatpush1.bf16.msra.mxu1 %v14820_v56  ;;  %v14916_v56 = vld [vmem:[%s20063_s5 + $0x330] ss:$8 sps:$4 sm:$0xff]  }
 0x495   :  { %6565 = vmatprep.subr.bf16.mxu1 %v14825_v31  ;;  %v14924_v31 = vld [vmem:[%s20063_s5 + $0x344] ss:$8 sps:$4 sm:$0xff]  }
 0x498   :  { %6566 = vmatpush1.bf16.msra.mxu1 %v14823_v0  ;;  %v3831_v0 = vld [vmem:[%s20064_s6] sm:$0x3] }
 0x499   :  { %6567 = vmatprep.subr.bf16.mxu1 %v14828_v2  ;;  %v3828_v2 = vstv %s12702_s26  ;;  %v3836_v7 = vrot.slane %v3831_v0, %v16759_v26 }
 0x49c   :  { %6568 = vmatpush1.bf16.msra.mxu1 %v14826_v10  ;;  %v14936_v10 = vld [vmem:[%s20063_s5 + $0x364] ss:$8 sps:$4 sm:$0xff]  }
 0x49d   :  { %6569 = vmatprep.subr.bf16.mxu1 %v14831_v12 }
 0x4a0   :  { %6570 = vmatpush1.bf16.msra.mxu1 %v14829_v16  ;;  %v3840_v16 = vrot.slane %v3831_v0, %v16762_v27  ;;  %v14982_v0 = vld [vmem:[%s20063_s5 + $0x3d4] ss:$8 sps:$4 sm:$0xff]  }
 0x4a1   :  { %6780 = vmatprep.subr.bf16.mxu1 %v14834_v17 }
 0x4a3   :  { %6572 = vmatmul.mubr.bf16.vlgmr.msra.gmra.mrb[4].mxu1 %v6375_v33  ;;  %v14934_v33 = vld [vmem:[%s20063_s5 + $0x360] ss:$8 sps:$4 sm:$0xff]  }
 0x4a4   :  { %6781 = vmatpush1.bf16.msra.mxu1 %v14832_v32  ;;  %6812 = vmatprep.mubr.bf16.mxu1 %v6617_v35 }
 0x4a5   :  { %6782 = vmatprep.subr.bf16.mxu1 %v14837_v34 }
 0x4a8   :  { %6783 = vmatpush1.bf16.msra.mxu1 %v14835_v36  ;;  %v14942_v36 = vld [vmem:[%s20063_s5 + $0x374] ss:$8 sps:$4 sm:$0xff]  }
 0x4a9   :  { %6784 = vmatprep.subr.bf16.mxu1 %v14840_v37 }
 0x4ac   :  { %6785 = vmatpush1.bf16.msra.mxu1 %v14838_v38 }
 0x4ad   :  { %6786 = vmatprep.subr.bf16.mxu1 %v14843_v39  ;;  %v6065_v39 = vld [vmem:[%s20064_s6] sm:$0x3] }
 0x4b0   :  { %6787 = vmatpush1.bf16.msra.mxu1 %v14841_v40 }
 0x4b1   :  { %6788 = vmatprep.subr.bf16.mxu1 %v14846_v41  ;;  %v14940_v41 = vld [vmem:[%s20063_s5 + $0x370] ss:$8 sps:$4 sm:$0xff]  }
 0x4b4   :  { %6789 = vmatpush1.bf16.msra.mxu1 %v14844_v42 }
 0x4b5   :  { %6790 = vmatprep.subr.bf16.mxu1 %v14849_v43  ;;  %v14948_v43 = vld [vmem:[%s20063_s5 + $0x384] ss:$8 sps:$4 sm:$0xff]  }
 0x4b8   :  { %6791 = vmatpush1.bf16.msra.mxu1 %v14847_v44 }
 0x4b9   :  { %6792 = vmatprep.subr.bf16.mxu1 %v14852_v45  ;;  %v6070_v45 = vrot.slane %v6065_v39, %v16759_v26 }
 0x4bc   :  { %6793 = vmatpush1.bf16.msra.mxu1 %v14850_v46 }
 0x4bd   :  { %6794 = vmatprep.subr.bf16.mxu1 %v14855_v47 }
 0x4c0   :  { %6795 = vmatpush1.bf16.msra.mxu1 %v14853_v48  ;;  %v6074_v48 = vrot.slane %v6065_v39, %v16762_v27 }
 0x4c1   :  { %6796 = vmatprep.subr.bf16.mxu1 %v14858_v52 }
 0x4c4   :  { %6797 = vmatpush1.bf16.msra.mxu1 %v14856_v53 }
 0x4c5   :  { %6798 = vmatprep.subr.bf16.mxu1 %v14861_v55  ;;  %v14946_v55 = vld [vmem:[%s20063_s5 + $0x380] ss:$8 sps:$4 sm:$0xff]  }
 0x4c8   :  { %6799 = vmatpush1.bf16.msra.mxu1 %v14859_v57 }
 0x4c9   :  { %6800 = vmatprep.subr.bf16.mxu1 %v14864_v58 }
 0x4cc   :  { %6801 = vmatpush1.bf16.msra.mxu1 %v14862_v59  ;;  %v14954_v59 = vld [vmem:[%s20063_s5 + $0x394] ss:$8 sps:$4 sm:$0xff]  }
 0x4cd   :  { %6802 = vmatprep.subr.bf16.mxu1 %v14870_v62 }
 0x4d0   :  { %6803 = vmatpush1.bf16.msra.mxu1 %v14868_v63 }
 0x4d1   :  { %6804 = vmatprep.subr.bf16.mxu1 %v14876_v1 }
 0x4d4   :  { %6805 = vmatpush1.bf16.msra.mxu1 %v14874_v3 }
 0x4d5   :  { %6806 = vmatprep.subr.bf16.mxu1 %v14882_v4  ;;  %v14952_v4 = vld [vmem:[%s20063_s5 + $0x390] ss:$8 sps:$4 sm:$0xff]  }
 0x4d8   :  { %6807 = vmatpush1.bf16.msra.mxu1 %v14880_v5 }
 0x4d9   :  { %6808 = vmatprep.subr.bf16.mxu1 %v14888_v8  ;;  %v14960_v8 = vld [vmem:[%s20063_s5 + $0x3a4] ss:$8 sps:$4 sm:$0xff]  }
 0x4dc   :  { %6809 = vmatpush1.bf16.msra.mxu1 %v14886_v9 }
 0x4dd   :  { %6810 = vmatprep.subr.bf16.mxu1 %v14894_v11 }
 0x4e0   :  { %6811 = vmatpush1.bf16.msra.mxu1 %v14892_v13 }
 0x4e1   :  { %7031 = vmatprep.subr.bf16.mxu1 %v14900_v15 }
 0x4e3   :  { %6813 = vmatmul.mubr.bf16.vlgmr.msra.gmra.mrb[4].mxu1 %v6616_v28 }
 0x4e4   :  { %7032 = vmatpush1.bf16.msra.mxu1 %v14898_v23  ;;  %7063 = vmatprep.mubr.bf16.mxu1 %v6868_v49  ;;  %v14963_v49 = vld [vmem:[%s20065_s7] ss:$8 sps:$4 sm:$0xff]  }
 0x4e5   :  { %7033 = vmatprep.subr.bf16.mxu1 %v14906_v25 }
 0x4e8   :  { %7034 = vmatpush1.bf16.msra.mxu1 %v14904_v29 }
 0x4e9   :  { %7035 = vmatprep.subr.bf16.mxu1 %v14912_v50  ;;  %v14966_v50 = vld [vmem:[%s20063_s5 + $0x3b0] ss:$8 sps:$4 sm:$0xff]  }
 0x4ec   :  { %7036 = vmatpush1.bf16.msra.mxu1 %v14910_v51  ;;  %v14973_v51 = vld [vmem:[%s20065_s7 + $0x14] ss:$8 sps:$4 sm:$0xff]  }
 0x4ed   :  { %7037 = vmatprep.subr.bf16.mxu1 %v14918_v54 }
 0x4f0   :  { %7038 = vmatpush1.bf16.msra.mxu1 %v14916_v56  ;;  %v14976_v56 = vld [vmem:[%s20063_s5 + $0x3c4] ss:$8 sps:$4 sm:$0xff]  }
 0x4f1   :  { %7039 = vmatprep.subr.bf16.mxu1 %v14924_v31  ;;  %v14971_v31 = vld [vmem:[%s20065_s7 + $0x10] ss:$8 sps:$4 sm:$0xff]  }
 0x4f4   :  { %7040 = vmatpush1.bf16.msra.mxu1 %v14922_v60  ;;  %v14974_v60 = vld [vmem:[%s20063_s5 + $0x3c0] ss:$8 sps:$4 sm:$0xff]  }
 0x4f5   :  { %7041 = vmatprep.subr.bf16.mxu1 %v14930_v61  ;;  %v14979_v61 = vld [vmem:[%s20065_s7 + $0x24] ss:$8 sps:$4 sm:$0xff]  }
 0x4f6   :  { %v3818_v12 = vpop.f32.mrb[0].mxu1 }
 0x4f7   :  { %v3829_v17 = vmul.f32 %v3828_v2, %v3818_v12  ;;  %v3820_v22 = vpop.f32.mrb[1].mxu1  ;;  %v14983_v12 = vld [vmem:[%s20065_s7 + $0x30] ss:$8 sps:$4 sm:$0xff]  }
 0x4f8   :  { %v3830_v30 = vmul.f32 %v3828_v2, %v3820_v22  ;;  %v3822_v32 = vpop.f32.mrb[2].mxu1  ;;  %7042 = vmatpush1.bf16.msra.mxu1 %v14928_v6  ;;  %v14980_v6 = vld [vmem:[%s20063_s5 + $0x3d0] ss:$8 sps:$4 sm:$0xff]   ;;  %v14994_v22 = vld [vmem:[%s20063_s5 + $0x3f4] ss:$8 sps:$4 sm:$0xff]  }
 0x4f9   :  { %v3843_v34 = vadd.f32 %v3836_v7, %v3829_v17  ;;  %v3823_v35 = vpop.f32.mrb[3].mxu1  ;;  %7043 = vmatprep.subr.bf16.mxu1 %v14936_v10  ;;  %v14985_v7 = vld [vmem:[%s20065_s7 + $0x34] ss:$8 sps:$4 sm:$0xff]   ;;  %v14988_v10 = vld [vmem:[%s20063_s5 + $0x3e4] ss:$8 sps:$4 sm:$0xff]  }
 0x4fa   :  { %v3844_v37 = vadd.f32 %v3840_v16, %v3830_v30  ;;  %v14986_v16 = vld [vmem:[%s20063_s5 + $0x3e0] ss:$8 sps:$4 sm:$0xff]   ;;  %v14991_v17 = vld [vmem:[%s20065_s7 + $0x44] ss:$8 sps:$4 sm:$0xff]   ;;  %v6823_v35 = vld [vmem:[#allocation2 + $0x10] sm:$0x80] }
 0x4fb   :  { %vm3845_vm2 = vcmp.ge.f32.partialorder %v3843_v34, 0.0  ;;  %v3847_v38 = vmul.f32 0.02, %v3843_v34  ;;  %v14989_v30 = vld [vmem:[%s20065_s7 + $0x40] ss:$8 sps:$4 sm:$0xff]   ;;  %v6863_v39 = vrot.slane %v6823_v35, 7 }
 0x4fc   :  { %vm3846_vm3 = vcmp.ge.f32.partialorder %v3844_v37, 0.0  ;;  %v3848_v40 = vmul.f32 0.02, %v3844_v37  ;;  %7044 = vmatpush1.bf16.msra.mxu1 %v14934_v33  ;;  %v6825_v32 = vld [vmem:[#allocation2 + $0x20] sm:$0x3] }
 0x4fd   :  { %v3849_v42 = vsel %vm3845_vm2, %v3843_v34, %v3847_v38  ;;  %7045 = vmatprep.subr.bf16.mxu1 %v14942_v36  ;;  %v14992_v33 = vld [vmem:[%s20063_s5 + $0x3f0] ss:$8 sps:$4 sm:$0xff]   ;;  %v14997_v34 = vld [vmem:[%s20065_s7 + $0x54] ss:$8 sps:$4 sm:$0xff]   ;;  %v15000_v36 = vld [vmem:[%s20063_s5 + $0x404] ss:$8 sps:$4 sm:$0xff]  }
 0x4fe   :  { %v3850_v44 = vsel %vm3846_vm3, %v3844_v37, %v3848_v40  ;;  %v6864_v37 = vrot.slane %v6825_v32, 7  ;;  %v14995_v38 = vld [vmem:[%s20065_s7 + $0x50] ss:$8 sps:$4 sm:$0xff]   ;;  %v14998_v40 = vld [vmem:[%s20063_s5 + $0x400] ss:$8 sps:$4 sm:$0xff]  }
 0x4ff   :  { %v13804_v46 = vpack.c.bf16 %v3850_v44, %v3849_v42  ;;  %v6052_v47 = vpop.f32.mrb[16].mxu0  ;;  %v15006_v42 = vld [vmem:[%s20063_s5 + $0x414] ss:$8 sps:$4 sm:$0xff]   ;;  %v7075_v44 = vld [vmem:[#allocation2 + $0x28] sm:$0x7] }
 0x500   :  { %v6063_v52 = vmul.f32 %v6052_v47, %v3828_v2  ;;  %v6054_v53 = vpop.f32.mrb[17].mxu0  ;;  %7046 = vmatpush1.bf16.msra.mxu1 %v14940_v41  ;;  %v15003_v41 = vld [vmem:[%s20065_s7 + $0x64] ss:$8 sps:$4 sm:$0xff]   ;;  %v15009_v47 = vld [vmem:[%s20065_s7 + $0x74] ss:$8 sps:$4 sm:$0xff]  }
 0x501   :  { %3859 = vst [vmem:[#allocation3] sm:$0x77] %v13804_v46  ;;  %v6064_v57 = vmul.f32 %v6054_v53, %v3828_v2  ;;  %v6056_v58 = vpop.f32.mrb[18].mxu0  ;;  %7047 = vmatprep.subr.bf16.mxu1 %v14948_v43  ;;  %v14977_v2 = vld [vmem:[%s20065_s7 + $0x20] ss:$8 sps:$4 sm:$0xff]   ;;  %v6865_v43 = vsel %vm2886_vm1, %v6863_v39, %v6864_v37 }
 0x502   :  { %v6077_v62 = vadd.f32 %v6070_v45, %v6063_v52  ;;  %v6057_v63 = vpop.f32.mrb[19].mxu0  ;;  %v15001_v45 = vld [vmem:[%s20065_s7 + $0x60] ss:$8 sps:$4 sm:$0xff]   ;;  %v15004_v46 = vld [vmem:[%s20063_s5 + $0x410] ss:$8 sps:$4 sm:$0xff]  }
 0x503   :  { %v6078_v1 = vadd.f32 %v6074_v48, %v6064_v57  ;;  %v15012_v48 = vld [vmem:[%s20063_s5 + $0x424] ss:$8 sps:$4 sm:$0xff]   ;;  %v15007_v52 = vld [vmem:[%s20065_s7 + $0x70] ss:$8 sps:$4 sm:$0xff]   ;;  %v15010_v53 = vld [vmem:[%s20063_s5 + $0x420] ss:$8 sps:$4 sm:$0xff]  }
 0x504   :  { %vm6079_vm4 = vcmp.ge.f32.partialorder %v6077_v62, 0.0  ;;  %v6081_v3 = vmul.f32 0.02, %v6077_v62  ;;  %7048 = vmatpush1.bf16.msra.mxu1 %v14946_v55  ;;  %v15015_v55 = vld [vmem:[%s20065_s7 + $0x84] ss:$8 sps:$4 sm:$0xff]  }
 0x505   :  { %vm6080_vm5 = vcmp.ge.f32.partialorder %v6078_v1, 0.0  ;;  %v6082_v5 = vmul.f32 0.02, %v6078_v1  ;;  %7049 = vmatprep.subr.bf16.mxu1 %v14954_v59  ;;  %v15018_v57 = vld [vmem:[%s20063_s5 + $0x434] ss:$8 sps:$4 sm:$0xff]  }
 0x506   :  { %v6083_v9 = vsel %vm6079_vm4, %v6077_v62, %v6081_v3  ;;  %v15013_v58 = vld [vmem:[%s20065_s7 + $0x80] ss:$8 sps:$4 sm:$0xff]   ;;  %v15016_v59 = vld [vmem:[%s20063_s5 + $0x430] ss:$8 sps:$4 sm:$0xff]   ;;  %v15021_v62 = vld [vmem:[%s20065_s7 + $0x94] ss:$8 sps:$4 sm:$0xff]  }
 0x507   :  { %v6084_v11 = vsel %vm6080_vm5, %v6078_v1, %v6082_v5  ;;  %v15024_v63 = vld [vmem:[%s20063_s5 + $0x444] ss:$8 sps:$4 sm:$0xff]   ;;  %v15019_v1 = vld [vmem:[%s20065_s7 + $0x90] ss:$8 sps:$4 sm:$0xff]   ;;  %v15022_v3 = vld [vmem:[%s20063_s5 + $0x440] ss:$8 sps:$4 sm:$0xff]  }
 0x508   :  { %v13805_v13 = vpack.c.bf16 %v6084_v11, %v6083_v9  ;;  %7050 = vmatpush1.bf16.msra.mxu1 %v14952_v4  ;;  %v8361_v15 = vld [vmem:[#allocation3] sm:$0x22]  ;;  %v18055_v28 = vld [vmem:[#allocation3] sm:$0x11]  ;;  %v15030_v5 = vld [vmem:[%s20063_s5 + $0x454] ss:$8 sps:$4 sm:$0xff]  }
 0x509   :  { %7051 = vmatprep.subr.bf16.mxu1 %v14960_v8  ;;  %v13284_v18 = vcombine.low %v8361_v15, %v8361_v15  ;;  %v13285_v19 = vcombine.high %v8361_v15, %v8361_v15  ;;  %v13319_v54 = vcombine.high %v18055_v28, %v18055_v28  ;;  %v15027_v4 = vld [vmem:[%s20065_s7 + $0xa4] ss:$8 sps:$4 sm:$0xff]   ;;  %v15025_v8 = vld [vmem:[%s20065_s7 + $0xa0] ss:$8 sps:$4 sm:$0xff]   ;;  %v15028_v9 = vld [vmem:[%s20063_s5 + $0x450] ss:$8 sps:$4 sm:$0xff]  }
 0x50a   :  { %v6092_v23 = vrot.slane %v13805_v13, 5  ;;  %v15033_v11 = vld [vmem:[%s20065_s7 + $0xb4] ss:$8 sps:$4 sm:$0xff]   ;;  %v15036_v13 = vld [vmem:[%s20063_s5 + $0x464] ss:$8 sps:$4 sm:$0xff]  }
 0x50b   :  { %v8399_v24 = vrot.slane %v13284_v18, 1  ;;  %v8400_v25 = vrot.slane %v13285_v19, 1  ;;  %v15034_v15 = vld [vmem:[%s20063_s5 + $0x460] ss:$8 sps:$4 sm:$0xff]   ;;  %v15039_v18 = vld [vmem:[%s20065_s7 + $0xc4] ss:$8 sps:$4 sm:$0xff]  }
 0x50c   :  { %v6093_v29 = vrot.slane %v6092_v23, 4  ;;  %6096 = vst [vmem:[#allocation3] sm:$0x88] %v6092_v23  ;;  %7052 = vmatpush1.bf16.msra.mxu1 %v14958_v14  ;;  %v15031_v14 = vld [vmem:[%s20065_s7 + $0xb0] ss:$8 sps:$4 sm:$0xff]  }
 0x50d   :  { %8595 = vmatprep.mubr.bf16.mxu0 %v8400_v25  ;;  %7053 = vmatprep.subr.bf16.mxu1 %v14968_v21  ;;  %v15042_v19 = vld [vmem:[%s20063_s5 + $0x474] ss:$8 sps:$4 sm:$0xff]   ;;  %v15037_v21 = vld [vmem:[%s20065_s7 + $0xc0] ss:$8 sps:$4 sm:$0xff]   ;;  %v15040_v23 = vld [vmem:[%s20063_s5 + $0x470] ss:$8 sps:$4 sm:$0xff]  }
 0x50e   :  { %6097 = vst [vmem:[#allocation3 + $0x8] sm:$0x33] %v6093_v29  ;;  %8596 = vmatmul.mubr.bf16.vlgmr.msra.gmra.mrb[20].mxu0 %v8399_v24  ;;  %v15045_v24 = vld [vmem:[%s20065_s7 + $0xd4] ss:$8 sps:$4 sm:$0xff]   ;;  %v15048_v25 = vld [vmem:[%s20063_s5 + $0x484] ss:$8 sps:$4 sm:$0xff]  }
 0x50f   :  { %8772 = vmatpush1.bf16.msra.mxu0 %v14963_v49  ;;  %8803 = vmatprep.mubr.bf16.mxu0 %v13319_v54  ;;  %v15043_v49 = vld [vmem:[%s20065_s7 + $0xd0] ss:$8 sps:$4 sm:$0xff]   ;;  %v15046_v29 = vld [vmem:[%s20063_s5 + $0x480] ss:$8 sps:$4 sm:$0xff]   ;;  %v15074_v32 = vld [vmem:[%s20063_s5 + $0x4c4] ss:$8 sps:$4 sm:$0xff]  }
 0x510   :  { %7054 = vmatpush1.bf16.msra.mxu1 %v14966_v50  ;;  %8773 = vmatprep.subr.bf16.mxu0 %v14973_v51  ;;  %v15051_v50 = vld [vmem:[%s20065_s7 + $0xe4] ss:$8 sps:$4 sm:$0xff]   ;;  %v15054_v51 = vld [vmem:[%s20063_s5 + $0x494] ss:$8 sps:$4 sm:$0xff]   ;;  %v15049_v54 = vld [vmem:[%s20065_s7 + $0xe0] ss:$8 sps:$4 sm:$0xff]  }
 0x511   :  { %7055 = vmatprep.subr.bf16.mxu1 %v14976_v56  ;;  %v15052_v56 = vld [vmem:[%s20063_s5 + $0x490] ss:$8 sps:$4 sm:$0xff]   ;;  %v15080_v35 = vld [vmem:[%s20063_s5 + $0x4d4] ss:$8 sps:$4 sm:$0xff]   ;;  %v15086_v39 = vld [vmem:[%s20063_s5 + $0x4e4] ss:$8 sps:$4 sm:$0xff]  }
 0x512   :  { %v15078_v37 = vld [vmem:[%s20063_s5 + $0x4d0] ss:$8 sps:$4 sm:$0xff]  }
 0x513   :  { %8774 = vmatpush1.bf16.msra.mxu0 %v14971_v31  ;;  %v15057_v31 = vld [vmem:[%s20065_s7 + $0xf4] ss:$8 sps:$4 sm:$0xff]  }
 0x514   :  { %7056 = vmatpush1.bf16.msra.mxu1 %v14974_v60  ;;  %8775 = vmatprep.subr.bf16.mxu0 %v14979_v61  ;;  %v15060_v60 = vld [vmem:[%s20063_s5 + $0x4a4] ss:$8 sps:$4 sm:$0xff]  }
 0x515   :  { %7057 = vmatprep.subr.bf16.mxu1 %v14982_v0  ;;  %v18240_v61 = vld [vmem:[#allocation3] sm:$0x44]  ;;  %v15055_v0 = vld [vmem:[%s20065_s7 + $0xf0] ss:$8 sps:$4 sm:$0xff]  }
 0x517   :  { %8776 = vmatpush1.bf16.msra.mxu0 %v14977_v2  ;;  %v15058_v2 = vld [vmem:[%s20063_s5 + $0x4a0] ss:$8 sps:$4 sm:$0xff]  }
 0x518   :  { %7058 = vmatpush1.bf16.msra.mxu1 %v14980_v6  ;;  %8777 = vmatprep.subr.bf16.mxu0 %v14985_v7  ;;  %v15063_v6 = vld [vmem:[%s20065_s7 + $0x204] ss:$8 sps:$4 sm:$0xff]   ;;  %v13353_v7 = vcombine.high %v18240_v61, %v18240_v61 }
 0x519   :  { %7059 = vmatprep.subr.bf16.mxu1 %v14988_v10  ;;  %v15068_v10 = vld [vmem:[%s20063_s5 + $0x4b4] ss:$8 sps:$4 sm:$0xff]  }
 0x51b   :  { %8778 = vmatpush1.bf16.msra.mxu0 %v14983_v12  ;;  %v15061_v12 = vld [vmem:[%s20065_s7 + $0x200] ss:$8 sps:$4 sm:$0xff]  }
 0x51c   :  { %7060 = vmatpush1.bf16.msra.mxu1 %v14986_v16  ;;  %8779 = vmatprep.subr.bf16.mxu0 %v14991_v17  ;;  %v13318_v16 = vcombine.low %v18055_v28, %v18055_v28  ;;  %v15066_v17 = vld [vmem:[%s20063_s5 + $0x4b0] ss:$8 sps:$4 sm:$0xff]  }
 0x51d   :  { %7061 = vmatprep.subr.bf16.mxu1 %v14994_v22  ;;  %v15071_v22 = vld [vmem:[%s20065_s7 + $0x214] ss:$8 sps:$4 sm:$0xff]   ;;  %v15069_v28 = vld [vmem:[%s20065_s7 + $0x210] ss:$8 sps:$4 sm:$0xff]  }
 0x51f   :  { %8780 = vmatpush1.bf16.msra.mxu0 %v14989_v30  ;;  %v8851_v30 = vrot.slane %v13353_v7, 2  ;;  %v15144_v7 = vld [vmem:[%s20063_s5 + $0x580] ss:$8 sps:$4 sm:$0xff]  }
 0x520   :  { %7062 = vmatpush1.bf16.msra.mxu1 %v14992_v33  ;;  %8781 = vmatprep.subr.bf16.mxu0 %v14997_v34  ;;  %v15072_v33 = vld [vmem:[%s20063_s5 + $0x4c0] ss:$8 sps:$4 sm:$0xff]   ;;  %v15077_v34 = vld [vmem:[%s20065_s7 + $0x224] ss:$8 sps:$4 sm:$0xff]  }
 0x521   :  { %7268 = vmatprep.subr.bf16.mxu1 %v15000_v36  ;;  %v15075_v36 = vld [vmem:[%s20065_s7 + $0x220] ss:$8 sps:$4 sm:$0xff]  }
 0x523   :  { %8782 = vmatpush1.bf16.msra.mxu0 %v14995_v38  ;;  %7064 = vmatmul.mubr.bf16.vlgmr.msra.gmra.mrb[4].mxu1 %v6865_v43  ;;  %v15083_v38 = vld [vmem:[%s20065_s7 + $0x234] ss:$8 sps:$4 sm:$0xff]  }
 0x524   :  { %7269 = vmatpush1.bf16.msra.mxu1 %v14998_v40  ;;  %7300 = vmatprep.mubr.bf16.mxu1 %v7075_v44  ;;  %v15081_v40 = vld [vmem:[%s20065_s7 + $0x230] ss:$8 sps:$4 sm:$0xff]   ;;  %v15092_v43 = vld [vmem:[%s20063_s5 + $0x4f4] ss:$8 sps:$4 sm:$0xff]   ;;  %v15087_v44 = vld [vmem:[%s20065_s7 + $0x240] ss:$8 sps:$4 sm:$0xff]  }
 0x525   :  { %8783 = vmatprep.subr.bf16.mxu0 %v15003_v41  ;;  %7270 = vmatprep.subr.bf16.mxu1 %v15006_v42  ;;  %v15084_v41 = vld [vmem:[%s20063_s5 + $0x4e0] ss:$8 sps:$4 sm:$0xff]   ;;  %v15089_v42 = vld [vmem:[%s20065_s7 + $0x244] ss:$8 sps:$4 sm:$0xff]  }
 0x527   :  { %8784 = vmatpush1.bf16.msra.mxu0 %v15001_v45  ;;  %v15090_v45 = vld [vmem:[%s20063_s5 + $0x4f0] ss:$8 sps:$4 sm:$0xff]  }
 0x528   :  { %7271 = vmatpush1.bf16.msra.mxu1 %v15004_v46  ;;  %8785 = vmatprep.subr.bf16.mxu0 %v15009_v47  ;;  %v15095_v46 = vld [vmem:[%s20065_s7 + $0x254] ss:$8 sps:$4 sm:$0xff]   ;;  %v15098_v47 = vld [vmem:[%s20063_s5 + $0x504] ss:$8 sps:$4 sm:$0xff]  }
 0x529   :  { %7272 = vmatprep.subr.bf16.mxu1 %v15012_v48  ;;  %v15093_v48 = vld [vmem:[%s20065_s7 + $0x250] ss:$8 sps:$4 sm:$0xff]  }
 0x52b   :  { %8786 = vmatpush1.bf16.msra.mxu0 %v15007_v52  ;;  %v7312_v52 = vld [vmem:[#allocation2 + $0x28] sm:$0xe] }
 0x52c   :  { %7273 = vmatpush1.bf16.msra.mxu1 %v15010_v53  ;;  %8787 = vmatprep.subr.bf16.mxu0 %v15015_v55  ;;  %v15096_v53 = vld [vmem:[%s20063_s5 + $0x500] ss:$8 sps:$4 sm:$0xff]   ;;  %v15101_v55 = vld [vmem:[%s20065_s7 + $0x264] ss:$8 sps:$4 sm:$0xff]  }
 0x52d   :  { %7274 = vmatprep.subr.bf16.mxu1 %v15018_v57  ;;  %v15104_v57 = vld [vmem:[%s20063_s5 + $0x514] ss:$8 sps:$4 sm:$0xff]  }
 0x52f   :  { %8788 = vmatpush1.bf16.msra.mxu0 %v15013_v58  ;;  %v7074_v58 = vld [vmem:[#allocation2 + $0x20] sm:$0x7] }
 0x530   :  { %7275 = vmatpush1.bf16.msra.mxu1 %v15016_v59  ;;  %8789 = vmatprep.subr.bf16.mxu0 %v15021_v62  ;;  %v7348_v59 = vrot.slane %v7312_v52, 1  ;;  %v15099_v62 = vld [vmem:[%s20065_s7 + $0x260] ss:$8 sps:$4 sm:$0xff]   ;;  %v15181_v52 = vld [vmem:[%s20065_s7 + $0x334] ss:$8 sps:$4 sm:$0xff]  }
 0x531   :  { %7276 = vmatprep.subr.bf16.mxu1 %v15024_v63  ;;  %v15102_v63 = vld [vmem:[%s20063_s5 + $0x510] ss:$8 sps:$4 sm:$0xff]  }
 0x533   :  { %8790 = vmatpush1.bf16.msra.mxu0 %v15019_v1  ;;  %v15107_v1 = vld [vmem:[%s20065_s7 + $0x274] ss:$8 sps:$4 sm:$0xff]  }
 0x534   :  { %7277 = vmatpush1.bf16.msra.mxu1 %v15022_v3  ;;  %8791 = vmatprep.subr.bf16.mxu0 %v15027_v4  ;;  %v15110_v3 = vld [vmem:[%s20063_s5 + $0x524] ss:$8 sps:$4 sm:$0xff]   ;;  %v15105_v4 = vld [vmem:[%s20065_s7 + $0x270] ss:$8 sps:$4 sm:$0xff]  }
 0x535   :  { %7278 = vmatprep.subr.bf16.mxu1 %v15030_v5  ;;  %v15108_v5 = vld [vmem:[%s20063_s5 + $0x520] ss:$8 sps:$4 sm:$0xff]  }
 0x537   :  { %8792 = vmatpush1.bf16.msra.mxu0 %v15025_v8  ;;  %v15113_v8 = vld [vmem:[%s20065_s7 + $0x284] ss:$8 sps:$4 sm:$0xff]  }
 0x538   :  { %7279 = vmatpush1.bf16.msra.mxu1 %v15028_v9  ;;  %8793 = vmatprep.subr.bf16.mxu0 %v15033_v11  ;;  %v15116_v9 = vld [vmem:[%s20063_s5 + $0x534] ss:$8 sps:$4 sm:$0xff]   ;;  %v15111_v11 = vld [vmem:[%s20065_s7 + $0x280] ss:$8 sps:$4 sm:$0xff]  }
 0x539   :  { %7280 = vmatprep.subr.bf16.mxu1 %v15036_v13  ;;  %v15114_v13 = vld [vmem:[%s20063_s5 + $0x530] ss:$8 sps:$4 sm:$0xff]  }
 0x53b   :  { %8794 = vmatpush1.bf16.msra.mxu0 %v15031_v14  ;;  %v15119_v14 = vld [vmem:[%s20065_s7 + $0x294] ss:$8 sps:$4 sm:$0xff]  }
 0x53c   :  { %7281 = vmatpush1.bf16.msra.mxu1 %v15034_v15  ;;  %8795 = vmatprep.subr.bf16.mxu0 %v15039_v18  ;;  %v15122_v15 = vld [vmem:[%s20063_s5 + $0x544] ss:$8 sps:$4 sm:$0xff]   ;;  %v15117_v18 = vld [vmem:[%s20065_s7 + $0x290] ss:$8 sps:$4 sm:$0xff]  }
 0x53d   :  { %7282 = vmatprep.subr.bf16.mxu1 %v15042_v19  ;;  %v15120_v19 = vld [vmem:[%s20063_s5 + $0x540] ss:$8 sps:$4 sm:$0xff]  }
 0x53f   :  { %8796 = vmatpush1.bf16.msra.mxu0 %v15037_v21  ;;  %v15125_v21 = vld [vmem:[%s20065_s7 + $0x2a4] ss:$8 sps:$4 sm:$0xff]  }
 0x540   :  { %7283 = vmatpush1.bf16.msra.mxu1 %v15040_v23  ;;  %8797 = vmatprep.subr.bf16.mxu0 %v15045_v24  ;;  %v15128_v23 = vld [vmem:[%s20063_s5 + $0x554] ss:$8 sps:$4 sm:$0xff]   ;;  %v15123_v24 = vld [vmem:[%s20065_s7 + $0x2a0] ss:$8 sps:$4 sm:$0xff]  }
 0x541   :  { %7284 = vmatprep.subr.bf16.mxu1 %v15048_v25  ;;  %v15126_v25 = vld [vmem:[%s20063_s5 + $0x550] ss:$8 sps:$4 sm:$0xff]  }
 0x543   :  { %8798 = vmatpush1.bf16.msra.mxu0 %v15043_v49  ;;  %v15131_v49 = vld [vmem:[%s20065_s7 + $0x2b4] ss:$8 sps:$4 sm:$0xff]  }
 0x544   :  { %7285 = vmatpush1.bf16.msra.mxu1 %v15046_v29  ;;  %8799 = vmatprep.subr.bf16.mxu0 %v15051_v50  ;;  %v15134_v29 = vld [vmem:[%s20063_s5 + $0x564] ss:$8 sps:$4 sm:$0xff]   ;;  %v15129_v50 = vld [vmem:[%s20065_s7 + $0x2b0] ss:$8 sps:$4 sm:$0xff]  }
 0x545   :  { %7286 = vmatprep.subr.bf16.mxu1 %v15054_v51  ;;  %v15132_v51 = vld [vmem:[%s20063_s5 + $0x560] ss:$8 sps:$4 sm:$0xff]  }
 0x547   :  { %8800 = vmatpush1.bf16.msra.mxu0 %v15049_v54  ;;  %v15137_v54 = vld [vmem:[%s20065_s7 + $0x2c4] ss:$8 sps:$4 sm:$0xff]  }
 0x548   :  { %7287 = vmatpush1.bf16.msra.mxu1 %v15052_v56  ;;  %8801 = vmatprep.subr.bf16.mxu0 %v15057_v31  ;;  %v15140_v56 = vld [vmem:[%s20063_s5 + $0x574] ss:$8 sps:$4 sm:$0xff]   ;;  %v15135_v31 = vld [vmem:[%s20065_s7 + $0x2c0] ss:$8 sps:$4 sm:$0xff]  }
 0x549   :  { %7288 = vmatprep.subr.bf16.mxu1 %v15060_v60  ;;  %v15138_v60 = vld [vmem:[%s20063_s5 + $0x570] ss:$8 sps:$4 sm:$0xff]  }
 0x54b   :  { %8802 = vmatpush1.bf16.msra.mxu0 %v15055_v0  ;;  %v15143_v0 = vld [vmem:[%s20065_s7 + $0x2d4] ss:$8 sps:$4 sm:$0xff]  }
 0x54c   :  { %7289 = vmatpush1.bf16.msra.mxu1 %v15058_v2  ;;  %9014 = vmatprep.subr.bf16.mxu0 %v15063_v6  ;;  %v15146_v2 = vld [vmem:[%s20063_s5 + $0x584] ss:$8 sps:$4 sm:$0xff]   ;;  %v15141_v6 = vld [vmem:[%s20065_s7 + $0x2d0] ss:$8 sps:$4 sm:$0xff]  }
 0x54d   :  { %7290 = vmatprep.subr.bf16.mxu1 %v15068_v10  ;;  %v15149_v10 = vld [vmem:[%s20065_s7 + $0x2e4] ss:$8 sps:$4 sm:$0xff]  }
 0x54e   :  { %8804 = vmatmul.mubr.bf16.vlgmr.msra.gmra.mrb[20].mxu0 %v13318_v16  ;;  %v15147_v16 = vld [vmem:[%s20065_s7 + $0x2e0] ss:$8 sps:$4 sm:$0xff]  }
 0x54f   :  { %9015 = vmatpush1.bf16.msra.mxu0 %v15061_v12  ;;  %9046 = vmatprep.mubr.bf16.mxu0 %v8851_v30  ;;  %v15152_v12 = vld [vmem:[%s20063_s5 + $0x594] ss:$8 sps:$4 sm:$0xff]   ;;  %v15158_v30 = vld [vmem:[%s20063_s5 + $0x5a4] ss:$8 sps:$4 sm:$0xff]  }
 0x550   :  { %7291 = vmatpush1.bf16.msra.mxu1 %v15066_v17  ;;  %9016 = vmatprep.subr.bf16.mxu0 %v15071_v22  ;;  %v15150_v17 = vld [vmem:[%s20063_s5 + $0x590] ss:$8 sps:$4 sm:$0xff]   ;;  %v15155_v22 = vld [vmem:[%s20065_s7 + $0x2f4] ss:$8 sps:$4 sm:$0xff]  }
 0x551   :  { %7292 = vmatprep.subr.bf16.mxu1 %v15074_v32  ;;  %v18438_v32 = vld [vmem:[#allocation3] sm:$0x88] }
 0x553   :  { %9017 = vmatpush1.bf16.msra.mxu0 %v15069_v28  ;;  %v15153_v28 = vld [vmem:[%s20065_s7 + $0x2f0] ss:$8 sps:$4 sm:$0xff]  }
 0x554   :  { %7293 = vmatpush1.bf16.msra.mxu1 %v15072_v33  ;;  %9018 = vmatprep.subr.bf16.mxu0 %v15077_v34  ;;  %v13352_v33 = vcombine.low %v18240_v61, %v18240_v61  ;;  %v15156_v34 = vld [vmem:[%s20063_s5 + $0x5a0] ss:$8 sps:$4 sm:$0xff]  }
 0x555   :  { %7294 = vmatprep.subr.bf16.mxu1 %v15080_v35  ;;  %v15161_v35 = vld [vmem:[%s20065_s7 + $0x304] ss:$8 sps:$4 sm:$0xff]   ;;  %v15159_v61 = vld [vmem:[%s20065_s7 + $0x300] ss:$8 sps:$4 sm:$0xff]  }
 0x557   :  { %9019 = vmatpush1.bf16.msra.mxu0 %v15075_v36  ;;  %v13387_v36 = vcombine.high %v18438_v32, %v18438_v32 }
 0x558   :  { %7295 = vmatpush1.bf16.msra.mxu1 %v15078_v37  ;;  %9020 = vmatprep.subr.bf16.mxu0 %v15083_v38  ;;  %v15166_v37 = vld [vmem:[%s20063_s5 + $0x5b4] ss:$8 sps:$4 sm:$0xff]   ;;  %v8850_v38 = vrot.slane %v13352_v33, 2  ;;  %v15236_v33 = vld [vmem:[%s20063_s5 + $0x670] ss:$8 sps:$4 sm:$0xff]  }
 0x559   :  { %7296 = vmatprep.subr.bf16.mxu1 %v15086_v39  ;;  %v15164_v39 = vld [vmem:[%s20063_s5 + $0x5b0] ss:$8 sps:$4 sm:$0xff]  }
 0x55b   :  { %9021 = vmatpush1.bf16.msra.mxu0 %v15081_v40  ;;  %v15169_v40 = vld [vmem:[%s20065_s7 + $0x314] ss:$8 sps:$4 sm:$0xff]  }
 0x55c   :  { %7297 = vmatpush1.bf16.msra.mxu1 %v15084_v41  ;;  %9022 = vmatprep.subr.bf16.mxu0 %v15089_v42  ;;  %v9096_v41 = vrot.slane %v13387_v36, 3  ;;  %v15172_v42 = vld [vmem:[%s20063_s5 + $0x5c4] ss:$8 sps:$4 sm:$0xff]   ;;  %v15239_v36 = vld [vmem:[%s20065_s7 + $0x3d0] ss:$8 sps:$4 sm:$0xff]  }
 0x55d   :  { %7298 = vmatprep.subr.bf16.mxu1 %v15092_v43  ;;  %v15167_v43 = vld [vmem:[%s20065_s7 + $0x310] ss:$8 sps:$4 sm:$0xff]  }
 0x55f   :  { %9023 = vmatpush1.bf16.msra.mxu0 %v15087_v44  ;;  %v15170_v44 = vld [vmem:[%s20063_s5 + $0x5c0] ss:$8 sps:$4 sm:$0xff]  }
 0x560   :  { %7299 = vmatpush1.bf16.msra.mxu1 %v15090_v45  ;;  %9024 = vmatprep.subr.bf16.mxu0 %v15095_v46  ;;  %v15175_v45 = vld [vmem:[%s20065_s7 + $0x324] ss:$8 sps:$4 sm:$0xff]   ;;  %v15178_v46 = vld [vmem:[%s20063_s5 + $0x5d4] ss:$8 sps:$4 sm:$0xff]  }
 0x561   :  { %7511 = vmatprep.subr.bf16.mxu1 %v15098_v47  ;;  %v15173_v47 = vld [vmem:[%s20065_s7 + $0x320] ss:$8 sps:$4 sm:$0xff]  }
 0x563   :  { %9025 = vmatpush1.bf16.msra.mxu0 %v15093_v48  ;;  %7301 = vmatmul.mubr.bf16.vlgmr.msra.gmra.mrb[4].mxu1 %v7074_v58  ;;  %v15176_v48 = vld [vmem:[%s20063_s5 + $0x5d0] ss:$8 sps:$4 sm:$0xff]   ;;  %v15187_v58 = vld [vmem:[%s20065_s7 + $0x344] ss:$8 sps:$4 sm:$0xff]  }
 0x564   :  { %7512 = vmatpush1.bf16.msra.mxu1 %v15096_v53  ;;  %7543 = vmatprep.mubr.bf16.mxu1 %v7348_v59  ;;  %v15184_v53 = vld [vmem:[%s20063_s5 + $0x5e4] ss:$8 sps:$4 sm:$0xff]   ;;  %v15190_v59 = vld [vmem:[%s20063_s5 + $0x5f4] ss:$8 sps:$4 sm:$0xff]  }
 0x565   :  { %9026 = vmatprep.subr.bf16.mxu0 %v15101_v55  ;;  %7513 = vmatprep.subr.bf16.mxu1 %v15104_v57  ;;  %v15179_v55 = vld [vmem:[%s20065_s7 + $0x330] ss:$8 sps:$4 sm:$0xff]   ;;  %v15182_v57 = vld [vmem:[%s20063_s5 + $0x5e0] ss:$8 sps:$4 sm:$0xff]  }
 0x567   :  { %9027 = vmatpush1.bf16.msra.mxu0 %v15099_v62  ;;  %v15185_v62 = vld [vmem:[%s20065_s7 + $0x340] ss:$8 sps:$4 sm:$0xff]  }
 0x568   :  { %7514 = vmatpush1.bf16.msra.mxu1 %v15102_v63  ;;  %9028 = vmatprep.subr.bf16.mxu0 %v15107_v1  ;;  %v15188_v63 = vld [vmem:[%s20063_s5 + $0x5f0] ss:$8 sps:$4 sm:$0xff]   ;;  %v15193_v1 = vld [vmem:[%s20065_s7 + $0x354] ss:$8 sps:$4 sm:$0xff]  }
 0x569   :  { %7515 = vmatprep.subr.bf16.mxu1 %v15110_v3  ;;  %v15196_v3 = vld [vmem:[%s20063_s5 + $0x604] ss:$8 sps:$4 sm:$0xff]  }
 0x56b   :  { %9029 = vmatpush1.bf16.msra.mxu0 %v15105_v4  ;;  %v7311_v4 = vld [vmem:[#allocation2 + $0x20] sm:$0xe] }
 0x56c   :  { %7516 = vmatpush1.bf16.msra.mxu1 %v15108_v5  ;;  %9030 = vmatprep.subr.bf16.mxu0 %v15113_v8  ;;  %v15191_v5 = vld [vmem:[%s20065_s7 + $0x350] ss:$8 sps:$4 sm:$0xff]   ;;  %v7555_v8 = vld [vmem:[#allocation2 + $0x28] sm:$0x70] }
 0x56d   :  { %7517 = vmatprep.subr.bf16.mxu1 %v15116_v9  ;;  %v15194_v9 = vld [vmem:[%s20063_s5 + $0x600] ss:$8 sps:$4 sm:$0xff]  }
 0x56f   :  { %9031 = vmatpush1.bf16.msra.mxu0 %v15111_v11  ;;  %v7347_v11 = vrot.slane %v7311_v4, 1  ;;  %v15274_v4 = vld [vmem:[%s20063_s5 + $0x6d0] ss:$8 sps:$4 sm:$0xff]  }
 0x570   :  { %7518 = vmatpush1.bf16.msra.mxu1 %v15114_v13  ;;  %9032 = vmatprep.subr.bf16.mxu0 %v15119_v14  ;;  %v15199_v13 = vld [vmem:[%s20065_s7 + $0x364] ss:$8 sps:$4 sm:$0xff]   ;;  %v15202_v14 = vld [vmem:[%s20063_s5 + $0x614] ss:$8 sps:$4 sm:$0xff]  }
 0x571   :  { %7519 = vmatprep.subr.bf16.mxu1 %v15122_v15  ;;  %v7591_v15 = vrot.slane %v7555_v8, 4  ;;  %v15282_v8 = vld [vmem:[%s20063_s5 + $0x6e4] ss:$8 sps:$4 sm:$0xff]  }
 0x573   :  { %9033 = vmatpush1.bf16.msra.mxu0 %v15117_v18  ;;  %v15197_v18 = vld [vmem:[%s20065_s7 + $0x360] ss:$8 sps:$4 sm:$0xff]  }
 0x574   :  { %7520 = vmatpush1.bf16.msra.mxu1 %v15120_v19  ;;  %9034 = vmatprep.subr.bf16.mxu0 %v15125_v21  ;;  %v15200_v19 = vld [vmem:[%s20063_s5 + $0x610] ss:$8 sps:$4 sm:$0xff]   ;;  %v15205_v21 = vld [vmem:[%s20065_s7 + $0x374] ss:$8 sps:$4 sm:$0xff]  }
 0x575   :  { %7521 = vmatprep.subr.bf16.mxu1 %v15128_v23  ;;  %v15208_v23 = vld [vmem:[%s20063_s5 + $0x624] ss:$8 sps:$4 sm:$0xff]  }
 0x577   :  { %9035 = vmatpush1.bf16.msra.mxu0 %v15123_v24  ;;  %v15203_v24 = vld [vmem:[%s20065_s7 + $0x370] ss:$8 sps:$4 sm:$0xff]  }
 0x578   :  { %7522 = vmatpush1.bf16.msra.mxu1 %v15126_v25  ;;  %9036 = vmatprep.subr.bf16.mxu0 %v15131_v49  ;;  %v15206_v25 = vld [vmem:[%s20063_s5 + $0x620] ss:$8 sps:$4 sm:$0xff]   ;;  %v15211_v49 = vld [vmem:[%s20065_s7 + $0x384] ss:$8 sps:$4 sm:$0xff]  }
 0x579   :  { %7523 = vmatprep.subr.bf16.mxu1 %v15134_v29  ;;  %v15214_v29 = vld [vmem:[%s20063_s5 + $0x634] ss:$8 sps:$4 sm:$0xff]  }
 0x57b   :  { %9037 = vmatpush1.bf16.msra.mxu0 %v15129_v50  ;;  %v15209_v50 = vld [vmem:[%s20065_s7 + $0x380] ss:$8 sps:$4 sm:$0xff]  }
 0x57c   :  { %7524 = vmatpush1.bf16.msra.mxu1 %v15132_v51  ;;  %9038 = vmatprep.subr.bf16.mxu0 %v15137_v54  ;;  %v15212_v51 = vld [vmem:[%s20063_s5 + $0x630] ss:$8 sps:$4 sm:$0xff]   ;;  %v15217_v54 = vld [vmem:[%s20065_s7 + $0x394] ss:$8 sps:$4 sm:$0xff]  }
 0x57d   :  { %7525 = vmatprep.subr.bf16.mxu1 %v15140_v56  ;;  %v15220_v56 = vld [vmem:[%s20063_s5 + $0x644] ss:$8 sps:$4 sm:$0xff]  }
 0x57f   :  { %9039 = vmatpush1.bf16.msra.mxu0 %v15135_v31  ;;  %v15215_v31 = vld [vmem:[%s20065_s7 + $0x390] ss:$8 sps:$4 sm:$0xff]  }
 0x580   :  { %7526 = vmatpush1.bf16.msra.mxu1 %v15138_v60  ;;  %9040 = vmatprep.subr.bf16.mxu0 %v15143_v0  ;;  %v15218_v60 = vld [vmem:[%s20063_s5 + $0x640] ss:$8 sps:$4 sm:$0xff]   ;;  %v15223_v0 = vld [vmem:[%s20065_s7 + $0x3a4] ss:$8 sps:$4 sm:$0xff]  }
 0x581   :  { %7527 = vmatprep.subr.bf16.mxu1 %v15146_v2  ;;  %v15226_v2 = vld [vmem:[%s20063_s5 + $0x654] ss:$8 sps:$4 sm:$0xff]  }
 0x583   :  { %9041 = vmatpush1.bf16.msra.mxu0 %v15141_v6  ;;  %v15221_v6 = vld [vmem:[%s20065_s7 + $0x3a0] ss:$8 sps:$4 sm:$0xff]  }
 0x584   :  { %7528 = vmatpush1.bf16.msra.mxu1 %v15144_v7  ;;  %9042 = vmatprep.subr.bf16.mxu0 %v15149_v10  ;;  %v15224_v7 = vld [vmem:[%s20063_s5 + $0x650] ss:$8 sps:$4 sm:$0xff]   ;;  %v15229_v10 = vld [vmem:[%s20065_s7 + $0x3b4] ss:$8 sps:$4 sm:$0xff]  }
 0x585   :  { %7529 = vmatprep.subr.bf16.mxu1 %v15152_v12  ;;  %v15232_v12 = vld [vmem:[%s20063_s5 + $0x664] ss:$8 sps:$4 sm:$0xff]  }
 0x587   :  { %9043 = vmatpush1.bf16.msra.mxu0 %v15147_v16  ;;  %v15227_v16 = vld [vmem:[%s20065_s7 + $0x3b0] ss:$8 sps:$4 sm:$0xff]  }
 0x588   :  { %7530 = vmatpush1.bf16.msra.mxu1 %v15150_v17  ;;  %9044 = vmatprep.subr.bf16.mxu0 %v15155_v22  ;;  %v15230_v17 = vld [vmem:[%s20063_s5 + $0x660] ss:$8 sps:$4 sm:$0xff]   ;;  %v15235_v22 = vld [vmem:[%s20065_s7 + $0x3c4] ss:$8 sps:$4 sm:$0xff]  }
 0x589   :  { %7531 = vmatprep.subr.bf16.mxu1 %v15158_v30  ;;  %v15238_v30 = vld [vmem:[%s20063_s5 + $0x674] ss:$8 sps:$4 sm:$0xff]  }
 0x58b   :  { %9045 = vmatpush1.bf16.msra.mxu0 %v15153_v28  ;;  %v15233_v28 = vld [vmem:[%s20065_s7 + $0x3c0] ss:$8 sps:$4 sm:$0xff]  }
 0x58c   :  { %7532 = vmatpush1.bf16.msra.mxu1 %v15156_v34  ;;  %9259 = vmatprep.subr.bf16.mxu0 %v15161_v35  ;;  %v15241_v34 = vld [vmem:[%s20065_s7 + $0x3d4] ss:$8 sps:$4 sm:$0xff]   ;;  %v15244_v35 = vld [vmem:[%s20063_s5 + $0x684] ss:$8 sps:$4 sm:$0xff]  }
 0x58d   :  { %7533 = vmatprep.subr.bf16.mxu1 %v15166_v37  ;;  %v15242_v37 = vld [vmem:[%s20063_s5 + $0x680] ss:$8 sps:$4 sm:$0xff]  }
 0x58e   :  { %9047 = vmatmul.mubr.bf16.vlgmr.msra.gmra.mrb[20].mxu0 %v8850_v38  ;;  %v15250_v38 = vld [vmem:[%s20063_s5 + $0x694] ss:$8 sps:$4 sm:$0xff]  }
 0x58f   :  { %9260 = vmatpush1.bf16.msra.mxu0 %v15159_v61  ;;  %9291 = vmatprep.mubr.bf16.mxu0 %v9096_v41  ;;  %v15247_v61 = vld [vmem:[%s20065_s7 + $0x3e4] ss:$8 sps:$4 sm:$0xff]   ;;  %v15253_v41 = vld [vmem:[%s20065_s7 + $0x3f4] ss:$8 sps:$4 sm:$0xff]  }
 0x590   :  { %7534 = vmatpush1.bf16.msra.mxu1 %v15164_v39  ;;  %9261 = vmatprep.subr.bf16.mxu0 %v15169_v40  ;;  %v15245_v39 = vld [vmem:[%s20065_s7 + $0x3e0] ss:$8 sps:$4 sm:$0xff]   ;;  %v15248_v40 = vld [vmem:[%s20063_s5 + $0x690] ss:$8 sps:$4 sm:$0xff]  }
 0x591   :  { %7535 = vmatprep.subr.bf16.mxu1 %v15172_v42  ;;  %v15256_v42 = vld [vmem:[%s20063_s5 + $0x6a4] ss:$8 sps:$4 sm:$0xff]  }
 0x593   :  { %9262 = vmatpush1.bf16.msra.mxu0 %v15167_v43  ;;  %v15251_v43 = vld [vmem:[%s20065_s7 + $0x3f0] ss:$8 sps:$4 sm:$0xff]  }
 0x594   :  { %7536 = vmatpush1.bf16.msra.mxu1 %v15170_v44  ;;  %9263 = vmatprep.subr.bf16.mxu0 %v15175_v45  ;;  %v13386_v44 = vcombine.low %v18438_v32, %v18438_v32  ;;  %v15254_v45 = vld [vmem:[%s20063_s5 + $0x6a0] ss:$8 sps:$4 sm:$0xff]  }
 0x595   :  { %7537 = vmatprep.subr.bf16.mxu1 %v15178_v46  ;;  %v15259_v46 = vld [vmem:[%s20065_s7 + $0x404] ss:$8 sps:$4 sm:$0xff]   ;;  %v15257_v32 = vld [vmem:[%s20065_s7 + $0x400] ss:$8 sps:$4 sm:$0xff]  }
 0x597   :  { %9264 = vmatpush1.bf16.msra.mxu0 %v15173_v47  ;;  %v15264_v47 = vld [vmem:[%s20063_s5 + $0x6b4] ss:$8 sps:$4 sm:$0xff]  }
 0x598   :  { %7538 = vmatpush1.bf16.msra.mxu1 %v15176_v48  ;;  %9265 = vmatprep.subr.bf16.mxu0 %v15181_v52  ;;  %v18650_v48 = vld [vmem:[#allocation3 + $0x8] sm:$0x11]  ;;  %v9095_v52 = vrot.slane %v13386_v44, 3  ;;  %v15339_v44 = vld [vmem:[%s20065_s7 + $0x4d4] ss:$8 sps:$4 sm:$0xff]  }
 0x599   :  { %7539 = vmatprep.subr.bf16.mxu1 %v15184_v53  ;;  %v15262_v53 = vld [vmem:[%s20063_s5 + $0x6b0] ss:$8 sps:$4 sm:$0xff]  }
 0x59b   :  { %9266 = vmatpush1.bf16.msra.mxu0 %v15179_v55  ;;  %v15267_v55 = vld [vmem:[%s20065_s7 + $0x414] ss:$8 sps:$4 sm:$0xff]  }
 0x59c   :  { %7540 = vmatpush1.bf16.msra.mxu1 %v15182_v57  ;;  %9267 = vmatprep.subr.bf16.mxu0 %v15187_v58  ;;  %v13421_v57 = vcombine.high %v18650_v48, %v18650_v48  ;;  %v15270_v58 = vld [vmem:[%s20063_s5 + $0x6c4] ss:$8 sps:$4 sm:$0xff]  }
 0x59d   :  { %7541 = vmatprep.subr.bf16.mxu1 %v15190_v59  ;;  %v15265_v59 = vld [vmem:[%s20065_s7 + $0x410] ss:$8 sps:$4 sm:$0xff]  }
 0x59f   :  { %9268 = vmatpush1.bf16.msra.mxu0 %v15185_v62  ;;  %v15268_v62 = vld [vmem:[%s20063_s5 + $0x6c0] ss:$8 sps:$4 sm:$0xff]  }
 0x5a0   :  { %7542 = vmatpush1.bf16.msra.mxu1 %v15188_v63  ;;  %9269 = vmatprep.subr.bf16.mxu0 %v15193_v1  ;;  %v15273_v63 = vld [vmem:[%s20065_s7 + $0x424] ss:$8 sps:$4 sm:$0xff]   ;;  %v15276_v1 = vld [vmem:[%s20063_s5 + $0x6d4] ss:$8 sps:$4 sm:$0xff]  }
 0x5a1   :  { %7754 = vmatprep.subr.bf16.mxu1 %v15196_v3  ;;  %v15271_v3 = vld [vmem:[%s20065_s7 + $0x420] ss:$8 sps:$4 sm:$0xff]  }
 0x5a3   :  { %9270 = vmatpush1.bf16.msra.mxu0 %v15191_v5  ;;  %7544 = vmatmul.mubr.bf16.vlgmr.msra.gmra.mrb[4].mxu1 %v7347_v11  ;;  %v15279_v5 = vld [vmem:[%s20065_s7 + $0x434] ss:$8 sps:$4 sm:$0xff]   ;;  %v15280_v11 = vld [vmem:[%s20063_s5 + $0x6e0] ss:$8 sps:$4 sm:$0xff]  }
 0x5a4   :  { %7755 = vmatpush1.bf16.msra.mxu1 %v15194_v9  ;;  %7786 = vmatprep.mubr.bf16.mxu1 %v7591_v15  ;;  %v15277_v9 = vld [vmem:[%s20065_s7 + $0x430] ss:$8 sps:$4 sm:$0xff]   ;;  %v15283_v15 = vld [vmem:[%s20065_s7 + $0x440] ss:$8 sps:$4 sm:$0xff]  }
 0x5a5   :  { %9271 = vmatprep.subr.bf16.mxu0 %v15199_v13  ;;  %7756 = vmatprep.subr.bf16.mxu1 %v15202_v14  ;;  %v15285_v13 = vld [vmem:[%s20065_s7 + $0x444] ss:$8 sps:$4 sm:$0xff]   ;;  %v15288_v14 = vld [vmem:[%s20063_s5 + $0x6f4] ss:$8 sps:$4 sm:$0xff]  }
 0x5a7   :  { %9272 = vmatpush1.bf16.msra.mxu0 %v15197_v18  ;;  %v15286_v18 = vld [vmem:[%s20063_s5 + $0x6f0] ss:$8 sps:$4 sm:$0xff]  }
 0x5a8   :  { %7757 = vmatpush1.bf16.msra.mxu1 %v15200_v19  ;;  %9273 = vmatprep.subr.bf16.mxu0 %v15205_v21  ;;  %v15291_v19 = vld [vmem:[%s20065_s7 + $0x454] ss:$8 sps:$4 sm:$0xff]   ;;  %v15294_v21 = vld [vmem:[%s20063_s5 + $0x704] ss:$8 sps:$4 sm:$0xff]  }
 0x5a9   :  { %7758 = vmatprep.subr.bf16.mxu1 %v15208_v23  ;;  %v7554_v23 = vld [vmem:[#allocation2 + $0x20] sm:$0x70] }
 0x5ab   :  { %9274 = vmatpush1.bf16.msra.mxu0 %v15203_v24  ;;  %v15289_v24 = vld [vmem:[%s20065_s7 + $0x450] ss:$8 sps:$4 sm:$0xff]  }
 0x5ac   :  { %7759 = vmatpush1.bf16.msra.mxu1 %v15206_v25  ;;  %9275 = vmatprep.subr.bf16.mxu0 %v15211_v49  ;;  %v7798_v25 = vld [vmem:[#allocation2 + $0x28] sm:$0xe0]  ;;  %v15292_v49 = vld [vmem:[%s20063_s5 + $0x700] ss:$8 sps:$4 sm:$0xff]  }
 0x5ad   :  { %7760 = vmatprep.subr.bf16.mxu1 %v15214_v29  ;;  %v7590_v29 = vrot.slane %v7554_v23, 4  ;;  %v15372_v23 = vld [vmem:[%s20063_s5 + $0x7d0] ss:$8 sps:$4 sm:$0xff]  }
 0x5af   :  { %9276 = vmatpush1.bf16.msra.mxu0 %v15209_v50  ;;  %v15297_v50 = vld [vmem:[%s20065_s7 + $0x464] ss:$8 sps:$4 sm:$0xff]  }
 0x5b0   :  { %7761 = vmatpush1.bf16.msra.mxu1 %v15212_v51  ;;  %9277 = vmatprep.subr.bf16.mxu0 %v15217_v54  ;;  %v15300_v51 = vld [vmem:[%s20063_s5 + $0x714] ss:$8 sps:$4 sm:$0xff]   ;;  %v7834_v54 = vrot.slane %v7798_v25, 5  ;;  %v15380_v25 = vld [vmem:[%s20063_s5 + $0x7e4] ss:$8 sps:$4 sm:$0xff]  }
 0x5b1   :  { %7762 = vmatprep.subr.bf16.mxu1 %v15220_v56  ;;  %v15295_v56 = vld [vmem:[%s20065_s7 + $0x460] ss:$8 sps:$4 sm:$0xff]  }
 0x5b3   :  { %9278 = vmatpush1.bf16.msra.mxu0 %v15215_v31  ;;  %v15298_v31 = vld [vmem:[%s20063_s5 + $0x710] ss:$8 sps:$4 sm:$0xff]  }
 0x5b4   :  { %7763 = vmatpush1.bf16.msra.mxu1 %v15218_v60  ;;  %9279 = vmatprep.subr.bf16.mxu0 %v15223_v0  ;;  %v15303_v60 = vld [vmem:[%s20065_s7 + $0x474] ss:$8 sps:$4 sm:$0xff]   ;;  %v15306_v0 = vld [vmem:[%s20063_s5 + $0x724] ss:$8 sps:$4 sm:$0xff]  }
 0x5b5   :  { %7764 = vmatprep.subr.bf16.mxu1 %v15226_v2  ;;  %v15301_v2 = vld [vmem:[%s20065_s7 + $0x470] ss:$8 sps:$4 sm:$0xff]  }
 0x5b7   :  { %9280 = vmatpush1.bf16.msra.mxu0 %v15221_v6  ;;  %v15304_v6 = vld [vmem:[%s20063_s5 + $0x720] ss:$8 sps:$4 sm:$0xff]  }
 0x5b8   :  { %7765 = vmatpush1.bf16.msra.mxu1 %v15224_v7  ;;  %9281 = vmatprep.subr.bf16.mxu0 %v15229_v10  ;;  %v15309_v7 = vld [vmem:[%s20065_s7 + $0x484] ss:$8 sps:$4 sm:$0xff]   ;;  %v15312_v10 = vld [vmem:[%s20063_s5 + $0x734] ss:$8 sps:$4 sm:$0xff]  }
 0x5b9   :  { %7766 = vmatprep.subr.bf16.mxu1 %v15232_v12  ;;  %v15307_v12 = vld [vmem:[%s20065_s7 + $0x480] ss:$8 sps:$4 sm:$0xff]  }
 0x5bb   :  { %9282 = vmatpush1.bf16.msra.mxu0 %v15227_v16  ;;  %v15310_v16 = vld [vmem:[%s20063_s5 + $0x730] ss:$8 sps:$4 sm:$0xff]  }
 0x5bc   :  { %7767 = vmatpush1.bf16.msra.mxu1 %v15230_v17  ;;  %9283 = vmatprep.subr.bf16.mxu0 %v15235_v22  ;;  %v15315_v17 = vld [vmem:[%s20065_s7 + $0x494] ss:$8 sps:$4 sm:$0xff]   ;;  %v15318_v22 = vld [vmem:[%s20063_s5 + $0x744] ss:$8 sps:$4 sm:$0xff]  }
 0x5bd   :  { %7768 = vmatprep.subr.bf16.mxu1 %v15238_v30  ;;  %v15313_v30 = vld [vmem:[%s20065_s7 + $0x490] ss:$8 sps:$4 sm:$0xff]  }
 0x5bf   :  { %9284 = vmatpush1.bf16.msra.mxu0 %v15233_v28  ;;  %v15316_v28 = vld [vmem:[%s20063_s5 + $0x740] ss:$8 sps:$4 sm:$0xff]  }
 0x5c0   :  { %7769 = vmatpush1.bf16.msra.mxu1 %v15236_v33  ;;  %9285 = vmatprep.subr.bf16.mxu0 %v15241_v34  ;;  %v15321_v33 = vld [vmem:[%s20065_s7 + $0x4a4] ss:$8 sps:$4 sm:$0xff]   ;;  %v15324_v34 = vld [vmem:[%s20063_s5 + $0x754] ss:$8 sps:$4 sm:$0xff]  }
 0x5c1   :  { %7770 = vmatprep.subr.bf16.mxu1 %v15244_v35  ;;  %v15319_v35 = vld [vmem:[%s20065_s7 + $0x4a0] ss:$8 sps:$4 sm:$0xff]  }
 0x5c3   :  { %9286 = vmatpush1.bf16.msra.mxu0 %v15239_v36  ;;  %v15322_v36 = vld [vmem:[%s20063_s5 + $0x750] ss:$8 sps:$4 sm:$0xff]  }
 0x5c4   :  { %7771 = vmatpush1.bf16.msra.mxu1 %v15242_v37  ;;  %9287 = vmatprep.subr.bf16.mxu0 %v15247_v61  ;;  %v15327_v37 = vld [vmem:[%s20065_s7 + $0x4b4] ss:$8 sps:$4 sm:$0xff]   ;;  %v15330_v61 = vld [vmem:[%s20063_s5 + $0x764] ss:$8 sps:$4 sm:$0xff]  }
 0x5c5   :  { %7772 = vmatprep.subr.bf16.mxu1 %v15250_v38  ;;  %v15325_v38 = vld [vmem:[%s20065_s7 + $0x4b0] ss:$8 sps:$4 sm:$0xff]  }
 0x5c7   :  { %9288 = vmatpush1.bf16.msra.mxu0 %v15245_v39  ;;  %v15328_v39 = vld [vmem:[%s20063_s5 + $0x760] ss:$8 sps:$4 sm:$0xff]  }
 0x5c8   :  { %7773 = vmatpush1.bf16.msra.mxu1 %v15248_v40  ;;  %9289 = vmatprep.subr.bf16.mxu0 %v15253_v41  ;;  %v15333_v40 = vld [vmem:[%s20065_s7 + $0x4c4] ss:$8 sps:$4 sm:$0xff]   ;;  %v15336_v41 = vld [vmem:[%s20063_s5 + $0x774] ss:$8 sps:$4 sm:$0xff]  }
 0x5c9   :  { %7774 = vmatprep.subr.bf16.mxu1 %v15256_v42  ;;  %v15331_v42 = vld [vmem:[%s20065_s7 + $0x4c0] ss:$8 sps:$4 sm:$0xff]  }
 0x5cb   :  { %9290 = vmatpush1.bf16.msra.mxu0 %v15251_v43  ;;  %v15334_v43 = vld [vmem:[%s20063_s5 + $0x770] ss:$8 sps:$4 sm:$0xff]  }
 0x5cc   :  { %7775 = vmatpush1.bf16.msra.mxu1 %v15254_v45  ;;  %9502 = vmatprep.subr.bf16.mxu0 %v15259_v46  ;;  %v15342_v45 = vld [vmem:[%s20063_s5 + $0x784] ss:$8 sps:$4 sm:$0xff]   ;;  %v15337_v46 = vld [vmem:[%s20065_s7 + $0x4d0] ss:$8 sps:$4 sm:$0xff]  }
 0x5cd   :  { %7776 = vmatprep.subr.bf16.mxu1 %v15264_v47  ;;  %v15340_v47 = vld [vmem:[%s20063_s5 + $0x780] ss:$8 sps:$4 sm:$0xff]  }
 0x5ce   :  { %9292 = vmatmul.mubr.bf16.vlgmr.msra.gmra.mrb[20].mxu0 %v9095_v52  ;;  %v15348_v52 = vld [vmem:[%s20063_s5 + $0x794] ss:$8 sps:$4 sm:$0xff]  }
 0x5cf   :  { %9503 = vmatpush1.bf16.msra.mxu0 %v15257_v32  ;;  %9534 = vmatprep.mubr.bf16.mxu0 %v13421_v57  ;;  %v15345_v32 = vld [vmem:[%s20065_s7 + $0x4e4] ss:$8 sps:$4 sm:$0xff]   ;;  %v15351_v57 = vld [vmem:[%s20065_s7 + $0x4f4] ss:$8 sps:$4 sm:$0xff]  }
 0x5d0   :  { %7777 = vmatpush1.bf16.msra.mxu1 %v15262_v53  ;;  %9504 = vmatprep.subr.bf16.mxu0 %v15267_v55  ;;  %v15343_v53 = vld [vmem:[%s20065_s7 + $0x4e0] ss:$8 sps:$4 sm:$0xff]   ;;  %v15346_v55 = vld [vmem:[%s20063_s5 + $0x790] ss:$8 sps:$4 sm:$0xff]  }
 0x5d1   :  { %7778 = vmatprep.subr.bf16.mxu1 %v15270_v58  ;;  %v15354_v58 = vld [vmem:[%s20063_s5 + $0x7a4] ss:$8 sps:$4 sm:$0xff]  }
 0x5d3   :  { %9505 = vmatpush1.bf16.msra.mxu0 %v15265_v59  ;;  %v18834_v59 = vld [vmem:[#allocation3 + $0x8] sm:$0x22] }
 0x5d4   :  { %7779 = vmatpush1.bf16.msra.mxu1 %v15268_v62  ;;  %9506 = vmatprep.subr.bf16.mxu0 %v15273_v63  ;;  %v15349_v62 = vld [vmem:[%s20065_s7 + $0x4f0] ss:$8 sps:$4 sm:$0xff]   ;;  %v15352_v63 = vld [vmem:[%s20063_s5 + $0x7a0] ss:$8 sps:$4 sm:$0xff]  }
 0x5d5   :  { %7780 = vmatprep.subr.bf16.mxu1 %v15276_v1  ;;  %v15357_v1 = vld [vmem:[%s20065_s7 + $0x504] ss:$8 sps:$4 sm:$0xff]  }
 0x5d7   :  { %9507 = vmatpush1.bf16.msra.mxu0 %v15271_v3  ;;  %v13455_v3 = vcombine.high %v18834_v59, %v18834_v59 }
 0x5d8   :  { %7781 = vmatpush1.bf16.msra.mxu1 %v15274_v4  ;;  %9508 = vmatprep.subr.bf16.mxu0 %v15279_v5  ;;  %v15362_v4 = vld [vmem:[%s20063_s5 + $0x7b4] ss:$8 sps:$4 sm:$0xff]   ;;  %v15355_v5 = vld [vmem:[%s20065_s7 + $0x500] ss:$8 sps:$4 sm:$0xff]  }
 0x5d9   :  { %7782 = vmatprep.subr.bf16.mxu1 %v15282_v8  ;;  %v13420_v8 = vcombine.low %v18650_v48, %v18650_v48  ;;  %v15363_v48 = vld [vmem:[%s20065_s7 + $0x510] ss:$8 sps:$4 sm:$0xff]  }
 0x5db   :  { %9509 = vmatpush1.bf16.msra.mxu0 %v15277_v9  ;;  %v15360_v9 = vld [vmem:[%s20063_s5 + $0x7b0] ss:$8 sps:$4 sm:$0xff]  }
 0x5dc   :  { %7783 = vmatpush1.bf16.msra.mxu1 %v15280_v11  ;;  %9510 = vmatprep.subr.bf16.mxu0 %v15285_v13  ;;  %v15365_v11 = vld [vmem:[%s20065_s7 + $0x514] ss:$8 sps:$4 sm:$0xff]   ;;  %v9584_v13 = vrot.slane %v13455_v3, 1  ;;  %v15432_v3 = vld [vmem:[%s20063_s5 + $0x870] ss:$8 sps:$4 sm:$0xff]  }
 0x5dd   :  { %7784 = vmatprep.subr.bf16.mxu1 %v15288_v14  ;;  %v15368_v14 = vld [vmem:[%s20063_s5 + $0x7c4] ss:$8 sps:$4 sm:$0xff]  }
 0x5df   :  { %9511 = vmatpush1.bf16.msra.mxu0 %v15283_v15  ;;  %v15366_v15 = vld [vmem:[%s20063_s5 + $0x7c0] ss:$8 sps:$4 sm:$0xff]  }
 0x5e0   :  { %7785 = vmatpush1.bf16.msra.mxu1 %v15286_v18  ;;  %9512 = vmatprep.subr.bf16.mxu0 %v15291_v19  ;;  %v15371_v18 = vld [vmem:[%s20065_s7 + $0x524] ss:$8 sps:$4 sm:$0xff]   ;;  %v15374_v19 = vld [vmem:[%s20063_s5 + $0x7d4] ss:$8 sps:$4 sm:$0xff]  }
 0x5e1   :  { %7997 = vmatprep.subr.bf16.mxu1 %v15294_v21  ;;  %v15369_v21 = vld [vmem:[%s20065_s7 + $0x520] ss:$8 sps:$4 sm:$0xff]  }
 0x5e3   :  { %9513 = vmatpush1.bf16.msra.mxu0 %v15289_v24  ;;  %7787 = vmatmul.mubr.bf16.vlgmr.msra.gmra.mrb[4].mxu1 %v7590_v29  ;;  %v15377_v24 = vld [vmem:[%s20065_s7 + $0x534] ss:$8 sps:$4 sm:$0xff]   ;;  %v15378_v29 = vld [vmem:[%s20063_s5 + $0x7e0] ss:$8 sps:$4 sm:$0xff]  }
 0x5e4   :  { %7998 = vmatpush1.bf16.msra.mxu1 %v15292_v49  ;;  %8029 = vmatprep.mubr.bf16.mxu1 %v7834_v54  ;;  %v15375_v49 = vld [vmem:[%s20065_s7 + $0x530] ss:$8 sps:$4 sm:$0xff]   ;;  %v15381_v54 = vld [vmem:[%s20065_s7 + $0x540] ss:$8 sps:$4 sm:$0xff]  }
 0x5e5   :  { %9514 = vmatprep.subr.bf16.mxu0 %v15297_v50  ;;  %7999 = vmatprep.subr.bf16.mxu1 %v15300_v51  ;;  %v15383_v50 = vld [vmem:[%s20065_s7 + $0x544] ss:$8 sps:$4 sm:$0xff]   ;;  %v15386_v51 = vld [vmem:[%s20063_s5 + $0x7f4] ss:$8 sps:$4 sm:$0xff]  }
 0x5e7   :  { %9515 = vmatpush1.bf16.msra.mxu0 %v15295_v56  ;;  %v15384_v56 = vld [vmem:[%s20063_s5 + $0x7f0] ss:$8 sps:$4 sm:$0xff]  }
 0x5e8   :  { %8000 = vmatpush1.bf16.msra.mxu1 %v15298_v31  ;;  %9516 = vmatprep.subr.bf16.mxu0 %v15303_v60  ;;  %v15389_v31 = vld [vmem:[%s20065_s7 + $0x554] ss:$8 sps:$4 sm:$0xff]   ;;  %v8043_v60 = vld [vmem:[#allocation2 + $0x38] sm:$0x1] }
 0x5e9   :  { %8001 = vmatprep.subr.bf16.mxu1 %v15306_v0  ;;  %v15392_v0 = vld [vmem:[%s20063_s5 + $0x804] ss:$8 sps:$4 sm:$0xff]  }
 0x5eb   :  { %9517 = vmatpush1.bf16.msra.mxu0 %v15301_v2  ;;  %v7797_v2 = vld [vmem:[#allocation2 + $0x20] sm:$0xe0] }
 0x5ec   :  { %8002 = vmatpush1.bf16.msra.mxu1 %v15304_v6  ;;  %9518 = vmatprep.subr.bf16.mxu0 %v15309_v7  ;;  %v8041_v6 = vld [vmem:[#allocation2 + $0x28] sm:$0xc0]  ;;  %v15387_v7 = vld [vmem:[%s20065_s7 + $0x550] ss:$8 sps:$4 sm:$0xff]  }
 0x5ed   :  { %8003 = vmatprep.subr.bf16.mxu1 %v15312_v10  ;;  %v8084_v10 = vrot.slane %v8043_v60, 6  ;;  %v15461_v60 = vld [vmem:[%s20063_s5 + $0x8d4] ss:$8 sps:$4 sm:$0xff]  }
 0x5ef   :  { %9519 = vmatpush1.bf16.msra.mxu0 %v15307_v12  ;;  %v15390_v12 = vld [vmem:[%s20063_s5 + $0x800] ss:$8 sps:$4 sm:$0xff]  }
 0x5f0   :  { %8004 = vmatpush1.bf16.msra.mxu1 %v15310_v16  ;;  %9520 = vmatprep.subr.bf16.mxu0 %v15315_v17  ;;  %v7833_v16 = vrot.slane %v7797_v2, 5  ;;  %v8083_v17 = vrot.slane %v8041_v6, 6  ;;  %v15459_v2 = vld [vmem:[%s20063_s5 + $0x8d0] ss:$8 sps:$4 sm:$0xff]   ;;  %v15479_v6 = vld [vmem:[%s20065_s7 + $0x634] ss:$8 sps:$4 sm:$0xff]  }
 0x5f1   :  { %8005 = vmatprep.subr.bf16.mxu1 %v15318_v22  ;;  %v15395_v22 = vld [vmem:[%s20065_s7 + $0x564] ss:$8 sps:$4 sm:$0xff]  }
 0x5f3   :  { %9521 = vmatpush1.bf16.msra.mxu0 %v15313_v30  ;;  %v15398_v30 = vld [vmem:[%s20063_s5 + $0x814] ss:$8 sps:$4 sm:$0xff]  }
 0x5f4   :  { %8006 = vmatpush1.bf16.msra.mxu1 %v15316_v28  ;;  %9522 = vmatprep.subr.bf16.mxu0 %v15321_v33  ;;  %v8085_v28 = vsel %vm2634_vm12, %v8083_v17, %v8084_v10  ;;  %v15393_v33 = vld [vmem:[%s20065_s7 + $0x560] ss:$8 sps:$4 sm:$0xff]   ;;  %v15477_v10 = vld [vmem:[%s20065_s7 + $0x630] ss:$8 sps:$4 sm:$0xff]   ;;  %v15467_v17 = vld [vmem:[%s20063_s5 + $0x8f4] ss:$8 sps:$4 sm:$0xff]  }
 0x5f5   :  { %8007 = vmatprep.subr.bf16.mxu1 %v15324_v34  ;;  %v15396_v34 = vld [vmem:[%s20063_s5 + $0x810] ss:$8 sps:$4 sm:$0xff]  }
 0x5f7   :  { %9523 = vmatpush1.bf16.msra.mxu0 %v15319_v35  ;;  %v15401_v35 = vld [vmem:[%s20065_s7 + $0x574] ss:$8 sps:$4 sm:$0xff]  }
 0x5f8   :  { %8008 = vmatpush1.bf16.msra.mxu1 %v15322_v36  ;;  %9524 = vmatprep.subr.bf16.mxu0 %v15327_v37  ;;  %v15404_v36 = vld [vmem:[%s20063_s5 + $0x824] ss:$8 sps:$4 sm:$0xff]   ;;  %v15399_v37 = vld [vmem:[%s20065_s7 + $0x570] ss:$8 sps:$4 sm:$0xff]  }
 0x5f9   :  { %8009 = vmatprep.subr.bf16.mxu1 %v15330_v61  ;;  %v15402_v61 = vld [vmem:[%s20063_s5 + $0x820] ss:$8 sps:$4 sm:$0xff]  }
 0x5fb   :  { %9525 = vmatpush1.bf16.msra.mxu0 %v15325_v38  ;;  %v15407_v38 = vld [vmem:[%s20065_s7 + $0x584] ss:$8 sps:$4 sm:$0xff]  }
 0x5fc   :  { %8010 = vmatpush1.bf16.msra.mxu1 %v15328_v39  ;;  %9526 = vmatprep.subr.bf16.mxu0 %v15333_v40  ;;  %v15410_v39 = vld [vmem:[%s20063_s5 + $0x834] ss:$8 sps:$4 sm:$0xff]   ;;  %v15405_v40 = vld [vmem:[%s20065_s7 + $0x580] ss:$8 sps:$4 sm:$0xff]  }
 0x5fd   :  { %8011 = vmatprep.subr.bf16.mxu1 %v15336_v41  ;;  %v15408_v41 = vld [vmem:[%s20063_s5 + $0x830] ss:$8 sps:$4 sm:$0xff]  }
 0x5ff   :  { %9527 = vmatpush1.bf16.msra.mxu0 %v15331_v42  ;;  %v15413_v42 = vld [vmem:[%s20065_s7 + $0x594] ss:$8 sps:$4 sm:$0xff]  }
 0x600   :  { %8012 = vmatpush1.bf16.msra.mxu1 %v15334_v43  ;;  %9528 = vmatprep.subr.bf16.mxu0 %v15339_v44  ;;  %v15416_v43 = vld [vmem:[%s20063_s5 + $0x844] ss:$8 sps:$4 sm:$0xff]   ;;  %v15411_v44 = vld [vmem:[%s20065_s7 + $0x590] ss:$8 sps:$4 sm:$0xff]  }
 0x601   :  { %8013 = vmatprep.subr.bf16.mxu1 %v15342_v45  ;;  %v15414_v45 = vld [vmem:[%s20063_s5 + $0x840] ss:$8 sps:$4 sm:$0xff]  }
 0x603   :  { %9529 = vmatpush1.bf16.msra.mxu0 %v15337_v46  ;;  %v15419_v46 = vld [vmem:[%s20065_s7 + $0x5a4] ss:$8 sps:$4 sm:$0xff]  }
 0x604   :  { %8014 = vmatpush1.bf16.msra.mxu1 %v15340_v47  ;;  %9530 = vmatprep.subr.bf16.mxu0 %v15345_v32  ;;  %v15422_v47 = vld [vmem:[%s20063_s5 + $0x854] ss:$8 sps:$4 sm:$0xff]   ;;  %v15417_v32 = vld [vmem:[%s20065_s7 + $0x5a0] ss:$8 sps:$4 sm:$0xff]  }
 0x605   :  { %8015 = vmatprep.subr.bf16.mxu1 %v15348_v52  ;;  %v15420_v52 = vld [vmem:[%s20063_s5 + $0x850] ss:$8 sps:$4 sm:$0xff]  }
 0x607   :  { %9531 = vmatpush1.bf16.msra.mxu0 %v15343_v53  ;;  %v15425_v53 = vld [vmem:[%s20065_s7 + $0x5b4] ss:$8 sps:$4 sm:$0xff]  }
 0x608   :  { %8016 = vmatpush1.bf16.msra.mxu1 %v15346_v55  ;;  %9532 = vmatprep.subr.bf16.mxu0 %v15351_v57  ;;  %v15428_v55 = vld [vmem:[%s20063_s5 + $0x864] ss:$8 sps:$4 sm:$0xff]   ;;  %v15423_v57 = vld [vmem:[%s20065_s7 + $0x5b0] ss:$8 sps:$4 sm:$0xff]  }
 0x609   :  { %8017 = vmatprep.subr.bf16.mxu1 %v15354_v58  ;;  %v15426_v58 = vld [vmem:[%s20063_s5 + $0x860] ss:$8 sps:$4 sm:$0xff]  }
 0x60b   :  { %9533 = vmatpush1.bf16.msra.mxu0 %v15349_v62  ;;  %v15431_v62 = vld [vmem:[%s20065_s7 + $0x5c4] ss:$8 sps:$4 sm:$0xff]  }
 0x60c   :  { %8018 = vmatpush1.bf16.msra.mxu1 %v15352_v63  ;;  %9747 = vmatprep.subr.bf16.mxu0 %v15357_v1  ;;  %v15434_v63 = vld [vmem:[%s20063_s5 + $0x874] ss:$8 sps:$4 sm:$0xff]   ;;  %v15429_v1 = vld [vmem:[%s20065_s7 + $0x5c0] ss:$8 sps:$4 sm:$0xff]  }
 0x60d   :  { %8019 = vmatprep.subr.bf16.mxu1 %v15362_v4  ;;  %v15437_v4 = vld [vmem:[%s20065_s7 + $0x5d4] ss:$8 sps:$4 sm:$0xff]  }
 0x60e   :  { %9535 = vmatmul.mubr.bf16.vlgmr.msra.gmra.mrb[20].mxu0 %v13420_v8  ;;  %v15435_v8 = vld [vmem:[%s20065_s7 + $0x5d0] ss:$8 sps:$4 sm:$0xff]  }
 0x60f   :  { %9748 = vmatpush1.bf16.msra.mxu0 %v15355_v5  ;;  %9779 = vmatprep.mubr.bf16.mxu0 %v9584_v13  ;;  %v15440_v5 = vld [vmem:[%s20063_s5 + $0x884] ss:$8 sps:$4 sm:$0xff]   ;;  %v15446_v13 = vld [vmem:[%s20063_s5 + $0x894] ss:$8 sps:$4 sm:$0xff]  }
 0x610   :  { %8020 = vmatpush1.bf16.msra.mxu1 %v15360_v9  ;;  %9749 = vmatprep.subr.bf16.mxu0 %v15365_v11  ;;  %v15438_v9 = vld [vmem:[%s20063_s5 + $0x880] ss:$8 sps:$4 sm:$0xff]   ;;  %v15443_v11 = vld [vmem:[%s20065_s7 + $0x5e4] ss:$8 sps:$4 sm:$0xff]  }
 0x611   :  { %8021 = vmatprep.subr.bf16.mxu1 %v15368_v14  ;;  %v15441_v14 = vld [vmem:[%s20065_s7 + $0x5e0] ss:$8 sps:$4 sm:$0xff]  }
 0x613   :  { %9750 = vmatpush1.bf16.msra.mxu0 %v15363_v48  ;;  %v15444_v48 = vld [vmem:[%s20063_s5 + $0x890] ss:$8 sps:$4 sm:$0xff]  }
 0x614   :  { %8022 = vmatpush1.bf16.msra.mxu1 %v15366_v15  ;;  %9751 = vmatprep.subr.bf16.mxu0 %v15371_v18  ;;  %v15449_v15 = vld [vmem:[%s20065_s7 + $0x5f4] ss:$8 sps:$4 sm:$0xff]   ;;  %v15452_v18 = vld [vmem:[%s20063_s5 + $0x8a4] ss:$8 sps:$4 sm:$0xff]  }
 0x615   :  { %8023 = vmatprep.subr.bf16.mxu1 %v15374_v19  ;;  %v15447_v19 = vld [vmem:[%s20065_s7 + $0x5f0] ss:$8 sps:$4 sm:$0xff]  }
 0x617   :  { %9752 = vmatpush1.bf16.msra.mxu0 %v15369_v21  ;;  %v13454_v21 = vcombine.low %v18834_v59, %v18834_v59  ;;  %v15468_v59 = vld [vmem:[%s20065_s7 + $0x600] ss:$8 sps:$4 sm:$0xff]  }
 0x618   :  { %8024 = vmatpush1.bf16.msra.mxu1 %v15372_v23  ;;  %9753 = vmatprep.subr.bf16.mxu0 %v15377_v24  ;;  %v15450_v23 = vld [vmem:[%s20063_s5 + $0x8a0] ss:$8 sps:$4 sm:$0xff]   ;;  %v15470_v24 = vld [vmem:[%s20065_s7 + $0x604] ss:$8 sps:$4 sm:$0xff]  }
 0x619   :  { %8025 = vmatprep.subr.bf16.mxu1 %v15380_v25  ;;  %v15455_v25 = vld [vmem:[%s20063_s5 + $0x8b4] ss:$8 sps:$4 sm:$0xff]  }
 0x61b   :  { %9754 = vmatpush1.bf16.msra.mxu0 %v15375_v49  ;;  %v9583_v49 = vrot.slane %v13454_v21, 1 }
 0x61c   :  { %8026 = vmatpush1.bf16.msra.mxu1 %v15378_v29  ;;  %9755 = vmatprep.subr.bf16.mxu0 %v15383_v50  ;;  %v15453_v29 = vld [vmem:[%s20063_s5 + $0x8b0] ss:$8 sps:$4 sm:$0xff]   ;;  %v15473_v50 = vld [vmem:[%s20065_s7 + $0x614] ss:$8 sps:$4 sm:$0xff]  }
 0x61d   :  { %8027 = vmatprep.subr.bf16.mxu1 %v15386_v51  ;;  %v15458_v51 = vld [vmem:[%s20063_s5 + $0x8c4] ss:$8 sps:$4 sm:$0xff]  }
 0x61f   :  { %9756 = vmatpush1.bf16.msra.mxu0 %v15381_v54  ;;  %v15471_v54 = vld [vmem:[%s20065_s7 + $0x610] ss:$8 sps:$4 sm:$0xff]  }
 0x620   :  { %8028 = vmatpush1.bf16.msra.mxu1 %v15384_v56  ;;  %9757 = vmatprep.subr.bf16.mxu0 %v15389_v31  ;;  %v15456_v56 = vld [vmem:[%s20063_s5 + $0x8c0] ss:$8 sps:$4 sm:$0xff]   ;;  %v15476_v31 = vld [vmem:[%s20065_s7 + $0x624] ss:$8 sps:$4 sm:$0xff]  }
 0x621   :  { %8248 = vmatprep.subr.bf16.mxu1 %v15392_v0  ;;  %v15474_v0 = vld [vmem:[%s20065_s7 + $0x620] ss:$8 sps:$4 sm:$0xff]  }
 0x623   :  { %9758 = vmatpush1.bf16.msra.mxu0 %v15387_v7  ;;  %8030 = vmatmul.mubr.bf16.vlgmr.msra.gmra.mrb[4].mxu1 %v7833_v16  ;;  %v15464_v7 = vld [vmem:[%s20063_s5 + $0x8e4] ss:$8 sps:$4 sm:$0xff]  }
 0x624   :  { %8249 = vmatpush1.bf16.msra.mxu1 %v15390_v12  ;;  %8280 = vmatprep.mubr.bf16.mxu1 %v8085_v28  ;;  %v15462_v12 = vld [vmem:[%s20063_s5 + $0x8e0] ss:$8 sps:$4 sm:$0xff]   ;;  %v15482_v16 = vld [vmem:[%s20065_s7 + $0x644] ss:$8 sps:$4 sm:$0xff]   ;;  %v15465_v28 = vld [vmem:[%s20063_s5 + $0x8f0] ss:$8 sps:$4 sm:$0xff]  }
 0x625   :  { %9759 = vmatprep.subr.bf16.mxu0 %v15395_v22  ;;  %8250 = vmatprep.subr.bf16.mxu1 %v15398_v30  ;;  %v8042_v22 = vld [vmem:[#allocation2 + $0x30] sm:$0x1]  ;;  %v15480_v30 = vld [vmem:[%s20065_s7 + $0x640] ss:$8 sps:$4 sm:$0xff]   ;;  %s13282_s5 = sld [smem:[#allocation5 + $0x1]] }
 0x627   :  { %9760 = vmatpush1.bf16.msra.mxu0 %v15393_v33  ;;  %v15485_v33 = vld [vmem:[%s20065_s7 + $0x654] ss:$8 sps:$4 sm:$0xff]  }
 0x628   :  { %8251 = vmatpush1.bf16.msra.mxu1 %v15396_v34  ;;  %9761 = vmatprep.subr.bf16.mxu0 %v15401_v35  ;;  %v8040_v34 = vld [vmem:[#allocation2 + $0x20] sm:$0xc0]  ;;  %v8081_v35 = vrot.slane %v8042_v22, 6  ;;  %v15523_v22 = vld [vmem:[%s20065_s7 + $0x710] ss:$8 sps:$4 sm:$0xff]  }
 0x629   :  { %8252 = vmatprep.subr.bf16.mxu1 %v15404_v36  ;;  %v15483_v36 = vld [vmem:[%s20065_s7 + $0x650] ss:$8 sps:$4 sm:$0xff]  }
 0x62b   :  { %9762 = vmatpush1.bf16.msra.mxu0 %v15399_v37  ;;  %v8080_v37 = vrot.slane %v8040_v34, 6  ;;  %v15626_v34 = vld [vmem:[%s20068_s10 + $0x44] ss:$16 sps:$4 sm:$0xff]  }
 0x62c   :  { %8253 = vmatpush1.bf16.msra.mxu1 %v15402_v61  ;;  %9763 = vmatprep.subr.bf16.mxu0 %v15407_v38  ;;  %v15488_v61 = vld [vmem:[%s20065_s7 + $0x664] ss:$8 sps:$4 sm:$0xff]  }
 0x62d   :  { %8254 = vmatprep.subr.bf16.mxu1 %v15410_v39  ;;  %v8082_v38 = vsel %vm2634_vm12, %v8080_v37, %v8081_v35  ;;  %v15486_v39 = vld [vmem:[%s20065_s7 + $0x660] ss:$8 sps:$4 sm:$0xff]  }
 0x62e   :  { %v15526_v35 = vld [vmem:[%s20065_s7 + $0x720] ss:$8 sps:$4 sm:$0xff]  }
 0x62f   :  { %9764 = vmatpush1.bf16.msra.mxu0 %v15405_v40  ;;  %v15491_v40 = vld [vmem:[%s20065_s7 + $0x674] ss:$8 sps:$4 sm:$0xff]   ;;  %v15624_v37 = vld [vmem:[%s20068_s10 + $0x40] ss:$16 sps:$4 sm:$0xff]  }
 0x630   :  { %8255 = vmatpush1.bf16.msra.mxu1 %v15408_v41  ;;  %9765 = vmatprep.subr.bf16.mxu0 %v15413_v42  ;;  %v15489_v41 = vld [vmem:[%s20065_s7 + $0x670] ss:$8 sps:$4 sm:$0xff]   ;;  %v15494_v42 = vld [vmem:[%s20065_s7 + $0x684] ss:$8 sps:$4 sm:$0xff]  }
 0x631   :  { %8256 = vmatprep.subr.bf16.mxu1 %v15416_v43  ;;  %v15492_v43 = vld [vmem:[%s20065_s7 + $0x680] ss:$8 sps:$4 sm:$0xff]  }
 0x633   :  { %9766 = vmatpush1.bf16.msra.mxu0 %v15411_v44  ;;  %v15497_v44 = vld [vmem:[%s20065_s7 + $0x694] ss:$8 sps:$4 sm:$0xff]  }
 0x634   :  { %8257 = vmatpush1.bf16.msra.mxu1 %v15414_v45  ;;  %9767 = vmatprep.subr.bf16.mxu0 %v15419_v46  ;;  %v15495_v45 = vld [vmem:[%s20065_s7 + $0x690] ss:$8 sps:$4 sm:$0xff]   ;;  %v15498_v46 = vld [vmem:[%s20065_s7 + $0x6a0] ss:$8 sps:$4 sm:$0xff]  }
 0x635   :  { %8258 = vmatprep.subr.bf16.mxu1 %v15422_v47  ;;  %v15500_v47 = vld [vmem:[%s20065_s7 + $0x6a4] ss:$8 sps:$4 sm:$0xff]  }
 0x637   :  { %9768 = vmatpush1.bf16.msra.mxu0 %v15417_v32  ;;  %v15503_v32 = vld [vmem:[%s20065_s7 + $0x6b4] ss:$8 sps:$4 sm:$0xff]  }
 0x638   :  { %8259 = vmatpush1.bf16.msra.mxu1 %v15420_v52  ;;  %9769 = vmatprep.subr.bf16.mxu0 %v15425_v53  ;;  %v15501_v52 = vld [vmem:[%s20065_s7 + $0x6b0] ss:$8 sps:$4 sm:$0xff]   ;;  %v15506_v53 = vld [vmem:[%s20065_s7 + $0x6c4] ss:$8 sps:$4 sm:$0xff]  }
 0x639   :  { %8260 = vmatprep.subr.bf16.mxu1 %v15428_v55  ;;  %v15504_v55 = vld [vmem:[%s20065_s7 + $0x6c0] ss:$8 sps:$4 sm:$0xff]  }
 0x63b   :  { %9770 = vmatpush1.bf16.msra.mxu0 %v15423_v57  ;;  %v15509_v57 = vld [vmem:[%s20065_s7 + $0x6d4] ss:$8 sps:$4 sm:$0xff]  }
 0x63c   :  { %8261 = vmatpush1.bf16.msra.mxu1 %v15426_v58  ;;  %9771 = vmatprep.subr.bf16.mxu0 %v15431_v62  ;;  %v15507_v58 = vld [vmem:[%s20065_s7 + $0x6d0] ss:$8 sps:$4 sm:$0xff]   ;;  %v15512_v62 = vld [vmem:[%s20065_s7 + $0x6e4] ss:$8 sps:$4 sm:$0xff]  }
 0x63d   :  { %8262 = vmatprep.subr.bf16.mxu1 %v15434_v63  ;;  %v15510_v63 = vld [vmem:[%s20065_s7 + $0x6e0] ss:$8 sps:$4 sm:$0xff]  }
 0x63f   :  { %9772 = vmatpush1.bf16.msra.mxu0 %v15429_v1  ;;  %v15515_v1 = vld [vmem:[%s20065_s7 + $0x6f4] ss:$8 sps:$4 sm:$0xff]  }
 0x640   :  { %8263 = vmatpush1.bf16.msra.mxu1 %v15432_v3  ;;  %9773 = vmatprep.subr.bf16.mxu0 %v15437_v4  ;;  %v15513_v3 = vld [vmem:[%s20065_s7 + $0x6f0] ss:$8 sps:$4 sm:$0xff]   ;;  %v15520_v4 = vld [vmem:[%s20065_s7 + $0x704] ss:$8 sps:$4 sm:$0xff]  }
 0x641   :  { %8264 = vmatprep.subr.bf16.mxu1 %v15440_v5  ;;  %v8295_v5 = vld [vmem:[%s20064_s6] sm:$0x3] }
 0x643   :  { %9774 = vmatpush1.bf16.msra.mxu0 %v15435_v8  ;;  %v8292_v8 = vstv %s13282_s5 }
 0x644   :  { %8265 = vmatpush1.bf16.msra.mxu1 %v15438_v9  ;;  %9775 = vmatprep.subr.bf16.mxu0 %v15443_v11  ;;  %v8300_v9 = vrot.slane %v8295_v5, %v16759_v26 }
 0x645   :  { %8266 = vmatprep.subr.bf16.mxu1 %v15446_v13  ;;  %v8304_v13 = vrot.slane %v8295_v5, %v16762_v27  ;;  %v15636_v5 = vld [vmem:[%s20068_s10 + $0xc0] ss:$16 sps:$4 sm:$0xff]  }
 0x647   :  { %9776 = vmatpush1.bf16.msra.mxu0 %v15441_v14 }
 0x648   :  { %8267 = vmatpush1.bf16.msra.mxu1 %v15444_v48  ;;  %9777 = vmatprep.subr.bf16.mxu0 %v15449_v15 }
 0x649   :  { %8268 = vmatprep.subr.bf16.mxu1 %v15452_v18 }
 0x64b   :  { %9778 = vmatpush1.bf16.msra.mxu0 %v15447_v19 }
 0x64c   :  { %8269 = vmatpush1.bf16.msra.mxu1 %v15450_v23  ;;  %9992 = vmatprep.subr.bf16.mxu0 %v15470_v24 }
 0x64d   :  { %8270 = vmatprep.subr.bf16.mxu1 %v15455_v25 }
 0x64e   :  { %9780 = vmatmul.mubr.bf16.vlgmr.msra.gmra.mrb[20].mxu0 %v9583_v49 }
 0x64f   :  { %9993 = vmatpush1.bf16.msra.mxu0 %v15468_v59 }
 0x650   :  { %8271 = vmatpush1.bf16.msra.mxu1 %v15453_v29  ;;  %9994 = vmatprep.subr.bf16.mxu0 %v15473_v50 }
 0x651   :  { %8272 = vmatprep.subr.bf16.mxu1 %v15458_v51 }
 0x653   :  { %9995 = vmatpush1.bf16.msra.mxu0 %v15471_v54 }
 0x654   :  { %8273 = vmatpush1.bf16.msra.mxu1 %v15456_v56  ;;  %9996 = vmatprep.subr.bf16.mxu0 %v15476_v31 }
 0x655   :  { %8274 = vmatprep.subr.bf16.mxu1 %v15461_v60 }
 0x657   :  { %9997 = vmatpush1.bf16.msra.mxu0 %v15474_v0 }
 0x658   :  { %8275 = vmatpush1.bf16.msra.mxu1 %v15459_v2  ;;  %9998 = vmatprep.subr.bf16.mxu0 %v15479_v6 }
 0x659   :  { %8276 = vmatprep.subr.bf16.mxu1 %v15464_v7  ;;  %v15518_v7 = vld [vmem:[%s20065_s7 + $0x700] ss:$8 sps:$4 sm:$0xff]  }
 0x65b   :  { %9999 = vmatpush1.bf16.msra.mxu0 %v15477_v10  ;;  %v15525_v10 = vld [vmem:[%s20065_s7 + $0x714] ss:$8 sps:$4 sm:$0xff]  }
 0x65c   :  { %8277 = vmatpush1.bf16.msra.mxu1 %v15462_v12  ;;  %10000 = vmatprep.subr.bf16.mxu0 %v15482_v16  ;;  %v15618_v16 = vld [vmem:[%s20068_s10] ss:$16 sps:$4 sm:$0xff]  }
 0x65d   :  { %8278 = vmatprep.subr.bf16.mxu1 %v15467_v17  ;;  %v15620_v17 = vld [vmem:[%s20068_s10 + $0x4] ss:$16 sps:$4 sm:$0xff]  }
 0x65f   :  { %10001 = vmatpush1.bf16.msra.mxu0 %v15480_v30  ;;  %v15623_v30 = vld [vmem:[%s20068_s10 + $0x24] ss:$16 sps:$4 sm:$0xff]  }
 0x660   :  { %8279 = vmatpush1.bf16.msra.mxu1 %v15465_v28  ;;  %10002 = vmatprep.subr.bf16.mxu0 %v15485_v33  ;;  %v15528_v28 = vld [vmem:[%s20065_s7 + $0x724] ss:$8 sps:$4 sm:$0xff]   ;;  %v15621_v33 = vld [vmem:[%s20068_s10 + $0x20] ss:$16 sps:$4 sm:$0xff]  }
 0x661   :  { %11023 = vmatprep.subr.bf16.mxu1 %v15620_v17  ;;  %v15662_v17 = vld [vmem:[%s20068_s10 + $0x1c4] ss:$16 sps:$4 sm:$0xff]  }
 0x663   :  { %8281 = vmatmul.mubr.bf16.vlgmr.msra.gmra.mrb[4].mxu1 %v8082_v38  ;;  %10003 = vmatpush1.bf16.msra.mxu0 %v15483_v36  ;;  %v15531_v36 = vld [vmem:[%s20065_s7 + $0x734] ss:$8 sps:$4 sm:$0xff]   ;;  %v15529_v38 = vld [vmem:[%s20065_s7 + $0x730] ss:$8 sps:$4 sm:$0xff]  }
 0x664   :  { %10004 = vmatprep.subr.bf16.mxu0 %v15488_v61  ;;  %11024 = vmatpush1.bf16.msra.mxu1 %v15618_v16  ;;  %v15629_v61 = vld [vmem:[%s20068_s10 + $0x64] ss:$16 sps:$4 sm:$0xff]   ;;  %v15657_v16 = vld [vmem:[%s20068_s10 + $0x1a0] ss:$16 sps:$4 sm:$0xff]  }
 0x665   :  { %11025 = vmatprep.subr.bf16.mxu1 %v15623_v30  ;;  %v15567_v30 = vld [vmem:[%s20065_s7 + $0x7f4] ss:$8 sps:$4 sm:$0xff]  }
 0x667   :  { %10005 = vmatpush1.bf16.msra.mxu0 %v15486_v39  ;;  %v15534_v39 = vld [vmem:[%s20065_s7 + $0x744] ss:$8 sps:$4 sm:$0xff]  }
 0x668   :  { %10006 = vmatprep.subr.bf16.mxu0 %v15491_v40  ;;  %11026 = vmatpush1.bf16.msra.mxu1 %v15621_v33  ;;  %v15627_v40 = vld [vmem:[%s20068_s10 + $0x60] ss:$16 sps:$4 sm:$0xff]   ;;  %v15665_v33 = vld [vmem:[%s20068_s10 + $0x1e4] ss:$16 sps:$4 sm:$0xff]  }
 0x669   :  { %11027 = vmatprep.subr.bf16.mxu1 %v15626_v34  ;;  %v15565_v34 = vld [vmem:[%s20065_s7 + $0x7f0] ss:$8 sps:$4 sm:$0xff]  }
 0x66b   :  { %10007 = vmatpush1.bf16.msra.mxu0 %v15489_v41  ;;  %v19231_v41 = vld.sshfl [vmem:[%s20060_s2] sm:$0x11 pattern:$0x75316420] }
 0x66c   :  { %10008 = vmatprep.subr.bf16.mxu0 %v15494_v42  ;;  %11028 = vmatpush1.bf16.msra.mxu1 %v15624_v37  ;;  %v15938_v42 = vmov 1966171168   ;;  %v15663_v37 = vld [vmem:[%s20068_s10 + $0x1e0] ss:$16 sps:$4 sm:$0xff]  }
 0x66d   :  { %11029 = vmatprep.subr.bf16.mxu1 %v15629_v61 }
 0x66f   :  { %10009 = vmatpush1.bf16.msra.mxu0 %v15492_v43  ;;  %v10688_v43 = vunpack.c.l.s4 %v15938_v42 }
 0x670   :  { %10010 = vmatprep.subr.bf16.mxu0 %v15497_v44  ;;  %v15632_v44 = vld [vmem:[%s20068_s10 + $0x84] ss:$16 sps:$4 sm:$0xff]   ;;  %11030 = vmatpush1.bf16.msra.mxu1 %v15627_v40 }
 0x671   :  { %11031 = vmatprep.subr.bf16.mxu1 %v15632_v44  ;;  %v15575_v40 = vld [vmem:[%s20065_s7 + $0x814] ss:$8 sps:$4 sm:$0xff]   ;;  %v15666_v44 = vld [vmem:[%s20068_s10 + $0x8] ss:$16 sps:$4 sm:$0xff]  }
 0x673   :  { %10011 = vmatpush1.bf16.msra.mxu0 %v15495_v45  ;;  %v15532_v45 = vld [vmem:[%s20065_s7 + $0x740] ss:$8 sps:$4 sm:$0xff]  }
 0x674   :  { %10012 = vmatprep.subr.bf16.mxu0 %v15500_v47  ;;  %v10689_v47 = vunpack.c.0.s8 %v10688_v43 }
 0x677   :  { %10013 = vmatpush1.bf16.msra.mxu0 %v15498_v46  ;;  %v10686_v46 = vcombine.high %v19231_v41, %v19231_v41 }
 0x678   :  { %10014 = vmatprep.subr.bf16.mxu0 %v15503_v32  ;;  %v15537_v32 = vld [vmem:[%s20065_s7 + $0x754] ss:$8 sps:$4 sm:$0xff]  }
 0x67b   :  { %10015 = vmatpush1.bf16.msra.mxu0 %v15501_v52  ;;  %v15630_v52 = vld [vmem:[%s20068_s10 + $0x80] ss:$16 sps:$4 sm:$0xff]  }
 0x67c   :  { %10016 = vmatprep.subr.bf16.mxu0 %v15506_v53  ;;  %v19248_v53 = vsub.s32 %v10689_v47, %v16753_v20  ;;  %11032 = vmatpush1.bf16.msra.mxu1 %v15630_v52  ;;  %v15669_v47 = vld [vmem:[%s20068_s10 + $0x28] ss:$16 sps:$4 sm:$0xff]  }
 0x67d   :  { %v15576_v52 = vld [vmem:[%s20065_s7 + $0x820] ss:$8 sps:$4 sm:$0xff]  }
 0x67e   :  { %v19401_v42 = vrot.slane %v19231_v41, %v19248_v53  ;;  %v15573_v41 = vld [vmem:[%s20065_s7 + $0x810] ss:$8 sps:$4 sm:$0xff]  }
 0x67f   :  { %10017 = vmatpush1.bf16.msra.mxu0 %v15504_v55  ;;  %v15635_v55 = vld [vmem:[%s20068_s10 + $0xa4] ss:$16 sps:$4 sm:$0xff]  }
 0x680   :  { %10018 = vmatprep.subr.bf16.mxu0 %v15509_v57  ;;  %v15535_v57 = vld [vmem:[%s20065_s7 + $0x750] ss:$8 sps:$4 sm:$0xff]   ;;  %11033 = vmatprep.subr.bf16.mxu1 %v15635_v55 }
 0x681   :  { %v15672_v55 = vld [vmem:[%s20068_s10 + $0x48] ss:$16 sps:$4 sm:$0xff]  }
 0x683   :  { %10019 = vmatpush1.bf16.msra.mxu0 %v15507_v58  ;;  %v19257_v58 = vrot.slane %v10686_v46, %v19248_v53  ;;  %v15578_v46 = vld [vmem:[%s20065_s7 + $0x824] ss:$8 sps:$4 sm:$0xff]   ;;  %v15581_v53 = vld [vmem:[%s20065_s7 + $0x834] ss:$8 sps:$4 sm:$0xff]  }
 0x684   :  { %10020 = vmatprep.subr.bf16.mxu0 %v15512_v62  ;;  %v15540_v62 = vld [vmem:[%s20065_s7 + $0x764] ss:$8 sps:$4 sm:$0xff]  }
 0x685   :  { %11055 = vmatprep.mubr.bf16.mxu1 %v19257_v58 }
 0x687   :  { %10021 = vmatpush1.bf16.msra.mxu0 %v15510_v63  ;;  %v15633_v63 = vld [vmem:[%s20068_s10 + $0xa0] ss:$16 sps:$4 sm:$0xff]  }
 0x688   :  { %10022 = vmatprep.subr.bf16.mxu0 %v15515_v1  ;;  %v15638_v1 = vld [vmem:[%s20068_s10 + $0xc4] ss:$16 sps:$4 sm:$0xff]   ;;  %11034 = vmatpush1.bf16.msra.mxu1 %v15633_v63  ;;  %v15675_v63 = vld [vmem:[%s20068_s10 + $0x68] ss:$16 sps:$4 sm:$0xff]  }
 0x689   :  { %11035 = vmatprep.subr.bf16.mxu1 %v15638_v1  ;;  %v15680_v1 = vld [vmem:[%s20068_s10 + $0x8c] ss:$16 sps:$4 sm:$0xff]  }
 0x68b   :  { %10023 = vmatpush1.bf16.msra.mxu0 %v15513_v3  ;;  %v15538_v3 = vld [vmem:[%s20065_s7 + $0x760] ss:$8 sps:$4 sm:$0xff]  }
 0x68c   :  { %10237 = vmatprep.subr.bf16.mxu0 %v15520_v4  ;;  %v15543_v4 = vld [vmem:[%s20065_s7 + $0x774] ss:$8 sps:$4 sm:$0xff]   ;;  %11036 = vmatpush1.bf16.msra.mxu1 %v15636_v5  ;;  %v15678_v5 = vld [vmem:[%s20068_s10 + $0x88] ss:$16 sps:$4 sm:$0xff]  }
 0x736   :  { %v8282_v11 = vpop.f32.mrb[4].mxu1 }
 0x737   :  { %v8293_v14 = vmul.f32 %v8292_v8, %v8282_v11  ;;  %v8284_v48 = vpop.f32.mrb[5].mxu1  ;;  %v15546_v11 = vld [vmem:[%s20065_s7 + $0x784] ss:$8 sps:$4 sm:$0xff]  }
 0x738   :  { %v8294_v15 = vmul.f32 %v8292_v8, %v8284_v48  ;;  %v8286_v18 = vpop.f32.mrb[6].mxu1  ;;  %v15641_v8 = vld [vmem:[%s20068_s10 + $0xe4] ss:$16 sps:$4 sm:$0xff]   ;;  %v15544_v48 = vld [vmem:[%s20065_s7 + $0x780] ss:$8 sps:$4 sm:$0xff]  }
 0x739   :  { %v8307_v19 = vadd.f32 %v8300_v9, %v8293_v14  ;;  %v8287_v21 = vpop.f32.mrb[7].mxu1  ;;  %v15541_v9 = vld [vmem:[%s20065_s7 + $0x770] ss:$8 sps:$4 sm:$0xff]   ;;  %11037 = vmatprep.subr.bf16.mxu1 %v15641_v8  ;;  %v15644_v14 = vld [vmem:[%s20068_s10 + $0x104] ss:$16 sps:$4 sm:$0xff]  }
 0x73a   :  { %v8308_v23 = vadd.f32 %v8304_v13, %v8294_v15  ;;  %v15639_v13 = vld [vmem:[%s20068_s10 + $0xe0] ss:$16 sps:$4 sm:$0xff]   ;;  %v15549_v15 = vld [vmem:[%s20065_s7 + $0x794] ss:$8 sps:$4 sm:$0xff]  }
 0x73b   :  { %vm8309_vm6 = vcmp.ge.f32.partialorder %v8307_v19, 0.0  ;;  %v8311_v24 = vmul.f32 0.02, %v8307_v19  ;;  %11038 = vmatpush1.bf16.msra.mxu1 %v15639_v13  ;;  %v15642_v18 = vld [vmem:[%s20068_s10 + $0x100] ss:$16 sps:$4 sm:$0xff]  }
 0x73c   :  { %vm8310_vm7 = vcmp.ge.f32.partialorder %v8308_v23, 0.0  ;;  %v8312_v25 = vmul.f32 0.02, %v8308_v23  ;;  %11039 = vmatprep.subr.bf16.mxu1 %v15644_v14  ;;  %v15547_v21 = vld [vmem:[%s20065_s7 + $0x790] ss:$8 sps:$4 sm:$0xff]  }
 0x73d   :  { %v8313_v59 = vsel %vm8309_vm6, %v8307_v19, %v8311_v24  ;;  %v15647_v19 = vld [vmem:[%s20068_s10 + $0x124] ss:$16 sps:$4 sm:$0xff]   ;;  %v15645_v24 = vld [vmem:[%s20068_s10 + $0x120] ss:$16 sps:$4 sm:$0xff]   ;;  %v15683_v8 = vld [vmem:[%s20068_s10 + $0xac] ss:$16 sps:$4 sm:$0xff]  }
 0x73e   :  { %v8314_v49 = vsel %vm8310_vm7, %v8308_v23, %v8312_v25  ;;  %v15552_v23 = vld [vmem:[%s20065_s7 + $0x7a4] ss:$8 sps:$4 sm:$0xff]   ;;  %v15681_v13 = vld [vmem:[%s20068_s10 + $0xa8] ss:$16 sps:$4 sm:$0xff]  }
 0x73f   :  { %v13806_v29 = vpack.c.bf16 %v8314_v49, %v8313_v59  ;;  %11040 = vmatpush1.bf16.msra.mxu1 %v15642_v18  ;;  %v15650_v25 = vld [vmem:[%s20068_s10 + $0x144] ss:$16 sps:$4 sm:$0xff]   ;;  %v15550_v59 = vld [vmem:[%s20065_s7 + $0x7a0] ss:$8 sps:$4 sm:$0xff]   ;;  %v15686_v14 = vld [vmem:[%s20068_s10 + $0xcc] ss:$16 sps:$4 sm:$0xff]  }
 0x740   :  { %11041 = vmatprep.subr.bf16.mxu1 %v15647_v19  ;;  %v15555_v49 = vld [vmem:[%s20065_s7 + $0x7b4] ss:$8 sps:$4 sm:$0xff]   ;;  %v15684_v18 = vld [vmem:[%s20068_s10 + $0xc8] ss:$16 sps:$4 sm:$0xff]  }
 0x741   :  { %v8322_v50 = vrot.slane %v13806_v29, 6  ;;  %v15648_v29 = vld [vmem:[%s20068_s10 + $0x140] ss:$16 sps:$4 sm:$0xff]   ;;  %v15689_v19 = vld [vmem:[%s20068_s10 + $0xec] ss:$16 sps:$4 sm:$0xff]  }
 0x743   :  { %v8323_v51 = vrot.slane %v8322_v50, 4  ;;  %8326 = vst [vmem:[#allocation3 + $0x8] sm:$0xcc] %v8322_v50  ;;  %11042 = vmatpush1.bf16.msra.mxu1 %v15645_v24  ;;  %v15653_v50 = vld [vmem:[%s20068_s10 + $0x164] ss:$16 sps:$4 sm:$0xff]  }
 0x744   :  { %11043 = vmatprep.subr.bf16.mxu1 %v15650_v25  ;;  %v15687_v24 = vld [vmem:[%s20068_s10 + $0xe8] ss:$16 sps:$4 sm:$0xff]   ;;  %v15692_v25 = vld [vmem:[%s20068_s10 + $0x10c] ss:$16 sps:$4 sm:$0xff]  }
 0x745   :  { %8327 = vst [vmem:[#allocation3 + $0x10] sm:$0x11] %v8323_v51  ;;  %v15553_v51 = vld [vmem:[%s20065_s7 + $0x7b0] ss:$8 sps:$4 sm:$0xff]  }
 0x747   :  { %11044 = vmatpush1.bf16.msra.mxu1 %v15648_v29  ;;  %v15690_v29 = vld [vmem:[%s20068_s10 + $0x108] ss:$16 sps:$4 sm:$0xff]  }
 0x748   :  { %11045 = vmatprep.subr.bf16.mxu1 %v15653_v50  ;;  %v15695_v50 = vld [vmem:[%s20068_s10 + $0x12c] ss:$16 sps:$4 sm:$0xff]  }
 0x74a   :  { %v9790_v54 = vld [vmem:[#allocation3 + $0x8] sm:$0x44]  ;;  %v19176_v56 = vld [vmem:[#allocation3 + $0x8] sm:$0x88] }
 0x74b   :  { %v13488_v31 = vcombine.low %v9790_v54, %v9790_v54  ;;  %v13489_v60 = vcombine.high %v9790_v54, %v9790_v54  ;;  %v13523_v0 = vcombine.high %v19176_v56, %v19176_v56  ;;  %v15558_v54 = vld [vmem:[%s20065_s7 + $0x7c4] ss:$8 sps:$4 sm:$0xff]  }
 0x74c   :  { %v19388_v61 = vld [vmem:[#allocation3 + $0x10] sm:$0x11] }
 0x74d   :  { %v9828_v2 = vrot.slane %v13488_v31, 2  ;;  %v9829_v6 = vrot.slane %v13489_v60, 2  ;;  %v10074_v12 = vrot.slane %v13523_v0, 3  ;;  %v15651_v31 = vld [vmem:[%s20068_s10 + $0x160] ss:$16 sps:$4 sm:$0xff]   ;;  %v13557_v43 = vcombine.high %v19388_v61, %v19388_v61 }
 0x74e   :  { %v15656_v60 = vld [vmem:[%s20068_s10 + $0x184] ss:$16 sps:$4 sm:$0xff]   ;;  %v15556_v0 = vld [vmem:[%s20065_s7 + $0x7c0] ss:$8 sps:$4 sm:$0xff]   ;;  %11046 = vmatpush1.bf16.msra.mxu1 %v15651_v31 }
 0x74f   :  { %10024 = vmatprep.mubr.bf16.mxu0 %v9829_v6  ;;  %v15654_v6 = vld [vmem:[%s20068_s10 + $0x180] ss:$16 sps:$4 sm:$0xff]   ;;  %11047 = vmatprep.subr.bf16.mxu1 %v15656_v60  ;;  %v15693_v31 = vld [vmem:[%s20068_s10 + $0x128] ss:$16 sps:$4 sm:$0xff]   ;;  %v15698_v60 = vld [vmem:[%s20068_s10 + $0x14c] ss:$16 sps:$4 sm:$0xff]  }
 0x750   :  { %10025 = vmatmul.mubr.bf16.vlgmr.msra.gmra.mrb[20].mxu0 %v9828_v2  ;;  %v15561_v2 = vld [vmem:[%s20065_s7 + $0x7d4] ss:$8 sps:$4 sm:$0xff]  }
 0x751   :  { %10238 = vmatpush1.bf16.msra.mxu0 %v15518_v7  ;;  %10269 = vmatprep.mubr.bf16.mxu0 %v10074_v12  ;;  %v15659_v7 = vld [vmem:[%s20068_s10 + $0x1a4] ss:$16 sps:$4 sm:$0xff]  }
 0x752   :  { %10239 = vmatprep.subr.bf16.mxu0 %v15525_v10  ;;  %v15559_v10 = vld [vmem:[%s20065_s7 + $0x7d0] ss:$8 sps:$4 sm:$0xff]   ;;  %v15564_v12 = vld [vmem:[%s20065_s7 + $0x7e4] ss:$8 sps:$4 sm:$0xff]   ;;  %11048 = vmatpush1.bf16.msra.mxu1 %v15654_v6 }
 0x753   :  { %11049 = vmatprep.subr.bf16.mxu1 %v15659_v7  ;;  %v15696_v6 = vld [vmem:[%s20068_s10 + $0x148] ss:$16 sps:$4 sm:$0xff]   ;;  %v15701_v7 = vld [vmem:[%s20068_s10 + $0x16c] ss:$16 sps:$4 sm:$0xff]  }
 0x755   :  { %10240 = vmatpush1.bf16.msra.mxu0 %v15523_v22  ;;  %v15562_v22 = vld [vmem:[%s20065_s7 + $0x7e0] ss:$8 sps:$4 sm:$0xff]  }
 0x756   :  { %10241 = vmatprep.subr.bf16.mxu0 %v15528_v28  ;;  %11050 = vmatpush1.bf16.msra.mxu1 %v15657_v16  ;;  %v15660_v28 = vld [vmem:[%s20068_s10 + $0x1c0] ss:$16 sps:$4 sm:$0xff]   ;;  %v15699_v16 = vld [vmem:[%s20068_s10 + $0x168] ss:$16 sps:$4 sm:$0xff]  }
 0x757   :  { %11051 = vmatprep.subr.bf16.mxu1 %v15662_v17  ;;  %v15704_v17 = vld [vmem:[%s20068_s10 + $0x18c] ss:$16 sps:$4 sm:$0xff]  }
 0x759   :  { %10242 = vmatpush1.bf16.msra.mxu0 %v15526_v35  ;;  %v13522_v35 = vcombine.low %v19176_v56, %v19176_v56  ;;  %v15568_v56 = vld [vmem:[%s20065_s7 + $0x800] ss:$8 sps:$4 sm:$0xff]  }
 0x75a   :  { %10243 = vmatprep.subr.bf16.mxu0 %v15531_v36  ;;  %v15570_v36 = vld [vmem:[%s20065_s7 + $0x804] ss:$8 sps:$4 sm:$0xff]   ;;  %11052 = vmatpush1.bf16.msra.mxu1 %v15660_v28  ;;  %v15702_v28 = vld [vmem:[%s20068_s10 + $0x188] ss:$16 sps:$4 sm:$0xff]  }
 0x75b   :  { %11053 = vmatprep.subr.bf16.mxu1 %v15665_v33  ;;  %v15707_v33 = vld [vmem:[%s20068_s10 + $0x1ac] ss:$16 sps:$4 sm:$0xff]  }
 0x75d   :  { %10244 = vmatpush1.bf16.msra.mxu0 %v15529_v38  ;;  %v15668_v38 = vld [vmem:[%s20068_s10 + $0xc] ss:$16 sps:$4 sm:$0xff]  }
 0x75e   :  { %10245 = vmatprep.subr.bf16.mxu0 %v15534_v39  ;;  %v10073_v39 = vrot.slane %v13522_v35, 3  ;;  %11054 = vmatpush1.bf16.msra.mxu1 %v15663_v37  ;;  %v15614_v35 = vld [vmem:[%s20065_s7 + $0x8e4] ss:$8 sps:$4 sm:$0xff]  }
 0x75f   :  { %11064 = vmatprep.subr.bf16.mxu1 %v15668_v38  ;;  %v15710_v37 = vld [vmem:[%s20068_s10 + $0x1cc] ss:$16 sps:$4 sm:$0xff]   ;;  %v15612_v38 = vld [vmem:[%s20065_s7 + $0x8e0] ss:$8 sps:$4 sm:$0xff]  }
 0x761   :  { %10246 = vmatpush1.bf16.msra.mxu0 %v15532_v45  ;;  %v15671_v45 = vld [vmem:[%s20068_s10 + $0x2c] ss:$16 sps:$4 sm:$0xff]   ;;  %11056 = vmatmul.mubr.bf16.vlgmr.msra.gmra.mrb[8].mxu1 %v19401_v42 }
 0x762   :  { %10247 = vmatprep.subr.bf16.mxu0 %v15537_v32  ;;  %11065 = vmatpush1.bf16.msra.mxu1 %v15666_v44  ;;  %v15674_v32 = vld [vmem:[%s20068_s10 + $0x4c] ss:$16 sps:$4 sm:$0xff]   ;;  %v15711_v44 = vld [vmem:[%s20068_s10 + $0x1e8] ss:$16 sps:$4 sm:$0xff]  }
 0x763   :  { %11096 = vmatprep.mubr.bf16.mxu1 %v19257_v58  ;;  %11066 = vmatprep.subr.bf16.mxu1 %v15671_v45  ;;  %v15579_v58 = vld [vmem:[%s20065_s7 + $0x830] ss:$8 sps:$4 sm:$0xff]   ;;  %v15716_v45 = vld [vmem:[%s20067_s9 + $0x4] ss:$16 sps:$4 sm:$0xff]  }
 0x765   :  { %10248 = vmatpush1.bf16.msra.mxu0 %v15535_v57  ;;  %v15677_v57 = vld [vmem:[%s20068_s10 + $0x6c] ss:$16 sps:$4 sm:$0xff]  }
 0x766   :  { %10249 = vmatprep.subr.bf16.mxu0 %v15540_v62  ;;  %11067 = vmatpush1.bf16.msra.mxu1 %v15669_v47  ;;  %v15584_v62 = vld [vmem:[%s20065_s7 + $0x844] ss:$8 sps:$4 sm:$0xff]  }
 0x767   :  { %11068 = vmatprep.subr.bf16.mxu1 %v15674_v32  ;;  %v15719_v47 = vld [vmem:[%s20067_s9 + $0x24] ss:$16 sps:$4 sm:$0xff]   ;;  %v15717_v32 = vld [vmem:[%s20067_s9 + $0x20] ss:$16 sps:$4 sm:$0xff]  }
 0x769   :  { %10250 = vmatpush1.bf16.msra.mxu0 %v15538_v3  ;;  %v15582_v3 = vld [vmem:[%s20065_s7 + $0x840] ss:$8 sps:$4 sm:$0xff]  }
 0x76a   :  { %10251 = vmatprep.subr.bf16.mxu0 %v15543_v4  ;;  %11069 = vmatpush1.bf16.msra.mxu1 %v15672_v55  ;;  %v15587_v4 = vld [vmem:[%s20065_s7 + $0x854] ss:$8 sps:$4 sm:$0xff]  }
 0x76b   :  { %11070 = vmatprep.subr.bf16.mxu1 %v15677_v57  ;;  %v15728_v55 = vld [vmem:[%s20067_s9 + $0x84] ss:$16 sps:$4 sm:$0xff]   ;;  %v15726_v57 = vld [vmem:[%s20067_s9 + $0x80] ss:$16 sps:$4 sm:$0xff]  }
 0x76d   :  { %10252 = vmatpush1.bf16.msra.mxu0 %v15541_v9  ;;  %v15585_v9 = vld [vmem:[%s20065_s7 + $0x850] ss:$8 sps:$4 sm:$0xff]  }
 0x76e   :  { %10253 = vmatprep.subr.bf16.mxu0 %v15546_v11  ;;  %11071 = vmatpush1.bf16.msra.mxu1 %v15675_v63  ;;  %v15590_v11 = vld [vmem:[%s20065_s7 + $0x864] ss:$8 sps:$4 sm:$0xff]  }
 0x76f   :  { %11072 = vmatprep.subr.bf16.mxu1 %v15680_v1  ;;  %v15734_v63 = vld [vmem:[%s20067_s9 + $0xc4] ss:$16 sps:$4 sm:$0xff]   ;;  %v15732_v1 = vld [vmem:[%s20067_s9 + $0xc0] ss:$16 sps:$4 sm:$0xff]  }
 0x771   :  { %10254 = vmatpush1.bf16.msra.mxu0 %v15544_v48  ;;  %v15588_v48 = vld [vmem:[%s20065_s7 + $0x860] ss:$8 sps:$4 sm:$0xff]  }
 0x772   :  { %10255 = vmatprep.subr.bf16.mxu0 %v15549_v15  ;;  %11073 = vmatpush1.bf16.msra.mxu1 %v15678_v5  ;;  %v15593_v15 = vld [vmem:[%s20065_s7 + $0x874] ss:$8 sps:$4 sm:$0xff]  }
 0x773   :  { %11074 = vmatprep.subr.bf16.mxu1 %v15683_v8  ;;  %v15740_v5 = vld [vmem:[%s20067_s9 + $0x104] ss:$16 sps:$4 sm:$0xff]   ;;  %v15738_v8 = vld [vmem:[%s20067_s9 + $0x100] ss:$16 sps:$4 sm:$0xff]  }
 0x775   :  { %10256 = vmatpush1.bf16.msra.mxu0 %v15547_v21  ;;  %v15591_v21 = vld [vmem:[%s20065_s7 + $0x870] ss:$8 sps:$4 sm:$0xff]  }
 0x776   :  { %10257 = vmatprep.subr.bf16.mxu0 %v15552_v23  ;;  %11075 = vmatpush1.bf16.msra.mxu1 %v15681_v13  ;;  %v15596_v23 = vld [vmem:[%s20065_s7 + $0x884] ss:$8 sps:$4 sm:$0xff]  }
 0x777   :  { %11076 = vmatprep.subr.bf16.mxu1 %v15686_v14  ;;  %v15746_v13 = vld [vmem:[%s20067_s9 + $0x144] ss:$16 sps:$4 sm:$0xff]   ;;  %v15744_v14 = vld [vmem:[%s20067_s9 + $0x140] ss:$16 sps:$4 sm:$0xff]  }
 0x779   :  { %10258 = vmatpush1.bf16.msra.mxu0 %v15550_v59  ;;  %v15594_v59 = vld [vmem:[%s20065_s7 + $0x880] ss:$8 sps:$4 sm:$0xff]  }
 0x77a   :  { %10259 = vmatprep.subr.bf16.mxu0 %v15555_v49  ;;  %11077 = vmatpush1.bf16.msra.mxu1 %v15684_v18  ;;  %v15599_v49 = vld [vmem:[%s20065_s7 + $0x894] ss:$8 sps:$4 sm:$0xff]  }
 0x77b   :  { %11078 = vmatprep.subr.bf16.mxu1 %v15689_v19  ;;  %v15752_v18 = vld [vmem:[%s20067_s9 + $0x184] ss:$16 sps:$4 sm:$0xff]   ;;  %v15750_v19 = vld [vmem:[%s20067_s9 + $0x180] ss:$16 sps:$4 sm:$0xff]  }
 0x77d   :  { %10260 = vmatpush1.bf16.msra.mxu0 %v15553_v51  ;;  %v15597_v51 = vld [vmem:[%s20065_s7 + $0x890] ss:$8 sps:$4 sm:$0xff]  }
 0x77e   :  { %10261 = vmatprep.subr.bf16.mxu0 %v15558_v54  ;;  %11079 = vmatpush1.bf16.msra.mxu1 %v15687_v24  ;;  %v15602_v54 = vld [vmem:[%s20065_s7 + $0x8a4] ss:$8 sps:$4 sm:$0xff]   ;;  %v15756_v24 = vld [vmem:[%s20067_s9 + $0x1c0] ss:$16 sps:$4 sm:$0xff]  }
 0x77f   :  { %11080 = vmatprep.subr.bf16.mxu1 %v15692_v25  ;;  %v15758_v25 = vld [vmem:[%s20067_s9 + $0x1c4] ss:$16 sps:$4 sm:$0xff]  }
 0x781   :  { %10262 = vmatpush1.bf16.msra.mxu0 %v15556_v0  ;;  %v15600_v0 = vld [vmem:[%s20065_s7 + $0x8a0] ss:$8 sps:$4 sm:$0xff]  }
 0x782   :  { %10263 = vmatprep.subr.bf16.mxu0 %v15561_v2  ;;  %11081 = vmatpush1.bf16.msra.mxu1 %v15690_v29  ;;  %v15605_v2 = vld [vmem:[%s20065_s7 + $0x8b4] ss:$8 sps:$4 sm:$0xff]  }
 0x783   :  { %11082 = vmatprep.subr.bf16.mxu1 %v15695_v50  ;;  %v15764_v29 = vld [vmem:[%s20067_s9 + $0xc] ss:$16 sps:$4 sm:$0xff]   ;;  %v10527_v50 = vld [vmem:[%s20066_s8] sm:$0x3] }
 0x785   :  { %10264 = vmatpush1.bf16.msra.mxu0 %v15559_v10  ;;  %v15603_v10 = vld [vmem:[%s20065_s7 + $0x8b0] ss:$8 sps:$4 sm:$0xff]  }
 0x786   :  { %10265 = vmatprep.subr.bf16.mxu0 %v15564_v12  ;;  %11083 = vmatpush1.bf16.msra.mxu1 %v15693_v31  ;;  %v15608_v12 = vld [vmem:[%s20065_s7 + $0x8c4] ss:$8 sps:$4 sm:$0xff]  }
 0x787   :  { %11084 = vmatprep.subr.bf16.mxu1 %v15698_v60  ;;  %v10536_v60 = vrot.slane %v10527_v50, %v16762_v27 }
 0x789   :  { %10266 = vmatpush1.bf16.msra.mxu0 %v15562_v22  ;;  %v15606_v22 = vld [vmem:[%s20065_s7 + $0x8c0] ss:$8 sps:$4 sm:$0xff]  }
 0x78a   :  { %10267 = vmatprep.subr.bf16.mxu0 %v15567_v30  ;;  %11085 = vmatpush1.bf16.msra.mxu1 %v15696_v6  ;;  %v15611_v30 = vld [vmem:[%s20065_s7 + $0x8d4] ss:$8 sps:$4 sm:$0xff]  }
 0x78b   :  { %11086 = vmatprep.subr.bf16.mxu1 %v15701_v7 }
 0x78d   :  { %10268 = vmatpush1.bf16.msra.mxu0 %v15565_v34  ;;  %v15609_v34 = vld [vmem:[%s20065_s7 + $0x8d0] ss:$8 sps:$4 sm:$0xff]  }
 0x78e   :  { %10480 = vmatprep.subr.bf16.mxu0 %v15570_v36  ;;  %11087 = vmatpush1.bf16.msra.mxu1 %v15699_v16  ;;  %v15705_v36 = vld [vmem:[%s20068_s10 + $0x1a8] ss:$16 sps:$4 sm:$0xff]  }
 0x78f   :  { %11088 = vmatprep.subr.bf16.mxu1 %v15704_v17 }
 0x790   :  { %10270 = vmatmul.mubr.bf16.vlgmr.msra.gmra.mrb[20].mxu0 %v10073_v39  ;;  %v15708_v39 = vld [vmem:[%s20068_s10 + $0x1c8] ss:$16 sps:$4 sm:$0xff]  }
 0x791   :  { %10481 = vmatpush1.bf16.msra.mxu0 %v15568_v56  ;;  %10512 = vmatprep.mubr.bf16.mxu0 %v13557_v43  ;;  %v15617_v56 = vld [vmem:[%s20065_s7 + $0x8f4] ss:$8 sps:$4 sm:$0xff]   ;;  %v15615_v43 = vld [vmem:[%s20065_s7 + $0x8f0] ss:$8 sps:$4 sm:$0xff]  }
 0x792   :  { %10482 = vmatprep.subr.bf16.mxu0 %v15575_v40  ;;  %11089 = vmatpush1.bf16.msra.mxu1 %v15702_v28  ;;  %v15713_v40 = vld [vmem:[%s20068_s10 + $0x1ec] ss:$16 sps:$4 sm:$0xff]  }
 0x793   :  { %11090 = vmatprep.subr.bf16.mxu1 %v15707_v33 }
 0x795   :  { %10483 = vmatpush1.bf16.msra.mxu0 %v15573_v41  ;;  %v13556_v41 = vcombine.low %v19388_v61, %v19388_v61  ;;  %v15722_v61 = vld [vmem:[%s20067_s9 + $0x44] ss:$16 sps:$4 sm:$0xff]  }
 0x796   :  { %10484 = vmatprep.subr.bf16.mxu0 %v15578_v46  ;;  %11091 = vmatpush1.bf16.msra.mxu1 %v15705_v36  ;;  %v15714_v46 = vld [vmem:[%s20067_s9] ss:$16 sps:$4 sm:$0xff]   ;;  %v15767_v36 = vld [vmem:[%s20067_s9 + $0x2c] ss:$16 sps:$4 sm:$0xff]  }
 0x797   :  { %11092 = vmatprep.subr.bf16.mxu1 %v15710_v37  ;;  %v15765_v37 = vld [vmem:[%s20067_s9 + $0x28] ss:$16 sps:$4 sm:$0xff]  }
 0x799   :  { %10485 = vmatpush1.bf16.msra.mxu0 %v15576_v52  ;;  %v15720_v52 = vld [vmem:[%s20067_s9 + $0x40] ss:$16 sps:$4 sm:$0xff]  }
 0x79a   :  { %10486 = vmatprep.subr.bf16.mxu0 %v15581_v53  ;;  %11093 = vmatpush1.bf16.msra.mxu1 %v15708_v39  ;;  %v15723_v53 = vld [vmem:[%s20067_s9 + $0x60] ss:$16 sps:$4 sm:$0xff]   ;;  %v15773_v39 = vld [vmem:[%s20067_s9 + $0x6c] ss:$16 sps:$4 sm:$0xff]  }
 0x79b   :  { %11094 = vmatprep.subr.bf16.mxu1 %v15713_v40  ;;  %v15771_v40 = vld [vmem:[%s20067_s9 + $0x68] ss:$16 sps:$4 sm:$0xff]  }
 0x79d   :  { %10487 = vmatpush1.bf16.msra.mxu0 %v15579_v58  ;;  %v15731_v58 = vld [vmem:[%s20067_s9 + $0xa4] ss:$16 sps:$4 sm:$0xff]  }
 0x79e   :  { %10488 = vmatprep.subr.bf16.mxu0 %v15584_v62  ;;  %11095 = vmatpush1.bf16.msra.mxu1 %v15711_v44  ;;  %v15729_v62 = vld [vmem:[%s20067_s9 + $0xa0] ss:$16 sps:$4 sm:$0xff]   ;;  %v15774_v44 = vld [vmem:[%s20067_s9 + $0x88] ss:$16 sps:$4 sm:$0xff]  }
 0x79f   :  { %11425 = vmatprep.subr.bf16.mxu1 %v15716_v45  ;;  %v15779_v45 = vld [vmem:[%s20067_s9 + $0xac] ss:$16 sps:$4 sm:$0xff]  }
 0x7a1   :  { %10489 = vmatpush1.bf16.msra.mxu0 %v15582_v3  ;;  %11097 = vmatmul.mubr.bf16.vlgmr.msra.gmra.mrb[12].mxu1 %v19401_v42  ;;  %v15725_v42 = vld [vmem:[%s20067_s9 + $0x64] ss:$16 sps:$4 sm:$0xff]  }
 0x7a2   :  { %10490 = vmatprep.subr.bf16.mxu0 %v15587_v4  ;;  %11426 = vmatpush1.bf16.msra.mxu1 %v15714_v46  ;;  %v15737_v3 = vld [vmem:[%s20067_s9 + $0xe4] ss:$16 sps:$4 sm:$0xff]   ;;  %v15735_v4 = vld [vmem:[%s20067_s9 + $0xe0] ss:$16 sps:$4 sm:$0xff]   ;;  %v15782_v46 = vld [vmem:[%s20067_s9 + $0xcc] ss:$16 sps:$4 sm:$0xff]  }
 0x7a3   :  { %11427 = vmatprep.subr.bf16.mxu1 %v15719_v47  ;;  %v15780_v47 = vld [vmem:[%s20067_s9 + $0xc8] ss:$16 sps:$4 sm:$0xff]  }
 0x7a5   :  { %10491 = vmatpush1.bf16.msra.mxu0 %v15585_v9  ;;  %v15743_v9 = vld [vmem:[%s20067_s9 + $0x124] ss:$16 sps:$4 sm:$0xff]  }
 0x7a6   :  { %10492 = vmatprep.subr.bf16.mxu0 %v15590_v11  ;;  %11428 = vmatpush1.bf16.msra.mxu1 %v15717_v32  ;;  %v15741_v11 = vld [vmem:[%s20067_s9 + $0x120] ss:$16 sps:$4 sm:$0xff]   ;;  %v15785_v32 = vld [vmem:[%s20067_s9 + $0xec] ss:$16 sps:$4 sm:$0xff]  }
 0x7a7   :  { %11429 = vmatprep.subr.bf16.mxu1 %v15722_v61  ;;  %v15783_v61 = vld [vmem:[%s20067_s9 + $0xe8] ss:$16 sps:$4 sm:$0xff]  }
 0x7a9   :  { %10493 = vmatpush1.bf16.msra.mxu0 %v15588_v48  ;;  %v15749_v48 = vld [vmem:[%s20067_s9 + $0x164] ss:$16 sps:$4 sm:$0xff]  }
 0x7aa   :  { %10494 = vmatprep.subr.bf16.mxu0 %v15593_v15  ;;  %11430 = vmatpush1.bf16.msra.mxu1 %v15720_v52  ;;  %v15747_v15 = vld [vmem:[%s20067_s9 + $0x160] ss:$16 sps:$4 sm:$0xff]   ;;  %v15788_v52 = vld [vmem:[%s20067_s9 + $0x10c] ss:$16 sps:$4 sm:$0xff]  }
 0x7ab   :  { %11431 = vmatprep.subr.bf16.mxu1 %v15725_v42  ;;  %v15786_v42 = vld [vmem:[%s20067_s9 + $0x108] ss:$16 sps:$4 sm:$0xff]  }
 0x7ad   :  { %10495 = vmatpush1.bf16.msra.mxu0 %v15591_v21  ;;  %v15755_v21 = vld [vmem:[%s20067_s9 + $0x1a4] ss:$16 sps:$4 sm:$0xff]  }
 0x7ae   :  { %10496 = vmatprep.subr.bf16.mxu0 %v15596_v23  ;;  %11432 = vmatpush1.bf16.msra.mxu1 %v15723_v53  ;;  %v15753_v23 = vld [vmem:[%s20067_s9 + $0x1a0] ss:$16 sps:$4 sm:$0xff]   ;;  %v15791_v53 = vld [vmem:[%s20067_s9 + $0x12c] ss:$16 sps:$4 sm:$0xff]  }
 0x7af   :  { %11433 = vmatprep.subr.bf16.mxu1 %v15728_v55  ;;  %v15789_v55 = vld [vmem:[%s20067_s9 + $0x128] ss:$16 sps:$4 sm:$0xff]  }
 0x7b1   :  { %10497 = vmatpush1.bf16.msra.mxu0 %v15594_v59  ;;  %v15761_v59 = vld [vmem:[%s20067_s9 + $0x1e4] ss:$16 sps:$4 sm:$0xff]  }
 0x7b2   :  { %10498 = vmatprep.subr.bf16.mxu0 %v15599_v49  ;;  %11434 = vmatpush1.bf16.msra.mxu1 %v15726_v57  ;;  %v15759_v49 = vld [vmem:[%s20067_s9 + $0x1e0] ss:$16 sps:$4 sm:$0xff]   ;;  %v15794_v57 = vld [vmem:[%s20067_s9 + $0x14c] ss:$16 sps:$4 sm:$0xff]  }
 0x7b3   :  { %11435 = vmatprep.subr.bf16.mxu1 %v15731_v58  ;;  %v15792_v58 = vld [vmem:[%s20067_s9 + $0x148] ss:$16 sps:$4 sm:$0xff]  }
 0x7b5   :  { %10499 = vmatpush1.bf16.msra.mxu0 %v15597_v51  ;;  %v10524_v51 = vstv %s13590_s1 }
 0x7b6   :  { %10500 = vmatprep.subr.bf16.mxu0 %v15602_v54  ;;  %11436 = vmatpush1.bf16.msra.mxu1 %v15729_v62  ;;  %v10532_v54 = vrot.slane %v10527_v50, %v16759_v26  ;;  %v15797_v62 = vld [vmem:[%s20067_s9 + $0x16c] ss:$16 sps:$4 sm:$0xff]  }
 0x7b7   :  { %11437 = vmatprep.subr.bf16.mxu1 %v15734_v63  ;;  %v15795_v63 = vld [vmem:[%s20067_s9 + $0x168] ss:$16 sps:$4 sm:$0xff]   ;;  %v15830_v50 = vld [vmem:[%s20070_s12 + $0x64] ss:$8 sps:$4 sm:$0xff]  }
 0x7b9   :  { %10501 = vmatpush1.bf16.msra.mxu0 %v15600_v0 }
 0x7ba   :  { %10502 = vmatprep.subr.bf16.mxu0 %v15605_v2  ;;  %11438 = vmatpush1.bf16.msra.mxu1 %v15732_v1  ;;  %v15800_v1 = vld [vmem:[%s20067_s9 + $0x18c] ss:$16 sps:$4 sm:$0xff]  }
 0x7bb   :  { %11439 = vmatprep.subr.bf16.mxu1 %v15737_v3  ;;  %v15798_v3 = vld [vmem:[%s20067_s9 + $0x188] ss:$16 sps:$4 sm:$0xff]  }
 0x7bd   :  { %10503 = vmatpush1.bf16.msra.mxu0 %v15603_v10 }
 0x7be   :  { %10504 = vmatprep.subr.bf16.mxu0 %v15608_v12  ;;  %11440 = vmatpush1.bf16.msra.mxu1 %v15735_v4  ;;  %v15803_v4 = vld [vmem:[%s20067_s9 + $0x1ac] ss:$16 sps:$4 sm:$0xff]  }
 0x7bf   :  { %11441 = vmatprep.subr.bf16.mxu1 %v15740_v5  ;;  %v15801_v5 = vld [vmem:[%s20067_s9 + $0x1a8] ss:$16 sps:$4 sm:$0xff]  }
 0x7c1   :  { %10505 = vmatpush1.bf16.msra.mxu0 %v15606_v22 }
 0x7c2   :  { %10506 = vmatprep.subr.bf16.mxu0 %v15611_v30  ;;  %11442 = vmatpush1.bf16.msra.mxu1 %v15738_v8  ;;  %v15806_v8 = vld [vmem:[%s20067_s9 + $0x1cc] ss:$16 sps:$4 sm:$0xff]  }
 0x7c3   :  { %11443 = vmatprep.subr.bf16.mxu1 %v15743_v9  ;;  %v15804_v9 = vld [vmem:[%s20067_s9 + $0x1c8] ss:$16 sps:$4 sm:$0xff]  }
 0x7c5   :  { %10507 = vmatpush1.bf16.msra.mxu0 %v15609_v34  ;;  %v15762_v34 = vld [vmem:[%s20067_s9 + $0x8] ss:$16 sps:$4 sm:$0xff]  }
 0x7c6   :  { %10508 = vmatprep.subr.bf16.mxu0 %v15614_v35  ;;  %11444 = vmatpush1.bf16.msra.mxu1 %v15741_v11  ;;  %v15809_v11 = vld [vmem:[%s20067_s9 + $0x1ec] ss:$16 sps:$4 sm:$0xff]  }
 0x7c7   :  { %11445 = vmatprep.subr.bf16.mxu1 %v15746_v13  ;;  %v15807_v13 = vld [vmem:[%s20067_s9 + $0x1e8] ss:$16 sps:$4 sm:$0xff]  }
 0x7c9   :  { %10509 = vmatpush1.bf16.msra.mxu0 %v15612_v38  ;;  %v15770_v38 = vld [vmem:[%s20067_s9 + $0x4c] ss:$16 sps:$4 sm:$0xff]  }
 0x7ca   :  { %10510 = vmatprep.subr.bf16.mxu0 %v15617_v56  ;;  %11446 = vmatpush1.bf16.msra.mxu1 %v15744_v14  ;;  %v15768_v56 = vld [vmem:[%s20067_s9 + $0x48] ss:$16 sps:$4 sm:$0xff]   ;;  %v15812_v14 = vld [vmem:[%s20070_s12 + $0x4] ss:$8 sps:$4 sm:$0xff]  }
 0x7cb   :  { %11447 = vmatprep.subr.bf16.mxu1 %v15749_v48  ;;  %v15810_v48 = vld [vmem:[%s20070_s12] ss:$8 sps:$4 sm:$0xff]  }
 0x7cd   :  { %10511 = vmatpush1.bf16.msra.mxu0 %v15615_v43  ;;  %v15776_v43 = vld [vmem:[%s20067_s9 + $0x8c] ss:$16 sps:$4 sm:$0xff]  }
 0x7ce   :  { %11448 = vmatpush1.bf16.msra.mxu1 %v15747_v15  ;;  %v15815_v15 = vld [vmem:[%s20070_s12 + $0x14] ss:$8 sps:$4 sm:$0xff]  }
 0x7cf   :  { %11449 = vmatprep.subr.bf16.mxu1 %v15752_v18  ;;  %v15813_v18 = vld [vmem:[%s20070_s12 + $0x10] ss:$8 sps:$4 sm:$0xff]  }
 0x7d0   :  { %10513 = vmatmul.mubr.bf16.vlgmr.msra.gmra.mrb[20].mxu0 %v13556_v41  ;;  %v15777_v41 = vld [vmem:[%s20067_s9 + $0xa8] ss:$16 sps:$4 sm:$0xff]  }
 0x7d2   :  { %11450 = vmatpush1.bf16.msra.mxu1 %v15750_v19  ;;  %v15818_v19 = vld [vmem:[%s20070_s12 + $0x24] ss:$8 sps:$4 sm:$0xff]  }
 0x7d3   :  { %11451 = vmatprep.subr.bf16.mxu1 %v15755_v21  ;;  %v15816_v21 = vld [vmem:[%s20070_s12 + $0x20] ss:$8 sps:$4 sm:$0xff]  }
 0x7d6   :  { %11452 = vmatpush1.bf16.msra.mxu1 %v15753_v23  ;;  %v15821_v23 = vld [vmem:[%s20070_s12 + $0x34] ss:$8 sps:$4 sm:$0xff]  }
 0x7d7   :  { %11453 = vmatprep.subr.bf16.mxu1 %v15758_v25  ;;  %v15824_v25 = vld [vmem:[%s20070_s12 + $0x44] ss:$8 sps:$4 sm:$0xff]  }
 0x7da   :  { %11454 = vmatpush1.bf16.msra.mxu1 %v15756_v24  ;;  %v15819_v24 = vld [vmem:[%s20070_s12 + $0x30] ss:$8 sps:$4 sm:$0xff]  }
 0x7db   :  { %11455 = vmatprep.subr.bf16.mxu1 %v15761_v59  ;;  %v15822_v59 = vld [vmem:[%s20070_s12 + $0x40] ss:$8 sps:$4 sm:$0xff]  }
 0x7de   :  { %11456 = vmatpush1.bf16.msra.mxu1 %v15759_v49  ;;  %v15827_v49 = vld [vmem:[%s20070_s12 + $0x54] ss:$8 sps:$4 sm:$0xff]  }
 0x7df   :  { %11466 = vmatprep.subr.bf16.mxu1 %v15764_v29  ;;  %v15825_v29 = vld [vmem:[%s20070_s12 + $0x50] ss:$8 sps:$4 sm:$0xff]  }
 0x8a3   :  { %v10514_v31 = vpop.f32.mrb[20].mxu0 }
 0x8a4   :  { %v10525_v0 = vmul.f32 %v10524_v51, %v10514_v31  ;;  %v10516_v2 = vpop.f32.mrb[21].mxu0  ;;  %v15831_v31 = vld [vmem:[%s20070_s12 + $0x70] ss:$8 sps:$4 sm:$0xff]  }
 0x8a5   :  { %v10526_v6 = vmul.f32 %v10524_v51, %v10516_v2  ;;  %v10518_v7 = vpop.f32.mrb[22].mxu0  ;;  %v15828_v51 = vld [vmem:[%s20070_s12 + $0x60] ss:$8 sps:$4 sm:$0xff]   ;;  %v15839_v2 = vld [vmem:[%s20070_s12 + $0x94] ss:$8 sps:$4 sm:$0xff]  }
 0x8a6   :  { %v10539_v10 = vadd.f32 %v10532_v54, %v10525_v0  ;;  %v10519_v12 = vpop.f32.mrb[23].mxu0  ;;  %v15833_v54 = vld [vmem:[%s20070_s12 + $0x74] ss:$8 sps:$4 sm:$0xff]   ;;  %v15834_v0 = vld [vmem:[%s20070_s12 + $0x80] ss:$8 sps:$4 sm:$0xff]  }
 0x8a7   :  { %v10540_v16 = vadd.f32 %v10536_v60, %v10526_v6  ;;  %v15836_v60 = vld [vmem:[%s20070_s12 + $0x84] ss:$8 sps:$4 sm:$0xff]   ;;  %v15837_v6 = vld [vmem:[%s20070_s12 + $0x90] ss:$8 sps:$4 sm:$0xff]   ;;  %v15845_v12 = vld [vmem:[%s20070_s12 + $0xb4] ss:$8 sps:$4 sm:$0xff]  }
 0x8a8   :  { %vm10541_vm8 = vcmp.ge.f32.partialorder %v10539_v10, 0.0  ;;  %v10543_v17 = vmul.f32 0.02, %v10539_v10  ;;  %v15842_v7 = vld [vmem:[%s20070_s12 + $0xa4] ss:$8 sps:$4 sm:$0xff]  }
 0x8a9   :  { %v10544_v22 = vmul.f32 0.02, %v10540_v16  ;;  %vm10542_vm9 = vcmp.ge.f32.partialorder %v10540_v16, 0.0 }
 0x8aa   :  { %v10545_v30 = vsel %vm10541_vm8, %v10539_v10, %v10543_v17  ;;  %v15840_v10 = vld [vmem:[%s20070_s12 + $0xa0] ss:$8 sps:$4 sm:$0xff]   ;;  %v15848_v17 = vld [vmem:[%s20070_s12 + $0xc4] ss:$8 sps:$4 sm:$0xff]  }
 0x8ab   :  { %v10546_v28 = vsel %vm10542_vm9, %v10540_v16, %v10544_v22  ;;  %v19697_v35 = vpack.c.bf16 %v10545_v30, %v10545_v30  ;;  %v15843_v16 = vld [vmem:[%s20070_s12 + $0xb0] ss:$8 sps:$4 sm:$0xff]   ;;  %v15846_v22 = vld [vmem:[%s20070_s12 + $0xc0] ss:$8 sps:$4 sm:$0xff]   ;;  %v15851_v30 = vld [vmem:[%s20070_s12 + $0xd4] ss:$8 sps:$4 sm:$0xff]  }
 0x8ac   :  { %v10548_v33 = vpack.c.bf16 %v10546_v28, %v10546_v28  ;;  %v15849_v28 = vld [vmem:[%s20070_s12 + $0xd0] ss:$8 sps:$4 sm:$0xff]  }
 0x8ae   :  { %11457 = vmatprep.mubr.bf16.mxu1 %v10548_v33 }
 0x8af   :  { %11458 = vmatmul.mubr.bf16.vlgmr.msra.gmra.mrb[8].mxu1 %v19697_v35 }
 0x8b0   :  { %11467 = vmatpush1.bf16.msra.mxu1 %v15762_v34  ;;  %11498 = vmatprep.mubr.bf16.mxu1 %v10548_v33  ;;  %v15854_v33 = vld [vmem:[%s20070_s12 + $0xe4] ss:$8 sps:$4 sm:$0xff]   ;;  %v15852_v34 = vld [vmem:[%s20070_s12 + $0xe0] ss:$8 sps:$4 sm:$0xff]  }
 0x8b1   :  { %11468 = vmatprep.subr.bf16.mxu1 %v15767_v36  ;;  %v15855_v36 = vld [vmem:[%s20070_s12 + $0xf0] ss:$8 sps:$4 sm:$0xff]  }
 0x8b4   :  { %11469 = vmatpush1.bf16.msra.mxu1 %v15765_v37  ;;  %v15860_v37 = vld [vmem:[%s20070_s12 + $0x104] ss:$8 sps:$4 sm:$0xff]  }
 0x8b5   :  { %11470 = vmatprep.subr.bf16.mxu1 %v15770_v38  ;;  %v15906_v38 = vld [vmem:[%s20072_s14 + $0x40] sm:$0xff]  }
 0x8b6   :  { %13807 = vmatprep.subr.bf16.mxu0 %v15906_v38 }
 0x8b8   :  { %11471 = vmatpush1.bf16.msra.mxu1 %v15768_v56  ;;  %v15907_v56 = vld [vmem:[%s20072_s14] sm:$0xff]  }
 0x8b9   :  { %11472 = vmatprep.subr.bf16.mxu1 %v15773_v39  ;;  %v15908_v39 = vld [vmem:[%s20072_s14 + $0x48] sm:$0xff]   ;;  %13808 = vmatpush3.bf16.msra.mxu0 %v15907_v56 }
 0x8ba   :  { %13809 = vmatprep.subr.bf16.mxu0 %v15908_v39 }
 0x8bc   :  { %11473 = vmatpush1.bf16.msra.mxu1 %v15771_v40  ;;  %v15909_v40 = vld [vmem:[%s20072_s14 + $0x8] sm:$0xff]  }
 0x8bd   :  { %11474 = vmatprep.subr.bf16.mxu1 %v15776_v43  ;;  %v15910_v43 = vld [vmem:[%s20072_s14 + $0x50] sm:$0xff]   ;;  %13810 = vmatpush3.bf16.msra.mxu0 %v15909_v40 }
 0x8be   :  { %13811 = vmatprep.subr.bf16.mxu0 %v15910_v43  ;;  %v15905_v43 = vld [vmem:[%s20070_s12 + $0x1f4] ss:$8 sps:$4 sm:$0xff]  }
 0x8c0   :  { %11475 = vmatpush1.bf16.msra.mxu1 %v15774_v44  ;;  %v15911_v44 = vld [vmem:[%s20072_s14 + $0x10] sm:$0xff]  }
 0x8c1   :  { %11476 = vmatprep.subr.bf16.mxu1 %v15779_v45  ;;  %v15912_v45 = vld [vmem:[%s20072_s14 + $0x58] sm:$0xff]   ;;  %13812 = vmatpush3.bf16.msra.mxu0 %v15911_v44 }
 0x8c2   :  { %13813 = vmatprep.subr.bf16.mxu0 %v15912_v45 }
 0x8c4   :  { %11477 = vmatpush1.bf16.msra.mxu1 %v15777_v41  ;;  %v15913_v41 = vld [vmem:[%s20072_s14 + $0x18] sm:$0xff]  }
 0x8c5   :  { %11478 = vmatprep.subr.bf16.mxu1 %v15782_v46  ;;  %v15914_v46 = vld [vmem:[%s20072_s14 + $0x60] sm:$0xff]   ;;  %13814 = vmatpush3.bf16.msra.mxu0 %v15913_v41 }
 0x8c6   :  { %13815 = vmatprep.subr.bf16.mxu0 %v15914_v46 }
 0x8c8   :  { %11479 = vmatpush1.bf16.msra.mxu1 %v15780_v47  ;;  %v15915_v47 = vld [vmem:[%s20072_s14 + $0x20] sm:$0xff]  }
 0x8c9   :  { %11480 = vmatprep.subr.bf16.mxu1 %v15785_v32  ;;  %13816 = vmatpush3.bf16.msra.mxu0 %v15915_v47  ;;  %v19923_v32 = vld [vmem:[%s20069_s11] sm:$0xf]  ;;  %v15903_v47 = vld [vmem:[%s20070_s12 + $0x1f0] ss:$8 sps:$4 sm:$0xff]  }
 0x8cc   :  { %11481 = vmatpush1.bf16.msra.mxu1 %v15783_v61  ;;  %v19925_v61 = vstv %s13720_s27 }
 0x8cd   :  { %11482 = vmatprep.subr.bf16.mxu1 %v15788_v52  ;;  %v11518_v52 = vrot.slane %v19923_v32, %v16759_v26 }
 0x8d0   :  { %11483 = vmatpush1.bf16.msra.mxu1 %v15786_v42 }
 0x8d1   :  { %11484 = vmatprep.subr.bf16.mxu1 %v15791_v53  ;;  %v11522_v53 = vrot.slane %v19923_v32, %v16762_v27 }
 0x8d4   :  { %11485 = vmatpush1.bf16.msra.mxu1 %v15789_v55 }
 0x8d5   :  { %11486 = vmatprep.subr.bf16.mxu1 %v15794_v57 }
 0x8d8   :  { %11487 = vmatpush1.bf16.msra.mxu1 %v15792_v58 }
 0x8d9   :  { %11488 = vmatprep.subr.bf16.mxu1 %v15797_v62 }
 0x8dc   :  { %11489 = vmatpush1.bf16.msra.mxu1 %v15795_v63 }
 0x8dd   :  { %11490 = vmatprep.subr.bf16.mxu1 %v15800_v1 }
 0x8e0   :  { %11491 = vmatpush1.bf16.msra.mxu1 %v15798_v3 }
 0x8e1   :  { %11492 = vmatprep.subr.bf16.mxu1 %v15803_v4 }
 0x8e4   :  { %11493 = vmatpush1.bf16.msra.mxu1 %v15801_v5 }
 0x8e5   :  { %11494 = vmatprep.subr.bf16.mxu1 %v15806_v8 }
 0x8e8   :  { %11495 = vmatpush1.bf16.msra.mxu1 %v15804_v9 }
 0x8e9   :  { %11496 = vmatprep.subr.bf16.mxu1 %v15809_v11 }
 0x8ec   :  { %11497 = vmatpush1.bf16.msra.mxu1 %v15807_v13  ;;  %v15858_v13 = vld [vmem:[%s20070_s12 + $0x100] ss:$8 sps:$4 sm:$0xff]  }
 0x8ed   :  { %11939 = vmatprep.subr.bf16.mxu1 %v15812_v14 }
 0x8ef   :  { %11499 = vmatmul.mubr.bf16.vlgmr.msra.gmra.mrb[12].mxu1 %v19697_v35  ;;  %v15857_v35 = vld [vmem:[%s20070_s12 + $0xf4] ss:$8 sps:$4 sm:$0xff]  }
 0x8f0   :  { %11940 = vmatpush1.bf16.msra.mxu1 %v15810_v48  ;;  %v15863_v48 = vld [vmem:[%s20070_s12 + $0x114] ss:$8 sps:$4 sm:$0xff]  }
 0x8f1   :  { %11941 = vmatprep.subr.bf16.mxu1 %v15815_v15  ;;  %v15861_v15 = vld [vmem:[%s20070_s12 + $0x110] ss:$8 sps:$4 sm:$0xff]  }
 0x8f4   :  { %11942 = vmatpush1.bf16.msra.mxu1 %v15813_v18  ;;  %v15866_v18 = vld [vmem:[%s20070_s12 + $0x124] ss:$8 sps:$4 sm:$0xff]  }
 0x8f5   :  { %11943 = vmatprep.subr.bf16.mxu1 %v15818_v19  ;;  %v15864_v19 = vld [vmem:[%s20070_s12 + $0x120] ss:$8 sps:$4 sm:$0xff]  }
 0x8f8   :  { %11944 = vmatpush1.bf16.msra.mxu1 %v15816_v21  ;;  %v15869_v21 = vld [vmem:[%s20070_s12 + $0x134] ss:$8 sps:$4 sm:$0xff]  }
 0x8f9   :  { %11945 = vmatprep.subr.bf16.mxu1 %v15821_v23  ;;  %v15867_v23 = vld [vmem:[%s20070_s12 + $0x130] ss:$8 sps:$4 sm:$0xff]  }
 0x8fc   :  { %11946 = vmatpush1.bf16.msra.mxu1 %v15819_v24  ;;  %v15872_v24 = vld [vmem:[%s20070_s12 + $0x144] ss:$8 sps:$4 sm:$0xff]  }
 0x8fd   :  { %11947 = vmatprep.subr.bf16.mxu1 %v15824_v25  ;;  %v15870_v25 = vld [vmem:[%s20070_s12 + $0x140] ss:$8 sps:$4 sm:$0xff]  }
 0x900   :  { %11948 = vmatpush1.bf16.msra.mxu1 %v15822_v59  ;;  %v15875_v59 = vld [vmem:[%s20070_s12 + $0x154] ss:$8 sps:$4 sm:$0xff]  }
 0x901   :  { %11949 = vmatprep.subr.bf16.mxu1 %v15827_v49  ;;  %v15873_v49 = vld [vmem:[%s20070_s12 + $0x150] ss:$8 sps:$4 sm:$0xff]  }
 0x904   :  { %11950 = vmatpush1.bf16.msra.mxu1 %v15825_v29  ;;  %v15878_v29 = vld [vmem:[%s20070_s12 + $0x164] ss:$8 sps:$4 sm:$0xff]  }
 0x905   :  { %11951 = vmatprep.subr.bf16.mxu1 %v15830_v50  ;;  %v15876_v50 = vld [vmem:[%s20070_s12 + $0x160] ss:$8 sps:$4 sm:$0xff]  }
 0x908   :  { %11952 = vmatpush1.bf16.msra.mxu1 %v15828_v51  ;;  %v15881_v51 = vld [vmem:[%s20070_s12 + $0x174] ss:$8 sps:$4 sm:$0xff]  }
 0x909   :  { %11953 = vmatprep.subr.bf16.mxu1 %v15833_v54  ;;  %v15879_v54 = vld [vmem:[%s20070_s12 + $0x170] ss:$8 sps:$4 sm:$0xff]  }
 0x90c   :  { %11954 = vmatpush1.bf16.msra.mxu1 %v15831_v31  ;;  %v15884_v31 = vld [vmem:[%s20070_s12 + $0x184] ss:$8 sps:$4 sm:$0xff]  }
 0x90d   :  { %11955 = vmatprep.subr.bf16.mxu1 %v15836_v60  ;;  %v15882_v60 = vld [vmem:[%s20070_s12 + $0x180] ss:$8 sps:$4 sm:$0xff]  }
 0x910   :  { %11956 = vmatpush1.bf16.msra.mxu1 %v15834_v0  ;;  %v15887_v0 = vld [vmem:[%s20070_s12 + $0x194] ss:$8 sps:$4 sm:$0xff]  }
 0x911   :  { %11957 = vmatprep.subr.bf16.mxu1 %v15839_v2  ;;  %v15885_v2 = vld [vmem:[%s20070_s12 + $0x190] ss:$8 sps:$4 sm:$0xff]  }
 0x914   :  { %11958 = vmatpush1.bf16.msra.mxu1 %v15837_v6  ;;  %v15890_v6 = vld [vmem:[%s20070_s12 + $0x1a4] ss:$8 sps:$4 sm:$0xff]  }
 0x915   :  { %11959 = vmatprep.subr.bf16.mxu1 %v15842_v7  ;;  %v15888_v7 = vld [vmem:[%s20070_s12 + $0x1a0] ss:$8 sps:$4 sm:$0xff]  }
 0x918   :  { %11960 = vmatpush1.bf16.msra.mxu1 %v15840_v10  ;;  %v15893_v10 = vld [vmem:[%s20070_s12 + $0x1b4] ss:$8 sps:$4 sm:$0xff]  }
 0x919   :  { %11961 = vmatprep.subr.bf16.mxu1 %v15845_v12  ;;  %v15891_v12 = vld [vmem:[%s20070_s12 + $0x1b0] ss:$8 sps:$4 sm:$0xff]  }
 0x91c   :  { %11962 = vmatpush1.bf16.msra.mxu1 %v15843_v16  ;;  %v15896_v16 = vld [vmem:[%s20070_s12 + $0x1c4] ss:$8 sps:$4 sm:$0xff]  }
 0x91d   :  { %11963 = vmatprep.subr.bf16.mxu1 %v15848_v17  ;;  %v15894_v17 = vld [vmem:[%s20070_s12 + $0x1c0] ss:$8 sps:$4 sm:$0xff]  }
 0x920   :  { %11964 = vmatpush1.bf16.msra.mxu1 %v15846_v22  ;;  %v15899_v22 = vld [vmem:[%s20070_s12 + $0x1d4] ss:$8 sps:$4 sm:$0xff]  }
 0x921   :  { %11965 = vmatprep.subr.bf16.mxu1 %v15851_v30  ;;  %v11525_v30 = vsub.s32 2, %v16753_v20 }
 0x924   :  { %11966 = vmatpush1.bf16.msra.mxu1 %v15849_v28  ;;  %v11529_v28 = vsub.s32 3, %v16753_v20  ;;  %v15900_v20 = vld [vmem:[%s20070_s12 + $0x1e0] ss:$8 sps:$4 sm:$0xff]  }
 0x925   :  { %11967 = vmatprep.subr.bf16.mxu1 %v15854_v33  ;;  %v15897_v33 = vld [vmem:[%s20070_s12 + $0x1d0] ss:$8 sps:$4 sm:$0xff]  }
 0x928   :  { %11968 = vmatpush1.bf16.msra.mxu1 %v15852_v34  ;;  %v15902_v34 = vld [vmem:[%s20070_s12 + $0x1e4] ss:$8 sps:$4 sm:$0xff]  }
 0x929   :  { %11969 = vmatprep.subr.bf16.mxu1 %v15857_v35  ;;  %v11526_v35 = vrot.slane %v19923_v32, %v11525_v30 }
 0x92c   :  { %11970 = vmatpush1.bf16.msra.mxu1 %v15855_v36 }
 0x92d   :  { %11980 = vmatprep.subr.bf16.mxu1 %v15860_v37  ;;  %v11530_v37 = vrot.slane %v19923_v32, %v11529_v28 }
 0x982   :  { %v11459_v42 = vpop.f32.mrb[8].mxu1 }
 0x983   :  { %v11509_v55 = vmul.f32 %v19925_v61, %v11459_v42  ;;  %v11461_v57 = vpop.f32.mrb[9].mxu1 }
 0x984   :  { %v11510_v58 = vmul.f32 %v19925_v61, %v11461_v57  ;;  %v11463_v62 = vpop.f32.mrb[10].mxu1  ;;  %v15917_v57 = vld [vmem:[%s20072_s14 + $0x28] sm:$0xff]  }
 0x985   :  { %v11535_v63 = vadd.f32 %v11518_v52, %v11509_v55  ;;  %v11464_v1 = vpop.f32.mrb[11].mxu1  ;;  %v15916_v55 = vld [vmem:[%s20072_s14 + $0x68] sm:$0xff]   ;;  %v15919_v62 = vld [vmem:[%s20072_s14 + $0x30] sm:$0xff]  }
 0x986   :  { %v11536_v3 = vadd.f32 %v11522_v53, %v11510_v58  ;;  %v15918_v58 = vld [vmem:[%s20072_s14 + $0x70] sm:$0xff]   ;;  %13817 = vmatprep.subr.bf16.mxu0 %v15916_v55  ;;  %v15921_v1 = vld [vmem:[%s20072_s14 + $0x38] sm:$0xff]  }
 0x987   :  { %vm11539_vm10 = vcmp.ge.f32.partialorder %v11535_v63, 0.0  ;;  %v11543_v4 = vmul.f32 0.02, %v11535_v63  ;;  %13818 = vmatpush3.bf16.msra.mxu0 %v15917_v57 }
 0x988   :  { %v11544_v5 = vmul.f32 0.02, %v11536_v3  ;;  %vm11540_vm11 = vcmp.ge.f32.partialorder %v11536_v3, 0.0  ;;  %13819 = vmatprep.subr.bf16.mxu0 %v15918_v58 }
 0x989   :  { %v11547_v8 = vsel %vm11539_vm10, %v11535_v63, %v11543_v4  ;;  %v15920_v63 = vld [vmem:[%s20072_s14 + $0x78] sm:$0xff]   ;;  %v12022_v4 = vstv %s13785_s24 }
 0x98a   :  { %v11548_v9 = vsel %vm11540_vm11, %v11536_v3, %v11544_v5  ;;  %v11551_v14 = vpack.c.bf16 %v11547_v8, %v11547_v8  ;;  %v12025_v3 = vld [vmem:[%s20071_s13] sm:$0x3]  ;;  %s13802_s13 = sld [smem:[#allocation5 + $0x5]] }
 0x98b   :  { %v11552_v11 = vpack.c.bf16 %v11548_v9, %v11548_v9  ;;  %13820 = vmatpush3.bf16.msra.mxu0 %v15919_v62  ;;  %v12030_v5 = vrot.slane %v12025_v3, %v16759_v26  ;;  %v12034_v9 = vrot.slane %v12025_v3, %v16762_v27 }
 0x98c   :  { %13821 = vmatprep.subr.bf16.mxu0 %v15920_v63 }
 0x98d   :  { %11971 = vmatprep.mubr.bf16.mxu1 %v11552_v11 }
 0x98e   :  { %11972 = vmatmul.mubr.bf16.vlgmr.msra.gmra.mrb[16].mxu1 %v11551_v14 }
 0x98f   :  { %11981 = vmatpush1.bf16.msra.mxu1 %v15858_v13  ;;  %13822 = vmatpush3.bf16.msra.mxu0 %v15921_v1 }
 0x990   :  { %11982 = vmatprep.subr.bf16.mxu1 %v15863_v48 }
 0x993   :  { %11983 = vmatpush1.bf16.msra.mxu1 %v15861_v15 }
 0x994   :  { %11984 = vmatprep.subr.bf16.mxu1 %v15866_v18 }
 0x997   :  { %11985 = vmatpush1.bf16.msra.mxu1 %v15864_v19 }
 0x998   :  { %11986 = vmatprep.subr.bf16.mxu1 %v15869_v21 }
 0x99b   :  { %11987 = vmatpush1.bf16.msra.mxu1 %v15867_v23 }
 0x99c   :  { %11988 = vmatprep.subr.bf16.mxu1 %v15872_v24 }
 0x99f   :  { %11989 = vmatpush1.bf16.msra.mxu1 %v15870_v25 }
 0x9a0   :  { %11990 = vmatprep.subr.bf16.mxu1 %v15875_v59 }
 0x9a3   :  { %11991 = vmatpush1.bf16.msra.mxu1 %v15873_v49 }
 0x9a4   :  { %11992 = vmatprep.subr.bf16.mxu1 %v15878_v29  ;;  %v12216_v29 = vstv %s13802_s13 }
 0x9a7   :  { %11993 = vmatpush1.bf16.msra.mxu1 %v15876_v50 }
 0x9a8   :  { %11994 = vmatprep.subr.bf16.mxu1 %v15881_v51 }
 0x9ab   :  { %11995 = vmatpush1.bf16.msra.mxu1 %v15879_v54  ;;  %v13803_v54 = vld [vmem:[#allocation4] ss:$0 sm:$0xff] }
 0x9ac   :  { %11996 = vmatprep.subr.bf16.mxu1 %v15884_v31 }
 0x9af   :  { %11997 = vmatpush1.bf16.msra.mxu1 %v15882_v60 }
 0x9b0   :  { %11998 = vmatprep.subr.bf16.mxu1 %v15887_v0 }
 0x9b3   :  { %11999 = vmatpush1.bf16.msra.mxu1 %v15885_v2 }
 0x9b4   :  { %12000 = vmatprep.subr.bf16.mxu1 %v15890_v6 }
 0x9b7   :  { %12001 = vmatpush1.bf16.msra.mxu1 %v15888_v7 }
 0x9b8   :  { %12002 = vmatprep.subr.bf16.mxu1 %v15893_v10 }
 0x9bb   :  { %12003 = vmatpush1.bf16.msra.mxu1 %v15891_v12 }
 0x9bc   :  { %12004 = vmatprep.subr.bf16.mxu1 %v15896_v16 }
 0x9bf   :  { %12005 = vmatpush1.bf16.msra.mxu1 %v15894_v17 }
 0x9c0   :  { %12006 = vmatprep.subr.bf16.mxu1 %v15899_v22 }
 0x9c2   :  { %v11500_v36 = vpop.f32.mrb[12].mxu1 }
 0x9c3   :  { %v11511_v38 = vmul.f32 %v19925_v61, %v11500_v36  ;;  %v11502_v56 = vpop.f32.mrb[13].mxu1  ;;  %12007 = vmatpush1.bf16.msra.mxu1 %v15897_v33 }
 0x9c4   :  { %v11512_v39 = vmul.f32 %v19925_v61, %v11502_v56  ;;  %v11504_v40 = vpop.f32.mrb[14].mxu1  ;;  %12008 = vmatprep.subr.bf16.mxu1 %v15902_v34 }
 0x9c5   :  { %v11537_v44 = vadd.f32 %v11526_v35, %v11511_v38  ;;  %v11505_v45 = vpop.f32.mrb[15].mxu1 }
 0x9c6   :  { %v11538_v41 = vadd.f32 %v11530_v37, %v11512_v39 }
 0x9c7   :  { %vm11541_vm12 = vcmp.ge.f32.partialorder %v11537_v44, 0.0  ;;  %v11545_v46 = vmul.f32 0.02, %v11537_v44  ;;  %12009 = vmatpush1.bf16.msra.mxu1 %v15900_v20 }
 0x9c8   :  { %v11546_v32 = vmul.f32 0.02, %v11538_v41  ;;  %12010 = vmatprep.subr.bf16.mxu1 %v15905_v43  ;;  %vm11542_vm13 = vcmp.ge.f32.partialorder %v11538_v41, 0.0 }
 0x9c9   :  { %v11549_v61 = vsel %vm11541_vm12, %v11537_v44, %v11545_v46 }
 0x9ca   :  { %v11550_v52 = vsel %vm11542_vm13, %v11538_v41, %v11546_v32  ;;  %v11553_v53 = vpack.c.bf16 %v11549_v61, %v11549_v61 }
 0x9cb   :  { %12011 = vmatpush1.bf16.msra.mxu1 %v15903_v47  ;;  %v11554_v42 = vpack.c.bf16 %v11550_v52, %v11550_v52 }
 0x9cd   :  { %12012 = vmatprep.mubr.bf16.mxu1 %v11554_v42 }
 0x9ce   :  { %12013 = vmatmul.mubr.bf16.vlgmr.msra.gmra.mrb[16].mxu1 %v11553_v53 }
 0xaa1   :  { %v12014_v8 = vpop.f32.mrb[16].mxu1 }
 0xaa2   :  { %v12023_v11 = vmul.f32 %v12022_v4, %v12014_v8  ;;  %v12016_v13 = vpop.f32.mrb[17].mxu1 }
 0xaa3   :  { %v12024_v14 = vmul.f32 %v12022_v4, %v12016_v13  ;;  %v12018_v48 = vpop.f32.mrb[18].mxu1 }
 0xaa4   :  { %v12037_v15 = vadd.f32 %v12030_v5, %v12023_v11  ;;  %v12019_v18 = vpop.f32.mrb[19].mxu1 }
 0xaa5   :  { %v12038_v19 = vadd.f32 %v12034_v9, %v12024_v14 }
 0xaa6   :  { %vm12039_vm14 = vcmp.ge.f32.partialorder %v12037_v15, 0.0  ;;  %v12041_v21 = vmul.f32 0.02, %v12037_v15 }
 0xaa7   :  { %v12042_v23 = vmul.f32 0.02, %v12038_v19  ;;  %vm12040_vm15 = vcmp.ge.f32.partialorder %v12038_v19, 0.0 }
 0xaa8   :  { %v12043_v24 = vsel %vm12039_vm14, %v12037_v15, %v12041_v21 }
 0xaa9   :  { %v12044_v25 = vsel %vm12040_vm15, %v12038_v19, %v12042_v23  ;;  %v12045_v49 = vpack.c.bf16 %v12043_v24, %v12043_v24 }
 0xaaa   :  { %v12046_v59 = vpack.c.bf16 %v12044_v25, %v12044_v25 }
 0xaac   :  { %12207 = vmatprep.mubr.bf16.mxu0 %v12046_v59 }
 0xaad   :  { %12208 = vmatmul.mubr.bf16.vlgmr.msra.gmra.mrb[24].mxu0 %v12045_v49 }
 0xb80   :  { %v13823_v26 = vpop.f32.mrb[24].mxu0 }
 0xb81   :  { %v13824_v27 = vpop.f32.mrb[25].mxu0 }
 0xb82   :  { %v13825_v50 = vadd.f32 %v13824_v27, %v13823_v26  ;;  %v13826_v51 = vpop.f32.mrb[26].mxu0 }
 0xb83   :  { %v13827_v31 = vpop.f32.mrb[27].mxu0 }
 0xb84   :  { %v12217_v60 = vmul.f32 %v13825_v50, %v12216_v29 }
 0xb86   :  { %v12225_v0 = vadd.f32 %v13803_v54, %v12217_v60 }
 0xb88   :  { %v12226_v2 = vadd.f32 1e-12, %v12225_v0 }
 0xb8a   :  { %12228 = vst.msk [vmem:[%s20074_s16] sm:$0x3] %vm12227_vm0, %v12226_v2 }
 0xb8b   :  { %12233 = vsyncpa [#allocation6], 1 }

</bundles_post_ra>
